<compile_context>
chip_gen: v6e
topology: v6e:2x2x1
jax: 0.10.0
libtpu: 0.0.40
codegen_flags: <defaults>
</compile_context>

<pallas_src>
import functools

import jax
import jax.numpy as jnp
from jax.experimental import pallas as pl
from jax.experimental.pallas import tpu as pltpu


# ------------- fused kernel: int8 actor slab -> folded critic -> tanh value -> softmax -------------
def _fused_actor_critic_kernel(
    x_ref, wq_ref, sc_ref, ba_ref, wf_ref, bf_ref, actions_ref, values_ref, *, n_steps,
):
    """Each grid step computes a (B, k_tile) slab of actor logits from one contiguous int8
    weight tile (dequant on the fly: exact int8->bf16 cast, f32 MXU accumulation, per-column
    scale applied post-matmul).  The last step runs the fused epilogue on the resident (B, N)
    logits block: folded-critic value -> tanh, softmax in place."""
    k_tile = wq_ref.shape[1]

    w_tile = wq_ref[...].astype(jnp.bfloat16)          # exact for int8 values; VPU, hidden under DMA
    a_k = jnp.dot(x_ref[...], w_tile, preferred_element_type=jnp.float32)
    a_k = a_k * sc_ref[...] + ba_ref[...]              # per-column dequant scale + actor bias

    def epilogue(a):
        # Folded critic: VPU multiply + XLU row-sum (no degenerate 1-lane MXU matmul).
        v = jnp.sum(a * wf_ref[...], axis=1, keepdims=True) + bf_ref[...]
        v = jnp.tanh(0.5 * v)                          # == 2*(sigmoid(v) - 1/2), single EUP op
        values_ref[...] = jnp.broadcast_to(v, values_ref.shape)   # lane-dense (B, 128) store
        # Softmax(dim=1) over the resident logits block (tiny, stays in VMEM).
        m = jnp.max(a, axis=1, keepdims=True)
        e = jnp.exp(a - m)
        actions_ref[...] = e * pl.reciprocal(jnp.sum(e, axis=1, keepdims=True), approx=True)

    if n_steps == 1:
        # Single-step fast path (k_tile == N): no pl.when gating, no dynamic-slice store.
        epilogue(a_k)
    else:
        k = pl.program_id(0)
        col = pl.multiple_of(k * k_tile, k_tile)
        actions_ref[:, pl.ds(col, k_tile)] = a_k

        @pl.when(k == n_steps - 1)
        def _():
            epilogue(actions_ref[...])


# ----------------------------------------- python wrappers -----------------------------------------
def prepare_params(params, *, k_tile=4096):
    """One-time prep (call once, outside the per-step forward):
      * fold the purely linear critic into a (1, N) vector + (1, 1) bias,
      * symmetric per-output-column int8 quantization of the big actor weight,
      * pre-pack the int8 weight into contiguous (n_tiles, IN, k_tile) slabs."""
    wa, ba, w1, b1, w2, b2, w3, b3 = params
    in_dim, n = wa.shape
    assert n % k_tile == 0 and k_tile % 128 == 0

    # Folded critic (right-associated so the fold itself is cheap).
    # TODO(synk): for trained checkpoints, consider doing this fold with x64 enabled; folding
    # changes f32 accumulation order vs the sequential Linear chain.
    w23 = w2 @ w3                                              # (1024, 1)
    w_fold = (w1 @ w23).reshape(1, n)                          # (1, 4096) f32, ~16 KiB
    b_fold = (b1 @ w23 + b2 @ w3 + b3).reshape(1, 1)           # (1, 1)    f32

    # Symmetric per-output-column int8 quantization of the actor weight.
    absmax = jnp.max(jnp.abs(wa), axis=0, keepdims=True)       # (1, n)
    scale = jnp.maximum(absmax, 1e-30) / 127.0                 # (1, n) f32
    wa_q = jnp.clip(jnp.round(wa / scale), -127, 127).astype(jnp.int8)

    # Contiguous tile packing: tile j holds output columns [j*k_tile, (j+1)*k_tile).
    n_tiles = n // k_tile
    wa_packed = wa_q.reshape(in_dim, n_tiles, k_tile).transpose(1, 0, 2)   # (n_tiles, IN, k_tile)

    return (wa_packed, scale, ba, w_fold, b_fold)


@jax.jit
def actor_critic_forward(position, prepared_params):
    wa_packed, wa_scale, ba, w_fold, b_fold = prepared_params
    n_steps, in_dim, k_tile = wa_packed.shape
    n = n_steps * k_tile                                       # 64*64 = 4096 action logits

    B = position.shape[0]
    x = position.reshape(B, -1).astype(jnp.bfloat16)           # flatten NCHW row-major (torch .view)
    assert x.shape[1] == in_dim
    B_pad = ((B + 7) // 8) * 8                                 # sublane-align the batch
    if B_pad != B:
        x = jnp.pad(x, ((0, B_pad - B), (0, 0)))

    kernel = functools.partial(_fused_actor_critic_kernel, n_steps=n_steps)

    actions_norm, values_pad = pl.pallas_call(
        kernel,
        out_shape=(
            jax.ShapeDtypeStruct((B_pad, n), jnp.float32),
            jax.ShapeDtypeStruct((B_pad, 128), jnp.float32),        # lane-dense value, sliced below
        ),
        grid_spec=pltpu.PrefetchScalarGridSpec(
            num_scalar_prefetch=0,
            grid=(n_steps,),
            in_specs=[
                pl.BlockSpec((B_pad, in_dim), lambda k: (0, 0)),          # x (resident, bf16)
                pl.BlockSpec((None, in_dim, k_tile), lambda k: (k, 0, 0)),  # int8 Wa tile (contiguous)
                pl.BlockSpec((1, k_tile), lambda k: (0, k)),              # per-column dequant scale
                pl.BlockSpec((1, k_tile), lambda k: (0, k)),              # actor bias tile
                pl.BlockSpec((1, n), lambda k: (0, 0)),                   # folded critic weight
                pl.BlockSpec((1, 1), lambda k: (0, 0)),                   # folded critic bias
            ],
            out_specs=[
                pl.BlockSpec((B_pad, n), lambda k: (0, 0)),               # softmaxed actions (resident)
                pl.BlockSpec((B_pad, 128), lambda k: (0, 0)),             # padded values (resident)
            ],
        ),
        compiler_params=pltpu.CompilerParams(
            dimension_semantics=("arbitrary",),   # outputs are resident accumulators over k
            vmem_limit_bytes=32 * 1024 * 1024,    # ~12 MiB worst case; safe on v5e/v6e/v7x
        ),
    )(x, wa_packed, wa_scale, ba, w_fold, b_fold)

    return actions_norm[:B], values_pad[:B, :1]


# --------------------------------------- deterministic params --------------------------------------
def init_params(key, in_dim, n_actions=64 * 64, critic_layers=(1024, 256)):
    """PyTorch-Linear-style uniform(-1/sqrt(fan_in), 1/sqrt(fan_in)) init, deterministic."""
    def linear(key, fan_in, fan_out):
        kw, kb = jax.random.split(key)
        bound = 1.0 / jnp.sqrt(fan_in)
        w = jax.random.uniform(kw, (fan_in, fan_out), jnp.float32, -bound, bound)
        b = jax.random.uniform(kb, (1, fan_out), jnp.float32, -bound, bound)
        return w, b

    k0, k1, k2, k3 = jax.random.split(key, 4)
    wa, ba = linear(k0, in_dim, n_actions)                    # actor stand-in
    w1, b1 = linear(k1, n_actions, critic_layers[0])          # critic Linear(4096, 1024)
    w2, b2 = linear(k2, critic_layers[0], critic_layers[1])   # Linear(1024, 256)
    w3, b3 = linear(k3, critic_layers[1], 1)                  # Linear(256, 1)
    return (wa, ba, w1, b1, w2, b2, w3, b3)


# -------------------------------------------- references -------------------------------------------
def reference_forward_module(position, params):
    """Original module semantics: f32 actor Linear, sequential critic Linears, sigmoid, softmax."""
    wa, ba, w1, b1, w2, b2, w3, b3 = params
    x = position.reshape(position.shape[0], -1).astype(jnp.float32)
    actions = x @ wa + ba
    h = actions @ w1 + b1
    h = h @ w2 + b2
    v = h @ w3 + b3
    values = 2.0 * (jax.nn.sigmoid(v) - 0.5)
    return jax.nn.softmax(actions, axis=1), values


def reference_forward_prepared(position, prepared_params):
    """Numerics-matched reference: same int8-dequant weights, same bf16 streaming precision
    (f32 MXU accumulation), same folded critic as the kernel."""
    wa_packed, wa_scale, ba, w_fold, b_fold = prepared_params
    n_tiles, in_dim, k_tile = wa_packed.shape
    wq = wa_packed.transpose(1, 0, 2).reshape(in_dim, n_tiles * k_tile)
    x = position.reshape(position.shape[0], -1).astype(jnp.bfloat16)
    a = jnp.dot(x, wq.astype(jnp.bfloat16), preferred_element_type=jnp.float32) * wa_scale + ba
    v = jnp.sum(a * w_fold, axis=1, keepdims=True) + b_fold
    values = 2.0 * (jax.nn.sigmoid(v) - 0.5)
    return jax.nn.softmax(a, axis=1), values


if __name__ == "__main__":
    key = jax.random.PRNGKey(0)
    k_pos, k_params = jax.random.split(key)

    # Chess-position-like input: NCHW (batch=2, planes=12, 8x8 board) -> 768 flat features.
    B, C, H, W = 2, 12, 8, 8
    position = jax.random.normal(k_pos, (B, C, H, W), jnp.float32)

    params = init_params(k_params, in_dim=C * H * W)
    prepared = prepare_params(params, k_tile=4096)   # sweep k_tile in {1024, 2048, 4096}

    actions_norm, values = actor_critic_forward(position, prepared)
    actions_norm, values = jax.block_until_ready((actions_norm, values))
    assert actions_norm.shape == (B, 64 * 64) and values.shape == (B, 1)

    # Tight check vs. a numerics-matched reference (same quantized weights, same critic fold).
    ref_a_q, ref_v_q = reference_forward_prepared(position, prepared)
    assert jnp.allclose(actions_norm, ref_a_q, rtol=5e-3, atol=1e-6)
    assert jnp.allclose(values, ref_v_q, rtol=5e-3, atol=1e-4)

    # Loose check vs. the original full-precision module semantics (guards packing/layout bugs;
    # remaining gap is the intentional int8 weight quantization + bf16 activation streaming).
    ref_a, ref_v = reference_forward_module(position, params)
    assert jnp.allclose(actions_norm, ref_a, rtol=0.25, atol=2e-4)
    assert jnp.allclose(values, ref_v, rtol=0.25, atol=2e-2)

    print("KERNEL_OK")
</pallas_src>

<mosaic_0001>
module attributes {stable_mosaic.version = 11 : i64} {
  func.func @_fused_actor_critic_kernel(%arg0: i32, %arg1: memref<8x768xbf16, #tpu.memory_space<vmem>>, %arg2: memref<1x768x4096xi8, #tpu.memory_space<vmem>>, %arg3: memref<1x4096xf32, #tpu.memory_space<vmem>>, %arg4: memref<1x4096xf32, #tpu.memory_space<vmem>>, %arg5: memref<1x4096xf32, #tpu.memory_space<vmem>>, %arg6: memref<1x1xf32, #tpu.memory_space<vmem>>, %arg7: memref<8x4096xf32, #tpu.memory_space<vmem>>, %arg8: memref<8x128xf32, #tpu.memory_space<vmem>>) attributes {dimension_semantics = [#tpu.dimension_semantics<arbitrary>], iteration_bounds = array<i64: 1>, scalar_prefetch = 0 : i64, scratch_operands = 0 : i64, tpu.core_type = #tpu.core_type<tc>, window_params = [{pipeline_mode = #tpu.pipeline_mode<synchronous>, transform_indices = @transform_0, window_bounds = array<i64: 8, 768>}, {transform_indices = @transform_1, window_bounds = array<i64: 1, 768, 4096>}, {transform_indices = @transform_2, window_bounds = array<i64: 1, 4096>}, {transform_indices = @transform_3, window_bounds = array<i64: 1, 4096>}, {pipeline_mode = #tpu.pipeline_mode<synchronous>, transform_indices = @transform_4, window_bounds = array<i64: 1, 4096>}, {pipeline_mode = #tpu.pipeline_mode<synchronous>, transform_indices = @transform_5, window_bounds = array<i64: 1, 1>}, {pipeline_mode = #tpu.pipeline_mode<synchronous>, transform_indices = @transform_6, window_bounds = array<i64: 8, 4096>}, {pipeline_mode = #tpu.pipeline_mode<synchronous>, transform_indices = @transform_7, window_bounds = array<i64: 8, 128>}]} {
    %c0 = arith.constant 0 : index
    %c0_0 = arith.constant 0 : index
    %c0_1 = arith.constant 0 : index
    %0 = vector.load %arg2[%c0, %c0_0, %c0_1] : memref<1x768x4096xi8, #tpu.memory_space<vmem>>, vector<1x768x4096xi8>
    %1 = vector.shape_cast %0 : vector<1x768x4096xi8> to vector<768x4096xi8>
    %2 = arith.sitofp %1 : vector<768x4096xi8> to vector<768x4096xbf16>
    %c0_2 = arith.constant 0 : index
    %c0_3 = arith.constant 0 : index
    %3 = vector.load %arg1[%c0_2, %c0_3] : memref<8x768xbf16, #tpu.memory_space<vmem>>, vector<8x768xbf16>
    %cst = arith.constant dense<0.000000e+00> : vector<8x4096xf32>
    %4 = tpu.matmul %3, %2, %cst {dimension_numbers = #tpu.dot_dimension_numbers<[1], [0], [0], [1], [0, 0, 1, 1], [], []>} : vector<8x768xbf16>, vector<768x4096xbf16>, vector<8x4096xf32> -> vector<8x4096xf32>
    %c0_4 = arith.constant 0 : index
    %c0_5 = arith.constant 0 : index
    %5 = vector.load %arg3[%c0_4, %c0_5] : memref<1x4096xf32, #tpu.memory_space<vmem>>, vector<1x4096xf32>
    %6 = vector.broadcast %5 : vector<1x4096xf32> to vector<8x4096xf32>
    %7 = arith.mulf %4, %6 : vector<8x4096xf32>
    %c0_6 = arith.constant 0 : index
    %c0_7 = arith.constant 0 : index
    %8 = vector.load %arg4[%c0_6, %c0_7] : memref<1x4096xf32, #tpu.memory_space<vmem>>, vector<1x4096xf32>
    %9 = vector.broadcast %8 : vector<1x4096xf32> to vector<8x4096xf32>
    %10 = arith.addf %7, %9 : vector<8x4096xf32>
    %c0_8 = arith.constant 0 : index
    %c0_9 = arith.constant 0 : index
    %11 = vector.load %arg5[%c0_8, %c0_9] : memref<1x4096xf32, #tpu.memory_space<vmem>>, vector<1x4096xf32>
    %12 = vector.broadcast %11 : vector<1x4096xf32> to vector<8x4096xf32>
    %13 = arith.mulf %10, %12 : vector<8x4096xf32>
    %cst_10 = arith.constant dense<0.000000e+00> : vector<8xf32>
    %14 = vector.multi_reduction <add>, %13, %cst_10 [1] : vector<8x4096xf32> to vector<8xf32>
    %15 = vector.shape_cast %14 : vector<8xf32> to vector<8x1xf32>
    %c0_11 = arith.constant 0 : index
    %c0_12 = arith.constant 0 : index
    %16 = vector.load %arg6[%c0_11, %c0_12] : memref<1x1xf32, #tpu.memory_space<vmem>>, vector<1x1xf32>
    %17 = vector.broadcast %16 : vector<1x1xf32> to vector<8x1xf32>
    %18 = arith.addf %15, %17 : vector<8x1xf32>
    %cst_13 = arith.constant 5.000000e-01 : f32
    %19 = vector.broadcast %cst_13 : f32 to vector<8x1xf32>
    %20 = arith.mulf %19, %18 : vector<8x1xf32>
    %21 = math.tanh %20 : vector<8x1xf32>
    %22 = vector.shape_cast %21 : vector<8x1xf32> to vector<8x1xf32>
    %23 = vector.broadcast %22 : vector<8x1xf32> to vector<8x128xf32>
    %c0_14 = arith.constant 0 : index
    %c0_15 = arith.constant 0 : index
    %24 = vector.load %arg8[%c0_14, %c0_15] : memref<8x128xf32, #tpu.memory_space<vmem>>, vector<8x128xf32>
    tpu.vector_store %arg8[%c0_14, %c0_15], %23 {strides = array<i32>} : memref<8x128xf32, #tpu.memory_space<vmem>>, vector<8x128xf32>,
    %cst_16 = arith.constant dense<0xFF800000> : vector<8xf32>
    %25 = vector.multi_reduction <maximumf>, %10, %cst_16 [1] : vector<8x4096xf32> to vector<8xf32>
    %26 = vector.shape_cast %25 : vector<8xf32> to vector<8x1xf32>
    %27 = vector.broadcast %26 : vector<8x1xf32> to vector<8x4096xf32>
    %28 = arith.subf %10, %27 : vector<8x4096xf32>
    %29 = math.exp %28 : vector<8x4096xf32>
    %cst_17 = arith.constant dense<0.000000e+00> : vector<8xf32>
    %30 = vector.multi_reduction <add>, %29, %cst_17 [1] : vector<8x4096xf32> to vector<8xf32>
    %31 = vector.shape_cast %30 : vector<8xf32> to vector<8x1xf32>
    %32 = tpu.reciprocal %31 {approx = true} : vector<8x1xf32> -> vector<8x1xf32>
    %33 = vector.broadcast %32 : vector<8x1xf32> to vector<8x4096xf32>
    %34 = arith.mulf %29, %33 : vector<8x4096xf32>
    %c0_18 = arith.constant 0 : index
    %c0_19 = arith.constant 0 : index
    %35 = vector.load %arg7[%c0_18, %c0_19] : memref<8x4096xf32, #tpu.memory_space<vmem>>, vector<8x4096xf32>
    tpu.vector_store %arg7[%c0_18, %c0_19], %34 {strides = array<i32>} : memref<8x4096xf32, #tpu.memory_space<vmem>>, vector<8x4096xf32>,
    return
  }
  func.func @transform_0(%arg0: i32) -> (i32, i32) {
    %c0_i32 = arith.constant 0 : i32
    %c0_i32_0 = arith.constant 0 : i32
    %c0_i32_1 = arith.constant 0 : i32
    return %c0_i32, %c0_i32_0 : i32, i32
  }
  func.func @transform_1(%arg0: i32) -> (i32, i32, i32) {
    %c0_i32 = arith.constant 0 : i32
    %c0_i32_0 = arith.constant 0 : i32
    %c0_i32_1 = arith.constant 0 : i32
    return %arg0, %c0_i32, %c0_i32_0 : i32, i32, i32
  }
  func.func @transform_2(%arg0: i32) -> (i32, i32) {
    %c0_i32 = arith.constant 0 : i32
    %c0_i32_0 = arith.constant 0 : i32
    return %c0_i32, %arg0 : i32, i32
  }
  func.func @transform_3(%arg0: i32) -> (i32, i32) {
    %c0_i32 = arith.constant 0 : i32
    %c0_i32_0 = arith.constant 0 : i32
    return %c0_i32, %arg0 : i32, i32
  }
  func.func @transform_4(%arg0: i32) -> (i32, i32) {
    %c0_i32 = arith.constant 0 : i32
    %c0_i32_0 = arith.constant 0 : i32
    %c0_i32_1 = arith.constant 0 : i32
    return %c0_i32, %c0_i32_0 : i32, i32
  }
  func.func @transform_5(%arg0: i32) -> (i32, i32) {
    %c0_i32 = arith.constant 0 : i32
    %c0_i32_0 = arith.constant 0 : i32
    %c0_i32_1 = arith.constant 0 : i32
    return %c0_i32, %c0_i32_0 : i32, i32
  }
  func.func @transform_6(%arg0: i32) -> (i32, i32) {
    %c0_i32 = arith.constant 0 : i32
    %c0_i32_0 = arith.constant 0 : i32
    %c0_i32_1 = arith.constant 0 : i32
    return %c0_i32, %c0_i32_0 : i32, i32
  }
  func.func @transform_7(%arg0: i32) -> (i32, i32) {
    %c0_i32 = arith.constant 0 : i32
    %c0_i32_0 = arith.constant 0 : i32
    %c0_i32_1 = arith.constant 0 : i32
    return %c0_i32, %c0_i32_0 : i32, i32
  }
}

</mosaic_0001>

<bundles_post_ra>
// kernel: actor_critic_forward.1
= control target key start
LH: loop header
LB: loop body
LE: loop exit
PB: predicated region body
PF: predicated region fallthrough
CT: control target
= control target key end

     0   :  { %s6461_s0 = inlined_call_operand.vmem [shape: bf16[8,768], index: 0, kind: input, shape index: {}]   ;;  %s6462_s1 = inlined_call_operand.hbm [shape: s8[1,768,4096], index: 1, kind: input, shape index: {}]   ;;  %s6463_s2 = inlined_call_operand.hbm [shape: f32[1,4096], index: 2, kind: input, shape index: {}]   ;;  %s6464_s3 = inlined_call_operand.hbm [shape: f32[1,4096], index: 3, kind: input, shape index: {}]   ;;  %s6465_s4 = inlined_call_operand.hbm [shape: f32[1,4096], index: 4, kind: input, shape index: {}]   ;;  %s6466_s5 = inlined_call_operand.<no memory space> [shape: f32[1,1], index: 5, kind: input, shape index: {}]   ;;  %s6467_s6 = inlined_call_operand.vmem [shape: f32[8,4096], index: 6, kind: output, shape index: {0}]   ;;  %s6468_s7 = inlined_call_operand.vmem [shape: f32[8,128], index: 7, kind: output, shape index: {1}]  }
   0x1   :  { %v13_v0 = vstv %s6466_s5 }
   0x2   :  { %14 = vst [vmem:[#allocation2] sm:$0x1] %v13_v0 }
   0x3   :  { %15 = vsyncpa [#allocation4], 0 }
   0x4   :  { %16 = vsyncpa [#allocation6], 0 }
   0x5   :  { %17 = vsyncpa [#allocation9], 0  ;;  %s5435_s26 = smov [#allocation5]   ;;  %s5436_s28 = smov [#allocation3]  }
   0x6   :  { %s38_s27 = sshll.u32 %s5435_s26, 4  ;;  %s25_s29 = sshll.u32 %s5436_s28, 4  ;;  %s39_s27 = int_to_ptr.vmem [resolvable:$true] %s38_s27  ;;  %s26_s29 = int_to_ptr.vmem [resolvable:$true] %s25_s29 }
   0x7   :  { %s5357_s30 = scalar_lea.vmem %s39_s27, 512  ;;  %p5362_p1 = scmp.lt.s32.totalorder %s39_s27, %s39_s27 }
   0x8   :  { %p5358_p0 = scmp.ne.s32.totalorder %s39_s27, %s5357_s30  ;;  %p5363_p2 = scmp.lt.s32.totalorder %s5357_s30, %s5357_s30 }
   0xa   :  { %p5364_p3 = por %p5363_p2, %p5362_p1 }
   0xc   :  { %p5365_p4 = pnand %p5364_p3, %p5358_p0 }
   0xe   :  { %5368 = shalt.err (!%p5365_p4)
}
   0xf   :  { %41 = dma.hbm_to_vmem [thread:$0]  %s6463_s2, 512, %s39_s27, [#allocation6]  }
  0x10   :  { %s5377_s5 = scalar_lea.vmem %s26_s29, 98304  ;;  %p5382_p6 = scmp.lt.s32.totalorder %s26_s29, %s26_s29 }
  0x11   :  { %p5378_p5 = scmp.ne.s32.totalorder %s26_s29, %s5377_s5  ;;  %p5383_p7 = scmp.lt.s32.totalorder %s5377_s5, %s5377_s5 }
  0x13   :  { %p5384_p8 = por %p5383_p7, %p5382_p6 }
  0x15   :  { %p5385_p9 = pnand %p5384_p8, %p5378_p5 }
  0x17   :  { %5388 = shalt.err (!%p5385_p9)
}
  0x18   :  { %s5437_s10 = smov 4096   ;;  %s5438_s11 = smov 256  }
  0x19   :  { %31 = dma.hbm_to_vmem [thread:$0]  %s6462_s1, 98304, %s26_s29, [#allocation4], %s5437_s10, %s5437_s10, %s5438_s11  }
  0x1a   :  { %s5439_s14 = smov [#allocation7]   ;;  %s5440_s16 = smov [#allocation8]  }
  0x1b   :  { %s48_s15 = sshll.u32 %s5439_s14, 4  ;;  %s58_s17 = sshll.u32 %s5440_s16, 4  ;;  %s49_s15 = int_to_ptr.vmem [resolvable:$true] %s48_s15  ;;  %s59_s17 = int_to_ptr.vmem [resolvable:$true] %s58_s17 }
  0x1c   :  { %s5397_s2 = scalar_lea.vmem %s49_s15, 512  ;;  %p5402_p11 = scmp.lt.s32.totalorder %s49_s15, %s49_s15 }
  0x1d   :  { %p5398_p10 = scmp.ne.s32.totalorder %s49_s15, %s5397_s2  ;;  %p5403_p12 = scmp.lt.s32.totalorder %s5397_s2, %s5397_s2 }
  0x1f   :  { %p5404_p13 = por %p5403_p12, %p5402_p11 }
  0x21   :  { %p5405_p0 = pnand %p5404_p13, %p5398_p10 }
  0x23   :  { %5408 = shalt.err (!%p5405_p0)
}
  0x24   :  { %51 = dma.hbm_to_vmem [thread:$0]  %s6464_s3, 512, %s49_s15, [#allocation6]  }
  0x25   :  { %s5417_s20 = scalar_lea.vmem %s59_s17, 512  ;;  %p5422_p2 = scmp.lt.s32.totalorder %s59_s17, %s59_s17 }
  0x26   :  { %p5418_p1 = scmp.ne.s32.totalorder %s59_s17, %s5417_s20  ;;  %p5423_p3 = scmp.lt.s32.totalorder %s5417_s20, %s5417_s20 }
  0x28   :  { %p5424_p4 = por %p5423_p3, %p5422_p2 }
  0x2a   :  { %p5425_p5 = pnand %p5424_p4, %p5418_p1 }
  0x2c   :  { %5428 = shalt.err (!%p5425_p5)
}
  0x2d   :  { %61 = dma.hbm_to_vmem [thread:$0]  %s6465_s4, 512, %s59_s17, [#allocation9]  }
  0x2e   :  { %5429 = dma.done.wait [#allocation4], 98304  }
  0x2f   :  { %5430 = vsyncadd [#allocation4], 4294868992 }
  0x30   :  { %5431 = dma.done.wait [#allocation6], 1024  }
  0x31   :  { %5432 = vsyncadd [#allocation6], 4294966272 }
  0x32   :  { %5433 = dma.done.wait [#allocation9], 512  }
  0x33   :  { %5434 = vsyncadd [#allocation9], 4294966784  ;;  %v173_v1 = vld [vmem:[#allocation3 + $0x308] sm:$0xff]  ;;  %v172_v3 = vld [vmem:[#allocation3 + $0x300] sm:$0xff] }
  0x34   :  { %v429_v2 = vld [vmem:[#allocation3 + $0xb08] sm:$0xff]  ;;  %v1037_v4 = vunpack.c.l.s8.bf16 %v173_v1  ;;  %v1069_v5 = vunpack.c.h.s8.bf16 %v173_v1  ;;  %v428_v8 = vld [vmem:[#allocation3 + $0xb00] sm:$0xff]  ;;  %v1068_v9 = vunpack.c.h.s8.bf16 %v172_v3  ;;  %v1036_v13 = vunpack.c.l.s8.bf16 %v172_v3 }
  0x35   :  { %v1549_v6 = vunpack.c.l.s8.bf16 %v429_v2  ;;  %v1581_v7 = vunpack.c.h.s8.bf16 %v429_v2  ;;  %v1580_v10 = vunpack.c.h.s8.bf16 %v428_v8  ;;  %v141_v11 = vld [vmem:[#allocation3 + $0x208] sm:$0xff]  ;;  %v1548_v14 = vunpack.c.l.s8.bf16 %v428_v8  ;;  %v140_v17 = vld [vmem:[#allocation3 + $0x200] sm:$0xff] }
  0x36   :  { %v397_v12 = vld [vmem:[#allocation3 + $0xa08] sm:$0xff]  ;;  %2404 = vmatprep.subr.bf16.mxu0 %v1069_v5  ;;  %v1005_v15 = vunpack.c.h.s8.bf16 %v141_v11  ;;  %v396_v18 = vld [vmem:[#allocation3 + $0xa00] sm:$0xff]  ;;  %v1004_v19 = vunpack.c.h.s8.bf16 %v140_v17  ;;  %v973_v21 = vunpack.c.l.s8.bf16 %v141_v11  ;;  %v972_v25 = vunpack.c.l.s8.bf16 %v140_v17 }
  0x37   :  { %2445 = vmatprep.subr.bf16.mxu1 %v1581_v7  ;;  %2405 = vmatpush1.bf16.msra.mxu0 %v1068_v9  ;;  %v1517_v16 = vunpack.c.h.s8.bf16 %v397_v12  ;;  %v1516_v20 = vunpack.c.h.s8.bf16 %v396_v18  ;;  %v1485_v22 = vunpack.c.l.s8.bf16 %v397_v12  ;;  %v109_v23 = vld [vmem:[#allocation3 + $0x108] sm:$0xff]  ;;  %v1484_v26 = vunpack.c.l.s8.bf16 %v396_v18  ;;  %v108_v29 = vld [vmem:[#allocation3 + $0x100] sm:$0xff] }
  0x38   :  { %2446 = vmatpush1.bf16.msra.mxu1 %v1580_v10  ;;  %2406 = vmatprep.subr.bf16.mxu0 %v1037_v4  ;;  %v365_v24 = vld [vmem:[#allocation3 + $0x908] sm:$0xff]  ;;  %v941_v27 = vunpack.c.h.s8.bf16 %v109_v23  ;;  %v364_v30 = vld [vmem:[#allocation3 + $0x900] sm:$0xff]  ;;  %v940_v33 = vunpack.c.h.s8.bf16 %v108_v29  ;;  %v909_v35 = vunpack.c.l.s8.bf16 %v109_v23  ;;  %v908_v41 = vunpack.c.l.s8.bf16 %v108_v29 }
  0x39   :  { %2447 = vmatprep.subr.bf16.mxu1 %v1549_v6  ;;  %v1453_v28 = vunpack.c.h.s8.bf16 %v365_v24  ;;  %v5500_v31 = vld [vmem:[%s6461_s0] sm:$0xff]  ;;  %v5505_v32 = vld [vmem:[%s6461_s0 + $0x8] sm:$0xff]  ;;  %v1452_v34 = vunpack.c.h.s8.bf16 %v364_v30  ;;  %v1421_v36 = vunpack.c.l.s8.bf16 %v365_v24  ;;  %v1420_v42 = vunpack.c.l.s8.bf16 %v364_v30 }
  0x3a   :  { %v5509_v37 = vcombine.high %v5500_v31, %v5500_v31  ;;  %v5513_v38 = vcombine.high %v5505_v32, %v5505_v32  ;;  %v77_v39 = vld [vmem:[#allocation3 + $0x8] sm:$0xff]  ;;  %v76_v45 = vld [vmem:[#allocation3] sm:$0xff] }
  0x3b   :  { %2407 = vmatpush1.bf16.msra.mxu0 %v1036_v13  ;;  %v333_v40 = vld [vmem:[#allocation3 + $0x808] sm:$0xff]  ;;  %v877_v43 = vunpack.c.h.s8.bf16 %v77_v39  ;;  %v332_v46 = vld [vmem:[#allocation3 + $0x800] sm:$0xff]  ;;  %v876_v47 = vunpack.c.h.s8.bf16 %v76_v45  ;;  %v845_v49 = vunpack.c.l.s8.bf16 %v77_v39  ;;  %v844_v53 = vunpack.c.l.s8.bf16 %v76_v45 }
  0x3c   :  { %2448 = vmatpush1.bf16.msra.mxu1 %v1548_v14  ;;  %2408 = vmatprep.subr.bf16.mxu0 %v1005_v15  ;;  %v1389_v44 = vunpack.c.h.s8.bf16 %v333_v40  ;;  %v1388_v48 = vunpack.c.h.s8.bf16 %v332_v46  ;;  %v1357_v50 = vunpack.c.l.s8.bf16 %v333_v40  ;;  %v301_v51 = vld [vmem:[#allocation3 + $0x708] sm:$0xff]  ;;  %v1356_v54 = vunpack.c.l.s8.bf16 %v332_v46  ;;  %v300_v57 = vld [vmem:[#allocation3 + $0x700] sm:$0xff]  ;;  %v175_v40 = vld [vmem:[#allocation3 + $0x318] sm:$0xff] }
  0x3d   :  { %2449 = vmatprep.subr.bf16.mxu1 %v1517_v16  ;;  %2436 = vmatprep.mubr.bf16.mxu0 %v5509_v37  ;;  %v557_v52 = vld [vmem:[#allocation3 + $0xf08] sm:$0xff]  ;;  %v1325_v55 = vunpack.c.h.s8.bf16 %v301_v51  ;;  %v556_v58 = vld [vmem:[#allocation3 + $0xf00] sm:$0xff]  ;;  %v1324_v59 = vunpack.c.h.s8.bf16 %v300_v57  ;;  %v1293_v61 = vunpack.c.l.s8.bf16 %v301_v51  ;;  %v1292_v1 = vunpack.c.l.s8.bf16 %v300_v57  ;;  %v174_v46 = vld [vmem:[#allocation3 + $0x310] sm:$0xff] }
  0x3e   :  { %2477 = vmatprep.mubr.bf16.mxu1 %v5513_v38  ;;  %v1837_v56 = vunpack.c.h.s8.bf16 %v557_v52  ;;  %v1836_v60 = vunpack.c.h.s8.bf16 %v556_v58  ;;  %v1805_v62 = vunpack.c.l.s8.bf16 %v557_v52  ;;  %v269_v63 = vld [vmem:[#allocation3 + $0x608] sm:$0xff]  ;;  %v1804_v2 = vunpack.c.l.s8.bf16 %v556_v58  ;;  %v268_v5 = vld [vmem:[#allocation3 + $0x600] sm:$0xff] }
  0x3f   :  { %2409 = vmatpush1.bf16.msra.mxu0 %v1004_v19  ;;  %v525_v0 = vld [vmem:[#allocation3 + $0xe08] sm:$0xff]  ;;  %v1261_v3 = vunpack.c.h.s8.bf16 %v269_v63  ;;  %v524_v6 = vld [vmem:[#allocation3 + $0xe00] sm:$0xff]  ;;  %v1260_v7 = vunpack.c.h.s8.bf16 %v268_v5  ;;  %v1229_v9 = vunpack.c.l.s8.bf16 %v269_v63  ;;  %v1228_v13 = vunpack.c.l.s8.bf16 %v268_v5 }
  0x40   :  { %2450 = vmatpush1.bf16.msra.mxu1 %v1516_v20  ;;  %2410 = vmatprep.subr.bf16.mxu0 %v973_v21  ;;  %v1773_v4 = vunpack.c.h.s8.bf16 %v525_v0  ;;  %v1772_v8 = vunpack.c.h.s8.bf16 %v524_v6  ;;  %v1741_v10 = vunpack.c.l.s8.bf16 %v525_v0  ;;  %v237_v11 = vld [vmem:[#allocation3 + $0x508] sm:$0xff]  ;;  %v1740_v14 = vunpack.c.l.s8.bf16 %v524_v6  ;;  %v236_v17 = vld [vmem:[#allocation3 + $0x500] sm:$0xff] }
  0x41   :  { %2451 = vmatprep.subr.bf16.mxu1 %v1485_v22  ;;  %v493_v12 = vld [vmem:[#allocation3 + $0xd08] sm:$0xff]  ;;  %v1197_v15 = vunpack.c.h.s8.bf16 %v237_v11  ;;  %v492_v18 = vld [vmem:[#allocation3 + $0xd00] sm:$0xff]  ;;  %v1196_v19 = vunpack.c.h.s8.bf16 %v236_v17  ;;  %v1165_v21 = vunpack.c.l.s8.bf16 %v237_v11  ;;  %v1070_v51 = vunpack.c.h.s8.bf16 %v174_v46 }
  0x42   :  { %v1709_v16 = vunpack.c.h.s8.bf16 %v493_v12  ;;  %v1708_v20 = vunpack.c.h.s8.bf16 %v492_v18  ;;  %v1677_v22 = vunpack.c.l.s8.bf16 %v493_v12  ;;  %v205_v23 = vld [vmem:[#allocation3 + $0x408] sm:$0xff]  ;;  %v204_v29 = vld [vmem:[#allocation3 + $0x400] sm:$0xff] }
  0x43   :  { %2411 = vmatpush1.bf16.msra.mxu0 %v972_v25  ;;  %v461_v24 = vld [vmem:[#allocation3 + $0xc08] sm:$0xff]  ;;  %v1164_v25 = vunpack.c.l.s8.bf16 %v236_v17  ;;  %v460_v30 = vld [vmem:[#allocation3 + $0xc00] sm:$0xff] }
  0x44   :  { %2452 = vmatpush1.bf16.msra.mxu1 %v1484_v26  ;;  %2412 = vmatprep.subr.bf16.mxu0 %v941_v27  ;;  %v1676_v26 = vunpack.c.l.s8.bf16 %v492_v18  ;;  %v1133_v27 = vunpack.c.h.s8.bf16 %v205_v23  ;;  %v685_v39 = vld [vmem:[#allocation3 + $0x1308] sm:$0xff]  ;;  %v684_v45 = vld [vmem:[#allocation3 + $0x1300] sm:$0xff] }
  0x45   :  { %2453 = vmatprep.subr.bf16.mxu1 %v1453_v28  ;;  %v1645_v28 = vunpack.c.h.s8.bf16 %v461_v24  ;;  %v2061_v52 = vunpack.c.l.s8.bf16 %v685_v39 }
  0x47   :  { %2413 = vmatpush1.bf16.msra.mxu0 %v940_v33  ;;  %v1132_v33 = vunpack.c.h.s8.bf16 %v204_v29 }
  0x48   :  { %2454 = vmatpush1.bf16.msra.mxu1 %v1452_v34  ;;  %2414 = vmatprep.subr.bf16.mxu0 %v909_v35  ;;  %v1644_v34 = vunpack.c.h.s8.bf16 %v460_v30  ;;  %v1101_v35 = vunpack.c.l.s8.bf16 %v205_v23 }
  0x49   :  { %2455 = vmatprep.subr.bf16.mxu1 %v1421_v36  ;;  %v1613_v36 = vunpack.c.l.s8.bf16 %v461_v24 }
  0x4b   :  { %2415 = vmatpush1.bf16.msra.mxu0 %v908_v41  ;;  %v1100_v41 = vunpack.c.l.s8.bf16 %v204_v29 }
  0x4c   :  { %2456 = vmatpush1.bf16.msra.mxu1 %v1420_v42  ;;  %2416 = vmatprep.subr.bf16.mxu0 %v877_v43  ;;  %v1612_v42 = vunpack.c.l.s8.bf16 %v460_v30  ;;  %v2093_v43 = vunpack.c.h.s8.bf16 %v685_v39 }
  0x4d   :  { %2457 = vmatprep.subr.bf16.mxu1 %v1389_v44  ;;  %v1071_v44 = vunpack.c.h.s8.bf16 %v175_v40 }
  0x4f   :  { %2417 = vmatpush1.bf16.msra.mxu0 %v876_v47  ;;  %v5519_v47 = vcombine.low %v5500_v31, %v5500_v31  ;;  %v143_v31 = vld [vmem:[#allocation3 + $0x218] sm:$0xff] }
  0x50   :  { %2458 = vmatpush1.bf16.msra.mxu1 %v1388_v48  ;;  %2418 = vmatprep.subr.bf16.mxu0 %v845_v49  ;;  %v5523_v48 = vcombine.low %v5505_v32, %v5505_v32  ;;  %v5528_v49 = vld [vmem:[%s6461_s0 + $0x10] sm:$0xff]  ;;  %v2060_v32 = vunpack.c.l.s8.bf16 %v684_v45  ;;  %v1007_v58 = vunpack.c.h.s8.bf16 %v143_v31  ;;  %v975_v0 = vunpack.c.l.s8.bf16 %v143_v31 }
  0x51   :  { %2459 = vmatprep.subr.bf16.mxu1 %v1357_v50  ;;  %v2092_v50 = vunpack.c.h.s8.bf16 %v684_v45 }
  0x53   :  { %2419 = vmatpush1.bf16.msra.mxu0 %v844_v53  ;;  %v1039_v53 = vunpack.c.l.s8.bf16 %v175_v40 }
  0x54   :  { %2460 = vmatpush1.bf16.msra.mxu1 %v1356_v54  ;;  %2420 = vmatprep.subr.bf16.mxu0 %v1325_v55  ;;  %v653_v54 = vld [vmem:[#allocation3 + $0x1208] sm:$0xff]  ;;  %v5532_v55 = vcombine.high %v5528_v49, %v5528_v49 }
  0x55   :  { %2461 = vmatprep.subr.bf16.mxu1 %v1837_v56  ;;  %v1038_v56 = vunpack.c.l.s8.bf16 %v174_v46  ;;  %v2029_v57 = vunpack.c.h.s8.bf16 %v653_v54  ;;  %v1997_v63 = vunpack.c.l.s8.bf16 %v653_v54 }
  0x57   :  { %2421 = vmatpush2.bf16.msra.mxu0 %v1324_v59  ;;  %v652_v59 = vld [vmem:[#allocation3 + $0x1200] sm:$0xff] }
  0x58   :  { %2462 = vmatpush2.bf16.msra.mxu1 %v1836_v60  ;;  %2422 = vmatprep.subr.bf16.mxu0 %v1293_v61  ;;  %v142_v60 = vld [vmem:[#allocation3 + $0x210] sm:$0xff]  ;;  %v2028_v61 = vunpack.c.h.s8.bf16 %v652_v59 }
  0x59   :  { %2463 = vmatprep.subr.bf16.mxu1 %v1805_v62  ;;  %v1006_v62 = vunpack.c.h.s8.bf16 %v142_v60 }
  0x5b   :  { %2423 = vmatpush2.bf16.msra.mxu0 %v1292_v1  ;;  %v621_v1 = vld [vmem:[#allocation3 + $0x1108] sm:$0xff] }
  0x5c   :  { %2464 = vmatpush2.bf16.msra.mxu1 %v1804_v2  ;;  %2424 = vmatprep.subr.bf16.mxu0 %v1261_v3  ;;  %v111_v2 = vld [vmem:[#allocation3 + $0x118] sm:$0xff]  ;;  %v1996_v3 = vunpack.c.l.s8.bf16 %v652_v59  ;;  %v1965_v5 = vunpack.c.h.s8.bf16 %v621_v1  ;;  %v1933_v11 = vunpack.c.l.s8.bf16 %v621_v1 }
  0x5d   :  { %2465 = vmatprep.subr.bf16.mxu1 %v1773_v4  ;;  %v974_v4 = vunpack.c.l.s8.bf16 %v142_v60  ;;  %v943_v6 = vunpack.c.h.s8.bf16 %v111_v2  ;;  %v911_v12 = vunpack.c.l.s8.bf16 %v111_v2 }
  0x5f   :  { %2425 = vmatpush2.bf16.msra.mxu0 %v1260_v7  ;;  %v620_v7 = vld [vmem:[#allocation3 + $0x1100] sm:$0xff] }
  0x60   :  { %2466 = vmatpush2.bf16.msra.mxu1 %v1772_v8  ;;  %2426 = vmatprep.subr.bf16.mxu0 %v1229_v9  ;;  %v110_v8 = vld [vmem:[#allocation3 + $0x110] sm:$0xff]  ;;  %v1964_v9 = vunpack.c.h.s8.bf16 %v620_v7 }
  0x61   :  { %2467 = vmatprep.subr.bf16.mxu1 %v1741_v10  ;;  %v942_v10 = vunpack.c.h.s8.bf16 %v110_v8 }
  0x63   :  { %2427 = vmatpush2.bf16.msra.mxu0 %v1228_v13  ;;  %v589_v13 = vld [vmem:[#allocation3 + $0x1008] sm:$0xff] }
  0x64   :  { %2468 = vmatpush2.bf16.msra.mxu1 %v1740_v14  ;;  %2428 = vmatprep.subr.bf16.mxu0 %v1197_v15  ;;  %v79_v14 = vld [vmem:[#allocation3 + $0x18] sm:$0xff]  ;;  %v1932_v15 = vunpack.c.l.s8.bf16 %v620_v7  ;;  %v1901_v17 = vunpack.c.h.s8.bf16 %v589_v13  ;;  %v1869_v23 = vunpack.c.l.s8.bf16 %v589_v13 }
  0x65   :  { %2469 = vmatprep.subr.bf16.mxu1 %v1709_v16  ;;  %v910_v16 = vunpack.c.l.s8.bf16 %v110_v8  ;;  %v879_v18 = vunpack.c.h.s8.bf16 %v79_v14  ;;  %v847_v24 = vunpack.c.l.s8.bf16 %v79_v14 }
  0x67   :  { %2429 = vmatpush2.bf16.msra.mxu0 %v1196_v19  ;;  %v588_v19 = vld [vmem:[#allocation3 + $0x1000] sm:$0xff] }
  0x68   :  { %2470 = vmatpush2.bf16.msra.mxu1 %v1708_v20  ;;  %2430 = vmatprep.subr.bf16.mxu0 %v1165_v21  ;;  %v78_v20 = vld [vmem:[#allocation3 + $0x10] sm:$0xff]  ;;  %v1900_v21 = vunpack.c.h.s8.bf16 %v588_v19 }
  0x69   :  { %2471 = vmatprep.subr.bf16.mxu1 %v1677_v22  ;;  %v878_v22 = vunpack.c.h.s8.bf16 %v78_v20 }
  0x6b   :  { %2431 = vmatpush2.bf16.msra.mxu0 %v1164_v25  ;;  %v813_v25 = vld [vmem:[#allocation3 + $0x1708] sm:$0xff] }
  0x6c   :  { %2472 = vmatpush2.bf16.msra.mxu1 %v1676_v26  ;;  %2432 = vmatprep.subr.bf16.mxu0 %v1133_v27  ;;  %v303_v26 = vld [vmem:[#allocation3 + $0x718] sm:$0xff]  ;;  %v1868_v27 = vunpack.c.l.s8.bf16 %v588_v19  ;;  %v2349_v29 = vunpack.c.h.s8.bf16 %v813_v25  ;;  %v2317_v39 = vunpack.c.l.s8.bf16 %v813_v25 }
  0x6d   :  { %2473 = vmatprep.subr.bf16.mxu1 %v1645_v28  ;;  %v846_v28 = vunpack.c.l.s8.bf16 %v78_v20  ;;  %v1327_v30 = vunpack.c.h.s8.bf16 %v303_v26  ;;  %v1295_v40 = vunpack.c.l.s8.bf16 %v303_v26 }
  0x6f   :  { %2433 = vmatpush2.bf16.msra.mxu0 %v1132_v33  ;;  %v812_v33 = vld [vmem:[#allocation3 + $0x1700] sm:$0xff] }
  0x70   :  { %2474 = vmatpush2.bf16.msra.mxu1 %v1644_v34  ;;  %2434 = vmatprep.subr.bf16.mxu0 %v1101_v35  ;;  %v302_v34 = vld [vmem:[#allocation3 + $0x710] sm:$0xff]  ;;  %v2348_v35 = vunpack.c.h.s8.bf16 %v812_v33 }
  0x71   :  { %2475 = vmatprep.subr.bf16.mxu1 %v1613_v36  ;;  %v1326_v36 = vunpack.c.h.s8.bf16 %v302_v34 }
  0x73   :  { %2435 = vmatpush2.bf16.msra.mxu0 %v1100_v41  ;;  %v781_v41 = vld [vmem:[#allocation3 + $0x1608] sm:$0xff] }
  0x74   :  { %2476 = vmatpush2.bf16.msra.mxu1 %v1612_v42  ;;  %2486 = vmatprep.subr.bf16.mxu0 %v2093_v43  ;;  %v271_v42 = vld [vmem:[#allocation3 + $0x618] sm:$0xff]  ;;  %v2316_v43 = vunpack.c.l.s8.bf16 %v812_v33  ;;  %v2285_v45 = vunpack.c.h.s8.bf16 %v781_v41  ;;  %v2253_v54 = vunpack.c.l.s8.bf16 %v781_v41 }
  0x75   :  { %2527 = vmatprep.subr.bf16.mxu1 %v1071_v44  ;;  %v1294_v44 = vunpack.c.l.s8.bf16 %v302_v34  ;;  %v1263_v46 = vunpack.c.h.s8.bf16 %v271_v42  ;;  %v1231_v31 = vunpack.c.l.s8.bf16 %v271_v42 }
  0x76   :  { %2437 = vmatmul.mubr.bf16.vlgmr.msra.gmra.mxu0 %v5519_v47 }
  0x77   :  { %2478 = vmatmul.mubr.bf16.vlgmr.msra.gmra.mxu1 %v5523_v48  ;;  %2487 = vmatpush1.bf16.msra.mxu0 %v2092_v50  ;;  %v780_v50 = vld [vmem:[#allocation3 + $0x1600] sm:$0xff] }
  0x78   :  { %2528 = vmatpush1.bf16.msra.mxu1 %v1070_v51  ;;  %2488 = vmatprep.subr.bf16.mxu0 %v2061_v52  ;;  %v270_v51 = vld [vmem:[#allocation3 + $0x610] sm:$0xff]  ;;  %v2284_v52 = vunpack.c.h.s8.bf16 %v780_v50 }
  0x79   :  { %2529 = vmatprep.subr.bf16.mxu1 %v1039_v53  ;;  %2518 = vmatprep.mubr.bf16.mxu0 %v5532_v55  ;;  %v1262_v53 = vunpack.c.h.s8.bf16 %v270_v51 }
  0x7a   :  { %2559 = vmatprep.mubr.bf16.mxu1 %v5509_v37 }
  0x7b   :  { %2489 = vmatpush1.bf16.msra.mxu0 %v2060_v32  ;;  %v749_v32 = vld [vmem:[#allocation3 + $0x1508] sm:$0xff] }
  0x7c   :  { %2530 = vmatpush1.bf16.msra.mxu1 %v1038_v56  ;;  %2490 = vmatprep.subr.bf16.mxu0 %v2029_v57  ;;  %v239_v56 = vld [vmem:[#allocation3 + $0x518] sm:$0xff]  ;;  %v2252_v57 = vunpack.c.l.s8.bf16 %v780_v50  ;;  %v2221_v59 = vunpack.c.h.s8.bf16 %v749_v32  ;;  %v2189_v1 = vunpack.c.l.s8.bf16 %v749_v32 }
  0x7d   :  { %2531 = vmatprep.subr.bf16.mxu1 %v1007_v58  ;;  %v1230_v58 = vunpack.c.l.s8.bf16 %v270_v51  ;;  %v1199_v60 = vunpack.c.h.s8.bf16 %v239_v56  ;;  %v1167_v2 = vunpack.c.l.s8.bf16 %v239_v56 }
  0x7f   :  { %2491 = vmatpush1.bf16.msra.mxu0 %v2028_v61  ;;  %v748_v61 = vld [vmem:[#allocation3 + $0x1500] sm:$0xff] }
  0x80   :  { %2532 = vmatpush1.bf16.msra.mxu1 %v1006_v62  ;;  %2492 = vmatprep.subr.bf16.mxu0 %v1997_v63  ;;  %v238_v62 = vld [vmem:[#allocation3 + $0x510] sm:$0xff]  ;;  %v2220_v63 = vunpack.c.h.s8.bf16 %v748_v61 }
  0x81   :  { %2533 = vmatprep.subr.bf16.mxu1 %v975_v0  ;;  %v1198_v0 = vunpack.c.h.s8.bf16 %v238_v62 }
  0x83   :  { %2493 = vmatpush1.bf16.msra.mxu0 %v1996_v3  ;;  %v717_v3 = vld [vmem:[#allocation3 + $0x1408] sm:$0xff] }
  0x84   :  { %2534 = vmatpush1.bf16.msra.mxu1 %v974_v4  ;;  %2494 = vmatprep.subr.bf16.mxu0 %v1965_v5  ;;  %v207_v4 = vld [vmem:[#allocation3 + $0x418] sm:$0xff]  ;;  %v2188_v5 = vunpack.c.l.s8.bf16 %v748_v61  ;;  %v2157_v7 = vunpack.c.h.s8.bf16 %v717_v3  ;;  %v2125_v13 = vunpack.c.l.s8.bf16 %v717_v3 }
  0x85   :  { %2535 = vmatprep.subr.bf16.mxu1 %v943_v6  ;;  %v1166_v6 = vunpack.c.l.s8.bf16 %v238_v62  ;;  %v1135_v8 = vunpack.c.h.s8.bf16 %v207_v4  ;;  %v1103_v14 = vunpack.c.l.s8.bf16 %v207_v4 }
  0x87   :  { %2495 = vmatpush1.bf16.msra.mxu0 %v1964_v9  ;;  %v716_v9 = vld [vmem:[#allocation3 + $0x1400] sm:$0xff] }
  0x88   :  { %2536 = vmatpush1.bf16.msra.mxu1 %v942_v10  ;;  %2496 = vmatprep.subr.bf16.mxu0 %v1933_v11  ;;  %v206_v10 = vld [vmem:[#allocation3 + $0x410] sm:$0xff]  ;;  %v2156_v11 = vunpack.c.h.s8.bf16 %v716_v9 }
  0x89   :  { %2537 = vmatprep.subr.bf16.mxu1 %v911_v12  ;;  %v1134_v12 = vunpack.c.h.s8.bf16 %v206_v10 }
  0x8b   :  { %2497 = vmatpush1.bf16.msra.mxu0 %v1932_v15  ;;  %v431_v15 = vld [vmem:[#allocation3 + $0xb18] sm:$0xff] }
  0x8c   :  { %2538 = vmatpush1.bf16.msra.mxu1 %v910_v16  ;;  %2498 = vmatprep.subr.bf16.mxu0 %v1901_v17  ;;  %v687_v16 = vld [vmem:[#allocation3 + $0x1318] sm:$0xff]  ;;  %v2124_v17 = vunpack.c.l.s8.bf16 %v716_v9  ;;  %v1583_v19 = vunpack.c.h.s8.bf16 %v431_v15  ;;  %v1551_v26 = vunpack.c.l.s8.bf16 %v431_v15 }
  0x8d   :  { %2539 = vmatprep.subr.bf16.mxu1 %v879_v18  ;;  %v1102_v18 = vunpack.c.l.s8.bf16 %v206_v10  ;;  %v2095_v20 = vunpack.c.h.s8.bf16 %v687_v16 }
  0x8f   :  { %2499 = vmatpush1.bf16.msra.mxu0 %v1900_v21  ;;  %v430_v21 = vld [vmem:[#allocation3 + $0xb10] sm:$0xff] }
  0x90   :  { %2540 = vmatpush1.bf16.msra.mxu1 %v878_v22  ;;  %2500 = vmatprep.subr.bf16.mxu0 %v1869_v23  ;;  %v686_v22 = vld [vmem:[#allocation3 + $0x1310] sm:$0xff]  ;;  %v5540_v23 = vcombine.low %v5528_v49, %v5528_v49 }
  0x91   :  { %2541 = vmatprep.subr.bf16.mxu1 %v847_v24  ;;  %v1582_v24 = vunpack.c.h.s8.bf16 %v430_v21  ;;  %v2094_v25 = vunpack.c.h.s8.bf16 %v686_v22  ;;  %v2062_v33 = vunpack.c.l.s8.bf16 %v686_v22 }
  0x93   :  { %2501 = vmatpush1.bf16.msra.mxu0 %v1868_v27  ;;  %v2063_v27 = vunpack.c.l.s8.bf16 %v687_v16 }
  0x94   :  { %2542 = vmatpush1.bf16.msra.mxu1 %v846_v28  ;;  %2502 = vmatprep.subr.bf16.mxu0 %v2349_v29  ;;  %v399_v28 = vld [vmem:[#allocation3 + $0xa18] sm:$0xff] }
  0x95   :  { %2543 = vmatprep.subr.bf16.mxu1 %v1327_v30  ;;  %v655_v29 = vld [vmem:[#allocation3 + $0x1218] sm:$0xff]  ;;  %v1550_v30 = vunpack.c.l.s8.bf16 %v430_v21  ;;  %v1519_v49 = vunpack.c.h.s8.bf16 %v399_v28  ;;  %v1487_v41 = vunpack.c.l.s8.bf16 %v399_v28 }
  0x96   :  { %v2031_v34 = vunpack.c.h.s8.bf16 %v655_v29  ;;  %v1999_v42 = vunpack.c.l.s8.bf16 %v655_v29 }
  0x97   :  { %2503 = vmatpush2.bf16.msra.mxu0 %v2348_v35  ;;  %v398_v35 = vld [vmem:[#allocation3 + $0xa10] sm:$0xff] }
  0x98   :  { %2544 = vmatpush2.bf16.msra.mxu1 %v1326_v36  ;;  %2504 = vmatprep.subr.bf16.mxu0 %v2317_v39  ;;  %v654_v36 = vld [vmem:[#allocation3 + $0x1210] sm:$0xff]  ;;  %v1518_v39 = vunpack.c.h.s8.bf16 %v398_v35 }
  0x99   :  { %2545 = vmatprep.subr.bf16.mxu1 %v1295_v40  ;;  %v2030_v40 = vunpack.c.h.s8.bf16 %v654_v36 }
  0x9b   :  { %2505 = vmatpush2.bf16.msra.mxu0 %v2316_v43  ;;  %v367_v43 = vld [vmem:[#allocation3 + $0x918] sm:$0xff] }
  0x9c   :  { %2546 = vmatpush2.bf16.msra.mxu1 %v1294_v44  ;;  %2506 = vmatprep.subr.bf16.mxu0 %v2285_v45  ;;  %v623_v44 = vld [vmem:[#allocation3 + $0x1118] sm:$0xff]  ;;  %v1486_v45 = vunpack.c.l.s8.bf16 %v398_v35  ;;  %v1455_v50 = vunpack.c.h.s8.bf16 %v367_v43  ;;  %v1423_v32 = vunpack.c.l.s8.bf16 %v367_v43 }
  0x9d   :  { %2547 = vmatprep.subr.bf16.mxu1 %v1263_v46  ;;  %v1998_v46 = vunpack.c.l.s8.bf16 %v654_v36  ;;  %v1967_v51 = vunpack.c.h.s8.bf16 %v623_v44  ;;  %v1935_v56 = vunpack.c.l.s8.bf16 %v623_v44 }
  0x9f   :  { %2507 = vmatpush2.bf16.msra.mxu0 %v2284_v52  ;;  %v366_v52 = vld [vmem:[#allocation3 + $0x910] sm:$0xff] }
  0xa0   :  { %2548 = vmatpush2.bf16.msra.mxu1 %v1262_v53  ;;  %2508 = vmatprep.subr.bf16.mxu0 %v2253_v54  ;;  %v622_v53 = vld [vmem:[#allocation3 + $0x1110] sm:$0xff]  ;;  %v1454_v54 = vunpack.c.h.s8.bf16 %v366_v52 }
  0xa1   :  { %2549 = vmatprep.subr.bf16.mxu1 %v1231_v31  ;;  %v1966_v31 = vunpack.c.h.s8.bf16 %v622_v53 }
  0xa3   :  { %2509 = vmatpush2.bf16.msra.mxu0 %v2252_v57  ;;  %v335_v57 = vld [vmem:[#allocation3 + $0x818] sm:$0xff] }
  0xa4   :  { %2550 = vmatpush2.bf16.msra.mxu1 %v1230_v58  ;;  %2510 = vmatprep.subr.bf16.mxu0 %v2221_v59  ;;  %v591_v58 = vld [vmem:[#allocation3 + $0x1018] sm:$0xff]  ;;  %v1422_v59 = vunpack.c.l.s8.bf16 %v366_v52  ;;  %v1391_v61 = vunpack.c.h.s8.bf16 %v335_v57  ;;  %v1359_v3 = vunpack.c.l.s8.bf16 %v335_v57 }
  0xa5   :  { %2551 = vmatprep.subr.bf16.mxu1 %v1199_v60  ;;  %v1934_v60 = vunpack.c.l.s8.bf16 %v622_v53  ;;  %v1903_v62 = vunpack.c.h.s8.bf16 %v591_v58  ;;  %v1871_v4 = vunpack.c.l.s8.bf16 %v591_v58 }
  0xa7   :  { %2511 = vmatpush2.bf16.msra.mxu0 %v2220_v63  ;;  %v334_v63 = vld [vmem:[#allocation3 + $0x810] sm:$0xff] }
  0xa8   :  { %2552 = vmatpush2.bf16.msra.mxu1 %v1198_v0  ;;  %2512 = vmatprep.subr.bf16.mxu0 %v2189_v1  ;;  %v590_v0 = vld [vmem:[#allocation3 + $0x1010] sm:$0xff]  ;;  %v1390_v1 = vunpack.c.h.s8.bf16 %v334_v63 }
  0xa9   :  { %2553 = vmatprep.subr.bf16.mxu1 %v1167_v2  ;;  %v1902_v2 = vunpack.c.h.s8.bf16 %v590_v0 }
  0xab   :  { %2513 = vmatpush2.bf16.msra.mxu0 %v2188_v5  ;;  %v559_v5 = vld [vmem:[#allocation3 + $0xf18] sm:$0xff] }
  0xac   :  { %2554 = vmatpush2.bf16.msra.mxu1 %v1166_v6  ;;  %2514 = vmatprep.subr.bf16.mxu0 %v2157_v7  ;;  %v815_v6 = vld [vmem:[#allocation3 + $0x1718] sm:$0xff]  ;;  %v1358_v7 = vunpack.c.l.s8.bf16 %v334_v63  ;;  %v1839_v9 = vunpack.c.h.s8.bf16 %v559_v5  ;;  %v1807_v15 = vunpack.c.l.s8.bf16 %v559_v5 }
  0xad   :  { %2555 = vmatprep.subr.bf16.mxu1 %v1135_v8  ;;  %v1870_v8 = vunpack.c.l.s8.bf16 %v590_v0  ;;  %v2351_v10 = vunpack.c.h.s8.bf16 %v815_v6  ;;  %v2319_v16 = vunpack.c.l.s8.bf16 %v815_v6 }
  0xaf   :  { %2515 = vmatpush2.bf16.msra.mxu0 %v2156_v11  ;;  %v558_v11 = vld [vmem:[#allocation3 + $0xf10] sm:$0xff] }
  0xb0   :  { %2556 = vmatpush2.bf16.msra.mxu1 %v1134_v12  ;;  %2516 = vmatprep.subr.bf16.mxu0 %v2125_v13  ;;  %v814_v12 = vld [vmem:[#allocation3 + $0x1710] sm:$0xff]  ;;  %v1838_v13 = vunpack.c.h.s8.bf16 %v558_v11 }
  0xb1   :  { %2557 = vmatprep.subr.bf16.mxu1 %v1103_v14  ;;  %v2350_v14 = vunpack.c.h.s8.bf16 %v814_v12 }
  0xb3   :  { %2517 = vmatpush2.bf16.msra.mxu0 %v2124_v17  ;;  %v527_v17 = vld [vmem:[#allocation3 + $0xe18] sm:$0xff] }
  0xb4   :  { %2558 = vmatpush2.bf16.msra.mxu1 %v1102_v18  ;;  %2568 = vmatprep.subr.bf16.mxu0 %v1583_v19  ;;  %v783_v18 = vld [vmem:[#allocation3 + $0x1618] sm:$0xff]  ;;  %v1806_v19 = vunpack.c.l.s8.bf16 %v558_v11  ;;  %v1775_v21 = vunpack.c.h.s8.bf16 %v527_v17  ;;  %v1743_v28 = vunpack.c.l.s8.bf16 %v527_v17 }
  0xb5   :  { %2609 = vmatprep.subr.bf16.mxu1 %v2095_v20  ;;  %v2318_v20 = vunpack.c.l.s8.bf16 %v814_v12  ;;  %v2287_v22 = vunpack.c.h.s8.bf16 %v783_v18  ;;  %v2255_v29 = vunpack.c.l.s8.bf16 %v783_v18 }
  0xb6   :  { %2519 = vmatmul.mubr.bf16.vlgmr.msra.gmra.mxu0 %v5540_v23 }
  0xb7   :  { %2560 = vmatmul.mubr.bf16.vlgmr.msra.gmra.mxu1 %v5519_v47  ;;  %2569 = vmatpush1.bf16.msra.mxu0 %v1582_v24  ;;  %v526_v24 = vld [vmem:[#allocation3 + $0xe10] sm:$0xff] }
  0xb8   :  { %2610 = vmatpush1.bf16.msra.mxu1 %v2094_v25  ;;  %2570 = vmatprep.subr.bf16.mxu0 %v1551_v26  ;;  %v782_v25 = vld [vmem:[#allocation3 + $0x1610] sm:$0xff]  ;;  %v1774_v26 = vunpack.c.h.s8.bf16 %v526_v24 }
  0xb9   :  { %2611 = vmatprep.subr.bf16.mxu1 %v2063_v27  ;;  %2600 = vmatprep.mubr.bf16.mxu0 %v5513_v38  ;;  %v2286_v27 = vunpack.c.h.s8.bf16 %v782_v25 }
  0xba   :  { %2641 = vmatprep.mubr.bf16.mxu1 %v5532_v55 }
  0xbb   :  { %2571 = vmatpush1.bf16.msra.mxu0 %v1550_v30  ;;  %v495_v30 = vld [vmem:[#allocation3 + $0xd18] sm:$0xff] }
  0xbc   :  { %2612 = vmatpush1.bf16.msra.mxu1 %v2062_v33  ;;  %2572 = vmatprep.subr.bf16.mxu0 %v1519_v49  ;;  %v751_v33 = vld [vmem:[#allocation3 + $0x1518] sm:$0xff]  ;;  %v1742_v49 = vunpack.c.l.s8.bf16 %v526_v24  ;;  %v1711_v35 = vunpack.c.h.s8.bf16 %v495_v30  ;;  %v1679_v43 = vunpack.c.l.s8.bf16 %v495_v30 }
  0xbd   :  { %2613 = vmatprep.subr.bf16.mxu1 %v2031_v34  ;;  %v2254_v34 = vunpack.c.l.s8.bf16 %v782_v25  ;;  %v2223_v36 = vunpack.c.h.s8.bf16 %v751_v33  ;;  %v2191_v44 = vunpack.c.l.s8.bf16 %v751_v33 }
  0xbf   :  { %2573 = vmatpush1.bf16.msra.mxu0 %v1518_v39  ;;  %v494_v39 = vld [vmem:[#allocation3 + $0xd10] sm:$0xff] }
  0xc0   :  { %2614 = vmatpush1.bf16.msra.mxu1 %v2030_v40  ;;  %2574 = vmatprep.subr.bf16.mxu0 %v1487_v41  ;;  %v750_v40 = vld [vmem:[#allocation3 + $0x1510] sm:$0xff]  ;;  %v1710_v41 = vunpack.c.h.s8.bf16 %v494_v39 }
  0xc1   :  { %2615 = vmatprep.subr.bf16.mxu1 %v1999_v42  ;;  %v2222_v42 = vunpack.c.h.s8.bf16 %v750_v40 }
  0xc3   :  { %2575 = vmatpush1.bf16.msra.mxu0 %v1486_v45  ;;  %v463_v45 = vld [vmem:[#allocation3 + $0xc18] sm:$0xff] }
  0xc4   :  { %2616 = vmatpush1.bf16.msra.mxu1 %v1998_v46  ;;  %2576 = vmatprep.subr.bf16.mxu0 %v1455_v50  ;;  %v719_v46 = vld [vmem:[#allocation3 + $0x1418] sm:$0xff]  ;;  %v1678_v50 = vunpack.c.l.s8.bf16 %v494_v39  ;;  %v1647_v52 = vunpack.c.h.s8.bf16 %v463_v45  ;;  %v1615_v57 = vunpack.c.l.s8.bf16 %v463_v45 }
  0xc5   :  { %2617 = vmatprep.subr.bf16.mxu1 %v1967_v51  ;;  %v2190_v51 = vunpack.c.l.s8.bf16 %v750_v40  ;;  %v2159_v53 = vunpack.c.h.s8.bf16 %v719_v46  ;;  %v2127_v58 = vunpack.c.l.s8.bf16 %v719_v46 }
  0xc7   :  { %2577 = vmatpush1.bf16.msra.mxu0 %v1454_v54  ;;  %v462_v54 = vld [vmem:[#allocation3 + $0xc10] sm:$0xff] }
  0xc8   :  { %2618 = vmatpush1.bf16.msra.mxu1 %v1966_v31  ;;  %2578 = vmatprep.subr.bf16.mxu0 %v1423_v32  ;;  %v718_v31 = vld [vmem:[#allocation3 + $0x1410] sm:$0xff]  ;;  %v1646_v32 = vunpack.c.h.s8.bf16 %v462_v54 }
  0xc9   :  { %2619 = vmatprep.subr.bf16.mxu1 %v1935_v56  ;;  %v2158_v56 = vunpack.c.h.s8.bf16 %v718_v31 }
  0xcb   :  { %2579 = vmatpush1.bf16.msra.mxu0 %v1422_v59  ;;  %v177_v59 = vld [vmem:[#allocation3 + $0x328] sm:$0xff] }
  0xcc   :  { %2620 = vmatpush1.bf16.msra.mxu1 %v1934_v60  ;;  %2580 = vmatprep.subr.bf16.mxu0 %v1391_v61  ;;  %v433_v60 = vld [vmem:[#allocation3 + $0xb28] sm:$0xff]  ;;  %v1614_v61 = vunpack.c.l.s8.bf16 %v462_v54  ;;  %v1073_v63 = vunpack.c.h.s8.bf16 %v177_v59  ;;  %v1041_v5 = vunpack.c.l.s8.bf16 %v177_v59 }
  0xcd   :  { %2621 = vmatprep.subr.bf16.mxu1 %v1903_v62  ;;  %v2126_v62 = vunpack.c.l.s8.bf16 %v718_v31  ;;  %v1585_v0 = vunpack.c.h.s8.bf16 %v433_v60  ;;  %v1553_v6 = vunpack.c.l.s8.bf16 %v433_v60 }
  0xcf   :  { %2581 = vmatpush1.bf16.msra.mxu0 %v1390_v1  ;;  %v176_v1 = vld [vmem:[#allocation3 + $0x320] sm:$0xff] }
  0xd0   :  { %2622 = vmatpush1.bf16.msra.mxu1 %v1902_v2  ;;  %2582 = vmatprep.subr.bf16.mxu0 %v1359_v3  ;;  %v432_v2 = vld [vmem:[#allocation3 + $0xb20] sm:$0xff]  ;;  %v1072_v3 = vunpack.c.h.s8.bf16 %v176_v1 }
  0xd1   :  { %2623 = vmatprep.subr.bf16.mxu1 %v1871_v4  ;;  %v1584_v4 = vunpack.c.h.s8.bf16 %v432_v2 }
  0xd3   :  { %2583 = vmatpush1.bf16.msra.mxu0 %v1358_v7  ;;  %v145_v7 = vld [vmem:[#allocation3 + $0x228] sm:$0xff] }
  0xd4   :  { %2624 = vmatpush1.bf16.msra.mxu1 %v1870_v8  ;;  %2584 = vmatprep.subr.bf16.mxu0 %v1839_v9  ;;  %v401_v8 = vld [vmem:[#allocation3 + $0xa28] sm:$0xff]  ;;  %v1040_v9 = vunpack.c.l.s8.bf16 %v176_v1  ;;  %v1009_v11 = vunpack.c.h.s8.bf16 %v145_v7  ;;  %v977_v17 = vunpack.c.l.s8.bf16 %v145_v7 }
  0xd5   :  { %2625 = vmatprep.subr.bf16.mxu1 %v2351_v10  ;;  %v1552_v10 = vunpack.c.l.s8.bf16 %v432_v2  ;;  %v1521_v12 = vunpack.c.h.s8.bf16 %v401_v8  ;;  %v1489_v18 = vunpack.c.l.s8.bf16 %v401_v8 }
  0xd7   :  { %2585 = vmatpush2.bf16.msra.mxu0 %v1838_v13  ;;  %v144_v13 = vld [vmem:[#allocation3 + $0x220] sm:$0xff] }
  0xd8   :  { %2626 = vmatpush2.bf16.msra.mxu1 %v2350_v14  ;;  %2586 = vmatprep.subr.bf16.mxu0 %v1807_v15  ;;  %v400_v14 = vld [vmem:[#allocation3 + $0xa20] sm:$0xff]  ;;  %v1008_v15 = vunpack.c.h.s8.bf16 %v144_v13 }
  0xd9   :  { %2627 = vmatprep.subr.bf16.mxu1 %v2319_v16  ;;  %v1520_v16 = vunpack.c.h.s8.bf16 %v400_v14 }
  0xdb   :  { %2587 = vmatpush2.bf16.msra.mxu0 %v1806_v19  ;;  %v113_v19 = vld [vmem:[#allocation3 + $0x128] sm:$0xff] }
  0xdc   :  { %2628 = vmatpush2.bf16.msra.mxu1 %v2318_v20  ;;  %2588 = vmatprep.subr.bf16.mxu0 %v1775_v21  ;;  %v369_v20 = vld [vmem:[#allocation3 + $0x928] sm:$0xff]  ;;  %v976_v21 = vunpack.c.l.s8.bf16 %v144_v13  ;;  %v945_v24 = vunpack.c.h.s8.bf16 %v113_v19  ;;  %v913_v30 = vunpack.c.l.s8.bf16 %v113_v19 }
  0xdd   :  { %2629 = vmatprep.subr.bf16.mxu1 %v2287_v22  ;;  %v1488_v22 = vunpack.c.l.s8.bf16 %v400_v14  ;;  %v1457_v25 = vunpack.c.h.s8.bf16 %v369_v20  ;;  %v1425_v33 = vunpack.c.l.s8.bf16 %v369_v20 }
  0xdf   :  { %2589 = vmatpush2.bf16.msra.mxu0 %v1774_v26  ;;  %v112_v26 = vld [vmem:[#allocation3 + $0x120] sm:$0xff] }
  0xe0   :  { %2630 = vmatpush2.bf16.msra.mxu1 %v2286_v27  ;;  %2590 = vmatprep.subr.bf16.mxu0 %v1743_v28  ;;  %v368_v27 = vld [vmem:[#allocation3 + $0x920] sm:$0xff]  ;;  %v944_v28 = vunpack.c.h.s8.bf16 %v112_v26 }
  0xe1   :  { %2631 = vmatprep.subr.bf16.mxu1 %v2255_v29  ;;  %v1456_v29 = vunpack.c.h.s8.bf16 %v368_v27 }
  0xe3   :  { %2591 = vmatpush2.bf16.msra.mxu0 %v1742_v49  ;;  %v81_v49 = vld [vmem:[#allocation3 + $0x28] sm:$0xff] }
  0xe4   :  { %2632 = vmatpush2.bf16.msra.mxu1 %v2254_v34  ;;  %2592 = vmatprep.subr.bf16.mxu0 %v1711_v35  ;;  %v337_v34 = vld [vmem:[#allocation3 + $0x828] sm:$0xff]  ;;  %v912_v35 = vunpack.c.l.s8.bf16 %v112_v26  ;;  %v881_v39 = vunpack.c.h.s8.bf16 %v81_v49  ;;  %v849_v45 = vunpack.c.l.s8.bf16 %v81_v49 }
  0xe5   :  { %2633 = vmatprep.subr.bf16.mxu1 %v2223_v36  ;;  %v1424_v36 = vunpack.c.l.s8.bf16 %v368_v27  ;;  %v1393_v40 = vunpack.c.h.s8.bf16 %v337_v34  ;;  %v1361_v46 = vunpack.c.l.s8.bf16 %v337_v34 }
  0xe7   :  { %2593 = vmatpush2.bf16.msra.mxu0 %v1710_v41  ;;  %v80_v41 = vld [vmem:[#allocation3 + $0x20] sm:$0xff] }
  0xe8   :  { %2634 = vmatpush2.bf16.msra.mxu1 %v2222_v42  ;;  %2594 = vmatprep.subr.bf16.mxu0 %v1679_v43  ;;  %v336_v42 = vld [vmem:[#allocation3 + $0x820] sm:$0xff]  ;;  %v880_v43 = vunpack.c.h.s8.bf16 %v80_v41 }
  0xe9   :  { %2635 = vmatprep.subr.bf16.mxu1 %v2191_v44  ;;  %v1392_v44 = vunpack.c.h.s8.bf16 %v336_v42 }
  0xeb   :  { %2595 = vmatpush2.bf16.msra.mxu0 %v1678_v50  ;;  %v305_v50 = vld [vmem:[#allocation3 + $0x728] sm:$0xff] }
  0xec   :  { %2636 = vmatpush2.bf16.msra.mxu1 %v2190_v51  ;;  %2596 = vmatprep.subr.bf16.mxu0 %v1647_v52  ;;  %v561_v51 = vld [vmem:[#allocation3 + $0xf28] sm:$0xff]  ;;  %v848_v52 = vunpack.c.l.s8.bf16 %v80_v41  ;;  %v1329_v54 = vunpack.c.h.s8.bf16 %v305_v50  ;;  %v1297_v59 = vunpack.c.l.s8.bf16 %v305_v50 }
  0xed   :  { %2637 = vmatprep.subr.bf16.mxu1 %v2159_v53  ;;  %v1360_v53 = vunpack.c.l.s8.bf16 %v336_v42  ;;  %v1841_v31 = vunpack.c.h.s8.bf16 %v561_v51  ;;  %v1809_v60 = vunpack.c.l.s8.bf16 %v561_v51 }
  0xef   :  { %2597 = vmatpush2.bf16.msra.mxu0 %v1646_v32  ;;  %v304_v32 = vld [vmem:[#allocation3 + $0x720] sm:$0xff] }
  0xf0   :  { %2638 = vmatpush2.bf16.msra.mxu1 %v2158_v56  ;;  %2598 = vmatprep.subr.bf16.mxu0 %v1615_v57  ;;  %v560_v56 = vld [vmem:[#allocation3 + $0xf20] sm:$0xff]  ;;  %v1328_v57 = vunpack.c.h.s8.bf16 %v304_v32 }
  0xf1   :  { %2639 = vmatprep.subr.bf16.mxu1 %v2127_v58  ;;  %v1840_v58 = vunpack.c.h.s8.bf16 %v560_v56 }
  0xf3   :  { %2599 = vmatpush2.bf16.msra.mxu0 %v1614_v61  ;;  %v273_v61 = vld [vmem:[#allocation3 + $0x628] sm:$0xff] }
  0xf4   :  { %2640 = vmatpush2.bf16.msra.mxu1 %v2126_v62  ;;  %2650 = vmatprep.subr.bf16.mxu0 %v1073_v63  ;;  %v529_v62 = vld [vmem:[#allocation3 + $0xe28] sm:$0xff]  ;;  %v1296_v63 = vunpack.c.l.s8.bf16 %v304_v32  ;;  %v1265_v1 = vunpack.c.h.s8.bf16 %v273_v61  ;;  %v1233_v7 = vunpack.c.l.s8.bf16 %v273_v61 }
  0xf5   :  { %2691 = vmatprep.subr.bf16.mxu1 %v1585_v0  ;;  %v1808_v0 = vunpack.c.l.s8.bf16 %v560_v56  ;;  %v1777_v2 = vunpack.c.h.s8.bf16 %v529_v62  ;;  %v1745_v8 = vunpack.c.l.s8.bf16 %v529_v62  ;;  %v656_v62 = vld [vmem:[#allocation3 + $0x1220] sm:$0xff] }
  0xf6   :  { %2601 = vmatmul.mubr.bf16.vlgmr.msra.gmra.mxu0 %v5523_v48 }
  0xf7   :  { %2642 = vmatmul.mubr.bf16.vlgmr.msra.gmra.mxu1 %v5540_v23  ;;  %2651 = vmatpush1.bf16.msra.mxu0 %v1072_v3  ;;  %v272_v3 = vld [vmem:[#allocation3 + $0x620] sm:$0xff] }
  0xf8   :  { %2692 = vmatpush1.bf16.msra.mxu1 %v1584_v4  ;;  %2652 = vmatprep.subr.bf16.mxu0 %v1041_v5  ;;  %v528_v4 = vld [vmem:[#allocation3 + $0xe20] sm:$0xff]  ;;  %v1264_v5 = vunpack.c.h.s8.bf16 %v272_v3 }
  0xf9   :  { %2693 = vmatprep.subr.bf16.mxu1 %v1553_v6  ;;  %2682 = vmatprep.mubr.bf16.mxu0 %v5509_v37  ;;  %v1776_v6 = vunpack.c.h.s8.bf16 %v528_v4 }
  0xfa   :  { %2723 = vmatprep.mubr.bf16.mxu1 %v5513_v38 }
  0xfb   :  { %2653 = vmatpush1.bf16.msra.mxu0 %v1040_v9  ;;  %v241_v9 = vld [vmem:[#allocation3 + $0x528] sm:$0xff] }
  0xfc   :  { %2694 = vmatpush1.bf16.msra.mxu1 %v1552_v10  ;;  %2654 = vmatprep.subr.bf16.mxu0 %v1009_v11  ;;  %v497_v10 = vld [vmem:[#allocation3 + $0xd28] sm:$0xff]  ;;  %v1232_v11 = vunpack.c.l.s8.bf16 %v272_v3  ;;  %v1201_v13 = vunpack.c.h.s8.bf16 %v241_v9  ;;  %v1169_v19 = vunpack.c.l.s8.bf16 %v241_v9  ;;  %v2032_v3 = vunpack.c.h.s8.bf16 %v656_v62 }
  0xfd   :  { %2695 = vmatprep.subr.bf16.mxu1 %v1521_v12  ;;  %v1744_v12 = vunpack.c.l.s8.bf16 %v528_v4  ;;  %v1713_v14 = vunpack.c.h.s8.bf16 %v497_v10  ;;  %v1681_v20 = vunpack.c.l.s8.bf16 %v497_v10  ;;  %v625_v9 = vld [vmem:[#allocation3 + $0x1128] sm:$0xff]  ;;  %v115_v10 = vld [vmem:[#allocation3 + $0x138] sm:$0xff] }
  0xff   :  { %2655 = vmatpush1.bf16.msra.mxu0 %v1008_v15  ;;  %v240_v15 = vld [vmem:[#allocation3 + $0x520] sm:$0xff] }
 0x100   :  { %2696 = vmatpush1.bf16.msra.mxu1 %v1520_v16  ;;  %2656 = vmatprep.subr.bf16.mxu0 %v977_v17  ;;  %v496_v16 = vld [vmem:[#allocation3 + $0xd20] sm:$0xff]  ;;  %v1200_v17 = vunpack.c.h.s8.bf16 %v240_v15 }
 0x101   :  { %2697 = vmatprep.subr.bf16.mxu1 %v1489_v18  ;;  %v1712_v18 = vunpack.c.h.s8.bf16 %v496_v16 }
 0x103   :  { %2657 = vmatpush1.bf16.msra.mxu0 %v976_v21  ;;  %v209_v21 = vld [vmem:[#allocation3 + $0x428] sm:$0xff] }
 0x104   :  { %2698 = vmatpush1.bf16.msra.mxu1 %v1488_v22  ;;  %2658 = vmatprep.subr.bf16.mxu0 %v945_v24  ;;  %v465_v22 = vld [vmem:[#allocation3 + $0xc28] sm:$0xff]  ;;  %v1168_v24 = vunpack.c.l.s8.bf16 %v240_v15  ;;  %v1137_v26 = vunpack.c.h.s8.bf16 %v209_v21  ;;  %v1105_v49 = vunpack.c.l.s8.bf16 %v209_v21  ;;  %v624_v15 = vld [vmem:[#allocation3 + $0x1120] sm:$0xff] }
 0x105   :  { %2699 = vmatprep.subr.bf16.mxu1 %v1457_v25  ;;  %v1680_v25 = vunpack.c.l.s8.bf16 %v496_v16  ;;  %v1649_v27 = vunpack.c.h.s8.bf16 %v465_v22  ;;  %v1617_v34 = vunpack.c.l.s8.bf16 %v465_v22  ;;  %v114_v16 = vld [vmem:[#allocation3 + $0x130] sm:$0xff]  ;;  %v593_v21 = vld [vmem:[#allocation3 + $0x1028] sm:$0xff]  ;;  %v83_v22 = vld [vmem:[#allocation3 + $0x38] sm:$0xff] }
 0x107   :  { %2659 = vmatpush1.bf16.msra.mxu0 %v944_v28  ;;  %v208_v28 = vld [vmem:[#allocation3 + $0x420] sm:$0xff] }
 0x108   :  { %2700 = vmatpush1.bf16.msra.mxu1 %v1456_v29  ;;  %2660 = vmatprep.subr.bf16.mxu0 %v913_v30  ;;  %v464_v29 = vld [vmem:[#allocation3 + $0xc20] sm:$0xff]  ;;  %v1136_v30 = vunpack.c.h.s8.bf16 %v208_v28 }
 0x109   :  { %2701 = vmatprep.subr.bf16.mxu1 %v1425_v33  ;;  %v1648_v33 = vunpack.c.h.s8.bf16 %v464_v29 }
 0x10b   :  { %2661 = vmatpush1.bf16.msra.mxu0 %v912_v35  ;;  %v689_v35 = vld [vmem:[#allocation3 + $0x1328] sm:$0xff] }
 0x10c   :  { %2702 = vmatpush1.bf16.msra.mxu1 %v1424_v36  ;;  %2662 = vmatprep.subr.bf16.mxu0 %v881_v39  ;;  %v179_v36 = vld [vmem:[#allocation3 + $0x338] sm:$0xff]  ;;  %v1104_v39 = vunpack.c.l.s8.bf16 %v208_v28  ;;  %v2097_v41 = vunpack.c.h.s8.bf16 %v689_v35  ;;  %v2065_v50 = vunpack.c.l.s8.bf16 %v689_v35  ;;  %v592_v28 = vld [vmem:[#allocation3 + $0x1020] sm:$0xff]  ;;  %v817_v35 = vld [vmem:[#allocation3 + $0x1728] sm:$0xff] }
 0x10d   :  { %2703 = vmatprep.subr.bf16.mxu1 %v1393_v40  ;;  %v1616_v40 = vunpack.c.l.s8.bf16 %v464_v29  ;;  %v1075_v42 = vunpack.c.h.s8.bf16 %v179_v36  ;;  %v1043_v51 = vunpack.c.l.s8.bf16 %v179_v36  ;;  %v82_v29 = vld [vmem:[#allocation3 + $0x30] sm:$0xff]  ;;  %v307_v36 = vld [vmem:[#allocation3 + $0x738] sm:$0xff] }
 0x10f   :  { %2663 = vmatpush1.bf16.msra.mxu0 %v880_v43  ;;  %v688_v43 = vld [vmem:[#allocation3 + $0x1320] sm:$0xff] }
 0x110   :  { %2704 = vmatpush1.bf16.msra.mxu1 %v1392_v44  ;;  %2664 = vmatprep.subr.bf16.mxu0 %v849_v45  ;;  %v178_v44 = vld [vmem:[#allocation3 + $0x330] sm:$0xff]  ;;  %v2096_v45 = vunpack.c.h.s8.bf16 %v688_v43  ;;  %v2064_v56 = vunpack.c.l.s8.bf16 %v688_v43  ;;  %v816_v43 = vld [vmem:[#allocation3 + $0x1720] sm:$0xff] }
 0x111   :  { %2705 = vmatprep.subr.bf16.mxu1 %v1361_v46  ;;  %v1074_v46 = vunpack.c.h.s8.bf16 %v178_v44 }
 0x113   :  { %2665 = vmatpush1.bf16.msra.mxu0 %v848_v52  ;;  %v657_v52 = vld [vmem:[#allocation3 + $0x1228] sm:$0xff] }
 0x114   :  { %2706 = vmatpush1.bf16.msra.mxu1 %v1360_v53  ;;  %2666 = vmatprep.subr.bf16.mxu0 %v1329_v54  ;;  %v147_v53 = vld [vmem:[#allocation3 + $0x238] sm:$0xff] }
 0x115   :  { %2707 = vmatprep.subr.bf16.mxu1 %v1841_v31  ;;  %v1011_v61 = vunpack.c.h.s8.bf16 %v147_v53 }
 0x117   :  { %2667 = vmatpush2.bf16.msra.mxu0 %v1328_v57  ;;  %v1042_v57 = vunpack.c.l.s8.bf16 %v178_v44  ;;  %v306_v44 = vld [vmem:[#allocation3 + $0x730] sm:$0xff] }
 0x118   :  { %2708 = vmatpush2.bf16.msra.mxu1 %v1840_v58  ;;  %2668 = vmatprep.subr.bf16.mxu0 %v1297_v59 }
 0x119   :  { %2709 = vmatprep.subr.bf16.mxu1 %v1809_v60  ;;  %v2033_v60 = vunpack.c.h.s8.bf16 %v657_v52 }
 0x11b   :  { %2669 = vmatpush2.bf16.msra.mxu0 %v1296_v63  ;;  %v146_v63 = vld [vmem:[#allocation3 + $0x230] sm:$0xff] }
 0x11c   :  { %2710 = vmatpush2.bf16.msra.mxu1 %v1808_v0  ;;  %2670 = vmatprep.subr.bf16.mxu0 %v1265_v1  ;;  %v1010_v4 = vunpack.c.h.s8.bf16 %v146_v63 }
 0x11d   :  { %2711 = vmatprep.subr.bf16.mxu1 %v1777_v2 }
 0x11f   :  { %2671 = vmatpush2.bf16.msra.mxu0 %v1264_v5 }
 0x120   :  { %2712 = vmatpush2.bf16.msra.mxu1 %v1776_v6  ;;  %2672 = vmatprep.subr.bf16.mxu0 %v1233_v7  ;;  %v2001_v7 = vunpack.c.l.s8.bf16 %v657_v52  ;;  %v785_v52 = vld [vmem:[#allocation3 + $0x1628] sm:$0xff] }
 0x121   :  { %2713 = vmatprep.subr.bf16.mxu1 %v1745_v8  ;;  %v979_v8 = vunpack.c.l.s8.bf16 %v147_v53  ;;  %v275_v53 = vld [vmem:[#allocation3 + $0x638] sm:$0xff] }
 0x123   :  { %2673 = vmatpush2.bf16.msra.mxu0 %v1232_v11  ;;  %v2000_v11 = vunpack.c.l.s8.bf16 %v656_v62  ;;  %v2257_v62 = vunpack.c.l.s8.bf16 %v785_v52 }
 0x124   :  { %2714 = vmatpush2.bf16.msra.mxu1 %v1744_v12  ;;  %2674 = vmatprep.subr.bf16.mxu0 %v1201_v13  ;;  %v978_v12 = vunpack.c.l.s8.bf16 %v146_v63  ;;  %v1969_v13 = vunpack.c.h.s8.bf16 %v625_v9  ;;  %v1235_v63 = vunpack.c.l.s8.bf16 %v275_v53 }
 0x125   :  { %2715 = vmatprep.subr.bf16.mxu1 %v1713_v14  ;;  %v947_v14 = vunpack.c.h.s8.bf16 %v115_v10 }
 0x127   :  { %2675 = vmatpush2.bf16.msra.mxu0 %v1200_v17  ;;  %v1968_v17 = vunpack.c.h.s8.bf16 %v624_v15 }
 0x128   :  { %2716 = vmatpush2.bf16.msra.mxu1 %v1712_v18  ;;  %2676 = vmatprep.subr.bf16.mxu0 %v1169_v19  ;;  %v946_v18 = vunpack.c.h.s8.bf16 %v114_v16  ;;  %v1937_v19 = vunpack.c.l.s8.bf16 %v625_v9 }
 0x129   :  { %2717 = vmatprep.subr.bf16.mxu1 %v1681_v20  ;;  %v915_v20 = vunpack.c.l.s8.bf16 %v115_v10 }
 0x12b   :  { %2677 = vmatpush2.bf16.msra.mxu0 %v1168_v24  ;;  %v1936_v24 = vunpack.c.l.s8.bf16 %v624_v15 }
 0x12c   :  { %2718 = vmatpush2.bf16.msra.mxu1 %v1680_v25  ;;  %2678 = vmatprep.subr.bf16.mxu0 %v1137_v26  ;;  %v914_v25 = vunpack.c.l.s8.bf16 %v114_v16  ;;  %v1905_v26 = vunpack.c.h.s8.bf16 %v593_v21 }
 0x12d   :  { %2719 = vmatprep.subr.bf16.mxu1 %v1649_v27  ;;  %v883_v27 = vunpack.c.h.s8.bf16 %v83_v22 }
 0x12f   :  { %2679 = vmatpush2.bf16.msra.mxu0 %v1136_v30  ;;  %v1904_v30 = vunpack.c.h.s8.bf16 %v592_v28 }
 0x130   :  { %2720 = vmatpush2.bf16.msra.mxu1 %v1648_v33  ;;  %2680 = vmatprep.subr.bf16.mxu0 %v1105_v49  ;;  %v882_v33 = vunpack.c.h.s8.bf16 %v82_v29  ;;  %v1873_v49 = vunpack.c.l.s8.bf16 %v593_v21 }
 0x131   :  { %2721 = vmatprep.subr.bf16.mxu1 %v1617_v34  ;;  %v851_v34 = vunpack.c.l.s8.bf16 %v83_v22 }
 0x133   :  { %2681 = vmatpush2.bf16.msra.mxu0 %v1104_v39  ;;  %v1872_v39 = vunpack.c.l.s8.bf16 %v592_v28 }
 0x134   :  { %2722 = vmatpush2.bf16.msra.mxu1 %v1616_v40  ;;  %2732 = vmatprep.subr.bf16.mxu0 %v2097_v41  ;;  %v850_v40 = vunpack.c.l.s8.bf16 %v82_v29  ;;  %v2353_v41 = vunpack.c.h.s8.bf16 %v817_v35 }
 0x135   :  { %2773 = vmatprep.subr.bf16.mxu1 %v1075_v42  ;;  %v1331_v42 = vunpack.c.h.s8.bf16 %v307_v36 }
 0x136   :  { %v2438_v54 = vpop.f32.mrf.mxu0  ;;  %2683 = vmatmul.mubr.bf16.vlgmr.msra.gmra.mxu0 %v5519_v47 }
 0x137   :  { %v2479_v31 = vpop.f32.mrf.mxu1  ;;  %2724 = vmatmul.mubr.bf16.vlgmr.msra.gmra.mxu1 %v5523_v48  ;;  %2733 = vmatpush1.bf16.msra.mxu0 %v2096_v45  ;;  %v2352_v45 = vunpack.c.h.s8.bf16 %v816_v43 }
 0x138   :  { %v5552_v32 = vadd.f32 %v2479_v31, %v2438_v54  ;;  %2774 = vmatpush1.bf16.msra.mxu1 %v1074_v46  ;;  %v2440_v58 = vpop.f32.mrf.mxu0  ;;  %2734 = vmatprep.subr.bf16.mxu0 %v2065_v50  ;;  %v1330_v46 = vunpack.c.h.s8.bf16 %v306_v44  ;;  %v2321_v50 = vunpack.c.l.s8.bf16 %v817_v35  ;;  %v2320_v54 = vunpack.c.l.s8.bf16 %v816_v43 }
 0x139   :  { %v2481_v59 = vpop.f32.mrf.mxu1  ;;  %2775 = vmatprep.subr.bf16.mxu1 %v1043_v51  ;;  %2764 = vmatprep.mubr.bf16.mxu0 %v5532_v55  ;;  %v1299_v51 = vunpack.c.l.s8.bf16 %v307_v36  ;;  %v1298_v31 = vunpack.c.l.s8.bf16 %v306_v44 }
 0x13a   :  { %v5554_v0 = vadd.f32 %v2481_v59, %v2440_v58  ;;  %2805 = vmatprep.mubr.bf16.mxu1 %v5509_v37  ;;  %v2442_v1 = vpop.f32.mrf.mxu0  ;;  %v784_v58 = vld [vmem:[#allocation3 + $0x1620] sm:$0xff]  ;;  %v274_v59 = vld [vmem:[#allocation3 + $0x630] sm:$0xff] }
 0x13b   :  { %v2483_v2 = vpop.f32.mrf.mxu1  ;;  %2735 = vmatpush1.bf16.msra.mxu0 %v2064_v56  ;;  %v2289_v56 = vunpack.c.h.s8.bf16 %v785_v52  ;;  %v753_v1 = vld [vmem:[#allocation3 + $0x1528] sm:$0xff] }
 0x13c   :  { %2776 = vmatpush1.bf16.msra.mxu1 %v1042_v57  ;;  %v2443_v5 = vpop.f32.mrf.mxu0  ;;  %2736 = vmatprep.subr.bf16.mxu0 %v2033_v60  ;;  %v1267_v57 = vunpack.c.h.s8.bf16 %v275_v53  ;;  %v2288_v60 = vunpack.c.h.s8.bf16 %v784_v58  ;;  %v243_v2 = vld [vmem:[#allocation3 + $0x538] sm:$0xff] }
 0x13d   :  { %v2484_v6 = vpop.f32.mrf.mxu1  ;;  %2777 = vmatprep.subr.bf16.mxu1 %v1011_v61  ;;  %v1266_v61 = vunpack.c.h.s8.bf16 %v274_v59  ;;  %v2225_v5 = vunpack.c.h.s8.bf16 %v753_v1 }
 0x13e   :  { %v1203_v6 = vunpack.c.h.s8.bf16 %v243_v2 }
 0x13f   :  { %2737 = vmatpush1.bf16.msra.mxu0 %v2032_v3  ;;  %v2256_v3 = vunpack.c.l.s8.bf16 %v784_v58 }
 0x140   :  { %2778 = vmatpush1.bf16.msra.mxu1 %v1010_v4  ;;  %2738 = vmatprep.subr.bf16.mxu0 %v2001_v7  ;;  %v1234_v4 = vunpack.c.l.s8.bf16 %v274_v59  ;;  %v752_v7 = vld [vmem:[#allocation3 + $0x1520] sm:$0xff] }
 0x141   :  { %2779 = vmatprep.subr.bf16.mxu1 %v979_v8  ;;  %v242_v8 = vld [vmem:[#allocation3 + $0x530] sm:$0xff]  ;;  %v2224_v9 = vunpack.c.h.s8.bf16 %v752_v7  ;;  %v2192_v15 = vunpack.c.l.s8.bf16 %v752_v7 }
 0x142   :  { %v1202_v10 = vunpack.c.h.s8.bf16 %v242_v8  ;;  %v1170_v16 = vunpack.c.l.s8.bf16 %v242_v8  ;;  %v370_v7 = vld [vmem:[#allocation3 + $0x930] sm:$0xff] }
 0x143   :  { %2739 = vmatpush1.bf16.msra.mxu0 %v2000_v11  ;;  %v2193_v11 = vunpack.c.l.s8.bf16 %v753_v1  ;;  %v626_v8 = vld [vmem:[#allocation3 + $0x1130] sm:$0xff] }
 0x144   :  { %2780 = vmatpush1.bf16.msra.mxu1 %v978_v12  ;;  %2740 = vmatprep.subr.bf16.mxu0 %v1969_v13  ;;  %v1171_v12 = vunpack.c.l.s8.bf16 %v243_v2  ;;  %v721_v13 = vld [vmem:[#allocation3 + $0x1428] sm:$0xff]  ;;  %v371_v2 = vld [vmem:[#allocation3 + $0x938] sm:$0xff] }
 0x145   :  { %2781 = vmatprep.subr.bf16.mxu1 %v947_v14  ;;  %v211_v14 = vld [vmem:[#allocation3 + $0x438] sm:$0xff] }
 0x147   :  { %2741 = vmatpush1.bf16.msra.mxu0 %v1968_v17  ;;  %v2161_v17 = vunpack.c.h.s8.bf16 %v721_v13 }
 0x148   :  { %2782 = vmatpush1.bf16.msra.mxu1 %v946_v18  ;;  %2742 = vmatprep.subr.bf16.mxu0 %v1937_v19  ;;  %v1139_v18 = vunpack.c.h.s8.bf16 %v211_v14  ;;  %v720_v19 = vld [vmem:[#allocation3 + $0x1420] sm:$0xff] }
 0x149   :  { %2783 = vmatprep.subr.bf16.mxu1 %v915_v20  ;;  %v210_v20 = vld [vmem:[#allocation3 + $0x430] sm:$0xff]  ;;  %v2160_v21 = vunpack.c.h.s8.bf16 %v720_v19  ;;  %v2128_v28 = vunpack.c.l.s8.bf16 %v720_v19 }
 0x14a   :  { %v1138_v22 = vunpack.c.h.s8.bf16 %v210_v20  ;;  %v1106_v29 = vunpack.c.l.s8.bf16 %v210_v20  ;;  %v338_v19 = vld [vmem:[#allocation3 + $0x830] sm:$0xff] }
 0x14b   :  { %2743 = vmatpush1.bf16.msra.mxu0 %v1936_v24  ;;  %v2129_v24 = vunpack.c.l.s8.bf16 %v721_v13  ;;  %v339_v13 = vld [vmem:[#allocation3 + $0x838] sm:$0xff]  ;;  %v594_v20 = vld [vmem:[#allocation3 + $0x1030] sm:$0xff] }
 0x14c   :  { %2784 = vmatpush1.bf16.msra.mxu1 %v914_v25  ;;  %2744 = vmatprep.subr.bf16.mxu0 %v1905_v26  ;;  %v1107_v25 = vunpack.c.l.s8.bf16 %v211_v14  ;;  %v435_v26 = vld [vmem:[#allocation3 + $0xb38] sm:$0xff] }
 0x14d   :  { %2785 = vmatprep.subr.bf16.mxu1 %v883_v27  ;;  %v691_v27 = vld [vmem:[#allocation3 + $0x1338] sm:$0xff] }
 0x14e   :  { %v595_v14 = vld [vmem:[#allocation3 + $0x1038] sm:$0xff] }
 0x14f   :  { %2745 = vmatpush1.bf16.msra.mxu0 %v1904_v30  ;;  %v1587_v30 = vunpack.c.h.s8.bf16 %v435_v26 }
 0x150   :  { %2786 = vmatpush1.bf16.msra.mxu1 %v882_v33  ;;  %2746 = vmatprep.subr.bf16.mxu0 %v1873_v49  ;;  %v2099_v33 = vunpack.c.h.s8.bf16 %v691_v27  ;;  %v434_v49 = vld [vmem:[#allocation3 + $0xb30] sm:$0xff] }
 0x151   :  { %2787 = vmatprep.subr.bf16.mxu1 %v851_v34  ;;  %v690_v34 = vld [vmem:[#allocation3 + $0x1330] sm:$0xff]  ;;  %v1586_v35 = vunpack.c.h.s8.bf16 %v434_v49 }
 0x152   :  { %v2098_v36 = vunpack.c.h.s8.bf16 %v690_v34 }
 0x153   :  { %2747 = vmatpush1.bf16.msra.mxu0 %v1872_v39  ;;  %v1555_v39 = vunpack.c.l.s8.bf16 %v435_v26  ;;  %v563_v26 = vld [vmem:[#allocation3 + $0xf38] sm:$0xff] }
 0x154   :  { %2788 = vmatpush1.bf16.msra.mxu1 %v850_v40  ;;  %2748 = vmatprep.subr.bf16.mxu0 %v2353_v41  ;;  %v2067_v40 = vunpack.c.l.s8.bf16 %v691_v27  ;;  %v403_v41 = vld [vmem:[#allocation3 + $0xa38] sm:$0xff] }
 0x155   :  { %2789 = vmatprep.subr.bf16.mxu1 %v1331_v42  ;;  %v659_v42 = vld [vmem:[#allocation3 + $0x1238] sm:$0xff]  ;;  %v1523_v53 = vunpack.c.h.s8.bf16 %v403_v41 }
 0x156   :  { %v2003_v1 = vunpack.c.l.s8.bf16 %v659_v42  ;;  %v819_v27 = vld [vmem:[#allocation3 + $0x1738] sm:$0xff] }
 0x157   :  { %2749 = vmatpush2.bf16.msra.mxu0 %v2352_v45 }
 0x158   :  { %2790 = vmatpush2.bf16.msra.mxu1 %v1330_v46  ;;  %2750 = vmatprep.subr.bf16.mxu0 %v2321_v50  ;;  %v1554_v46 = vunpack.c.l.s8.bf16 %v434_v49  ;;  %v2066_v50 = vunpack.c.l.s8.bf16 %v690_v34  ;;  %v562_v49 = vld [vmem:[#allocation3 + $0xf30] sm:$0xff] }
 0x159   :  { %2791 = vmatprep.subr.bf16.mxu1 %v1299_v51  ;;  %v818_v34 = vld [vmem:[#allocation3 + $0x1730] sm:$0xff] }
 0x15b   :  { %2751 = vmatpush2.bf16.msra.mxu0 %v2320_v54  ;;  %v2035_v54 = vunpack.c.h.s8.bf16 %v659_v42  ;;  %v787_v42 = vld [vmem:[#allocation3 + $0x1638] sm:$0xff] }
 0x15c   :  { %2792 = vmatpush2.bf16.msra.mxu1 %v1298_v31  ;;  %2752 = vmatprep.subr.bf16.mxu0 %v2289_v56  ;;  %v402_v31 = vld [vmem:[#allocation3 + $0xa30] sm:$0xff] }
 0x15d   :  { %2793 = vmatprep.subr.bf16.mxu1 %v1267_v57  ;;  %v658_v56 = vld [vmem:[#allocation3 + $0x1230] sm:$0xff]  ;;  %v1522_v59 = vunpack.c.h.s8.bf16 %v402_v31 }
 0x15f   :  { %2753 = vmatpush2.bf16.msra.mxu0 %v2288_v60  ;;  %v2034_v60 = vunpack.c.h.s8.bf16 %v658_v56 }
 0x160   :  { %2794 = vmatpush2.bf16.msra.mxu1 %v1266_v61  ;;  %2754 = vmatprep.subr.bf16.mxu0 %v2257_v62 }
 0x161   :  { %2795 = vmatprep.subr.bf16.mxu1 %v1235_v63  ;;  %v1491_v63 = vunpack.c.l.s8.bf16 %v403_v41  ;;  %v531_v41 = vld [vmem:[#allocation3 + $0xe38] sm:$0xff] }
 0x163   :  { %2755 = vmatpush2.bf16.msra.mxu0 %v2256_v3  ;;  %v627_v3 = vld [vmem:[#allocation3 + $0x1138] sm:$0xff] }
 0x164   :  { %2796 = vmatpush2.bf16.msra.mxu1 %v1234_v4  ;;  %2756 = vmatprep.subr.bf16.mxu0 %v2225_v5  ;;  %v2002_v4 = vunpack.c.l.s8.bf16 %v658_v56  ;;  %v1459_v5 = vunpack.c.h.s8.bf16 %v371_v2 }
 0x165   :  { %2797 = vmatprep.subr.bf16.mxu1 %v1203_v6  ;;  %v1971_v6 = vunpack.c.h.s8.bf16 %v627_v3 }
 0x167   :  { %2757 = vmatpush2.bf16.msra.mxu0 %v2224_v9  ;;  %v1458_v9 = vunpack.c.h.s8.bf16 %v370_v7 }
 0x168   :  { %2798 = vmatpush2.bf16.msra.mxu1 %v1202_v10  ;;  %2758 = vmatprep.subr.bf16.mxu0 %v2193_v11  ;;  %v1970_v10 = vunpack.c.h.s8.bf16 %v626_v8  ;;  %v1427_v11 = vunpack.c.l.s8.bf16 %v371_v2  ;;  %v498_v2 = vld [vmem:[#allocation3 + $0xd30] sm:$0xff] }
 0x169   :  { %2799 = vmatprep.subr.bf16.mxu1 %v1171_v12  ;;  %v1939_v12 = vunpack.c.l.s8.bf16 %v627_v3  ;;  %v754_v3 = vld [vmem:[#allocation3 + $0x1530] sm:$0xff] }
 0x16b   :  { %2759 = vmatpush2.bf16.msra.mxu0 %v2192_v15  ;;  %v1426_v15 = vunpack.c.l.s8.bf16 %v370_v7  ;;  %v467_v7 = vld [vmem:[#allocation3 + $0xc38] sm:$0xff] }
 0x16c   :  { %2800 = vmatpush2.bf16.msra.mxu1 %v1170_v16  ;;  %2760 = vmatprep.subr.bf16.mxu0 %v2161_v17  ;;  %v1938_v16 = vunpack.c.l.s8.bf16 %v626_v8  ;;  %v1395_v17 = vunpack.c.h.s8.bf16 %v339_v13  ;;  %v723_v8 = vld [vmem:[#allocation3 + $0x1438] sm:$0xff] }
 0x16d   :  { %2801 = vmatprep.subr.bf16.mxu1 %v1139_v18  ;;  %v1907_v18 = vunpack.c.h.s8.bf16 %v595_v14 }
 0x16f   :  { %2761 = vmatpush2.bf16.msra.mxu0 %v2160_v21  ;;  %v1394_v21 = vunpack.c.h.s8.bf16 %v338_v19 }
 0x170   :  { %2802 = vmatpush2.bf16.msra.mxu1 %v1138_v22  ;;  %2762 = vmatprep.subr.bf16.mxu0 %v2129_v24  ;;  %v1906_v22 = vunpack.c.h.s8.bf16 %v594_v20  ;;  %v1363_v24 = vunpack.c.l.s8.bf16 %v339_v13  ;;  %v466_v13 = vld [vmem:[#allocation3 + $0xc30] sm:$0xff] }
 0x171   :  { %2803 = vmatprep.subr.bf16.mxu1 %v1107_v25  ;;  %v1875_v25 = vunpack.c.l.s8.bf16 %v595_v14  ;;  %v722_v14 = vld [vmem:[#allocation3 + $0x1430] sm:$0xff] }
 0x173   :  { %2763 = vmatpush2.bf16.msra.mxu0 %v2128_v28  ;;  %v1362_v28 = vunpack.c.l.s8.bf16 %v338_v19  ;;  %v181_v19 = vld [vmem:[#allocation3 + $0x348] sm:$0xff] }
 0x174   :  { %2804 = vmatpush2.bf16.msra.mxu1 %v1106_v29  ;;  %2814 = vmatprep.subr.bf16.mxu0 %v1587_v30  ;;  %v1874_v29 = vunpack.c.l.s8.bf16 %v594_v20  ;;  %v1843_v30 = vunpack.c.h.s8.bf16 %v563_v26  ;;  %v437_v20 = vld [vmem:[#allocation3 + $0xb48] sm:$0xff] }
 0x175   :  { %2855 = vmatprep.subr.bf16.mxu1 %v2099_v33  ;;  %v2355_v33 = vunpack.c.h.s8.bf16 %v819_v27 }
 0x176   :  { %v2520_v43 = vpop.f32.mrf.mxu0  ;;  %2765 = vmatmul.mubr.bf16.vlgmr.msra.gmra.mxu0 %v5540_v23 }
 0x177   :  { %v5558_v44 = vpop.f32.mrf.mxu1  ;;  %2806 = vmatmul.mubr.bf16.vlgmr.msra.gmra.mxu1 %v5519_v47  ;;  %v5563_v45 = vadd.f32 %v2520_v43, %v5552_v32  ;;  %2815 = vmatpush1.bf16.msra.mxu0 %v1586_v35  ;;  %v1842_v35 = vunpack.c.h.s8.bf16 %v562_v49  ;;  %v1810_v43 = vunpack.c.l.s8.bf16 %v562_v49  ;;  %v149_v49 = vld [vmem:[#allocation3 + $0x248] sm:$0xff] }
 0x178   :  { %2856 = vmatpush1.bf16.msra.mxu1 %v2098_v36  ;;  %v2522_v51 = vpop.f32.mrf.mxu0  ;;  %2816 = vmatprep.subr.bf16.mxu0 %v1555_v39  ;;  %v2354_v36 = vunpack.c.h.s8.bf16 %v818_v34  ;;  %v1811_v39 = vunpack.c.l.s8.bf16 %v563_v26  ;;  %v180_v26 = vld [vmem:[#allocation3 + $0x340] sm:$0xff] }
 0x179   :  { %v5565_v52 = vpop.f32.mrf.mxu1  ;;  %2857 = vmatprep.subr.bf16.mxu1 %v2067_v40  ;;  %v5568_v57 = vadd.f32 %v2522_v51, %v5554_v0  ;;  %2846 = vmatprep.mubr.bf16.mxu0 %v5513_v38  ;;  %v1490_v0 = vunpack.c.l.s8.bf16 %v402_v31  ;;  %v2323_v40 = vunpack.c.l.s8.bf16 %v819_v27  ;;  %v2291_v51 = vunpack.c.h.s8.bf16 %v787_v42  ;;  %v436_v27 = vld [vmem:[#allocation3 + $0xb40] sm:$0xff] }
 0x17a   :  { %2887 = vmatprep.mubr.bf16.mxu1 %v5532_v55  ;;  %v2524_v32 = vpop.f32.mrf.mxu0 }
 0x17b   :  { %v2565_v58 = vpop.f32.mrf.mxu1  ;;  %2817 = vmatpush1.bf16.msra.mxu0 %v1554_v46  ;;  %v2322_v46 = vunpack.c.l.s8.bf16 %v818_v34  ;;  %v1747_v32 = vunpack.c.l.s8.bf16 %v531_v41  ;;  %v405_v34 = vld [vmem:[#allocation3 + $0xa48] sm:$0xff] }
 0x17c   :  { %2858 = vmatpush1.bf16.msra.mxu1 %v2066_v50  ;;  %v2525_v61 = vpop.f32.mrf.mxu0  ;;  %2818 = vmatprep.subr.bf16.mxu0 %v1523_v53  ;;  %v1779_v50 = vunpack.c.h.s8.bf16 %v531_v41  ;;  %v530_v53 = vld [vmem:[#allocation3 + $0xe30] sm:$0xff]  ;;  %v2259_v58 = vunpack.c.l.s8.bf16 %v787_v42  ;;  %v1556_v41 = vunpack.c.l.s8.bf16 %v436_v27 }
 0x17d   :  { %v2566_v62 = vpop.f32.mrf.mxu1  ;;  %2859 = vmatprep.subr.bf16.mxu1 %v2035_v54  ;;  %v786_v54 = vld [vmem:[#allocation3 + $0x1630] sm:$0xff]  ;;  %v1778_v31 = vunpack.c.h.s8.bf16 %v530_v53  ;;  %v1746_v61 = vunpack.c.l.s8.bf16 %v530_v53  ;;  %v404_v53 = vld [vmem:[#allocation3 + $0xa40] sm:$0xff] }
 0x17e   :  { %v2290_v56 = vunpack.c.h.s8.bf16 %v786_v54  ;;  %v2258_v62 = vunpack.c.l.s8.bf16 %v786_v54 }
 0x17f   :  { %2819 = vmatpush1.bf16.msra.mxu0 %v1522_v59  ;;  %v499_v59 = vld [vmem:[#allocation3 + $0xd38] sm:$0xff] }
 0x180   :  { %2860 = vmatpush1.bf16.msra.mxu1 %v2034_v60  ;;  %2820 = vmatprep.subr.bf16.mxu0 %v1491_v63  ;;  %v755_v60 = vld [vmem:[#allocation3 + $0x1538] sm:$0xff]  ;;  %v1715_v63 = vunpack.c.h.s8.bf16 %v499_v59 }
 0x181   :  { %2861 = vmatprep.subr.bf16.mxu1 %v2003_v1  ;;  %v2227_v1 = vunpack.c.h.s8.bf16 %v755_v60 }
 0x183   :  { %2821 = vmatpush1.bf16.msra.mxu0 %v1490_v0  ;;  %v1714_v0 = vunpack.c.h.s8.bf16 %v498_v2 }
 0x184   :  { %2862 = vmatpush1.bf16.msra.mxu1 %v2002_v4  ;;  %2822 = vmatprep.subr.bf16.mxu0 %v1459_v5  ;;  %v2226_v4 = vunpack.c.h.s8.bf16 %v754_v3  ;;  %v1683_v5 = vunpack.c.l.s8.bf16 %v499_v59  ;;  %v1524_v59 = vunpack.c.h.s8.bf16 %v404_v53 }
 0x185   :  { %2863 = vmatprep.subr.bf16.mxu1 %v1971_v6  ;;  %v2195_v6 = vunpack.c.l.s8.bf16 %v755_v60 }
 0x187   :  { %2823 = vmatpush1.bf16.msra.mxu0 %v1458_v9  ;;  %v1682_v9 = vunpack.c.l.s8.bf16 %v498_v2 }
 0x188   :  { %2864 = vmatpush1.bf16.msra.mxu1 %v1970_v10  ;;  %2824 = vmatprep.subr.bf16.mxu0 %v1427_v11  ;;  %v2194_v10 = vunpack.c.l.s8.bf16 %v754_v3  ;;  %v1651_v11 = vunpack.c.h.s8.bf16 %v467_v7  ;;  %v1492_v3 = vunpack.c.l.s8.bf16 %v404_v53 }
 0x189   :  { %2865 = vmatprep.subr.bf16.mxu1 %v1939_v12  ;;  %v2163_v12 = vunpack.c.h.s8.bf16 %v723_v8 }
 0x18b   :  { %2825 = vmatpush1.bf16.msra.mxu0 %v1426_v15  ;;  %v1650_v15 = vunpack.c.h.s8.bf16 %v466_v13 }
 0x18c   :  { %2866 = vmatpush1.bf16.msra.mxu1 %v1938_v16  ;;  %2826 = vmatprep.subr.bf16.mxu0 %v1395_v17  ;;  %v2162_v16 = vunpack.c.h.s8.bf16 %v722_v14  ;;  %v1619_v17 = vunpack.c.l.s8.bf16 %v467_v7 }
 0x18d   :  { %2867 = vmatprep.subr.bf16.mxu1 %v1907_v18  ;;  %v2131_v18 = vunpack.c.l.s8.bf16 %v723_v8 }
 0x18f   :  { %2827 = vmatpush1.bf16.msra.mxu0 %v1394_v21  ;;  %v1618_v21 = vunpack.c.l.s8.bf16 %v466_v13 }
 0x190   :  { %2868 = vmatpush1.bf16.msra.mxu1 %v1906_v22  ;;  %2828 = vmatprep.subr.bf16.mxu0 %v1363_v24  ;;  %v2130_v22 = vunpack.c.l.s8.bf16 %v722_v14  ;;  %v1077_v24 = vunpack.c.h.s8.bf16 %v181_v19 }
 0x191   :  { %2869 = vmatprep.subr.bf16.mxu1 %v1875_v25  ;;  %v1589_v25 = vunpack.c.h.s8.bf16 %v437_v20 }
 0x193   :  { %2829 = vmatpush1.bf16.msra.mxu0 %v1362_v28  ;;  %v1076_v28 = vunpack.c.h.s8.bf16 %v180_v26 }
 0x194   :  { %2870 = vmatpush1.bf16.msra.mxu1 %v1874_v29  ;;  %2830 = vmatprep.subr.bf16.mxu0 %v1843_v30  ;;  %v1588_v29 = vunpack.c.h.s8.bf16 %v436_v27  ;;  %v1045_v30 = vunpack.c.l.s8.bf16 %v181_v19 }
 0x195   :  { %2871 = vmatprep.subr.bf16.mxu1 %v2355_v33  ;;  %v1557_v33 = vunpack.c.l.s8.bf16 %v437_v20 }
 0x197   :  { %2831 = vmatpush2.bf16.msra.mxu0 %v1842_v35 }
 0x198   :  { %2872 = vmatpush2.bf16.msra.mxu1 %v2354_v36  ;;  %2832 = vmatprep.subr.bf16.mxu0 %v1811_v39 }
 0x199   :  { %2873 = vmatprep.subr.bf16.mxu1 %v2323_v40  ;;  %v1044_v40 = vunpack.c.l.s8.bf16 %v180_v26 }
 0x19b   :  { %2833 = vmatpush2.bf16.msra.mxu0 %v1810_v43 }
 0x19c   :  { %2874 = vmatpush2.bf16.msra.mxu1 %v2322_v46  ;;  %2834 = vmatprep.subr.bf16.mxu0 %v1779_v50  ;;  %v1013_v46 = vunpack.c.h.s8.bf16 %v149_v49  ;;  %v1525_v50 = vunpack.c.h.s8.bf16 %v405_v34 }
 0x19d   :  { %2875 = vmatprep.subr.bf16.mxu1 %v2291_v51  ;;  %v148_v51 = vld [vmem:[#allocation3 + $0x240] sm:$0xff] }
 0x19e   :  { %v980_v2 = vunpack.c.l.s8.bf16 %v148_v51 }
 0x19f   :  { %2835 = vmatpush2.bf16.msra.mxu0 %v1778_v31 }
 0x1a0   :  { %2876 = vmatpush2.bf16.msra.mxu1 %v2290_v56  ;;  %2836 = vmatprep.subr.bf16.mxu0 %v1747_v32 }
 0x1a1   :  { %2877 = vmatprep.subr.bf16.mxu1 %v2259_v58  ;;  %v1012_v58 = vunpack.c.h.s8.bf16 %v148_v51  ;;  %v532_v51 = vld [vmem:[#allocation3 + $0xe40] sm:$0xff] }
 0x1a3   :  { %2837 = vmatpush2.bf16.msra.mxu0 %v1746_v61 }
 0x1a4   :  { %2878 = vmatpush2.bf16.msra.mxu1 %v2258_v62  ;;  %2838 = vmatprep.subr.bf16.mxu0 %v1715_v63  ;;  %v981_v62 = vunpack.c.l.s8.bf16 %v149_v49  ;;  %v1493_v63 = vunpack.c.l.s8.bf16 %v405_v34 }
 0x1a5   :  { %2879 = vmatprep.subr.bf16.mxu1 %v2227_v1  ;;  %v117_v1 = vld [vmem:[#allocation3 + $0x148] sm:$0xff] }
 0x1a7   :  { %2839 = vmatpush2.bf16.msra.mxu0 %v1714_v0  ;;  %v949_v0 = vunpack.c.h.s8.bf16 %v117_v1 }
 0x1a8   :  { %2880 = vmatpush2.bf16.msra.mxu1 %v2226_v4  ;;  %2840 = vmatprep.subr.bf16.mxu0 %v1683_v5  ;;  %v116_v5 = vld [vmem:[#allocation3 + $0x140] sm:$0xff] }
 0x1a9   :  { %2881 = vmatprep.subr.bf16.mxu1 %v2195_v6  ;;  %v372_v6 = vld [vmem:[#allocation3 + $0x940] sm:$0xff]  ;;  %v948_v7 = vunpack.c.h.s8.bf16 %v116_v5  ;;  %v916_v13 = vunpack.c.l.s8.bf16 %v116_v5  ;;  %v213_v5 = vld [vmem:[#allocation3 + $0x448] sm:$0xff] }
 0x1aa   :  { %v1460_v8 = vunpack.c.h.s8.bf16 %v372_v6  ;;  %v1428_v14 = vunpack.c.l.s8.bf16 %v372_v6  ;;  %v469_v6 = vld [vmem:[#allocation3 + $0xc48] sm:$0xff] }
 0x1ab   :  { %2841 = vmatpush2.bf16.msra.mxu0 %v1682_v9  ;;  %v917_v9 = vunpack.c.l.s8.bf16 %v117_v1  ;;  %v244_v1 = vld [vmem:[#allocation3 + $0x540] sm:$0xff] }
 0x1ac   :  { %2882 = vmatpush2.bf16.msra.mxu1 %v2194_v10  ;;  %2842 = vmatprep.subr.bf16.mxu0 %v1651_v11  ;;  %v85_v11 = vld [vmem:[#allocation3 + $0x48] sm:$0xff] }
 0x1ad   :  { %2883 = vmatprep.subr.bf16.mxu1 %v2163_v12  ;;  %v341_v12 = vld [vmem:[#allocation3 + $0x848] sm:$0xff] }
 0x1af   :  { %2843 = vmatpush2.bf16.msra.mxu0 %v1650_v15  ;;  %v885_v15 = vunpack.c.h.s8.bf16 %v85_v11 }
 0x1b0   :  { %2884 = vmatpush2.bf16.msra.mxu1 %v2162_v16  ;;  %2844 = vmatprep.subr.bf16.mxu0 %v1619_v17  ;;  %v1397_v16 = vunpack.c.h.s8.bf16 %v341_v12  ;;  %v84_v17 = vld [vmem:[#allocation3 + $0x40] sm:$0xff] }
 0x1b1   :  { %2885 = vmatprep.subr.bf16.mxu1 %v2131_v18  ;;  %v340_v18 = vld [vmem:[#allocation3 + $0x840] sm:$0xff]  ;;  %v884_v19 = vunpack.c.h.s8.bf16 %v84_v17  ;;  %v852_v26 = vunpack.c.l.s8.bf16 %v84_v17  ;;  %v693_v17 = vld [vmem:[#allocation3 + $0x1348] sm:$0xff] }
 0x1b2   :  { %v1396_v20 = vunpack.c.h.s8.bf16 %v340_v18  ;;  %v1364_v27 = vunpack.c.l.s8.bf16 %v340_v18  ;;  %v183_v18 = vld [vmem:[#allocation3 + $0x358] sm:$0xff] }
 0x1b3   :  { %2845 = vmatpush2.bf16.msra.mxu0 %v1618_v21  ;;  %v853_v21 = vunpack.c.l.s8.bf16 %v85_v11  ;;  %v212_v11 = vld [vmem:[#allocation3 + $0x440] sm:$0xff] }
 0x1b4   :  { %2886 = vmatpush2.bf16.msra.mxu1 %v2130_v22  ;;  %2896 = vmatprep.subr.bf16.mxu0 %v1077_v24  ;;  %v1365_v22 = vunpack.c.l.s8.bf16 %v341_v12  ;;  %v309_v24 = vld [vmem:[#allocation3 + $0x748] sm:$0xff]  ;;  %v468_v12 = vld [vmem:[#allocation3 + $0xc40] sm:$0xff] }
 0x1b5   :  { %2937 = vmatprep.subr.bf16.mxu1 %v1589_v25  ;;  %v565_v25 = vld [vmem:[#allocation3 + $0xf48] sm:$0xff] }
 0x1b6   :  { %v2602_v35 = vpop.f32.mrf.mxu0  ;;  %2847 = vmatmul.mubr.bf16.vlgmr.msra.gmra.mxu0 %v5523_v48 }
 0x1b7   :  { %v2643_v36 = vpop.f32.mrf.mxu1  ;;  %2888 = vmatmul.mubr.bf16.vlgmr.msra.gmra.mxu1 %v5540_v23  ;;  %v2603_v39 = vadd.f32 %v2602_v35, %v5558_v44  ;;  %2897 = vmatpush1.bf16.msra.mxu0 %v1076_v28  ;;  %v1333_v28 = vunpack.c.h.s8.bf16 %v309_v24  ;;  %v1301_v35 = vunpack.c.l.s8.bf16 %v309_v24  ;;  %v692_v24 = vld [vmem:[#allocation3 + $0x1340] sm:$0xff] }
 0x1b8   :  { %2938 = vmatpush1.bf16.msra.mxu1 %v1588_v29  ;;  %v2604_v42 = vpop.f32.mrf.mxu0  ;;  %2898 = vmatprep.subr.bf16.mxu0 %v1045_v30  ;;  %v1845_v29 = vunpack.c.h.s8.bf16 %v565_v25  ;;  %v308_v30 = vld [vmem:[#allocation3 + $0x740] sm:$0xff] }
 0x1b9   :  { %v2645_v43 = vpop.f32.mrf.mxu1  ;;  %2939 = vmatprep.subr.bf16.mxu1 %v1557_v33  ;;  %v5575_v54 = vadd.f32 %v2643_v36, %v2603_v39  ;;  %v2605_v31 = vadd.f32 %v2604_v42, %v5565_v52  ;;  %2928 = vmatprep.mubr.bf16.mxu0 %v5509_v37  ;;  %v373_v52 = vld [vmem:[#allocation3 + $0x948] sm:$0xff]  ;;  %v564_v33 = vld [vmem:[#allocation3 + $0xf40] sm:$0xff]  ;;  %v1332_v49 = vunpack.c.h.s8.bf16 %v308_v30  ;;  %v1813_v36 = vunpack.c.l.s8.bf16 %v565_v25  ;;  %v182_v25 = vld [vmem:[#allocation3 + $0x350] sm:$0xff] }
 0x1ba   :  { %2969 = vmatprep.mubr.bf16.mxu1 %v5513_v38  ;;  %v2606_v44 = vpop.f32.mrf.mxu0  ;;  %v1461_v4 = vunpack.c.h.s8.bf16 %v373_v52  ;;  %v1429_v10 = vunpack.c.l.s8.bf16 %v373_v52  ;;  %v1844_v34 = vunpack.c.h.s8.bf16 %v564_v33  ;;  %v277_v39 = vld [vmem:[#allocation3 + $0x648] sm:$0xff]  ;;  %v1812_v42 = vunpack.c.l.s8.bf16 %v564_v33  ;;  %v500_v52 = vld [vmem:[#allocation3 + $0xd40] sm:$0xff]  ;;  %v151_v33 = vld [vmem:[#allocation3 + $0x258] sm:$0xff] }
 0x1bb   :  { %v2647_v56 = vpop.f32.mrf.mxu1  ;;  %v5580_v32 = vadd.f32 %v2645_v43, %v2605_v31  ;;  %2899 = vmatpush1.bf16.msra.mxu0 %v1044_v40  ;;  %v533_v40 = vld [vmem:[#allocation3 + $0xe48] sm:$0xff]  ;;  %v1269_v43 = vunpack.c.h.s8.bf16 %v277_v39  ;;  %v1780_v31 = vunpack.c.h.s8.bf16 %v532_v51  ;;  %v1237_v44 = vunpack.c.l.s8.bf16 %v277_v39 }
 0x1bc   :  { %2940 = vmatpush1.bf16.msra.mxu1 %v1556_v41  ;;  %v2607_v60 = vpop.f32.mrf.mxu0  ;;  %2900 = vmatprep.subr.bf16.mxu0 %v1013_v46  ;;  %v1300_v41 = vunpack.c.l.s8.bf16 %v308_v30  ;;  %v1781_v46 = vunpack.c.h.s8.bf16 %v533_v40  ;;  %v1749_v56 = vunpack.c.l.s8.bf16 %v533_v40  ;;  %v661_v30 = vld [vmem:[#allocation3 + $0x1248] sm:$0xff]  ;;  %v1046_v39 = vunpack.c.l.s8.bf16 %v182_v25 }
 0x1bd   :  { %v2648_v61 = vpop.f32.mrf.mxu1  ;;  %2941 = vmatprep.subr.bf16.mxu1 %v1525_v50  ;;  %v276_v50 = vld [vmem:[#allocation3 + $0x640] sm:$0xff] }
 0x1be   :  { %v1268_v53 = vunpack.c.h.s8.bf16 %v276_v50  ;;  %v1236_v60 = vunpack.c.l.s8.bf16 %v276_v50  ;;  %v1748_v61 = vunpack.c.l.s8.bf16 %v532_v51  ;;  %v150_v50 = vld [vmem:[#allocation3 + $0x250] sm:$0xff] }
 0x1bf   :  { %2901 = vmatpush1.bf16.msra.mxu0 %v1012_v58  ;;  %v245_v58 = vld [vmem:[#allocation3 + $0x548] sm:$0xff] }
 0x1c0   :  { %2942 = vmatpush1.bf16.msra.mxu1 %v1524_v59  ;;  %2902 = vmatprep.subr.bf16.mxu0 %v981_v62  ;;  %v501_v59 = vld [vmem:[#allocation3 + $0xd48] sm:$0xff]  ;;  %v1205_v62 = vunpack.c.h.s8.bf16 %v245_v58 }
 0x1c1   :  { %2943 = vmatprep.subr.bf16.mxu1 %v1493_v63  ;;  %v1717_v63 = vunpack.c.h.s8.bf16 %v501_v59 }
 0x1c3   :  { %2903 = vmatpush1.bf16.msra.mxu0 %v980_v2  ;;  %v1204_v2 = vunpack.c.h.s8.bf16 %v244_v1 }
 0x1c4   :  { %2944 = vmatpush1.bf16.msra.mxu1 %v1492_v3  ;;  %2904 = vmatprep.subr.bf16.mxu0 %v949_v0  ;;  %v1716_v3 = vunpack.c.h.s8.bf16 %v500_v52  ;;  %v1173_v0 = vunpack.c.l.s8.bf16 %v245_v58 }
 0x1c5   :  { %2945 = vmatprep.subr.bf16.mxu1 %v1461_v4  ;;  %v1685_v4 = vunpack.c.l.s8.bf16 %v501_v59 }
 0x1c7   :  { %2905 = vmatpush1.bf16.msra.mxu0 %v948_v7  ;;  %v1172_v7 = vunpack.c.l.s8.bf16 %v244_v1 }
 0x1c8   :  { %2946 = vmatpush1.bf16.msra.mxu1 %v1460_v8  ;;  %2906 = vmatprep.subr.bf16.mxu0 %v917_v9  ;;  %v1684_v8 = vunpack.c.l.s8.bf16 %v500_v52  ;;  %v1141_v9 = vunpack.c.h.s8.bf16 %v213_v5  ;;  %v982_v52 = vunpack.c.l.s8.bf16 %v150_v50 }
 0x1c9   :  { %2947 = vmatprep.subr.bf16.mxu1 %v1429_v10  ;;  %v1653_v10 = vunpack.c.h.s8.bf16 %v469_v6 }
 0x1cb   :  { %2907 = vmatpush1.bf16.msra.mxu0 %v916_v13  ;;  %v1140_v13 = vunpack.c.h.s8.bf16 %v212_v11 }
 0x1cc   :  { %2948 = vmatpush1.bf16.msra.mxu1 %v1428_v14  ;;  %2908 = vmatprep.subr.bf16.mxu0 %v885_v15  ;;  %v1652_v14 = vunpack.c.h.s8.bf16 %v468_v12  ;;  %v1109_v15 = vunpack.c.l.s8.bf16 %v213_v5 }
 0x1cd   :  { %2949 = vmatprep.subr.bf16.mxu1 %v1397_v16  ;;  %v1621_v16 = vunpack.c.l.s8.bf16 %v469_v6 }
 0x1cf   :  { %2909 = vmatpush1.bf16.msra.mxu0 %v884_v19  ;;  %v1108_v19 = vunpack.c.l.s8.bf16 %v212_v11 }
 0x1d0   :  { %2950 = vmatpush1.bf16.msra.mxu1 %v1396_v20  ;;  %2910 = vmatprep.subr.bf16.mxu0 %v853_v21  ;;  %v1620_v20 = vunpack.c.l.s8.bf16 %v468_v12  ;;  %v2101_v21 = vunpack.c.h.s8.bf16 %v693_v17 }
 0x1d1   :  { %2951 = vmatprep.subr.bf16.mxu1 %v1365_v22  ;;  %v1079_v22 = vunpack.c.h.s8.bf16 %v183_v18 }
 0x1d3   :  { %2911 = vmatpush1.bf16.msra.mxu0 %v852_v26  ;;  %v2100_v26 = vunpack.c.h.s8.bf16 %v692_v24 }
 0x1d4   :  { %2952 = vmatpush1.bf16.msra.mxu1 %v1364_v27  ;;  %2912 = vmatprep.subr.bf16.mxu0 %v1333_v28  ;;  %v1078_v27 = vunpack.c.h.s8.bf16 %v182_v25  ;;  %v2069_v28 = vunpack.c.l.s8.bf16 %v693_v17 }
 0x1d5   :  { %2953 = vmatprep.subr.bf16.mxu1 %v1845_v29  ;;  %v1047_v29 = vunpack.c.l.s8.bf16 %v183_v18 }
 0x1d7   :  { %2913 = vmatpush2.bf16.msra.mxu0 %v1332_v49 }
 0x1d8   :  { %2954 = vmatpush2.bf16.msra.mxu1 %v1844_v34  ;;  %2914 = vmatprep.subr.bf16.mxu0 %v1301_v35 }
 0x1d9   :  { %2955 = vmatprep.subr.bf16.mxu1 %v1813_v36  ;;  %v2068_v36 = vunpack.c.l.s8.bf16 %v692_v24 }
 0x1db   :  { %2915 = vmatpush2.bf16.msra.mxu0 %v1300_v41 }
 0x1dc   :  { %2956 = vmatpush2.bf16.msra.mxu1 %v1812_v42  ;;  %2916 = vmatprep.subr.bf16.mxu0 %v1269_v43  ;;  %v2037_v42 = vunpack.c.h.s8.bf16 %v661_v30  ;;  %v1015_v43 = vunpack.c.h.s8.bf16 %v151_v33 }
 0x1dd   :  { %2957 = vmatprep.subr.bf16.mxu1 %v1781_v46  ;;  %v660_v46 = vld [vmem:[#allocation3 + $0x1240] sm:$0xff] }
 0x1de   :  { %v2004_v1 = vunpack.c.l.s8.bf16 %v660_v46 }
 0x1df   :  { %2917 = vmatpush2.bf16.msra.mxu0 %v1268_v53 }
 0x1e0   :  { %2958 = vmatpush2.bf16.msra.mxu1 %v1780_v31  ;;  %2918 = vmatprep.subr.bf16.mxu0 %v1237_v44  ;;  %v2036_v44 = vunpack.c.h.s8.bf16 %v660_v46  ;;  %v788_v46 = vld [vmem:[#allocation3 + $0x1640] sm:$0xff] }
 0x1e1   :  { %2959 = vmatprep.subr.bf16.mxu1 %v1749_v56  ;;  %v1014_v56 = vunpack.c.h.s8.bf16 %v150_v50  ;;  %v278_v50 = vld [vmem:[#allocation3 + $0x650] sm:$0xff] }
 0x1e3   :  { %2919 = vmatpush2.bf16.msra.mxu0 %v1236_v60  ;;  %v2005_v60 = vunpack.c.l.s8.bf16 %v661_v30 }
 0x1e4   :  { %2960 = vmatpush2.bf16.msra.mxu1 %v1748_v61  ;;  %2920 = vmatprep.subr.bf16.mxu0 %v1205_v62  ;;  %v983_v61 = vunpack.c.l.s8.bf16 %v151_v33  ;;  %v629_v62 = vld [vmem:[#allocation3 + $0x1148] sm:$0xff] }
 0x1e5   :  { %2961 = vmatprep.subr.bf16.mxu1 %v1717_v63  ;;  %v119_v63 = vld [vmem:[#allocation3 + $0x158] sm:$0xff] }
 0x1e7   :  { %2921 = vmatpush2.bf16.msra.mxu0 %v1204_v2  ;;  %v1973_v2 = vunpack.c.h.s8.bf16 %v629_v62 }
 0x1e8   :  { %2962 = vmatpush2.bf16.msra.mxu1 %v1716_v3  ;;  %2922 = vmatprep.subr.bf16.mxu0 %v1173_v0  ;;  %v951_v3 = vunpack.c.h.s8.bf16 %v119_v63  ;;  %v628_v0 = vld [vmem:[#allocation3 + $0x1140] sm:$0xff] }
 0x1e9   :  { %2963 = vmatprep.subr.bf16.mxu1 %v1685_v4  ;;  %v118_v4 = vld [vmem:[#allocation3 + $0x150] sm:$0xff]  ;;  %v1972_v5 = vunpack.c.h.s8.bf16 %v628_v0  ;;  %v1940_v11 = vunpack.c.l.s8.bf16 %v628_v0 }
 0x1ea   :  { %v950_v6 = vunpack.c.h.s8.bf16 %v118_v4  ;;  %v918_v12 = vunpack.c.l.s8.bf16 %v118_v4 }
 0x1eb   :  { %2923 = vmatpush2.bf16.msra.mxu0 %v1172_v7  ;;  %v1941_v7 = vunpack.c.l.s8.bf16 %v629_v62 }
 0x1ec   :  { %2964 = vmatpush2.bf16.msra.mxu1 %v1684_v8  ;;  %2924 = vmatprep.subr.bf16.mxu0 %v1141_v9  ;;  %v919_v8 = vunpack.c.l.s8.bf16 %v119_v63  ;;  %v597_v9 = vld [vmem:[#allocation3 + $0x1048] sm:$0xff] }
 0x1ed   :  { %2965 = vmatprep.subr.bf16.mxu1 %v1653_v10  ;;  %v87_v10 = vld [vmem:[#allocation3 + $0x58] sm:$0xff] }
 0x1ef   :  { %2925 = vmatpush2.bf16.msra.mxu0 %v1140_v13  ;;  %v1909_v13 = vunpack.c.h.s8.bf16 %v597_v9 }
 0x1f0   :  { %2966 = vmatpush2.bf16.msra.mxu1 %v1652_v14  ;;  %2926 = vmatprep.subr.bf16.mxu0 %v1109_v15  ;;  %v887_v14 = vunpack.c.h.s8.bf16 %v87_v10  ;;  %v596_v15 = vld [vmem:[#allocation3 + $0x1040] sm:$0xff] }
 0x1f1   :  { %2967 = vmatprep.subr.bf16.mxu1 %v1621_v16  ;;  %v86_v16 = vld [vmem:[#allocation3 + $0x50] sm:$0xff]  ;;  %v1908_v17 = vunpack.c.h.s8.bf16 %v596_v15  ;;  %v1876_v24 = vunpack.c.l.s8.bf16 %v596_v15 }
 0x1f2   :  { %v886_v18 = vunpack.c.h.s8.bf16 %v86_v16  ;;  %v854_v25 = vunpack.c.l.s8.bf16 %v86_v16 }
 0x1f3   :  { %2927 = vmatpush2.bf16.msra.mxu0 %v1108_v19  ;;  %v1877_v19 = vunpack.c.l.s8.bf16 %v597_v9 }
 0x1f4   :  { %2968 = vmatpush2.bf16.msra.mxu1 %v1620_v20  ;;  %2978 = vmatprep.subr.bf16.mxu0 %v2101_v21  ;;  %v855_v20 = vunpack.c.l.s8.bf16 %v87_v10  ;;  %v821_v21 = vld [vmem:[#allocation3 + $0x1748] sm:$0xff] }
 0x1f5   :  { %3019 = vmatprep.subr.bf16.mxu1 %v1079_v22  ;;  %v311_v22 = vld [vmem:[#allocation3 + $0x758] sm:$0xff] }
 0x1f6   :  { %v2684_v49 = vpop.f32.mrf.mxu0  ;;  %2929 = vmatmul.mubr.bf16.vlgmr.msra.gmra.mxu0 %v5519_v47 }
 0x1f7   :  { %v2725_v34 = vpop.f32.mrf.mxu1  ;;  %2970 = vmatmul.mubr.bf16.vlgmr.msra.gmra.mxu1 %v5523_v48  ;;  %2979 = vmatpush1.bf16.msra.mxu0 %v2100_v26  ;;  %v2357_v26 = vunpack.c.h.s8.bf16 %v821_v21 }
 0x1f8   :  { %v5584_v35 = vadd.f32 %v2725_v34, %v2684_v49  ;;  %3020 = vmatpush1.bf16.msra.mxu1 %v1078_v27  ;;  %v2686_v40 = vpop.f32.mrf.mxu0  ;;  %2980 = vmatprep.subr.bf16.mxu0 %v2069_v28  ;;  %v1335_v27 = vunpack.c.h.s8.bf16 %v311_v22  ;;  %v820_v28 = vld [vmem:[#allocation3 + $0x1740] sm:$0xff]  ;;  %v2325_v49 = vunpack.c.l.s8.bf16 %v821_v21  ;;  %v1303_v34 = vunpack.c.l.s8.bf16 %v311_v22 }
 0x1f9   :  { %v2727_v41 = vpop.f32.mrf.mxu1  ;;  %3021 = vmatprep.subr.bf16.mxu1 %v1047_v29  ;;  %3010 = vmatprep.mubr.bf16.mxu0 %v5532_v55  ;;  %v310_v29 = vld [vmem:[#allocation3 + $0x750] sm:$0xff]  ;;  %v2356_v30 = vunpack.c.h.s8.bf16 %v820_v28 }
 0x1fa   :  { %v5586_v51 = vadd.f32 %v2727_v41, %v2686_v40  ;;  %3051 = vmatprep.mubr.bf16.mxu1 %v5509_v37  ;;  %v2688_v53 = vpop.f32.mrf.mxu0  ;;  %v1334_v33 = vunpack.c.h.s8.bf16 %v310_v29  ;;  %v2324_v40 = vunpack.c.l.s8.bf16 %v820_v28  ;;  %v1302_v41 = vunpack.c.l.s8.bf16 %v310_v29 }
 0x1fb   :  { %v2729_v31 = vpop.f32.mrf.mxu1  ;;  %2981 = vmatpush1.bf16.msra.mxu0 %v2068_v36  ;;  %v789_v36 = vld [vmem:[#allocation3 + $0x1648] sm:$0xff]  ;;  %v2292_v53 = vunpack.c.h.s8.bf16 %v788_v46 }
 0x1fc   :  { %3022 = vmatpush1.bf16.msra.mxu1 %v1046_v39  ;;  %v2689_v58 = vpop.f32.mrf.mxu0  ;;  %2982 = vmatprep.subr.bf16.mxu0 %v2037_v42  ;;  %v279_v39 = vld [vmem:[#allocation3 + $0x658] sm:$0xff]  ;;  %v2293_v42 = vunpack.c.h.s8.bf16 %v789_v36  ;;  %v1270_v31 = vunpack.c.h.s8.bf16 %v278_v50 }
 0x1fd   :  { %v2730_v59 = vpop.f32.mrf.mxu1  ;;  %3023 = vmatprep.subr.bf16.mxu1 %v1015_v43  ;;  %v1271_v43 = vunpack.c.h.s8.bf16 %v279_v39  ;;  %v757_v58 = vld [vmem:[#allocation3 + $0x1548] sm:$0xff] }
 0x1fe   :  { %v247_v59 = vld [vmem:[#allocation3 + $0x558] sm:$0xff]  ;;  %v2229_v62 = vunpack.c.h.s8.bf16 %v757_v58  ;;  %v2197_v0 = vunpack.c.l.s8.bf16 %v757_v58 }
 0x1ff   :  { %2983 = vmatpush1.bf16.msra.mxu0 %v2036_v44  ;;  %v2261_v44 = vunpack.c.l.s8.bf16 %v789_v36  ;;  %v1207_v63 = vunpack.c.h.s8.bf16 %v247_v59  ;;  %v1175_v4 = vunpack.c.l.s8.bf16 %v247_v59 }
 0x200   :  { %3024 = vmatpush1.bf16.msra.mxu1 %v1014_v56  ;;  %2984 = vmatprep.subr.bf16.mxu0 %v2005_v60  ;;  %v1239_v56 = vunpack.c.l.s8.bf16 %v279_v39  ;;  %v2260_v60 = vunpack.c.l.s8.bf16 %v788_v46 }
 0x201   :  { %3025 = vmatprep.subr.bf16.mxu1 %v983_v61  ;;  %v1238_v61 = vunpack.c.l.s8.bf16 %v278_v50  ;;  %v406_v50 = vld [vmem:[#allocation3 + $0xa50] sm:$0xff] }
 0x203   :  { %2985 = vmatpush1.bf16.msra.mxu0 %v2004_v1  ;;  %v756_v1 = vld [vmem:[#allocation3 + $0x1540] sm:$0xff] }
 0x204   :  { %3026 = vmatpush1.bf16.msra.mxu1 %v982_v52  ;;  %2986 = vmatprep.subr.bf16.mxu0 %v1973_v2  ;;  %v246_v52 = vld [vmem:[#allocation3 + $0x550] sm:$0xff]  ;;  %v2228_v2 = vunpack.c.h.s8.bf16 %v756_v1 }
 0x205   :  { %3027 = vmatprep.subr.bf16.mxu1 %v951_v3  ;;  %v1206_v3 = vunpack.c.h.s8.bf16 %v246_v52 }
 0x207   :  { %2987 = vmatpush1.bf16.msra.mxu0 %v1972_v5  ;;  %v725_v5 = vld [vmem:[#allocation3 + $0x1448] sm:$0xff] }
 0x208   :  { %3028 = vmatpush1.bf16.msra.mxu1 %v950_v6  ;;  %2988 = vmatprep.subr.bf16.mxu0 %v1941_v7  ;;  %v215_v6 = vld [vmem:[#allocation3 + $0x458] sm:$0xff]  ;;  %v2196_v7 = vunpack.c.l.s8.bf16 %v756_v1  ;;  %v2165_v9 = vunpack.c.h.s8.bf16 %v725_v5  ;;  %v2133_v15 = vunpack.c.l.s8.bf16 %v725_v5 }
 0x209   :  { %3029 = vmatprep.subr.bf16.mxu1 %v919_v8  ;;  %v1174_v8 = vunpack.c.l.s8.bf16 %v246_v52  ;;  %v1143_v10 = vunpack.c.h.s8.bf16 %v215_v6  ;;  %v1111_v16 = vunpack.c.l.s8.bf16 %v215_v6  ;;  %v631_v1 = vld [vmem:[#allocation3 + $0x1158] sm:$0xff] }
 0x20b   :  { %2989 = vmatpush1.bf16.msra.mxu0 %v1940_v11  ;;  %v724_v11 = vld [vmem:[#allocation3 + $0x1440] sm:$0xff] }
 0x20c   :  { %3030 = vmatpush1.bf16.msra.mxu1 %v918_v12  ;;  %2990 = vmatprep.subr.bf16.mxu0 %v1909_v13  ;;  %v214_v12 = vld [vmem:[#allocation3 + $0x450] sm:$0xff]  ;;  %v2164_v13 = vunpack.c.h.s8.bf16 %v724_v11 }
 0x20d   :  { %3031 = vmatprep.subr.bf16.mxu1 %v887_v14  ;;  %v1142_v14 = vunpack.c.h.s8.bf16 %v214_v12 }
 0x20f   :  { %2991 = vmatpush1.bf16.msra.mxu0 %v1908_v17  ;;  %v439_v17 = vld [vmem:[#allocation3 + $0xb58] sm:$0xff] }
 0x210   :  { %3032 = vmatpush1.bf16.msra.mxu1 %v886_v18  ;;  %2992 = vmatprep.subr.bf16.mxu0 %v1877_v19  ;;  %v695_v18 = vld [vmem:[#allocation3 + $0x1358] sm:$0xff]  ;;  %v2132_v19 = vunpack.c.l.s8.bf16 %v724_v11  ;;  %v1591_v21 = vunpack.c.h.s8.bf16 %v439_v17  ;;  %v1559_v28 = vunpack.c.l.s8.bf16 %v439_v17 }
 0x211   :  { %3033 = vmatprep.subr.bf16.mxu1 %v855_v20  ;;  %v1110_v20 = vunpack.c.l.s8.bf16 %v214_v12  ;;  %v2103_v22 = vunpack.c.h.s8.bf16 %v695_v18  ;;  %v2071_v29 = vunpack.c.l.s8.bf16 %v695_v18 }
 0x213   :  { %2993 = vmatpush1.bf16.msra.mxu0 %v1876_v24  ;;  %v438_v24 = vld [vmem:[#allocation3 + $0xb50] sm:$0xff] }
 0x214   :  { %3034 = vmatpush1.bf16.msra.mxu1 %v854_v25  ;;  %2994 = vmatprep.subr.bf16.mxu0 %v2357_v26  ;;  %v694_v25 = vld [vmem:[#allocation3 + $0x1350] sm:$0xff]  ;;  %v1590_v26 = vunpack.c.h.s8.bf16 %v438_v24  ;;  %v1558_v39 = vunpack.c.l.s8.bf16 %v438_v24 }
 0x215   :  { %3035 = vmatprep.subr.bf16.mxu1 %v1335_v27  ;;  %v2102_v27 = vunpack.c.h.s8.bf16 %v694_v25 }
 0x217   :  { %2995 = vmatpush2.bf16.msra.mxu0 %v2356_v30  ;;  %v407_v30 = vld [vmem:[#allocation3 + $0xa58] sm:$0xff] }
 0x218   :  { %3036 = vmatpush2.bf16.msra.mxu1 %v1334_v33  ;;  %2996 = vmatprep.subr.bf16.mxu0 %v2325_v49  ;;  %v663_v33 = vld [vmem:[#allocation3 + $0x1258] sm:$0xff] }
 0x219   :  { %3037 = vmatprep.subr.bf16.mxu1 %v1303_v34  ;;  %v2039_v46 = vunpack.c.h.s8.bf16 %v663_v33 }
 0x21b   :  { %2997 = vmatpush2.bf16.msra.mxu0 %v2324_v40  ;;  %v2070_v40 = vunpack.c.l.s8.bf16 %v694_v25 }
 0x21c   :  { %3038 = vmatpush2.bf16.msra.mxu1 %v1302_v41  ;;  %2998 = vmatprep.subr.bf16.mxu0 %v2293_v42 }
 0x21d   :  { %3039 = vmatprep.subr.bf16.mxu1 %v1271_v43  ;;  %v1527_v43 = vunpack.c.h.s8.bf16 %v407_v30 }
 0x21f   :  { %2999 = vmatpush2.bf16.msra.mxu0 %v2292_v53  ;;  %v662_v53 = vld [vmem:[#allocation3 + $0x1250] sm:$0xff] }
 0x220   :  { %3040 = vmatpush2.bf16.msra.mxu1 %v1270_v31  ;;  %3000 = vmatprep.subr.bf16.mxu0 %v2261_v44  ;;  %v2038_v58 = vunpack.c.h.s8.bf16 %v662_v53  ;;  %v2006_v52 = vunpack.c.l.s8.bf16 %v662_v53 }
 0x221   :  { %3041 = vmatprep.subr.bf16.mxu1 %v1239_v56  ;;  %v1526_v56 = vunpack.c.h.s8.bf16 %v406_v50 }
 0x223   :  { %3001 = vmatpush2.bf16.msra.mxu0 %v2260_v60 }
 0x224   :  { %3042 = vmatpush2.bf16.msra.mxu1 %v1238_v61  ;;  %3002 = vmatprep.subr.bf16.mxu0 %v2229_v62  ;;  %v1495_v61 = vunpack.c.l.s8.bf16 %v407_v30  ;;  %v2007_v62 = vunpack.c.l.s8.bf16 %v663_v33 }
 0x225   :  { %3043 = vmatprep.subr.bf16.mxu1 %v1207_v63  ;;  %v375_v63 = vld [vmem:[#allocation3 + $0x958] sm:$0xff] }
 0x227   :  { %3003 = vmatpush2.bf16.msra.mxu0 %v2228_v2  ;;  %v1463_v2 = vunpack.c.h.s8.bf16 %v375_v63 }
 0x228   :  { %3044 = vmatpush2.bf16.msra.mxu1 %v1206_v3  ;;  %3004 = vmatprep.subr.bf16.mxu0 %v2197_v0  ;;  %v1975_v3 = vunpack.c.h.s8.bf16 %v631_v1  ;;  %v374_v0 = vld [vmem:[#allocation3 + $0x950] sm:$0xff] }
 0x229   :  { %3045 = vmatprep.subr.bf16.mxu1 %v1175_v4  ;;  %v630_v4 = vld [vmem:[#allocation3 + $0x1150] sm:$0xff]  ;;  %v1462_v5 = vunpack.c.h.s8.bf16 %v374_v0  ;;  %v1430_v11 = vunpack.c.l.s8.bf16 %v374_v0 }
 0x22a   :  { %v1974_v6 = vunpack.c.h.s8.bf16 %v630_v4  ;;  %v1942_v12 = vunpack.c.l.s8.bf16 %v630_v4 }
 0x22b   :  { %3005 = vmatpush2.bf16.msra.mxu0 %v2196_v7  ;;  %v1431_v7 = vunpack.c.l.s8.bf16 %v375_v63 }
 0x22c   :  { %3046 = vmatpush2.bf16.msra.mxu1 %v1174_v8  ;;  %3006 = vmatprep.subr.bf16.mxu0 %v2165_v9  ;;  %v1943_v8 = vunpack.c.l.s8.bf16 %v631_v1  ;;  %v343_v9 = vld [vmem:[#allocation3 + $0x858] sm:$0xff] }
 0x22d   :  { %3047 = vmatprep.subr.bf16.mxu1 %v1143_v10  ;;  %v599_v10 = vld [vmem:[#allocation3 + $0x1058] sm:$0xff] }
 0x22f   :  { %3007 = vmatpush2.bf16.msra.mxu0 %v2164_v13  ;;  %v1399_v13 = vunpack.c.h.s8.bf16 %v343_v9 }
 0x230   :  { %3048 = vmatpush2.bf16.msra.mxu1 %v1142_v14  ;;  %3008 = vmatprep.subr.bf16.mxu0 %v2133_v15  ;;  %v1911_v14 = vunpack.c.h.s8.bf16 %v599_v10  ;;  %v342_v15 = vld [vmem:[#allocation3 + $0x850] sm:$0xff] }
 0x231   :  { %3049 = vmatprep.subr.bf16.mxu1 %v1111_v16  ;;  %v598_v16 = vld [vmem:[#allocation3 + $0x1050] sm:$0xff]  ;;  %v1398_v17 = vunpack.c.h.s8.bf16 %v342_v15  ;;  %v1366_v24 = vunpack.c.l.s8.bf16 %v342_v15 }
 0x232   :  { %v1910_v18 = vunpack.c.h.s8.bf16 %v598_v16  ;;  %v1878_v25 = vunpack.c.l.s8.bf16 %v598_v16 }
 0x233   :  { %3009 = vmatpush2.bf16.msra.mxu0 %v2132_v19  ;;  %v1367_v19 = vunpack.c.l.s8.bf16 %v343_v9 }
 0x234   :  { %3050 = vmatpush2.bf16.msra.mxu1 %v1110_v20  ;;  %3060 = vmatprep.subr.bf16.mxu0 %v1591_v21  ;;  %v1879_v20 = vunpack.c.l.s8.bf16 %v599_v10  ;;  %v567_v21 = vld [vmem:[#allocation3 + $0xf58] sm:$0xff] }
 0x235   :  { %3101 = vmatprep.subr.bf16.mxu1 %v2103_v22  ;;  %v823_v22 = vld [vmem:[#allocation3 + $0x1758] sm:$0xff] }
 0x236   :  { %v2766_v49 = vpop.f32.mrf.mxu0  ;;  %3011 = vmatmul.mubr.bf16.vlgmr.msra.gmra.mxu0 %v5540_v23 }
 0x237   :  { %v5590_v34 = vpop.f32.mrf.mxu1  ;;  %3052 = vmatmul.mubr.bf16.vlgmr.msra.gmra.mxu1 %v5519_v47  ;;  %v5595_v36 = vadd.f32 %v2766_v49, %v5584_v35  ;;  %3061 = vmatpush1.bf16.msra.mxu0 %v1590_v26  ;;  %v1847_v26 = vunpack.c.h.s8.bf16 %v567_v21  ;;  %v1815_v49 = vunpack.c.l.s8.bf16 %v567_v21 }
 0x238   :  { %3102 = vmatpush1.bf16.msra.mxu1 %v2102_v27  ;;  %v2768_v41 = vpop.f32.mrf.mxu0  ;;  %3062 = vmatprep.subr.bf16.mxu0 %v1559_v28  ;;  %v2359_v27 = vunpack.c.h.s8.bf16 %v823_v22  ;;  %v566_v28 = vld [vmem:[#allocation3 + $0xf50] sm:$0xff] }
 0x239   :  { %v5597_v42 = vpop.f32.mrf.mxu1  ;;  %3103 = vmatprep.subr.bf16.mxu1 %v2071_v29  ;;  %v5600_v31 = vadd.f32 %v2768_v41, %v5586_v51  ;;  %3092 = vmatprep.mubr.bf16.mxu0 %v5513_v38  ;;  %v1494_v51 = vunpack.c.l.s8.bf16 %v406_v50  ;;  %v822_v29 = vld [vmem:[#allocation3 + $0x1750] sm:$0xff]  ;;  %v1846_v30 = vunpack.c.h.s8.bf16 %v566_v28  ;;  %v791_v41 = vld [vmem:[#allocation3 + $0x1658] sm:$0xff] }
 0x23a   :  { %3133 = vmatprep.mubr.bf16.mxu1 %v5532_v55  ;;  %v2770_v35 = vpop.f32.mrf.mxu0  ;;  %v2358_v33 = vunpack.c.h.s8.bf16 %v822_v29  ;;  %v2295_v53 = vunpack.c.h.s8.bf16 %v791_v41 }
 0x23b   :  { %v2811_v44 = vpop.f32.mrf.mxu1  ;;  %3063 = vmatpush1.bf16.msra.mxu0 %v1558_v39  ;;  %v2327_v39 = vunpack.c.l.s8.bf16 %v823_v22  ;;  %v534_v35 = vld [vmem:[#allocation3 + $0xe50] sm:$0xff] }
 0x23c   :  { %3104 = vmatpush1.bf16.msra.mxu1 %v2070_v40  ;;  %v2771_v59 = vpop.f32.mrf.mxu0  ;;  %3064 = vmatprep.subr.bf16.mxu0 %v1527_v43  ;;  %v535_v40 = vld [vmem:[#allocation3 + $0xe58] sm:$0xff]  ;;  %v1814_v43 = vunpack.c.l.s8.bf16 %v566_v28  ;;  %v790_v44 = vld [vmem:[#allocation3 + $0x1650] sm:$0xff]  ;;  %v1750_v63 = vunpack.c.l.s8.bf16 %v534_v35 }
 0x23d   :  { %v2812_v60 = vpop.f32.mrf.mxu1  ;;  %3105 = vmatprep.subr.bf16.mxu1 %v2039_v46  ;;  %v2326_v46 = vunpack.c.l.s8.bf16 %v822_v29  ;;  %v1783_v50 = vunpack.c.h.s8.bf16 %v535_v40  ;;  %v1751_v59 = vunpack.c.l.s8.bf16 %v535_v40  ;;  %v2262_v1 = vunpack.c.l.s8.bf16 %v790_v44 }
 0x23e   :  { %v2263_v60 = vunpack.c.l.s8.bf16 %v791_v41 }
 0x23f   :  { %3065 = vmatpush1.bf16.msra.mxu0 %v1526_v56  ;;  %v1782_v56 = vunpack.c.h.s8.bf16 %v534_v35 }
 0x240   :  { %3106 = vmatpush1.bf16.msra.mxu1 %v2038_v58  ;;  %3066 = vmatprep.subr.bf16.mxu0 %v1495_v61  ;;  %v2294_v58 = vunpack.c.h.s8.bf16 %v790_v44  ;;  %v503_v61 = vld [vmem:[#allocation3 + $0xd58] sm:$0xff] }
 0x241   :  { %3107 = vmatprep.subr.bf16.mxu1 %v2007_v62  ;;  %v759_v62 = vld [vmem:[#allocation3 + $0x1558] sm:$0xff] }
 0x243   :  { %3067 = vmatpush1.bf16.msra.mxu0 %v1494_v51  ;;  %v1719_v51 = vunpack.c.h.s8.bf16 %v503_v61 }
 0x244   :  { %3108 = vmatpush1.bf16.msra.mxu1 %v2006_v52  ;;  %3068 = vmatprep.subr.bf16.mxu0 %v1463_v2  ;;  %v2231_v52 = vunpack.c.h.s8.bf16 %v759_v62  ;;  %v502_v2 = vld [vmem:[#allocation3 + $0xd50] sm:$0xff] }
 0x245   :  { %3109 = vmatprep.subr.bf16.mxu1 %v1975_v3  ;;  %v758_v3 = vld [vmem:[#allocation3 + $0x1550] sm:$0xff]  ;;  %v1718_v0 = vunpack.c.h.s8.bf16 %v502_v2  ;;  %v1686_v9 = vunpack.c.l.s8.bf16 %v502_v2 }
 0x246   :  { %v2230_v4 = vunpack.c.h.s8.bf16 %v758_v3  ;;  %v2198_v10 = vunpack.c.l.s8.bf16 %v758_v3 }
 0x247   :  { %3069 = vmatpush1.bf16.msra.mxu0 %v1462_v5  ;;  %v1687_v5 = vunpack.c.l.s8.bf16 %v503_v61 }
 0x248   :  { %3110 = vmatpush1.bf16.msra.mxu1 %v1974_v6  ;;  %3070 = vmatprep.subr.bf16.mxu0 %v1431_v7  ;;  %v2199_v6 = vunpack.c.l.s8.bf16 %v759_v62  ;;  %v471_v7 = vld [vmem:[#allocation3 + $0xc58] sm:$0xff] }
 0x249   :  { %3111 = vmatprep.subr.bf16.mxu1 %v1943_v8  ;;  %v727_v8 = vld [vmem:[#allocation3 + $0x1458] sm:$0xff] }
 0x24b   :  { %3071 = vmatpush1.bf16.msra.mxu0 %v1430_v11  ;;  %v1655_v11 = vunpack.c.h.s8.bf16 %v471_v7 }
 0x24c   :  { %3112 = vmatpush1.bf16.msra.mxu1 %v1942_v12  ;;  %3072 = vmatprep.subr.bf16.mxu0 %v1399_v13  ;;  %v2167_v12 = vunpack.c.h.s8.bf16 %v727_v8  ;;  %v470_v13 = vld [vmem:[#allocation3 + $0xc50] sm:$0xff] }
 0x24d   :  { %3113 = vmatprep.subr.bf16.mxu1 %v1911_v14  ;;  %v726_v14 = vld [vmem:[#allocation3 + $0x1450] sm:$0xff]  ;;  %v1654_v15 = vunpack.c.h.s8.bf16 %v470_v13  ;;  %v1622_v21 = vunpack.c.l.s8.bf16 %v470_v13 }
 0x24e   :  { %v2166_v16 = vunpack.c.h.s8.bf16 %v726_v14  ;;  %v2134_v22 = vunpack.c.l.s8.bf16 %v726_v14 }
 0x24f   :  { %3073 = vmatpush1.bf16.msra.mxu0 %v1398_v17  ;;  %v1623_v17 = vunpack.c.l.s8.bf16 %v471_v7 }
 0x250   :  { %3114 = vmatpush1.bf16.msra.mxu1 %v1910_v18  ;;  %3074 = vmatprep.subr.bf16.mxu0 %v1367_v19  ;;  %v2135_v18 = vunpack.c.l.s8.bf16 %v727_v8  ;;  %v185_v19 = vld [vmem:[#allocation3 + $0x368] sm:$0xff] }
 0x251   :  { %3115 = vmatprep.subr.bf16.mxu1 %v1879_v20  ;;  %v441_v20 = vld [vmem:[#allocation3 + $0xb68] sm:$0xff] }
 0x253   :  { %3075 = vmatpush1.bf16.msra.mxu0 %v1366_v24  ;;  %v1081_v24 = vunpack.c.h.s8.bf16 %v185_v19 }
 0x254   :  { %3116 = vmatpush1.bf16.msra.mxu1 %v1878_v25  ;;  %3076 = vmatprep.subr.bf16.mxu0 %v1847_v26  ;;  %v1593_v25 = vunpack.c.h.s8.bf16 %v441_v20  ;;  %v184_v26 = vld [vmem:[#allocation3 + $0x360] sm:$0xff] }
 0x255   :  { %3117 = vmatprep.subr.bf16.mxu1 %v2359_v27  ;;  %v440_v27 = vld [vmem:[#allocation3 + $0xb60] sm:$0xff]  ;;  %v1080_v28 = vunpack.c.h.s8.bf16 %v184_v26 }
 0x256   :  { %v1592_v29 = vunpack.c.h.s8.bf16 %v440_v27 }
 0x257   :  { %3077 = vmatpush2.bf16.msra.mxu0 %v1846_v30  ;;  %v1049_v30 = vunpack.c.l.s8.bf16 %v185_v19 }
 0x258   :  { %3118 = vmatpush2.bf16.msra.mxu1 %v2358_v33  ;;  %3078 = vmatprep.subr.bf16.mxu0 %v1815_v49  ;;  %v1561_v33 = vunpack.c.l.s8.bf16 %v441_v20  ;;  %v153_v49 = vld [vmem:[#allocation3 + $0x268] sm:$0xff] }
 0x259   :  { %3119 = vmatprep.subr.bf16.mxu1 %v2327_v39  ;;  %v409_v39 = vld [vmem:[#allocation3 + $0xa68] sm:$0xff]  ;;  %v1017_v44 = vunpack.c.h.s8.bf16 %v153_v49  ;;  %v985_v3 = vunpack.c.l.s8.bf16 %v153_v49 }
 0x25b   :  { %3079 = vmatpush2.bf16.msra.mxu0 %v1814_v43 }
 0x25c   :  { %3120 = vmatpush2.bf16.msra.mxu1 %v2326_v46  ;;  %3080 = vmatprep.subr.bf16.mxu0 %v1783_v50  ;;  %v1048_v46 = vunpack.c.l.s8.bf16 %v184_v26  ;;  %v1560_v50 = vunpack.c.l.s8.bf16 %v440_v27 }
 0x25d   :  { %3121 = vmatprep.subr.bf16.mxu1 %v2295_v53 }
 0x25f   :  { %3081 = vmatpush2.bf16.msra.mxu0 %v1782_v56  ;;  %v1529_v56 = vunpack.c.h.s8.bf16 %v409_v39 }
 0x260   :  { %3122 = vmatpush2.bf16.msra.mxu1 %v2294_v58  ;;  %3082 = vmatprep.subr.bf16.mxu0 %v1751_v59  ;;  %v152_v58 = vld [vmem:[#allocation3 + $0x260] sm:$0xff] }
 0x261   :  { %3123 = vmatprep.subr.bf16.mxu1 %v2263_v60  ;;  %v408_v59 = vld [vmem:[#allocation3 + $0xa60] sm:$0xff] }
 0x263   :  { %3083 = vmatpush2.bf16.msra.mxu0 %v1750_v63 }
 0x264   :  { %3124 = vmatpush2.bf16.msra.mxu1 %v2262_v1  ;;  %3084 = vmatprep.subr.bf16.mxu0 %v1719_v51  ;;  %v1016_v1 = vunpack.c.h.s8.bf16 %v152_v58  ;;  %v1528_v51 = vunpack.c.h.s8.bf16 %v408_v59 }
 0x265   :  { %3125 = vmatprep.subr.bf16.mxu1 %v2231_v52 }
 0x267   :  { %3085 = vmatpush2.bf16.msra.mxu0 %v1718_v0  ;;  %v1497_v0 = vunpack.c.l.s8.bf16 %v409_v39 }
 0x268   :  { %3126 = vmatpush2.bf16.msra.mxu1 %v2230_v4  ;;  %3086 = vmatprep.subr.bf16.mxu0 %v1687_v5  ;;  %v121_v4 = vld [vmem:[#allocation3 + $0x168] sm:$0xff]  ;;  %v984_v5 = vunpack.c.l.s8.bf16 %v152_v58 }
 0x269   :  { %3127 = vmatprep.subr.bf16.mxu1 %v2199_v6  ;;  %v1496_v6 = vunpack.c.l.s8.bf16 %v408_v59  ;;  %v953_v7 = vunpack.c.h.s8.bf16 %v121_v4  ;;  %v921_v13 = vunpack.c.l.s8.bf16 %v121_v4 }
 0x26b   :  { %3087 = vmatpush2.bf16.msra.mxu0 %v1686_v9  ;;  %v120_v9 = vld [vmem:[#allocation3 + $0x160] sm:$0xff] }
 0x26c   :  { %3128 = vmatpush2.bf16.msra.mxu1 %v2198_v10  ;;  %3088 = vmatprep.subr.bf16.mxu0 %v1655_v11  ;;  %v376_v10 = vld [vmem:[#allocation3 + $0x960] sm:$0xff]  ;;  %v952_v11 = vunpack.c.h.s8.bf16 %v120_v9 }
 0x26d   :  { %3129 = vmatprep.subr.bf16.mxu1 %v2167_v12  ;;  %v1464_v12 = vunpack.c.h.s8.bf16 %v376_v10 }
 0x26f   :  { %3089 = vmatpush2.bf16.msra.mxu0 %v1654_v15  ;;  %v89_v15 = vld [vmem:[#allocation3 + $0x68] sm:$0xff] }
 0x270   :  { %3130 = vmatpush2.bf16.msra.mxu1 %v2166_v16  ;;  %3090 = vmatprep.subr.bf16.mxu0 %v1623_v17  ;;  %v345_v16 = vld [vmem:[#allocation3 + $0x868] sm:$0xff]  ;;  %v920_v17 = vunpack.c.l.s8.bf16 %v120_v9  ;;  %v889_v19 = vunpack.c.h.s8.bf16 %v89_v15  ;;  %v857_v26 = vunpack.c.l.s8.bf16 %v89_v15 }
 0x271   :  { %3131 = vmatprep.subr.bf16.mxu1 %v2135_v18  ;;  %v1432_v18 = vunpack.c.l.s8.bf16 %v376_v10  ;;  %v1401_v20 = vunpack.c.h.s8.bf16 %v345_v16  ;;  %v1369_v27 = vunpack.c.l.s8.bf16 %v345_v16 }
 0x273   :  { %3091 = vmatpush2.bf16.msra.mxu0 %v1622_v21  ;;  %v88_v21 = vld [vmem:[#allocation3 + $0x60] sm:$0xff] }
 0x274   :  { %3132 = vmatpush2.bf16.msra.mxu1 %v2134_v22  ;;  %3142 = vmatprep.subr.bf16.mxu0 %v1081_v24  ;;  %v344_v22 = vld [vmem:[#allocation3 + $0x860] sm:$0xff]  ;;  %v888_v24 = vunpack.c.h.s8.bf16 %v88_v21 }
 0x275   :  { %3183 = vmatprep.subr.bf16.mxu1 %v1593_v25  ;;  %v1400_v25 = vunpack.c.h.s8.bf16 %v344_v22 }
 0x276   :  { %v2848_v40 = vpop.f32.mrf.mxu0  ;;  %3093 = vmatmul.mubr.bf16.vlgmr.msra.gmra.mxu0 %v5523_v48 }
 0x277   :  { %v2889_v41 = vpop.f32.mrf.mxu1  ;;  %3134 = vmatmul.mubr.bf16.vlgmr.msra.gmra.mxu1 %v5540_v23  ;;  %v2849_v43 = vadd.f32 %v2848_v40, %v5590_v34  ;;  %3143 = vmatpush1.bf16.msra.mxu0 %v1080_v28  ;;  %v313_v28 = vld [vmem:[#allocation3 + $0x768] sm:$0xff]  ;;  %v312_v40 = vld [vmem:[#allocation3 + $0x760] sm:$0xff] }
 0x278   :  { %3184 = vmatpush1.bf16.msra.mxu1 %v1592_v29  ;;  %v2850_v53 = vpop.f32.mrf.mxu0  ;;  %3144 = vmatprep.subr.bf16.mxu0 %v1049_v30  ;;  %v569_v29 = vld [vmem:[#allocation3 + $0xf68] sm:$0xff]  ;;  %v856_v30 = vunpack.c.l.s8.bf16 %v88_v21  ;;  %v1337_v49 = vunpack.c.h.s8.bf16 %v313_v28 }
 0x279   :  { %v2891_v35 = vpop.f32.mrf.mxu1  ;;  %3185 = vmatprep.subr.bf16.mxu1 %v1561_v33  ;;  %v5607_v60 = vadd.f32 %v2889_v41, %v2849_v43  ;;  %v2851_v61 = vadd.f32 %v2850_v53, %v5597_v42  ;;  %3174 = vmatprep.mubr.bf16.mxu0 %v5509_v37  ;;  %v377_v42 = vld [vmem:[#allocation3 + $0x968] sm:$0xff]  ;;  %v1368_v33 = vunpack.c.l.s8.bf16 %v344_v22  ;;  %v1849_v39 = vunpack.c.h.s8.bf16 %v569_v29  ;;  %v568_v41 = vld [vmem:[#allocation3 + $0xf60] sm:$0xff] }
 0x27a   :  { %3215 = vmatprep.mubr.bf16.mxu1 %v5513_v38  ;;  %v2852_v34 = vpop.f32.mrf.mxu0  ;;  %v1465_v8 = vunpack.c.h.s8.bf16 %v377_v42  ;;  %v1433_v14 = vunpack.c.l.s8.bf16 %v377_v42  ;;  %v1336_v43 = vunpack.c.h.s8.bf16 %v312_v40  ;;  %v1817_v53 = vunpack.c.l.s8.bf16 %v569_v29 }
 0x27b   :  { %v2893_v62 = vpop.f32.mrf.mxu1  ;;  %v5612_v63 = vadd.f32 %v2891_v35, %v2851_v61  ;;  %3145 = vmatpush1.bf16.msra.mxu0 %v1048_v46  ;;  %v1848_v46 = vunpack.c.h.s8.bf16 %v568_v41  ;;  %v281_v35 = vld [vmem:[#allocation3 + $0x668] sm:$0xff]  ;;  %v1816_v58 = vunpack.c.l.s8.bf16 %v568_v41  ;;  %v280_v34 = vld [vmem:[#allocation3 + $0x660] sm:$0xff] }
 0x27c   :  { %3186 = vmatpush1.bf16.msra.mxu1 %v1560_v50  ;;  %v2853_v52 = vpop.f32.mrf.mxu0  ;;  %3146 = vmatprep.subr.bf16.mxu0 %v1017_v44  ;;  %v1305_v50 = vunpack.c.l.s8.bf16 %v313_v28  ;;  %v537_v44 = vld [vmem:[#allocation3 + $0xe68] sm:$0xff]  ;;  %v1273_v59 = vunpack.c.h.s8.bf16 %v281_v35  ;;  %v536_v62 = vld [vmem:[#allocation3 + $0xe60] sm:$0xff]  ;;  %v1240_v4 = vunpack.c.l.s8.bf16 %v280_v34 }
 0x27d   :  { %v2894_v2 = vpop.f32.mrf.mxu1  ;;  %3187 = vmatprep.subr.bf16.mxu1 %v1529_v56  ;;  %v1304_v56 = vunpack.c.l.s8.bf16 %v312_v40  ;;  %v1785_v61 = vunpack.c.h.s8.bf16 %v537_v44  ;;  %v1241_v52 = vunpack.c.l.s8.bf16 %v281_v35  ;;  %v1752_v42 = vunpack.c.l.s8.bf16 %v536_v62 }
 0x27e   :  { %v1753_v2 = vunpack.c.l.s8.bf16 %v537_v44 }
 0x27f   :  { %3147 = vmatpush1.bf16.msra.mxu0 %v1016_v1  ;;  %v1272_v1 = vunpack.c.h.s8.bf16 %v280_v34 }
 0x280   :  { %3188 = vmatpush1.bf16.msra.mxu1 %v1528_v51  ;;  %3148 = vmatprep.subr.bf16.mxu0 %v985_v3  ;;  %v1784_v51 = vunpack.c.h.s8.bf16 %v536_v62  ;;  %v249_v3 = vld [vmem:[#allocation3 + $0x568] sm:$0xff] }
 0x281   :  { %3189 = vmatprep.subr.bf16.mxu1 %v1497_v0  ;;  %v505_v0 = vld [vmem:[#allocation3 + $0xd68] sm:$0xff] }
 0x283   :  { %3149 = vmatpush1.bf16.msra.mxu0 %v984_v5  ;;  %v1209_v5 = vunpack.c.h.s8.bf16 %v249_v3 }
 0x284   :  { %3190 = vmatpush1.bf16.msra.mxu1 %v1496_v6  ;;  %3150 = vmatprep.subr.bf16.mxu0 %v953_v7  ;;  %v1721_v6 = vunpack.c.h.s8.bf16 %v505_v0  ;;  %v248_v7 = vld [vmem:[#allocation3 + $0x560] sm:$0xff] }
 0x285   :  { %3191 = vmatprep.subr.bf16.mxu1 %v1465_v8  ;;  %v504_v8 = vld [vmem:[#allocation3 + $0xd60] sm:$0xff]  ;;  %v1208_v9 = vunpack.c.h.s8.bf16 %v248_v7  ;;  %v1176_v15 = vunpack.c.l.s8.bf16 %v248_v7 }
 0x286   :  { %v1720_v10 = vunpack.c.h.s8.bf16 %v504_v8  ;;  %v1688_v16 = vunpack.c.l.s8.bf16 %v504_v8 }
 0x287   :  { %3151 = vmatpush1.bf16.msra.mxu0 %v952_v11  ;;  %v1177_v11 = vunpack.c.l.s8.bf16 %v249_v3 }
 0x288   :  { %3192 = vmatpush1.bf16.msra.mxu1 %v1464_v12  ;;  %3152 = vmatprep.subr.bf16.mxu0 %v921_v13  ;;  %v1689_v12 = vunpack.c.l.s8.bf16 %v505_v0  ;;  %v217_v13 = vld [vmem:[#allocation3 + $0x468] sm:$0xff] }
 0x289   :  { %3193 = vmatprep.subr.bf16.mxu1 %v1433_v14  ;;  %v473_v14 = vld [vmem:[#allocation3 + $0xc68] sm:$0xff] }
 0x28b   :  { %3153 = vmatpush1.bf16.msra.mxu0 %v920_v17  ;;  %v1145_v17 = vunpack.c.h.s8.bf16 %v217_v13 }
 0x28c   :  { %3194 = vmatpush1.bf16.msra.mxu1 %v1432_v18  ;;  %3154 = vmatprep.subr.bf16.mxu0 %v889_v19  ;;  %v1657_v18 = vunpack.c.h.s8.bf16 %v473_v14  ;;  %v216_v19 = vld [vmem:[#allocation3 + $0x460] sm:$0xff] }
 0x28d   :  { %3195 = vmatprep.subr.bf16.mxu1 %v1401_v20  ;;  %v472_v20 = vld [vmem:[#allocation3 + $0xc60] sm:$0xff]  ;;  %v1144_v21 = vunpack.c.h.s8.bf16 %v216_v19  ;;  %v1112_v28 = vunpack.c.l.s8.bf16 %v216_v19 }
 0x28e   :  { %v1656_v22 = vunpack.c.h.s8.bf16 %v472_v20  ;;  %v1624_v29 = vunpack.c.l.s8.bf16 %v472_v20 }
 0x28f   :  { %3155 = vmatpush1.bf16.msra.mxu0 %v888_v24  ;;  %v1113_v24 = vunpack.c.l.s8.bf16 %v217_v13 }
 0x290   :  { %3196 = vmatpush1.bf16.msra.mxu1 %v1400_v25  ;;  %3156 = vmatprep.subr.bf16.mxu0 %v857_v26  ;;  %v1625_v25 = vunpack.c.l.s8.bf16 %v473_v14  ;;  %v697_v26 = vld [vmem:[#allocation3 + $0x1368] sm:$0xff] }
 0x291   :  { %3197 = vmatprep.subr.bf16.mxu1 %v1369_v27  ;;  %v187_v27 = vld [vmem:[#allocation3 + $0x378] sm:$0xff] }
 0x293   :  { %3157 = vmatpush1.bf16.msra.mxu0 %v856_v30  ;;  %v2105_v30 = vunpack.c.h.s8.bf16 %v697_v26 }
 0x294   :  { %3198 = vmatpush1.bf16.msra.mxu1 %v1368_v33  ;;  %3158 = vmatprep.subr.bf16.mxu0 %v1337_v49  ;;  %v1083_v33 = vunpack.c.h.s8.bf16 %v187_v27  ;;  %v696_v49 = vld [vmem:[#allocation3 + $0x1360] sm:$0xff] }
 0x295   :  { %3199 = vmatprep.subr.bf16.mxu1 %v1849_v39  ;;  %v186_v39 = vld [vmem:[#allocation3 + $0x370] sm:$0xff]  ;;  %v2104_v40 = vunpack.c.h.s8.bf16 %v696_v49 }
 0x296   :  { %v1082_v41 = vunpack.c.h.s8.bf16 %v186_v39 }
 0x297   :  { %3159 = vmatpush2.bf16.msra.mxu0 %v1336_v43  ;;  %v2073_v43 = vunpack.c.l.s8.bf16 %v697_v26 }
 0x298   :  { %3200 = vmatpush2.bf16.msra.mxu1 %v1848_v46  ;;  %3160 = vmatprep.subr.bf16.mxu0 %v1305_v50  ;;  %v1051_v46 = vunpack.c.l.s8.bf16 %v187_v27  ;;  %v665_v50 = vld [vmem:[#allocation3 + $0x1268] sm:$0xff] }
 0x299   :  { %3201 = vmatprep.subr.bf16.mxu1 %v1817_v53  ;;  %v155_v53 = vld [vmem:[#allocation3 + $0x278] sm:$0xff]  ;;  %v2041_v62 = vunpack.c.h.s8.bf16 %v665_v50  ;;  %v2009_v7 = vunpack.c.l.s8.bf16 %v665_v50 }
 0x29a   :  { %v987_v8 = vunpack.c.l.s8.bf16 %v155_v53 }
 0x29b   :  { %3161 = vmatpush2.bf16.msra.mxu0 %v1304_v56 }
 0x29c   :  { %3202 = vmatpush2.bf16.msra.mxu1 %v1816_v58  ;;  %3162 = vmatprep.subr.bf16.mxu0 %v1273_v59  ;;  %v2072_v58 = vunpack.c.l.s8.bf16 %v696_v49  ;;  %v1050_v59 = vunpack.c.l.s8.bf16 %v186_v39 }
 0x29d   :  { %3203 = vmatprep.subr.bf16.mxu1 %v1785_v61 }
 0x29f   :  { %3163 = vmatpush2.bf16.msra.mxu0 %v1272_v1  ;;  %v1019_v1 = vunpack.c.h.s8.bf16 %v155_v53 }
 0x2a0   :  { %3204 = vmatpush2.bf16.msra.mxu1 %v1784_v51  ;;  %3164 = vmatprep.subr.bf16.mxu0 %v1241_v52  ;;  %v664_v51 = vld [vmem:[#allocation3 + $0x1260] sm:$0xff]  ;;  %v154_v52 = vld [vmem:[#allocation3 + $0x270] sm:$0xff] }
 0x2a1   :  { %3205 = vmatprep.subr.bf16.mxu1 %v1753_v2 }
 0x2a3   :  { %3165 = vmatpush2.bf16.msra.mxu0 %v1240_v4  ;;  %v2040_v4 = vunpack.c.h.s8.bf16 %v664_v51 }
 0x2a4   :  { %3206 = vmatpush2.bf16.msra.mxu1 %v1752_v42  ;;  %3166 = vmatprep.subr.bf16.mxu0 %v1209_v5  ;;  %v1018_v42 = vunpack.c.h.s8.bf16 %v154_v52 }
 0x2a5   :  { %3207 = vmatprep.subr.bf16.mxu1 %v1721_v6 }
 0x2a7   :  { %3167 = vmatpush2.bf16.msra.mxu0 %v1208_v9  ;;  %v633_v9 = vld [vmem:[#allocation3 + $0x1168] sm:$0xff] }
 0x2a8   :  { %3208 = vmatpush2.bf16.msra.mxu1 %v1720_v10  ;;  %3168 = vmatprep.subr.bf16.mxu0 %v1177_v11  ;;  %v123_v10 = vld [vmem:[#allocation3 + $0x178] sm:$0xff]  ;;  %v2008_v11 = vunpack.c.l.s8.bf16 %v664_v51  ;;  %v1977_v13 = vunpack.c.h.s8.bf16 %v633_v9  ;;  %v1945_v19 = vunpack.c.l.s8.bf16 %v633_v9  ;;  %v761_v9 = vld [vmem:[#allocation3 + $0x1568] sm:$0xff] }
 0x2a9   :  { %3209 = vmatprep.subr.bf16.mxu1 %v1689_v12  ;;  %v986_v12 = vunpack.c.l.s8.bf16 %v154_v52  ;;  %v955_v14 = vunpack.c.h.s8.bf16 %v123_v10  ;;  %v923_v20 = vunpack.c.l.s8.bf16 %v123_v10  ;;  %v251_v10 = vld [vmem:[#allocation3 + $0x578] sm:$0xff] }
 0x2ab   :  { %3169 = vmatpush2.bf16.msra.mxu0 %v1176_v15  ;;  %v632_v15 = vld [vmem:[#allocation3 + $0x1160] sm:$0xff] }
 0x2ac   :  { %3210 = vmatpush2.bf16.msra.mxu1 %v1688_v16  ;;  %3170 = vmatprep.subr.bf16.mxu0 %v1145_v17  ;;  %v122_v16 = vld [vmem:[#allocation3 + $0x170] sm:$0xff]  ;;  %v1976_v17 = vunpack.c.h.s8.bf16 %v632_v15 }
 0x2ad   :  { %3211 = vmatprep.subr.bf16.mxu1 %v1657_v18  ;;  %v954_v18 = vunpack.c.h.s8.bf16 %v122_v16 }
 0x2af   :  { %3171 = vmatpush2.bf16.msra.mxu0 %v1144_v21  ;;  %v601_v21 = vld [vmem:[#allocation3 + $0x1068] sm:$0xff] }
 0x2b0   :  { %3212 = vmatpush2.bf16.msra.mxu1 %v1656_v22  ;;  %3172 = vmatprep.subr.bf16.mxu0 %v1113_v24  ;;  %v91_v22 = vld [vmem:[#allocation3 + $0x78] sm:$0xff]  ;;  %v1944_v24 = vunpack.c.l.s8.bf16 %v632_v15  ;;  %v1913_v26 = vunpack.c.h.s8.bf16 %v601_v21  ;;  %v1881_v49 = vunpack.c.l.s8.bf16 %v601_v21  ;;  %v760_v15 = vld [vmem:[#allocation3 + $0x1560] sm:$0xff]  ;;  %v729_v21 = vld [vmem:[#allocation3 + $0x1468] sm:$0xff] }
 0x2b1   :  { %3213 = vmatprep.subr.bf16.mxu1 %v1625_v25  ;;  %v922_v25 = vunpack.c.l.s8.bf16 %v122_v16  ;;  %v891_v27 = vunpack.c.h.s8.bf16 %v91_v22  ;;  %v859_v39 = vunpack.c.l.s8.bf16 %v91_v22  ;;  %v250_v16 = vld [vmem:[#allocation3 + $0x570] sm:$0xff]  ;;  %v219_v22 = vld [vmem:[#allocation3 + $0x478] sm:$0xff] }
 0x2b3   :  { %3173 = vmatpush2.bf16.msra.mxu0 %v1112_v28  ;;  %v600_v28 = vld [vmem:[#allocation3 + $0x1060] sm:$0xff] }
 0x2b4   :  { %3214 = vmatpush2.bf16.msra.mxu1 %v1624_v29  ;;  %3224 = vmatprep.subr.bf16.mxu0 %v2105_v30  ;;  %v90_v29 = vld [vmem:[#allocation3 + $0x70] sm:$0xff]  ;;  %v1912_v30 = vunpack.c.h.s8.bf16 %v600_v28 }
 0x2b5   :  { %3265 = vmatprep.subr.bf16.mxu1 %v1083_v33  ;;  %v890_v33 = vunpack.c.h.s8.bf16 %v90_v29 }
 0x2b6   :  { %v2930_v35 = vpop.f32.mrf.mxu0  ;;  %3175 = vmatmul.mubr.bf16.vlgmr.msra.gmra.mxu0 %v5519_v47 }
 0x2b7   :  { %v2971_v44 = vpop.f32.mrf.mxu1  ;;  %3216 = vmatmul.mubr.bf16.vlgmr.msra.gmra.mxu1 %v5523_v48  ;;  %3225 = vmatpush1.bf16.msra.mxu0 %v2104_v40  ;;  %v825_v40 = vld [vmem:[#allocation3 + $0x1768] sm:$0xff] }
 0x2b8   :  { %v5616_v56 = vadd.f32 %v2971_v44, %v2930_v35  ;;  %3266 = vmatpush1.bf16.msra.mxu1 %v1082_v41  ;;  %v2932_v61 = vpop.f32.mrf.mxu0  ;;  %3226 = vmatprep.subr.bf16.mxu0 %v2073_v43  ;;  %v315_v41 = vld [vmem:[#allocation3 + $0x778] sm:$0xff]  ;;  %v1880_v43 = vunpack.c.l.s8.bf16 %v600_v28  ;;  %v2361_v50 = vunpack.c.h.s8.bf16 %v825_v40  ;;  %v824_v35 = vld [vmem:[#allocation3 + $0x1760] sm:$0xff]  ;;  %v314_v44 = vld [vmem:[#allocation3 + $0x770] sm:$0xff] }
 0x2b9   :  { %v2973_v34 = vpop.f32.mrf.mxu1  ;;  %3267 = vmatprep.subr.bf16.mxu1 %v1051_v46  ;;  %3256 = vmatprep.mubr.bf16.mxu0 %v5532_v55  ;;  %v858_v46 = vunpack.c.l.s8.bf16 %v90_v29  ;;  %v1339_v53 = vunpack.c.h.s8.bf16 %v315_v41  ;;  %v2328_v51 = vunpack.c.l.s8.bf16 %v824_v35  ;;  %v1306_v52 = vunpack.c.l.s8.bf16 %v314_v44  ;;  %v728_v28 = vld [vmem:[#allocation3 + $0x1460] sm:$0xff]  ;;  %v218_v29 = vld [vmem:[#allocation3 + $0x470] sm:$0xff] }
 0x2ba   :  { %v5618_v2 = vadd.f32 %v2973_v34, %v2932_v61  ;;  %3297 = vmatprep.mubr.bf16.mxu1 %v5509_v37  ;;  %v2934_v3 = vpop.f32.mrf.mxu0  ;;  %v2329_v61 = vunpack.c.l.s8.bf16 %v825_v40  ;;  %v1307_v34 = vunpack.c.l.s8.bf16 %v315_v41  ;;  %v443_v40 = vld [vmem:[#allocation3 + $0xb78] sm:$0xff] }
 0x2bb   :  { %v2975_v0 = vpop.f32.mrf.mxu1  ;;  %3227 = vmatpush1.bf16.msra.mxu0 %v2072_v58  ;;  %v2360_v58 = vunpack.c.h.s8.bf16 %v824_v35  ;;  %v699_v41 = vld [vmem:[#allocation3 + $0x1378] sm:$0xff]  ;;  %v442_v35 = vld [vmem:[#allocation3 + $0xb70] sm:$0xff] }
 0x2bc   :  { %3268 = vmatpush1.bf16.msra.mxu1 %v1050_v59  ;;  %v2935_v5 = vpop.f32.mrf.mxu0  ;;  %3228 = vmatprep.subr.bf16.mxu0 %v2041_v62  ;;  %v1338_v59 = vunpack.c.h.s8.bf16 %v314_v44  ;;  %v793_v62 = vld [vmem:[#allocation3 + $0x1668] sm:$0xff]  ;;  %v698_v44 = vld [vmem:[#allocation3 + $0x1370] sm:$0xff] }
 0x2bd   :  { %v2976_v6 = vpop.f32.mrf.mxu1  ;;  %3269 = vmatprep.subr.bf16.mxu1 %v1019_v1  ;;  %v283_v1 = vld [vmem:[#allocation3 + $0x678] sm:$0xff]  ;;  %v2297_v3 = vunpack.c.h.s8.bf16 %v793_v62 }
 0x2be   :  { %v1275_v0 = vunpack.c.h.s8.bf16 %v283_v1 }
 0x2bf   :  { %3229 = vmatpush1.bf16.msra.mxu0 %v2040_v4  ;;  %v792_v4 = vld [vmem:[#allocation3 + $0x1660] sm:$0xff] }
 0x2c0   :  { %3270 = vmatpush1.bf16.msra.mxu1 %v1018_v42  ;;  %3230 = vmatprep.subr.bf16.mxu0 %v2009_v7  ;;  %v282_v42 = vld [vmem:[#allocation3 + $0x670] sm:$0xff]  ;;  %v2296_v5 = vunpack.c.h.s8.bf16 %v792_v4  ;;  %v2265_v7 = vunpack.c.l.s8.bf16 %v793_v62  ;;  %v411_v62 = vld [vmem:[#allocation3 + $0xa78] sm:$0xff] }
 0x2c1   :  { %3271 = vmatprep.subr.bf16.mxu1 %v987_v8  ;;  %v1274_v6 = vunpack.c.h.s8.bf16 %v282_v42  ;;  %v1243_v8 = vunpack.c.l.s8.bf16 %v283_v1  ;;  %v667_v1 = vld [vmem:[#allocation3 + $0x1278] sm:$0xff] }
 0x2c3   :  { %3231 = vmatpush1.bf16.msra.mxu0 %v2008_v11  ;;  %v2264_v11 = vunpack.c.l.s8.bf16 %v792_v4  ;;  %v2074_v4 = vunpack.c.l.s8.bf16 %v698_v44 }
 0x2c4   :  { %3272 = vmatpush1.bf16.msra.mxu1 %v986_v12  ;;  %3232 = vmatprep.subr.bf16.mxu0 %v1977_v13  ;;  %v1242_v12 = vunpack.c.l.s8.bf16 %v282_v42  ;;  %v2233_v13 = vunpack.c.h.s8.bf16 %v761_v9 }
 0x2c5   :  { %3273 = vmatprep.subr.bf16.mxu1 %v955_v14  ;;  %v1211_v14 = vunpack.c.h.s8.bf16 %v251_v10 }
 0x2c7   :  { %3233 = vmatpush1.bf16.msra.mxu0 %v1976_v17  ;;  %v2232_v17 = vunpack.c.h.s8.bf16 %v760_v15 }
 0x2c8   :  { %3274 = vmatpush1.bf16.msra.mxu1 %v954_v18  ;;  %3234 = vmatprep.subr.bf16.mxu0 %v1945_v19  ;;  %v1210_v18 = vunpack.c.h.s8.bf16 %v250_v16  ;;  %v2201_v19 = vunpack.c.l.s8.bf16 %v761_v9  ;;  %v666_v9 = vld [vmem:[#allocation3 + $0x1270] sm:$0xff] }
 0x2c9   :  { %3275 = vmatprep.subr.bf16.mxu1 %v923_v20  ;;  %v1179_v20 = vunpack.c.l.s8.bf16 %v251_v10 }
 0x2cb   :  { %3235 = vmatpush1.bf16.msra.mxu0 %v1944_v24  ;;  %v2200_v24 = vunpack.c.l.s8.bf16 %v760_v15 }
 0x2cc   :  { %3276 = vmatpush1.bf16.msra.mxu1 %v922_v25  ;;  %3236 = vmatprep.subr.bf16.mxu0 %v1913_v26  ;;  %v1178_v25 = vunpack.c.l.s8.bf16 %v250_v16  ;;  %v2169_v26 = vunpack.c.h.s8.bf16 %v729_v21  ;;  %v1499_v16 = vunpack.c.l.s8.bf16 %v411_v62 }
 0x2cd   :  { %3277 = vmatprep.subr.bf16.mxu1 %v891_v27  ;;  %v1147_v27 = vunpack.c.h.s8.bf16 %v219_v22 }
 0x2cf   :  { %3237 = vmatpush1.bf16.msra.mxu0 %v1912_v30  ;;  %v2168_v30 = vunpack.c.h.s8.bf16 %v728_v28 }
 0x2d0   :  { %3278 = vmatpush1.bf16.msra.mxu1 %v890_v33  ;;  %3238 = vmatprep.subr.bf16.mxu0 %v1881_v49  ;;  %v1146_v33 = vunpack.c.h.s8.bf16 %v218_v29  ;;  %v2137_v49 = vunpack.c.l.s8.bf16 %v729_v21 }
 0x2d1   :  { %3279 = vmatprep.subr.bf16.mxu1 %v859_v39  ;;  %v1115_v39 = vunpack.c.l.s8.bf16 %v219_v22 }
 0x2d3   :  { %3239 = vmatpush1.bf16.msra.mxu0 %v1880_v43  ;;  %v2136_v43 = vunpack.c.l.s8.bf16 %v728_v28 }
 0x2d4   :  { %3280 = vmatpush1.bf16.msra.mxu1 %v858_v46  ;;  %3240 = vmatprep.subr.bf16.mxu0 %v2361_v50  ;;  %v1114_v46 = vunpack.c.l.s8.bf16 %v218_v29  ;;  %v1595_v50 = vunpack.c.h.s8.bf16 %v443_v40 }
 0x2d5   :  { %3281 = vmatprep.subr.bf16.mxu1 %v1339_v53  ;;  %v2107_v53 = vunpack.c.h.s8.bf16 %v699_v41 }
 0x2d7   :  { %3241 = vmatpush2.bf16.msra.mxu0 %v2360_v58  ;;  %v1594_v58 = vunpack.c.h.s8.bf16 %v442_v35 }
 0x2d8   :  { %3282 = vmatpush2.bf16.msra.mxu1 %v1338_v59  ;;  %3242 = vmatprep.subr.bf16.mxu0 %v2329_v61  ;;  %v2106_v59 = vunpack.c.h.s8.bf16 %v698_v44  ;;  %v1563_v61 = vunpack.c.l.s8.bf16 %v443_v40 }
 0x2d9   :  { %3283 = vmatprep.subr.bf16.mxu1 %v1307_v34  ;;  %v2075_v34 = vunpack.c.l.s8.bf16 %v699_v41 }
 0x2db   :  { %3243 = vmatpush2.bf16.msra.mxu0 %v2328_v51 }
 0x2dc   :  { %3284 = vmatpush2.bf16.msra.mxu1 %v1306_v52  ;;  %3244 = vmatprep.subr.bf16.mxu0 %v2297_v3 }
 0x2dd   :  { %3285 = vmatprep.subr.bf16.mxu1 %v1275_v0  ;;  %v1562_v0 = vunpack.c.l.s8.bf16 %v442_v35 }
 0x2df   :  { %3245 = vmatpush2.bf16.msra.mxu0 %v2296_v5 }
 0x2e0   :  { %3286 = vmatpush2.bf16.msra.mxu1 %v1274_v6  ;;  %3246 = vmatprep.subr.bf16.mxu0 %v2265_v7  ;;  %v1531_v6 = vunpack.c.h.s8.bf16 %v411_v62  ;;  %v2043_v7 = vunpack.c.h.s8.bf16 %v667_v1 }
 0x2e1   :  { %3287 = vmatprep.subr.bf16.mxu1 %v1243_v8  ;;  %v410_v8 = vld [vmem:[#allocation3 + $0xa70] sm:$0xff] }
 0x2e3   :  { %3247 = vmatpush2.bf16.msra.mxu0 %v2264_v11 }
 0x2e4   :  { %3288 = vmatpush2.bf16.msra.mxu1 %v1242_v12  ;;  %3248 = vmatprep.subr.bf16.mxu0 %v2233_v13  ;;  %v1530_v12 = vunpack.c.h.s8.bf16 %v410_v8  ;;  %v2042_v13 = vunpack.c.h.s8.bf16 %v666_v9 }
 0x2e5   :  { %3289 = vmatprep.subr.bf16.mxu1 %v1211_v14 }
 0x2e7   :  { %3249 = vmatpush2.bf16.msra.mxu0 %v2232_v17  ;;  %v2011_v17 = vunpack.c.l.s8.bf16 %v667_v1 }
 0x2e8   :  { %3290 = vmatpush2.bf16.msra.mxu1 %v1210_v18  ;;  %3250 = vmatprep.subr.bf16.mxu0 %v2201_v19  ;;  %v379_v18 = vld [vmem:[#allocation3 + $0x978] sm:$0xff] }
 0x2e9   :  { %3291 = vmatprep.subr.bf16.mxu1 %v1179_v20  ;;  %v635_v19 = vld [vmem:[#allocation3 + $0x1178] sm:$0xff]  ;;  %v2010_v20 = vunpack.c.l.s8.bf16 %v666_v9  ;;  %v1467_v21 = vunpack.c.h.s8.bf16 %v379_v18  ;;  %v1435_v28 = vunpack.c.l.s8.bf16 %v379_v18 }
 0x2ea   :  { %v1979_v22 = vunpack.c.h.s8.bf16 %v635_v19  ;;  %v1947_v29 = vunpack.c.l.s8.bf16 %v635_v19  ;;  %v795_v9 = vld [vmem:[#allocation3 + $0x1678] sm:$0xff] }
 0x2eb   :  { %3251 = vmatpush2.bf16.msra.mxu0 %v2200_v24  ;;  %v378_v24 = vld [vmem:[#allocation3 + $0x970] sm:$0xff]  ;;  %v2267_v19 = vunpack.c.l.s8.bf16 %v795_v9 }
 0x2ec   :  { %3292 = vmatpush2.bf16.msra.mxu1 %v1178_v25  ;;  %3252 = vmatprep.subr.bf16.mxu0 %v2169_v26  ;;  %v634_v25 = vld [vmem:[#allocation3 + $0x1170] sm:$0xff]  ;;  %v1466_v26 = vunpack.c.h.s8.bf16 %v378_v24 }
 0x2ed   :  { %3293 = vmatprep.subr.bf16.mxu1 %v1147_v27  ;;  %v1978_v27 = vunpack.c.h.s8.bf16 %v634_v25 }
 0x2ef   :  { %3253 = vmatpush2.bf16.msra.mxu0 %v2168_v30  ;;  %v347_v30 = vld [vmem:[#allocation3 + $0x878] sm:$0xff] }
 0x2f0   :  { %3294 = vmatpush2.bf16.msra.mxu1 %v1146_v33  ;;  %3254 = vmatprep.subr.bf16.mxu0 %v2137_v49  ;;  %v603_v33 = vld [vmem:[#allocation3 + $0x1078] sm:$0xff]  ;;  %v1434_v49 = vunpack.c.l.s8.bf16 %v378_v24  ;;  %v1403_v40 = vunpack.c.h.s8.bf16 %v347_v30  ;;  %v1371_v35 = vunpack.c.l.s8.bf16 %v347_v30 }
 0x2f1   :  { %3295 = vmatprep.subr.bf16.mxu1 %v1115_v39  ;;  %v1946_v39 = vunpack.c.l.s8.bf16 %v634_v25  ;;  %v1915_v41 = vunpack.c.h.s8.bf16 %v603_v33  ;;  %v1883_v44 = vunpack.c.l.s8.bf16 %v603_v33 }
 0x2f3   :  { %3255 = vmatpush2.bf16.msra.mxu0 %v2136_v43  ;;  %v346_v43 = vld [vmem:[#allocation3 + $0x870] sm:$0xff] }
 0x2f4   :  { %3296 = vmatpush2.bf16.msra.mxu1 %v1114_v46  ;;  %3306 = vmatprep.subr.bf16.mxu0 %v1595_v50  ;;  %v602_v46 = vld [vmem:[#allocation3 + $0x1070] sm:$0xff]  ;;  %v1402_v50 = vunpack.c.h.s8.bf16 %v346_v43 }
 0x2f5   :  { %3347 = vmatprep.subr.bf16.mxu1 %v2107_v53  ;;  %v1914_v53 = vunpack.c.h.s8.bf16 %v602_v46 }
 0x2f6   :  { %v3012_v51 = vpop.f32.mrf.mxu0  ;;  %3257 = vmatmul.mubr.bf16.vlgmr.msra.gmra.mxu0 %v5540_v23 }
 0x2f7   :  { %v5622_v52 = vpop.f32.mrf.mxu1  ;;  %3298 = vmatmul.mubr.bf16.vlgmr.msra.gmra.mxu1 %v5519_v47  ;;  %v5627_v3 = vadd.f32 %v3012_v51, %v5616_v56  ;;  %3307 = vmatpush1.bf16.msra.mxu0 %v1594_v58  ;;  %v571_v58 = vld [vmem:[#allocation3 + $0xf78] sm:$0xff]  ;;  %v570_v51 = vld [vmem:[#allocation3 + $0xf70] sm:$0xff] }
 0x2f8   :  { %3348 = vmatpush1.bf16.msra.mxu1 %v2106_v59  ;;  %v3014_v42 = vpop.f32.mrf.mxu0  ;;  %3308 = vmatprep.subr.bf16.mxu0 %v1563_v61  ;;  %v827_v59 = vld [vmem:[#allocation3 + $0x1778] sm:$0xff]  ;;  %v1370_v61 = vunpack.c.l.s8.bf16 %v346_v43  ;;  %v1851_v62 = vunpack.c.h.s8.bf16 %v571_v58 }
 0x2f9   :  { %v5629_v5 = vpop.f32.mrf.mxu1  ;;  %3349 = vmatprep.subr.bf16.mxu1 %v2075_v34  ;;  %v5632_v10 = vadd.f32 %v3014_v42, %v5618_v2  ;;  %3338 = vmatprep.mubr.bf16.mxu0 %v5513_v38  ;;  %v1498_v2 = vunpack.c.l.s8.bf16 %v410_v8  ;;  %v1882_v34 = vunpack.c.l.s8.bf16 %v602_v46  ;;  %v2363_v1 = vunpack.c.h.s8.bf16 %v827_v59  ;;  %v539_v8 = vld [vmem:[#allocation3 + $0xe78] sm:$0xff] }
 0x2fa   :  { %3379 = vmatprep.mubr.bf16.mxu1 %v5532_v55  ;;  %v3016_v56 = vpop.f32.mrf.mxu0  ;;  %v1755_v18 = vunpack.c.l.s8.bf16 %v539_v8 }
 0x2fb   :  { %v3057_v11 = vpop.f32.mrf.mxu1  ;;  %3309 = vmatpush1.bf16.msra.mxu0 %v1562_v0  ;;  %v826_v0 = vld [vmem:[#allocation3 + $0x1770] sm:$0xff]  ;;  %v1818_v56 = vunpack.c.l.s8.bf16 %v570_v51 }
 0x2fc   :  { %3350 = vmatpush1.bf16.msra.mxu1 %v2074_v4  ;;  %v3017_v14 = vpop.f32.mrf.mxu0  ;;  %3310 = vmatprep.subr.bf16.mxu0 %v1531_v6  ;;  %v1850_v4 = vunpack.c.h.s8.bf16 %v570_v51  ;;  %v2362_v42 = vunpack.c.h.s8.bf16 %v826_v0  ;;  %v1819_v6 = vunpack.c.l.s8.bf16 %v571_v58  ;;  %v2330_v11 = vunpack.c.l.s8.bf16 %v826_v0 }
 0x2fd   :  { %v3058_v15 = vpop.f32.mrf.mxu1  ;;  %3351 = vmatprep.subr.bf16.mxu1 %v2043_v7  ;;  %v2331_v7 = vunpack.c.l.s8.bf16 %v827_v59  ;;  %v538_v14 = vld [vmem:[#allocation3 + $0xe70] sm:$0xff] }
 0x2fe   :  { %v794_v15 = vld [vmem:[#allocation3 + $0x1670] sm:$0xff] }
 0x2ff   :  { %3311 = vmatpush1.bf16.msra.mxu0 %v1530_v12  ;;  %v1787_v12 = vunpack.c.h.s8.bf16 %v539_v8 }
 0x300   :  { %3352 = vmatpush1.bf16.msra.mxu1 %v2042_v13  ;;  %3312 = vmatprep.subr.bf16.mxu0 %v1499_v16  ;;  %v2299_v13 = vunpack.c.h.s8.bf16 %v795_v9  ;;  %v1786_v16 = vunpack.c.h.s8.bf16 %v538_v14 }
 0x301   :  { %3353 = vmatprep.subr.bf16.mxu1 %v2011_v17  ;;  %v2298_v17 = vunpack.c.h.s8.bf16 %v794_v15 }
 0x303   :  { %3313 = vmatpush1.bf16.msra.mxu0 %v1498_v2  ;;  %v507_v2 = vld [vmem:[#allocation3 + $0xd78] sm:$0xff] }
 0x304   :  { %3354 = vmatpush1.bf16.msra.mxu1 %v2010_v20  ;;  %3314 = vmatprep.subr.bf16.mxu0 %v1467_v21  ;;  %v763_v20 = vld [vmem:[#allocation3 + $0x1578] sm:$0xff]  ;;  %v1754_v21 = vunpack.c.l.s8.bf16 %v538_v14  ;;  %v1723_v24 = vunpack.c.h.s8.bf16 %v507_v2  ;;  %v1691_v30 = vunpack.c.l.s8.bf16 %v507_v2 }
 0x305   :  { %3355 = vmatprep.subr.bf16.mxu1 %v1979_v22  ;;  %v2266_v22 = vunpack.c.l.s8.bf16 %v794_v15  ;;  %v2235_v25 = vunpack.c.h.s8.bf16 %v763_v20  ;;  %v2203_v33 = vunpack.c.l.s8.bf16 %v763_v20  ;;  %v156_v20 = vld [vmem:[#allocation3 + $0x280] sm:$0xff] }
 0x307   :  { %3315 = vmatpush1.bf16.msra.mxu0 %v1466_v26  ;;  %v506_v26 = vld [vmem:[#allocation3 + $0xd70] sm:$0xff] }
 0x308   :  { %3356 = vmatpush1.bf16.msra.mxu1 %v1978_v27  ;;  %3316 = vmatprep.subr.bf16.mxu0 %v1435_v28  ;;  %v762_v27 = vld [vmem:[#allocation3 + $0x1570] sm:$0xff]  ;;  %v1722_v28 = vunpack.c.h.s8.bf16 %v506_v26 }
 0x309   :  { %3357 = vmatprep.subr.bf16.mxu1 %v1947_v29  ;;  %v2234_v29 = vunpack.c.h.s8.bf16 %v762_v27 }
 0x30b   :  { %3317 = vmatpush1.bf16.msra.mxu0 %v1434_v49  ;;  %v475_v49 = vld [vmem:[#allocation3 + $0xc78] sm:$0xff] }
 0x30c   :  { %3358 = vmatpush1.bf16.msra.mxu1 %v1946_v39  ;;  %3318 = vmatprep.subr.bf16.mxu0 %v1403_v40  ;;  %v731_v39 = vld [vmem:[#allocation3 + $0x1478] sm:$0xff]  ;;  %v1690_v40 = vunpack.c.l.s8.bf16 %v506_v26  ;;  %v1659_v43 = vunpack.c.h.s8.bf16 %v475_v49  ;;  %v1627_v58 = vunpack.c.l.s8.bf16 %v475_v49 }
 0x30d   :  { %3359 = vmatprep.subr.bf16.mxu1 %v1915_v41  ;;  %v2202_v41 = vunpack.c.l.s8.bf16 %v762_v27  ;;  %v2171_v46 = vunpack.c.h.s8.bf16 %v731_v39  ;;  %v2139_v59 = vunpack.c.l.s8.bf16 %v731_v39  ;;  %v1020_v27 = vunpack.c.h.s8.bf16 %v156_v20  ;;  %v125_v39 = vld [vmem:[#allocation3 + $0x188] sm:$0xff] }
 0x30f   :  { %3319 = vmatpush1.bf16.msra.mxu0 %v1402_v50  ;;  %v474_v50 = vld [vmem:[#allocation3 + $0xc70] sm:$0xff] }
 0x310   :  { %3360 = vmatpush1.bf16.msra.mxu1 %v1914_v53  ;;  %3320 = vmatprep.subr.bf16.mxu0 %v1371_v35  ;;  %v730_v53 = vld [vmem:[#allocation3 + $0x1470] sm:$0xff]  ;;  %v1658_v35 = vunpack.c.h.s8.bf16 %v474_v50 }
 0x311   :  { %3361 = vmatprep.subr.bf16.mxu1 %v1883_v44  ;;  %v2170_v44 = vunpack.c.h.s8.bf16 %v730_v53 }
 0x313   :  { %3321 = vmatpush1.bf16.msra.mxu0 %v1370_v61  ;;  %v189_v61 = vld [vmem:[#allocation3 + $0x388] sm:$0xff] }
 0x314   :  { %3362 = vmatpush1.bf16.msra.mxu1 %v1882_v34  ;;  %3322 = vmatprep.subr.bf16.mxu0 %v1851_v62  ;;  %v445_v34 = vld [vmem:[#allocation3 + $0xb88] sm:$0xff]  ;;  %v1626_v62 = vunpack.c.l.s8.bf16 %v474_v50  ;;  %v1085_v51 = vunpack.c.h.s8.bf16 %v189_v61  ;;  %v1053_v8 = vunpack.c.l.s8.bf16 %v189_v61  ;;  %v124_v50 = vld [vmem:[#allocation3 + $0x180] sm:$0xff] }
 0x315   :  { %3363 = vmatprep.subr.bf16.mxu1 %v2363_v1  ;;  %v2138_v1 = vunpack.c.l.s8.bf16 %v730_v53  ;;  %v1597_v0 = vunpack.c.h.s8.bf16 %v445_v34  ;;  %v1565_v9 = vunpack.c.l.s8.bf16 %v445_v34  ;;  %v380_v53 = vld [vmem:[#allocation3 + $0x980] sm:$0xff]  ;;  %v93_v61 = vld [vmem:[#allocation3 + $0x88] sm:$0xff] }
 0x316   :  { %v349_v34 = vld [vmem:[#allocation3 + $0x888] sm:$0xff] }
 0x317   :  { %3323 = vmatpush2.bf16.msra.mxu0 %v1850_v4  ;;  %v188_v4 = vld [vmem:[#allocation3 + $0x380] sm:$0xff] }
 0x318   :  { %3364 = vmatpush2.bf16.msra.mxu1 %v2362_v42  ;;  %3324 = vmatprep.subr.bf16.mxu0 %v1819_v6  ;;  %v444_v42 = vld [vmem:[#allocation3 + $0xb80] sm:$0xff]  ;;  %v1084_v6 = vunpack.c.h.s8.bf16 %v188_v4  ;;  %v1052_v15 = vunpack.c.l.s8.bf16 %v188_v4 }
 0x319   :  { %3365 = vmatprep.subr.bf16.mxu1 %v2331_v7  ;;  %v1596_v7 = vunpack.c.h.s8.bf16 %v444_v42  ;;  %v92_v4 = vld [vmem:[#allocation3 + $0x80] sm:$0xff] }
 0x31b   :  { %3325 = vmatpush2.bf16.msra.mxu0 %v1818_v56  ;;  %v157_v56 = vld [vmem:[#allocation3 + $0x288] sm:$0xff] }
 0x31c   :  { %3366 = vmatpush2.bf16.msra.mxu1 %v2330_v11  ;;  %3326 = vmatprep.subr.bf16.mxu0 %v1787_v12  ;;  %v413_v11 = vld [vmem:[#allocation3 + $0xa88] sm:$0xff] }
 0x31d   :  { %3367 = vmatprep.subr.bf16.mxu1 %v2299_v13  ;;  %v1533_v2 = vunpack.c.h.s8.bf16 %v413_v11  ;;  %v1501_v49 = vunpack.c.l.s8.bf16 %v413_v11  ;;  %v573_v11 = vld [vmem:[#allocation3 + $0xf88] sm:$0xff] }
 0x31f   :  { %3327 = vmatpush2.bf16.msra.mxu0 %v1786_v16  ;;  %v1564_v16 = vunpack.c.l.s8.bf16 %v444_v42  ;;  %v348_v42 = vld [vmem:[#allocation3 + $0x880] sm:$0xff] }
 0x320   :  { %3368 = vmatpush2.bf16.msra.mxu1 %v2298_v17  ;;  %3328 = vmatprep.subr.bf16.mxu0 %v1755_v18 }
 0x321   :  { %3369 = vmatprep.subr.bf16.mxu1 %v2267_v19  ;;  %v1021_v19 = vunpack.c.h.s8.bf16 %v157_v56 }
 0x323   :  { %3329 = vmatpush2.bf16.msra.mxu0 %v1754_v21  ;;  %v412_v21 = vld [vmem:[#allocation3 + $0xa80] sm:$0xff] }
 0x324   :  { %3370 = vmatpush2.bf16.msra.mxu1 %v2266_v22  ;;  %3330 = vmatprep.subr.bf16.mxu0 %v1723_v24 }
 0x325   :  { %3371 = vmatprep.subr.bf16.mxu1 %v2235_v25 }
 0x327   :  { %3331 = vmatpush2.bf16.msra.mxu0 %v1722_v28  ;;  %v1532_v28 = vunpack.c.h.s8.bf16 %v412_v21 }
 0x328   :  { %3372 = vmatpush2.bf16.msra.mxu1 %v2234_v29  ;;  %3332 = vmatprep.subr.bf16.mxu0 %v1691_v30 }
 0x329   :  { %3373 = vmatprep.subr.bf16.mxu1 %v2203_v33  ;;  %v989_v33 = vunpack.c.l.s8.bf16 %v157_v56  ;;  %v317_v56 = vld [vmem:[#allocation3 + $0x788] sm:$0xff] }
 0x32b   :  { %3333 = vmatpush2.bf16.msra.mxu0 %v1690_v40  ;;  %v988_v40 = vunpack.c.l.s8.bf16 %v156_v20  ;;  %v1821_v20 = vunpack.c.l.s8.bf16 %v573_v11 }
 0x32c   :  { %3374 = vmatpush2.bf16.msra.mxu1 %v2202_v41  ;;  %3334 = vmatprep.subr.bf16.mxu0 %v1659_v43  ;;  %v1500_v41 = vunpack.c.l.s8.bf16 %v412_v21  ;;  %v957_v43 = vunpack.c.h.s8.bf16 %v125_v39  ;;  %v285_v21 = vld [vmem:[#allocation3 + $0x688] sm:$0xff] }
 0x32d   :  { %3375 = vmatprep.subr.bf16.mxu1 %v2171_v46 }
 0x32f   :  { %3335 = vmatpush2.bf16.msra.mxu0 %v1658_v35  ;;  %v956_v35 = vunpack.c.h.s8.bf16 %v124_v50 }
 0x330   :  { %3376 = vmatpush2.bf16.msra.mxu1 %v2170_v44  ;;  %3336 = vmatprep.subr.bf16.mxu0 %v1627_v58  ;;  %v1468_v44 = vunpack.c.h.s8.bf16 %v380_v53  ;;  %v925_v58 = vunpack.c.l.s8.bf16 %v125_v39  ;;  %v1245_v39 = vunpack.c.l.s8.bf16 %v285_v21 }
 0x331   :  { %3377 = vmatprep.subr.bf16.mxu1 %v2139_v59 }
 0x333   :  { %3337 = vmatpush2.bf16.msra.mxu0 %v1626_v62  ;;  %v924_v62 = vunpack.c.l.s8.bf16 %v124_v50 }
 0x334   :  { %3378 = vmatpush2.bf16.msra.mxu1 %v2138_v1  ;;  %3388 = vmatprep.subr.bf16.mxu0 %v1085_v51  ;;  %v1436_v1 = vunpack.c.l.s8.bf16 %v380_v53  ;;  %v893_v51 = vunpack.c.h.s8.bf16 %v93_v61 }
 0x335   :  { %3429 = vmatprep.subr.bf16.mxu1 %v1597_v0  ;;  %v1405_v0 = vunpack.c.h.s8.bf16 %v349_v34 }
 0x336   :  { %v3094_v12 = vpop.f32.mrf.mxu0  ;;  %3339 = vmatmul.mubr.bf16.vlgmr.msra.gmra.mxu0 %v5523_v48 }
 0x337   :  { %v3135_v13 = vpop.f32.mrf.mxu1  ;;  %3380 = vmatmul.mubr.bf16.vlgmr.msra.gmra.mxu1 %v5540_v23  ;;  %v3095_v14 = vadd.f32 %v3094_v12, %v5622_v52  ;;  %3389 = vmatpush1.bf16.msra.mxu0 %v1084_v6  ;;  %v892_v6 = vunpack.c.h.s8.bf16 %v92_v4  ;;  %v860_v12 = vunpack.c.l.s8.bf16 %v92_v4 }
 0x338   :  { %3430 = vmatpush1.bf16.msra.mxu1 %v1596_v7  ;;  %v3096_v17 = vpop.f32.mrf.mxu0  ;;  %3390 = vmatprep.subr.bf16.mxu0 %v1053_v8  ;;  %v1404_v7 = vunpack.c.h.s8.bf16 %v348_v42  ;;  %v861_v8 = vunpack.c.l.s8.bf16 %v93_v61 }
 0x339   :  { %v3137_v18 = vpop.f32.mrf.mxu1  ;;  %3431 = vmatprep.subr.bf16.mxu1 %v1565_v9  ;;  %v5639_v22 = vadd.f32 %v3135_v13, %v3095_v14  ;;  %v3097_v24 = vadd.f32 %v3096_v17, %v5629_v5  ;;  %3420 = vmatprep.mubr.bf16.mxu0 %v5509_v37  ;;  %v381_v5 = vld [vmem:[#allocation3 + $0x988] sm:$0xff]  ;;  %v1373_v9 = vunpack.c.l.s8.bf16 %v349_v34  ;;  %v1372_v13 = vunpack.c.l.s8.bf16 %v348_v42  ;;  %v572_v17 = vld [vmem:[#allocation3 + $0xf80] sm:$0xff] }
 0x33a   :  { %3461 = vmatprep.mubr.bf16.mxu1 %v5513_v38  ;;  %v3098_v52 = vpop.f32.mrf.mxu0  ;;  %v1469_v46 = vunpack.c.h.s8.bf16 %v381_v5  ;;  %v1437_v59 = vunpack.c.l.s8.bf16 %v381_v5  ;;  %v1341_v14 = vunpack.c.h.s8.bf16 %v317_v56 }
 0x33b   :  { %v3139_v25 = vpop.f32.mrf.mxu1  ;;  %v5644_v26 = vadd.f32 %v3137_v18, %v3097_v24  ;;  %3391 = vmatpush1.bf16.msra.mxu0 %v1052_v15  ;;  %v1853_v15 = vunpack.c.h.s8.bf16 %v573_v11  ;;  %v541_v24 = vld [vmem:[#allocation3 + $0xe88] sm:$0xff] }
 0x33c   :  { %3432 = vmatpush1.bf16.msra.mxu1 %v1564_v16  ;;  %v3099_v29 = vpop.f32.mrf.mxu0  ;;  %3392 = vmatprep.subr.bf16.mxu0 %v1021_v19  ;;  %v316_v16 = vld [vmem:[#allocation3 + $0x780] sm:$0xff]  ;;  %v1852_v19 = vunpack.c.h.s8.bf16 %v572_v17  ;;  %v1820_v25 = vunpack.c.l.s8.bf16 %v572_v17  ;;  %v1757_v5 = vunpack.c.l.s8.bf16 %v541_v24 }
 0x33d   :  { %v3140_v30 = vpop.f32.mrf.mxu1  ;;  %3433 = vmatprep.subr.bf16.mxu1 %v1533_v2  ;;  %v1340_v18 = vunpack.c.h.s8.bf16 %v316_v16  ;;  %v1309_v2 = vunpack.c.l.s8.bf16 %v317_v56  ;;  %v1308_v52 = vunpack.c.l.s8.bf16 %v316_v16  ;;  %v284_v29 = vld [vmem:[#allocation3 + $0x680] sm:$0xff] }
 0x33e   :  { %v540_v30 = vld [vmem:[#allocation3 + $0xe80] sm:$0xff] }
 0x33f   :  { %3393 = vmatpush1.bf16.msra.mxu0 %v1020_v27  ;;  %v1277_v27 = vunpack.c.h.s8.bf16 %v285_v21 }
 0x340   :  { %3434 = vmatpush1.bf16.msra.mxu1 %v1532_v28  ;;  %3394 = vmatprep.subr.bf16.mxu0 %v989_v33  ;;  %v1789_v28 = vunpack.c.h.s8.bf16 %v541_v24  ;;  %v1276_v33 = vunpack.c.h.s8.bf16 %v284_v29 }
 0x341   :  { %3435 = vmatprep.subr.bf16.mxu1 %v1501_v49  ;;  %v1788_v49 = vunpack.c.h.s8.bf16 %v540_v30 }
 0x343   :  { %3395 = vmatpush1.bf16.msra.mxu0 %v988_v40  ;;  %v253_v40 = vld [vmem:[#allocation3 + $0x588] sm:$0xff] }
 0x344   :  { %3436 = vmatpush1.bf16.msra.mxu1 %v1500_v41  ;;  %3396 = vmatprep.subr.bf16.mxu0 %v957_v43  ;;  %v509_v41 = vld [vmem:[#allocation3 + $0xd88] sm:$0xff]  ;;  %v1244_v43 = vunpack.c.l.s8.bf16 %v284_v29  ;;  %v1213_v50 = vunpack.c.h.s8.bf16 %v253_v40  ;;  %v1181_v61 = vunpack.c.l.s8.bf16 %v253_v40 }
 0x345   :  { %3437 = vmatprep.subr.bf16.mxu1 %v1469_v46  ;;  %v1756_v46 = vunpack.c.l.s8.bf16 %v540_v30  ;;  %v1725_v53 = vunpack.c.h.s8.bf16 %v509_v41  ;;  %v1693_v34 = vunpack.c.l.s8.bf16 %v509_v41  ;;  %v668_v41 = vld [vmem:[#allocation3 + $0x1280] sm:$0xff] }
 0x347   :  { %3397 = vmatpush1.bf16.msra.mxu0 %v956_v35  ;;  %v252_v35 = vld [vmem:[#allocation3 + $0x580] sm:$0xff] }
 0x348   :  { %3438 = vmatpush1.bf16.msra.mxu1 %v1468_v44  ;;  %3398 = vmatprep.subr.bf16.mxu0 %v925_v58  ;;  %v508_v44 = vld [vmem:[#allocation3 + $0xd80] sm:$0xff]  ;;  %v1212_v58 = vunpack.c.h.s8.bf16 %v252_v35 }
 0x349   :  { %3439 = vmatprep.subr.bf16.mxu1 %v1437_v59  ;;  %v1724_v59 = vunpack.c.h.s8.bf16 %v508_v44 }
 0x34b   :  { %3399 = vmatpush1.bf16.msra.mxu0 %v924_v62  ;;  %v221_v62 = vld [vmem:[#allocation3 + $0x488] sm:$0xff] }
 0x34c   :  { %3440 = vmatpush1.bf16.msra.mxu1 %v1436_v1  ;;  %3400 = vmatprep.subr.bf16.mxu0 %v893_v51  ;;  %v477_v1 = vld [vmem:[#allocation3 + $0xc88] sm:$0xff]  ;;  %v1180_v51 = vunpack.c.l.s8.bf16 %v252_v35  ;;  %v1149_v4 = vunpack.c.h.s8.bf16 %v221_v62  ;;  %v1117_v56 = vunpack.c.l.s8.bf16 %v221_v62  ;;  %v2044_v35 = vunpack.c.h.s8.bf16 %v668_v41 }
 0x34d   :  { %3441 = vmatprep.subr.bf16.mxu1 %v1405_v0  ;;  %v1692_v0 = vunpack.c.l.s8.bf16 %v508_v44  ;;  %v1661_v42 = vunpack.c.h.s8.bf16 %v477_v1  ;;  %v1629_v11 = vunpack.c.l.s8.bf16 %v477_v1  ;;  %v637_v62 = vld [vmem:[#allocation3 + $0x1188] sm:$0xff]  ;;  %v127_v1 = vld [vmem:[#allocation3 + $0x198] sm:$0xff] }
 0x34f   :  { %3401 = vmatpush1.bf16.msra.mxu0 %v892_v6  ;;  %v220_v6 = vld [vmem:[#allocation3 + $0x480] sm:$0xff] }
 0x350   :  { %3442 = vmatpush1.bf16.msra.mxu1 %v1404_v7  ;;  %3402 = vmatprep.subr.bf16.mxu0 %v861_v8  ;;  %v476_v7 = vld [vmem:[#allocation3 + $0xc80] sm:$0xff]  ;;  %v1148_v8 = vunpack.c.h.s8.bf16 %v220_v6 }
 0x351   :  { %3443 = vmatprep.subr.bf16.mxu1 %v1373_v9  ;;  %v1660_v9 = vunpack.c.h.s8.bf16 %v476_v7 }
 0x353   :  { %3403 = vmatpush1.bf16.msra.mxu0 %v860_v12  ;;  %v701_v12 = vld [vmem:[#allocation3 + $0x1388] sm:$0xff] }
 0x354   :  { %3444 = vmatpush1.bf16.msra.mxu1 %v1372_v13  ;;  %3404 = vmatprep.subr.bf16.mxu0 %v1341_v14  ;;  %v191_v13 = vld [vmem:[#allocation3 + $0x398] sm:$0xff]  ;;  %v1116_v14 = vunpack.c.l.s8.bf16 %v220_v6  ;;  %v2109_v16 = vunpack.c.h.s8.bf16 %v701_v12  ;;  %v2077_v21 = vunpack.c.l.s8.bf16 %v701_v12  ;;  %v636_v6 = vld [vmem:[#allocation3 + $0x1180] sm:$0xff]  ;;  %v605_v12 = vld [vmem:[#allocation3 + $0x1088] sm:$0xff] }
 0x355   :  { %3445 = vmatprep.subr.bf16.mxu1 %v1853_v15  ;;  %v1628_v15 = vunpack.c.l.s8.bf16 %v476_v7  ;;  %v1087_v17 = vunpack.c.h.s8.bf16 %v191_v13  ;;  %v1055_v24 = vunpack.c.l.s8.bf16 %v191_v13  ;;  %v126_v7 = vld [vmem:[#allocation3 + $0x190] sm:$0xff]  ;;  %v95_v13 = vld [vmem:[#allocation3 + $0x98] sm:$0xff] }
 0x357   :  { %3405 = vmatpush2.bf16.msra.mxu0 %v1340_v18  ;;  %v700_v18 = vld [vmem:[#allocation3 + $0x1380] sm:$0xff] }
 0x358   :  { %3446 = vmatpush2.bf16.msra.mxu1 %v1852_v19  ;;  %3406 = vmatprep.subr.bf16.mxu0 %v1309_v2  ;;  %v190_v19 = vld [vmem:[#allocation3 + $0x390] sm:$0xff]  ;;  %v2108_v2 = vunpack.c.h.s8.bf16 %v700_v18  ;;  %v2076_v30 = vunpack.c.l.s8.bf16 %v700_v18  ;;  %v604_v18 = vld [vmem:[#allocation3 + $0x1080] sm:$0xff] }
 0x359   :  { %3447 = vmatprep.subr.bf16.mxu1 %v1821_v20  ;;  %v1086_v20 = vunpack.c.h.s8.bf16 %v190_v19 }
 0x35b   :  { %3407 = vmatpush2.bf16.msra.mxu0 %v1308_v52  ;;  %v669_v52 = vld [vmem:[#allocation3 + $0x1288] sm:$0xff] }
 0x35c   :  { %3448 = vmatpush2.bf16.msra.mxu1 %v1820_v25  ;;  %3408 = vmatprep.subr.bf16.mxu0 %v1277_v27  ;;  %v159_v25 = vld [vmem:[#allocation3 + $0x298] sm:$0xff] }
 0x35d   :  { %3449 = vmatprep.subr.bf16.mxu1 %v1789_v28  ;;  %v1023_v40 = vunpack.c.h.s8.bf16 %v159_v25 }
 0x35f   :  { %3409 = vmatpush2.bf16.msra.mxu0 %v1276_v33  ;;  %v1054_v33 = vunpack.c.l.s8.bf16 %v190_v19  ;;  %v94_v19 = vld [vmem:[#allocation3 + $0x90] sm:$0xff] }
 0x360   :  { %3450 = vmatpush2.bf16.msra.mxu1 %v1788_v49  ;;  %3410 = vmatprep.subr.bf16.mxu0 %v1245_v39 }
 0x361   :  { %3451 = vmatprep.subr.bf16.mxu1 %v1757_v5  ;;  %v2045_v5 = vunpack.c.h.s8.bf16 %v669_v52 }
 0x363   :  { %3411 = vmatpush2.bf16.msra.mxu0 %v1244_v43  ;;  %v158_v43 = vld [vmem:[#allocation3 + $0x290] sm:$0xff] }
 0x364   :  { %3452 = vmatpush2.bf16.msra.mxu1 %v1756_v46  ;;  %3412 = vmatprep.subr.bf16.mxu0 %v1213_v50  ;;  %v1022_v44 = vunpack.c.h.s8.bf16 %v158_v43 }
 0x365   :  { %3453 = vmatprep.subr.bf16.mxu1 %v1725_v53 }
 0x367   :  { %3413 = vmatpush2.bf16.msra.mxu0 %v1212_v58 }
 0x368   :  { %3454 = vmatpush2.bf16.msra.mxu1 %v1724_v59  ;;  %3414 = vmatprep.subr.bf16.mxu0 %v1181_v61  ;;  %v2013_v61 = vunpack.c.l.s8.bf16 %v669_v52  ;;  %v829_v52 = vld [vmem:[#allocation3 + $0x1788] sm:$0xff] }
 0x369   :  { %3455 = vmatprep.subr.bf16.mxu1 %v1693_v34  ;;  %v991_v34 = vunpack.c.l.s8.bf16 %v159_v25  ;;  %v319_v25 = vld [vmem:[#allocation3 + $0x798] sm:$0xff] }
 0x36b   :  { %3415 = vmatpush2.bf16.msra.mxu0 %v1180_v51  ;;  %v2012_v51 = vunpack.c.l.s8.bf16 %v668_v41  ;;  %v2333_v41 = vunpack.c.l.s8.bf16 %v829_v52 }
 0x36c   :  { %3456 = vmatpush2.bf16.msra.mxu1 %v1692_v0  ;;  %3416 = vmatprep.subr.bf16.mxu0 %v1149_v4  ;;  %v990_v0 = vunpack.c.l.s8.bf16 %v158_v43  ;;  %v1981_v4 = vunpack.c.h.s8.bf16 %v637_v62  ;;  %v1311_v43 = vunpack.c.l.s8.bf16 %v319_v25 }
 0x36d   :  { %3457 = vmatprep.subr.bf16.mxu1 %v1661_v42  ;;  %v959_v42 = vunpack.c.h.s8.bf16 %v127_v1 }
 0x36f   :  { %3417 = vmatpush2.bf16.msra.mxu0 %v1148_v8  ;;  %v1980_v8 = vunpack.c.h.s8.bf16 %v636_v6 }
 0x370   :  { %3458 = vmatpush2.bf16.msra.mxu1 %v1660_v9  ;;  %3418 = vmatprep.subr.bf16.mxu0 %v1117_v56  ;;  %v958_v9 = vunpack.c.h.s8.bf16 %v126_v7  ;;  %v1949_v56 = vunpack.c.l.s8.bf16 %v637_v62 }
 0x371   :  { %3459 = vmatprep.subr.bf16.mxu1 %v1629_v11  ;;  %v927_v11 = vunpack.c.l.s8.bf16 %v127_v1 }
 0x373   :  { %3419 = vmatpush2.bf16.msra.mxu0 %v1116_v14  ;;  %v1948_v14 = vunpack.c.l.s8.bf16 %v636_v6 }
 0x374   :  { %3460 = vmatpush2.bf16.msra.mxu1 %v1628_v15  ;;  %3470 = vmatprep.subr.bf16.mxu0 %v2109_v16  ;;  %v926_v15 = vunpack.c.l.s8.bf16 %v126_v7  ;;  %v1917_v16 = vunpack.c.h.s8.bf16 %v605_v12 }
 0x375   :  { %3511 = vmatprep.subr.bf16.mxu1 %v1087_v17  ;;  %v895_v17 = vunpack.c.h.s8.bf16 %v95_v13 }
 0x376   :  { %v3176_v27 = vpop.f32.mrf.mxu0  ;;  %3421 = vmatmul.mubr.bf16.vlgmr.msra.gmra.mxu0 %v5519_v47 }
 0x377   :  { %v3217_v28 = vpop.f32.mrf.mxu1  ;;  %3462 = vmatmul.mubr.bf16.vlgmr.msra.gmra.mxu1 %v5523_v48  ;;  %3471 = vmatpush1.bf16.msra.mxu0 %v2108_v2  ;;  %v1916_v2 = vunpack.c.h.s8.bf16 %v604_v18 }
 0x378   :  { %v5648_v29 = vadd.f32 %v3217_v28, %v3176_v27  ;;  %3512 = vmatpush1.bf16.msra.mxu1 %v1086_v20  ;;  %v3178_v49 = vpop.f32.mrf.mxu0  ;;  %3472 = vmatprep.subr.bf16.mxu0 %v2077_v21  ;;  %v894_v20 = vunpack.c.h.s8.bf16 %v94_v19  ;;  %v1885_v21 = vunpack.c.l.s8.bf16 %v605_v12  ;;  %v1884_v27 = vunpack.c.l.s8.bf16 %v604_v18 }
 0x379   :  { %v3219_v39 = vpop.f32.mrf.mxu1  ;;  %3513 = vmatprep.subr.bf16.mxu1 %v1055_v24  ;;  %3502 = vmatprep.mubr.bf16.mxu0 %v5532_v55  ;;  %v863_v24 = vunpack.c.l.s8.bf16 %v95_v13  ;;  %v862_v28 = vunpack.c.l.s8.bf16 %v94_v19 }
 0x37a   :  { %v5650_v46 = vadd.f32 %v3219_v39, %v3178_v49  ;;  %3543 = vmatprep.mubr.bf16.mxu1 %v5509_v37  ;;  %v3180_v50 = vpop.f32.mrf.mxu0  ;;  %v828_v49 = vld [vmem:[#allocation3 + $0x1780] sm:$0xff]  ;;  %v318_v39 = vld [vmem:[#allocation3 + $0x790] sm:$0xff] }
 0x37b   :  { %v3221_v53 = vpop.f32.mrf.mxu1  ;;  %3473 = vmatpush1.bf16.msra.mxu0 %v2076_v30  ;;  %v2365_v30 = vunpack.c.h.s8.bf16 %v829_v52  ;;  %v797_v50 = vld [vmem:[#allocation3 + $0x1688] sm:$0xff] }
 0x37c   :  { %3514 = vmatpush1.bf16.msra.mxu1 %v1054_v33  ;;  %v3181_v58 = vpop.f32.mrf.mxu0  ;;  %3474 = vmatprep.subr.bf16.mxu0 %v2045_v5  ;;  %v1343_v33 = vunpack.c.h.s8.bf16 %v319_v25  ;;  %v2364_v5 = vunpack.c.h.s8.bf16 %v828_v49  ;;  %v287_v53 = vld [vmem:[#allocation3 + $0x698] sm:$0xff] }
 0x37d   :  { %v3222_v59 = vpop.f32.mrf.mxu1  ;;  %3515 = vmatprep.subr.bf16.mxu1 %v1023_v40  ;;  %v1342_v40 = vunpack.c.h.s8.bf16 %v318_v39  ;;  %v2301_v58 = vunpack.c.h.s8.bf16 %v797_v50 }
 0x37e   :  { %v1279_v59 = vunpack.c.h.s8.bf16 %v287_v53 }
 0x37f   :  { %3475 = vmatpush1.bf16.msra.mxu0 %v2044_v35  ;;  %v2332_v35 = vunpack.c.l.s8.bf16 %v828_v49 }
 0x380   :  { %3516 = vmatpush1.bf16.msra.mxu1 %v1022_v44  ;;  %3476 = vmatprep.subr.bf16.mxu0 %v2013_v61  ;;  %v1310_v44 = vunpack.c.l.s8.bf16 %v318_v39  ;;  %v796_v61 = vld [vmem:[#allocation3 + $0x1680] sm:$0xff] }
 0x381   :  { %3517 = vmatprep.subr.bf16.mxu1 %v991_v34  ;;  %v286_v34 = vld [vmem:[#allocation3 + $0x690] sm:$0xff]  ;;  %v2300_v62 = vunpack.c.h.s8.bf16 %v796_v61  ;;  %v2268_v6 = vunpack.c.l.s8.bf16 %v796_v61 }
 0x382   :  { %v1278_v1 = vunpack.c.h.s8.bf16 %v286_v34  ;;  %v1246_v7 = vunpack.c.l.s8.bf16 %v286_v34 }
 0x383   :  { %3477 = vmatpush1.bf16.msra.mxu0 %v2012_v51  ;;  %v2269_v51 = vunpack.c.l.s8.bf16 %v797_v50 }
 0x384   :  { %3518 = vmatpush1.bf16.msra.mxu1 %v990_v0  ;;  %3478 = vmatprep.subr.bf16.mxu0 %v1981_v4  ;;  %v1247_v0 = vunpack.c.l.s8.bf16 %v287_v53  ;;  %v765_v4 = vld [vmem:[#allocation3 + $0x1588] sm:$0xff] }
 0x385   :  { %3519 = vmatprep.subr.bf16.mxu1 %v959_v42  ;;  %v255_v42 = vld [vmem:[#allocation3 + $0x598] sm:$0xff] }
 0x387   :  { %3479 = vmatpush1.bf16.msra.mxu0 %v1980_v8  ;;  %v2237_v8 = vunpack.c.h.s8.bf16 %v765_v4 }
 0x388   :  { %3520 = vmatpush1.bf16.msra.mxu1 %v958_v9  ;;  %3480 = vmatprep.subr.bf16.mxu0 %v1949_v56  ;;  %v1215_v9 = vunpack.c.h.s8.bf16 %v255_v42  ;;  %v764_v56 = vld [vmem:[#allocation3 + $0x1580] sm:$0xff] }
 0x389   :  { %3521 = vmatprep.subr.bf16.mxu1 %v927_v11  ;;  %v254_v11 = vld [vmem:[#allocation3 + $0x590] sm:$0xff]  ;;  %v2236_v12 = vunpack.c.h.s8.bf16 %v764_v56  ;;  %v2204_v18 = vunpack.c.l.s8.bf16 %v764_v56 }
 0x38a   :  { %v1214_v13 = vunpack.c.h.s8.bf16 %v254_v11  ;;  %v1182_v19 = vunpack.c.l.s8.bf16 %v254_v11 }
 0x38b   :  { %3481 = vmatpush1.bf16.msra.mxu0 %v1948_v14  ;;  %v2205_v14 = vunpack.c.l.s8.bf16 %v765_v4 }
 0x38c   :  { %3522 = vmatpush1.bf16.msra.mxu1 %v926_v15  ;;  %3482 = vmatprep.subr.bf16.mxu0 %v1917_v16  ;;  %v1183_v15 = vunpack.c.l.s8.bf16 %v255_v42  ;;  %v733_v16 = vld [vmem:[#allocation3 + $0x1488] sm:$0xff] }
 0x38d   :  { %3523 = vmatprep.subr.bf16.mxu1 %v895_v17  ;;  %v223_v17 = vld [vmem:[#allocation3 + $0x498] sm:$0xff] }
 0x38f   :  { %3483 = vmatpush1.bf16.msra.mxu0 %v1916_v2  ;;  %v2173_v2 = vunpack.c.h.s8.bf16 %v733_v16 }
 0x390   :  { %3524 = vmatpush1.bf16.msra.mxu1 %v894_v20  ;;  %3484 = vmatprep.subr.bf16.mxu0 %v1885_v21  ;;  %v1151_v20 = vunpack.c.h.s8.bf16 %v223_v17  ;;  %v732_v21 = vld [vmem:[#allocation3 + $0x1480] sm:$0xff] }
 0x391   :  { %3525 = vmatprep.subr.bf16.mxu1 %v863_v24  ;;  %v222_v24 = vld [vmem:[#allocation3 + $0x490] sm:$0xff]  ;;  %v2172_v52 = vunpack.c.h.s8.bf16 %v732_v21  ;;  %v2140_v49 = vunpack.c.l.s8.bf16 %v732_v21 }
 0x392   :  { %v1150_v25 = vunpack.c.h.s8.bf16 %v222_v24  ;;  %v1118_v39 = vunpack.c.l.s8.bf16 %v222_v24  ;;  %v382_v21 = vld [vmem:[#allocation3 + $0x990] sm:$0xff] }
 0x393   :  { %3485 = vmatpush1.bf16.msra.mxu0 %v1884_v27  ;;  %v2141_v27 = vunpack.c.l.s8.bf16 %v733_v16  ;;  %v638_v24 = vld [vmem:[#allocation3 + $0x1190] sm:$0xff] }
 0x394   :  { %3526 = vmatpush1.bf16.msra.mxu1 %v862_v28  ;;  %3486 = vmatprep.subr.bf16.mxu0 %v2365_v30  ;;  %v1119_v28 = vunpack.c.l.s8.bf16 %v223_v17  ;;  %v447_v30 = vld [vmem:[#allocation3 + $0xb98] sm:$0xff] }
 0x395   :  { %3527 = vmatprep.subr.bf16.mxu1 %v1343_v33  ;;  %v703_v33 = vld [vmem:[#allocation3 + $0x1398] sm:$0xff] }
 0x396   :  { %v383_v17 = vld [vmem:[#allocation3 + $0x998] sm:$0xff] }
 0x397   :  { %3487 = vmatpush2.bf16.msra.mxu0 %v2364_v5  ;;  %v1599_v5 = vunpack.c.h.s8.bf16 %v447_v30 }
 0x398   :  { %3528 = vmatpush2.bf16.msra.mxu1 %v1342_v40  ;;  %3488 = vmatprep.subr.bf16.mxu0 %v2333_v41  ;;  %v2111_v40 = vunpack.c.h.s8.bf16 %v703_v33  ;;  %v446_v41 = vld [vmem:[#allocation3 + $0xb90] sm:$0xff] }
 0x399   :  { %3529 = vmatprep.subr.bf16.mxu1 %v1311_v43  ;;  %v702_v43 = vld [vmem:[#allocation3 + $0x1390] sm:$0xff]  ;;  %v1598_v50 = vunpack.c.h.s8.bf16 %v446_v41 }
 0x39a   :  { %v2110_v53 = vunpack.c.h.s8.bf16 %v702_v43 }
 0x39b   :  { %3489 = vmatpush2.bf16.msra.mxu0 %v2332_v35  ;;  %v1567_v35 = vunpack.c.l.s8.bf16 %v447_v30  ;;  %v351_v30 = vld [vmem:[#allocation3 + $0x898] sm:$0xff] }
 0x39c   :  { %3530 = vmatpush2.bf16.msra.mxu1 %v1310_v44  ;;  %3490 = vmatprep.subr.bf16.mxu0 %v2301_v58  ;;  %v2079_v44 = vunpack.c.l.s8.bf16 %v703_v33  ;;  %v415_v58 = vld [vmem:[#allocation3 + $0xa98] sm:$0xff] }
 0x39d   :  { %3531 = vmatprep.subr.bf16.mxu1 %v1279_v59  ;;  %v671_v59 = vld [vmem:[#allocation3 + $0x1298] sm:$0xff]  ;;  %v1535_v42 = vunpack.c.h.s8.bf16 %v415_v58 }
 0x39e   :  { %v2015_v16 = vunpack.c.l.s8.bf16 %v671_v59  ;;  %v607_v33 = vld [vmem:[#allocation3 + $0x1098] sm:$0xff] }
 0x39f   :  { %3491 = vmatpush2.bf16.msra.mxu0 %v2300_v62 }
 0x3a0   :  { %3532 = vmatpush2.bf16.msra.mxu1 %v1278_v1  ;;  %3492 = vmatprep.subr.bf16.mxu0 %v2269_v51  ;;  %v1566_v1 = vunpack.c.l.s8.bf16 %v446_v41  ;;  %v2078_v51 = vunpack.c.l.s8.bf16 %v702_v43  ;;  %v350_v41 = vld [vmem:[#allocation3 + $0x890] sm:$0xff] }
 0x3a1   :  { %3533 = vmatprep.subr.bf16.mxu1 %v1247_v0  ;;  %v606_v43 = vld [vmem:[#allocation3 + $0x1090] sm:$0xff] }
 0x3a3   :  { %3493 = vmatpush2.bf16.msra.mxu0 %v2268_v6  ;;  %v2047_v6 = vunpack.c.h.s8.bf16 %v671_v59  ;;  %v831_v59 = vld [vmem:[#allocation3 + $0x1798] sm:$0xff] }
 0x3a4   :  { %3534 = vmatpush2.bf16.msra.mxu1 %v1246_v7  ;;  %3494 = vmatprep.subr.bf16.mxu0 %v2237_v8  ;;  %v414_v7 = vld [vmem:[#allocation3 + $0xa90] sm:$0xff] }
 0x3a5   :  { %3535 = vmatprep.subr.bf16.mxu1 %v1215_v9  ;;  %v670_v8 = vld [vmem:[#allocation3 + $0x1290] sm:$0xff]  ;;  %v1534_v11 = vunpack.c.h.s8.bf16 %v414_v7 }
 0x3a7   :  { %3495 = vmatpush2.bf16.msra.mxu0 %v2236_v12  ;;  %v2046_v12 = vunpack.c.h.s8.bf16 %v670_v8 }
 0x3a8   :  { %3536 = vmatpush2.bf16.msra.mxu1 %v1214_v13  ;;  %3496 = vmatprep.subr.bf16.mxu0 %v2205_v14 }
 0x3a9   :  { %3537 = vmatprep.subr.bf16.mxu1 %v1183_v15  ;;  %v1503_v15 = vunpack.c.l.s8.bf16 %v415_v58  ;;  %v575_v58 = vld [vmem:[#allocation3 + $0xf98] sm:$0xff] }
 0x3ab   :  { %3497 = vmatpush2.bf16.msra.mxu0 %v2204_v18  ;;  %v639_v18 = vld [vmem:[#allocation3 + $0x1198] sm:$0xff] }
 0x3ac   :  { %3538 = vmatpush2.bf16.msra.mxu1 %v1182_v19  ;;  %3498 = vmatprep.subr.bf16.mxu0 %v2173_v2  ;;  %v2014_v19 = vunpack.c.l.s8.bf16 %v670_v8  ;;  %v1471_v2 = vunpack.c.h.s8.bf16 %v383_v17 }
 0x3ad   :  { %3539 = vmatprep.subr.bf16.mxu1 %v1151_v20  ;;  %v1983_v20 = vunpack.c.h.s8.bf16 %v639_v18 }
 0x3af   :  { %3499 = vmatpush2.bf16.msra.mxu0 %v2172_v52  ;;  %v1470_v52 = vunpack.c.h.s8.bf16 %v382_v21 }
 0x3b0   :  { %3540 = vmatpush2.bf16.msra.mxu1 %v1150_v25  ;;  %3500 = vmatprep.subr.bf16.mxu0 %v2141_v27  ;;  %v1982_v25 = vunpack.c.h.s8.bf16 %v638_v24  ;;  %v1439_v27 = vunpack.c.l.s8.bf16 %v383_v17  ;;  %v542_v17 = vld [vmem:[#allocation3 + $0xe90] sm:$0xff] }
 0x3b1   :  { %3541 = vmatprep.subr.bf16.mxu1 %v1119_v28  ;;  %v1951_v28 = vunpack.c.l.s8.bf16 %v639_v18  ;;  %v798_v18 = vld [vmem:[#allocation3 + $0x1690] sm:$0xff] }
 0x3b3   :  { %3501 = vmatpush2.bf16.msra.mxu0 %v2140_v49  ;;  %v1438_v49 = vunpack.c.l.s8.bf16 %v382_v21  ;;  %v511_v21 = vld [vmem:[#allocation3 + $0xd98] sm:$0xff] }
 0x3b4   :  { %3542 = vmatpush2.bf16.msra.mxu1 %v1118_v39  ;;  %3552 = vmatprep.subr.bf16.mxu0 %v1599_v5  ;;  %v1950_v39 = vunpack.c.l.s8.bf16 %v638_v24  ;;  %v1407_v5 = vunpack.c.h.s8.bf16 %v351_v30  ;;  %v767_v24 = vld [vmem:[#allocation3 + $0x1598] sm:$0xff] }
 0x3b5   :  { %3593 = vmatprep.subr.bf16.mxu1 %v2111_v40  ;;  %v1919_v40 = vunpack.c.h.s8.bf16 %v607_v33 }
 0x3b6   :  { %v3258_v61 = vpop.f32.mrf.mxu0  ;;  %3503 = vmatmul.mubr.bf16.vlgmr.msra.gmra.mxu0 %v5540_v23 }
 0x3b7   :  { %v5654_v34 = vpop.f32.mrf.mxu1  ;;  %3544 = vmatmul.mubr.bf16.vlgmr.msra.gmra.mxu1 %v5519_v47  ;;  %v5659_v62 = vadd.f32 %v3258_v61, %v5648_v29  ;;  %3553 = vmatpush1.bf16.msra.mxu0 %v1598_v50  ;;  %v1406_v50 = vunpack.c.h.s8.bf16 %v350_v41  ;;  %v1374_v61 = vunpack.c.l.s8.bf16 %v350_v41  ;;  %v479_v41 = vld [vmem:[#allocation3 + $0xc98] sm:$0xff] }
 0x3b8   :  { %3594 = vmatpush1.bf16.msra.mxu1 %v2110_v53  ;;  %v3260_v0 = vpop.f32.mrf.mxu0  ;;  %3554 = vmatprep.subr.bf16.mxu0 %v1567_v35  ;;  %v1918_v53 = vunpack.c.h.s8.bf16 %v606_v43  ;;  %v1375_v35 = vunpack.c.l.s8.bf16 %v351_v30  ;;  %v510_v30 = vld [vmem:[#allocation3 + $0xd90] sm:$0xff] }
 0x3b9   :  { %v5661_v4 = vpop.f32.mrf.mxu1  ;;  %3595 = vmatprep.subr.bf16.mxu1 %v2079_v44  ;;  %v5664_v9 = vadd.f32 %v3260_v0, %v5650_v46  ;;  %3584 = vmatprep.mubr.bf16.mxu0 %v5513_v38  ;;  %v1502_v46 = vunpack.c.l.s8.bf16 %v414_v7  ;;  %v1887_v44 = vunpack.c.l.s8.bf16 %v607_v33  ;;  %v2367_v0 = vunpack.c.h.s8.bf16 %v831_v59  ;;  %v766_v33 = vld [vmem:[#allocation3 + $0x1590] sm:$0xff] }
 0x3ba   :  { %3625 = vmatprep.mubr.bf16.mxu1 %v5532_v55  ;;  %v3262_v29 = vpop.f32.mrf.mxu0 }
 0x3bb   :  { %v3303_v56 = vpop.f32.mrf.mxu1  ;;  %3555 = vmatpush1.bf16.msra.mxu0 %v1566_v1  ;;  %v1886_v1 = vunpack.c.l.s8.bf16 %v606_v43  ;;  %v1823_v29 = vunpack.c.l.s8.bf16 %v575_v58  ;;  %v735_v43 = vld [vmem:[#allocation3 + $0x1498] sm:$0xff] }
 0x3bc   :  { %3596 = vmatpush1.bf16.msra.mxu1 %v2078_v51  ;;  %v3263_v13 = vpop.f32.mrf.mxu0  ;;  %3556 = vmatprep.subr.bf16.mxu0 %v1535_v42  ;;  %v1855_v51 = vunpack.c.h.s8.bf16 %v575_v58  ;;  %v574_v42 = vld [vmem:[#allocation3 + $0xf90] sm:$0xff]  ;;  %v2335_v56 = vunpack.c.l.s8.bf16 %v831_v59 }
 0x3bd   :  { %v3304_v14 = vpop.f32.mrf.mxu1  ;;  %3597 = vmatprep.subr.bf16.mxu1 %v2047_v6  ;;  %v830_v6 = vld [vmem:[#allocation3 + $0x1790] sm:$0xff]  ;;  %v1854_v7 = vunpack.c.h.s8.bf16 %v574_v42  ;;  %v1822_v13 = vunpack.c.l.s8.bf16 %v574_v42  ;;  %v193_v42 = vld [vmem:[#allocation3 + $0x3a8] sm:$0xff] }
 0x3be   :  { %v2366_v8 = vunpack.c.h.s8.bf16 %v830_v6  ;;  %v2334_v14 = vunpack.c.l.s8.bf16 %v830_v6  ;;  %v478_v58 = vld [vmem:[#allocation3 + $0xc90] sm:$0xff]  ;;  %v449_v6 = vld [vmem:[#allocation3 + $0xba8] sm:$0xff] }
 0x3bf   :  { %3557 = vmatpush1.bf16.msra.mxu0 %v1534_v11  ;;  %v543_v11 = vld [vmem:[#allocation3 + $0xe98] sm:$0xff]  ;;  %v734_v59 = vld [vmem:[#allocation3 + $0x1490] sm:$0xff] }
 0x3c0   :  { %3598 = vmatpush1.bf16.msra.mxu1 %v2046_v12  ;;  %3558 = vmatprep.subr.bf16.mxu0 %v1503_v15  ;;  %v799_v12 = vld [vmem:[#allocation3 + $0x1698] sm:$0xff]  ;;  %v1791_v15 = vunpack.c.h.s8.bf16 %v543_v11 }
 0x3c1   :  { %3599 = vmatprep.subr.bf16.mxu1 %v2015_v16  ;;  %v2303_v16 = vunpack.c.h.s8.bf16 %v799_v12 }
 0x3c3   :  { %3559 = vmatpush1.bf16.msra.mxu0 %v1502_v46  ;;  %v1790_v46 = vunpack.c.h.s8.bf16 %v542_v17 }
 0x3c4   :  { %3600 = vmatpush1.bf16.msra.mxu1 %v2014_v19  ;;  %3560 = vmatprep.subr.bf16.mxu0 %v1471_v2  ;;  %v2302_v19 = vunpack.c.h.s8.bf16 %v798_v18  ;;  %v1759_v2 = vunpack.c.l.s8.bf16 %v543_v11  ;;  %v192_v11 = vld [vmem:[#allocation3 + $0x3a0] sm:$0xff] }
 0x3c5   :  { %3601 = vmatprep.subr.bf16.mxu1 %v1983_v20  ;;  %v2271_v20 = vunpack.c.l.s8.bf16 %v799_v12  ;;  %v448_v12 = vld [vmem:[#allocation3 + $0xba0] sm:$0xff] }
 0x3c7   :  { %3561 = vmatpush1.bf16.msra.mxu0 %v1470_v52  ;;  %v1758_v52 = vunpack.c.l.s8.bf16 %v542_v17  ;;  %v161_v17 = vld [vmem:[#allocation3 + $0x2a8] sm:$0xff] }
 0x3c8   :  { %3602 = vmatpush1.bf16.msra.mxu1 %v1982_v25  ;;  %3562 = vmatprep.subr.bf16.mxu0 %v1439_v27  ;;  %v2270_v25 = vunpack.c.l.s8.bf16 %v798_v18  ;;  %v1727_v27 = vunpack.c.h.s8.bf16 %v511_v21  ;;  %v417_v18 = vld [vmem:[#allocation3 + $0xaa8] sm:$0xff] }
 0x3c9   :  { %3603 = vmatprep.subr.bf16.mxu1 %v1951_v28  ;;  %v2239_v28 = vunpack.c.h.s8.bf16 %v767_v24 }
 0x3cb   :  { %3563 = vmatpush1.bf16.msra.mxu0 %v1438_v49  ;;  %v1726_v49 = vunpack.c.h.s8.bf16 %v510_v30 }
 0x3cc   :  { %3604 = vmatpush1.bf16.msra.mxu1 %v1950_v39  ;;  %3564 = vmatprep.subr.bf16.mxu0 %v1407_v5  ;;  %v2238_v39 = vunpack.c.h.s8.bf16 %v766_v33  ;;  %v1695_v5 = vunpack.c.l.s8.bf16 %v511_v21  ;;  %v1568_v21 = vunpack.c.l.s8.bf16 %v448_v12 }
 0x3cd   :  { %3605 = vmatprep.subr.bf16.mxu1 %v1919_v40  ;;  %v2207_v40 = vunpack.c.l.s8.bf16 %v767_v24 }
 0x3cf   :  { %3565 = vmatpush1.bf16.msra.mxu0 %v1406_v50  ;;  %v1694_v50 = vunpack.c.l.s8.bf16 %v510_v30  ;;  %v416_v30 = vld [vmem:[#allocation3 + $0xaa0] sm:$0xff] }
 0x3d0   :  { %3606 = vmatpush1.bf16.msra.mxu1 %v1918_v53  ;;  %3566 = vmatprep.subr.bf16.mxu0 %v1375_v35  ;;  %v2206_v53 = vunpack.c.l.s8.bf16 %v766_v33  ;;  %v1663_v35 = vunpack.c.h.s8.bf16 %v479_v41 }
 0x3d1   :  { %3607 = vmatprep.subr.bf16.mxu1 %v1887_v44  ;;  %v2175_v44 = vunpack.c.h.s8.bf16 %v735_v43 }
 0x3d3   :  { %3567 = vmatpush1.bf16.msra.mxu0 %v1374_v61  ;;  %v1662_v61 = vunpack.c.h.s8.bf16 %v478_v58 }
 0x3d4   :  { %3608 = vmatpush1.bf16.msra.mxu1 %v1886_v1  ;;  %3568 = vmatprep.subr.bf16.mxu0 %v1855_v51  ;;  %v2174_v1 = vunpack.c.h.s8.bf16 %v734_v59  ;;  %v1631_v51 = vunpack.c.l.s8.bf16 %v479_v41  ;;  %v1536_v41 = vunpack.c.h.s8.bf16 %v416_v30 }
 0x3d5   :  { %3609 = vmatprep.subr.bf16.mxu1 %v2367_v0  ;;  %v2143_v0 = vunpack.c.l.s8.bf16 %v735_v43 }
 0x3d7   :  { %3569 = vmatpush2.bf16.msra.mxu0 %v1854_v7  ;;  %v1630_v7 = vunpack.c.l.s8.bf16 %v478_v58 }
 0x3d8   :  { %3610 = vmatpush2.bf16.msra.mxu1 %v2366_v8  ;;  %3570 = vmatprep.subr.bf16.mxu0 %v1823_v29  ;;  %v2142_v8 = vunpack.c.l.s8.bf16 %v734_v59  ;;  %v1089_v29 = vunpack.c.h.s8.bf16 %v193_v42  ;;  %v1504_v59 = vunpack.c.l.s8.bf16 %v416_v30 }
 0x3d9   :  { %3611 = vmatprep.subr.bf16.mxu1 %v2335_v56  ;;  %v1601_v56 = vunpack.c.h.s8.bf16 %v449_v6 }
 0x3db   :  { %3571 = vmatpush2.bf16.msra.mxu0 %v1822_v13  ;;  %v1088_v13 = vunpack.c.h.s8.bf16 %v192_v11 }
 0x3dc   :  { %3612 = vmatpush2.bf16.msra.mxu1 %v2334_v14  ;;  %3572 = vmatprep.subr.bf16.mxu0 %v1791_v15  ;;  %v1600_v14 = vunpack.c.h.s8.bf16 %v448_v12  ;;  %v1057_v15 = vunpack.c.l.s8.bf16 %v193_v42 }
 0x3dd   :  { %3613 = vmatprep.subr.bf16.mxu1 %v2303_v16  ;;  %v1569_v16 = vunpack.c.l.s8.bf16 %v449_v6 }
 0x3df   :  { %3573 = vmatpush2.bf16.msra.mxu0 %v1790_v46 }
 0x3e0   :  { %3614 = vmatpush2.bf16.msra.mxu1 %v2302_v19  ;;  %3574 = vmatprep.subr.bf16.mxu0 %v1759_v2 }
 0x3e1   :  { %3615 = vmatprep.subr.bf16.mxu1 %v2271_v20  ;;  %v1056_v20 = vunpack.c.l.s8.bf16 %v192_v11 }
 0x3e3   :  { %3575 = vmatpush2.bf16.msra.mxu0 %v1758_v52 }
 0x3e4   :  { %3616 = vmatpush2.bf16.msra.mxu1 %v2270_v25  ;;  %3576 = vmatprep.subr.bf16.mxu0 %v1727_v27  ;;  %v1025_v25 = vunpack.c.h.s8.bf16 %v161_v17  ;;  %v1537_v27 = vunpack.c.h.s8.bf16 %v417_v18 }
 0x3e5   :  { %3617 = vmatprep.subr.bf16.mxu1 %v2239_v28  ;;  %v160_v28 = vld [vmem:[#allocation3 + $0x2a0] sm:$0xff] }
 0x3e6   :  { %v992_v58 = vunpack.c.l.s8.bf16 %v160_v28 }
 0x3e7   :  { %3577 = vmatpush2.bf16.msra.mxu0 %v1726_v49 }
 0x3e8   :  { %3618 = vmatpush2.bf16.msra.mxu1 %v2238_v39  ;;  %3578 = vmatprep.subr.bf16.mxu0 %v1695_v5 }
 0x3e9   :  { %3619 = vmatprep.subr.bf16.mxu1 %v2207_v40  ;;  %v1024_v40 = vunpack.c.h.s8.bf16 %v160_v28  ;;  %v576_v28 = vld [vmem:[#allocation3 + $0xfa0] sm:$0xff] }
 0x3eb   :  { %3579 = vmatpush2.bf16.msra.mxu0 %v1694_v50 }
 0x3ec   :  { %3620 = vmatpush2.bf16.msra.mxu1 %v2206_v53  ;;  %3580 = vmatprep.subr.bf16.mxu0 %v1663_v35  ;;  %v993_v53 = vunpack.c.l.s8.bf16 %v161_v17  ;;  %v1505_v35 = vunpack.c.l.s8.bf16 %v417_v18 }
 0x3ed   :  { %3621 = vmatprep.subr.bf16.mxu1 %v2175_v44  ;;  %v129_v44 = vld [vmem:[#allocation3 + $0x1a8] sm:$0xff] }
 0x3ef   :  { %3581 = vmatpush2.bf16.msra.mxu0 %v1662_v61  ;;  %v961_v61 = vunpack.c.h.s8.bf16 %v129_v44 }
 0x3f0   :  { %3622 = vmatpush2.bf16.msra.mxu1 %v2174_v1  ;;  %3582 = vmatprep.subr.bf16.mxu0 %v1631_v51  ;;  %v128_v51 = vld [vmem:[#allocation3 + $0x1a0] sm:$0xff] }
 0x3f1   :  { %3623 = vmatprep.subr.bf16.mxu1 %v2143_v0  ;;  %v384_v0 = vld [vmem:[#allocation3 + $0x9a0] sm:$0xff]  ;;  %v960_v42 = vunpack.c.h.s8.bf16 %v128_v51  ;;  %v928_v11 = vunpack.c.l.s8.bf16 %v128_v51  ;;  %v257_v51 = vld [vmem:[#allocation3 + $0x5a8] sm:$0xff] }
 0x3f2   :  { %v1472_v6 = vunpack.c.h.s8.bf16 %v384_v0  ;;  %v1440_v12 = vunpack.c.l.s8.bf16 %v384_v0  ;;  %v513_v0 = vld [vmem:[#allocation3 + $0xda8] sm:$0xff] }
 0x3f3   :  { %3583 = vmatpush2.bf16.msra.mxu0 %v1630_v7  ;;  %v929_v7 = vunpack.c.l.s8.bf16 %v129_v44  ;;  %v288_v44 = vld [vmem:[#allocation3 + $0x6a0] sm:$0xff] }
 0x3f4   :  { %3624 = vmatpush2.bf16.msra.mxu1 %v2142_v8  ;;  %3634 = vmatprep.subr.bf16.mxu0 %v1089_v29  ;;  %v97_v29 = vld [vmem:[#allocation3 + $0xa8] sm:$0xff] }
 0x3f5   :  { %3675 = vmatprep.subr.bf16.mxu1 %v1601_v56  ;;  %v353_v56 = vld [vmem:[#allocation3 + $0x8a8] sm:$0xff] }
 0x3f6   :  { %v3340_v46 = vpop.f32.mrf.mxu0  ;;  %3585 = vmatmul.mubr.bf16.vlgmr.msra.gmra.mxu0 %v5523_v48 }
 0x3f7   :  { %v3381_v19 = vpop.f32.mrf.mxu1  ;;  %3626 = vmatmul.mubr.bf16.vlgmr.msra.gmra.mxu1 %v5540_v23  ;;  %v3341_v2 = vadd.f32 %v3340_v46, %v5654_v34  ;;  %3635 = vmatpush1.bf16.msra.mxu0 %v1088_v13  ;;  %v897_v13 = vunpack.c.h.s8.bf16 %v97_v29  ;;  %v865_v46 = vunpack.c.l.s8.bf16 %v97_v29  ;;  %v256_v29 = vld [vmem:[#allocation3 + $0x5a0] sm:$0xff] }
 0x3f8   :  { %3676 = vmatpush1.bf16.msra.mxu1 %v1600_v14  ;;  %v3342_v24 = vpop.f32.mrf.mxu0  ;;  %3636 = vmatprep.subr.bf16.mxu0 %v1057_v15  ;;  %v1409_v14 = vunpack.c.h.s8.bf16 %v353_v56  ;;  %v96_v15 = vld [vmem:[#allocation3 + $0xa0] sm:$0xff] }
 0x3f9   :  { %v3383_v52 = vpop.f32.mrf.mxu1  ;;  %3677 = vmatprep.subr.bf16.mxu1 %v1569_v16  ;;  %v5671_v33 = vadd.f32 %v3381_v19, %v3341_v2  ;;  %v3343_v49 = vadd.f32 %v3342_v24, %v5661_v4  ;;  %3666 = vmatprep.mubr.bf16.mxu0 %v5509_v37  ;;  %v385_v4 = vld [vmem:[#allocation3 + $0x9a8] sm:$0xff]  ;;  %v352_v16 = vld [vmem:[#allocation3 + $0x8a0] sm:$0xff]  ;;  %v896_v17 = vunpack.c.h.s8.bf16 %v96_v15  ;;  %v1377_v19 = vunpack.c.l.s8.bf16 %v353_v56 }
 0x3fa   :  { %3707 = vmatprep.mubr.bf16.mxu1 %v5513_v38  ;;  %v3344_v34 = vpop.f32.mrf.mxu0  ;;  %v1473_v1 = vunpack.c.h.s8.bf16 %v385_v4  ;;  %v1441_v8 = vunpack.c.l.s8.bf16 %v385_v4  ;;  %v1408_v18 = vunpack.c.h.s8.bf16 %v352_v16  ;;  %v321_v2 = vld [vmem:[#allocation3 + $0x7a8] sm:$0xff]  ;;  %v1376_v24 = vunpack.c.l.s8.bf16 %v352_v16  ;;  %v544_v4 = vld [vmem:[#allocation3 + $0xea0] sm:$0xff] }
 0x3fb   :  { %v3385_v39 = vpop.f32.mrf.mxu1  ;;  %v5676_v5 = vadd.f32 %v3383_v52, %v3343_v49  ;;  %3637 = vmatpush1.bf16.msra.mxu0 %v1056_v20  ;;  %v577_v20 = vld [vmem:[#allocation3 + $0xfa8] sm:$0xff]  ;;  %v1345_v52 = vunpack.c.h.s8.bf16 %v321_v2  ;;  %v1856_v49 = vunpack.c.h.s8.bf16 %v576_v28  ;;  %v1313_v34 = vunpack.c.l.s8.bf16 %v321_v2  ;;  %v512_v56 = vld [vmem:[#allocation3 + $0xda0] sm:$0xff] }
 0x3fc   :  { %3678 = vmatpush1.bf16.msra.mxu1 %v1568_v21  ;;  %v3345_v43 = vpop.f32.mrf.mxu0  ;;  %3638 = vmatprep.subr.bf16.mxu0 %v1025_v25  ;;  %v864_v21 = vunpack.c.l.s8.bf16 %v96_v15  ;;  %v1857_v25 = vunpack.c.h.s8.bf16 %v577_v20  ;;  %v1825_v39 = vunpack.c.l.s8.bf16 %v577_v20  ;;  %v225_v15 = vld [vmem:[#allocation3 + $0x4a8] sm:$0xff]  ;;  %v224_v2 = vld [vmem:[#allocation3 + $0x4a0] sm:$0xff] }
 0x3fd   :  { %v3386_v50 = vpop.f32.mrf.mxu1  ;;  %3679 = vmatprep.subr.bf16.mxu1 %v1537_v27  ;;  %v320_v27 = vld [vmem:[#allocation3 + $0x7a0] sm:$0xff]  ;;  %v481_v16 = vld [vmem:[#allocation3 + $0xca8] sm:$0xff] }
 0x3fe   :  { %v1344_v30 = vunpack.c.h.s8.bf16 %v320_v27  ;;  %v1312_v43 = vunpack.c.l.s8.bf16 %v320_v27  ;;  %v1824_v50 = vunpack.c.l.s8.bf16 %v576_v28  ;;  %v480_v20 = vld [vmem:[#allocation3 + $0xca0] sm:$0xff]  ;;  %v705_v27 = vld [vmem:[#allocation3 + $0x13a8] sm:$0xff]  ;;  %v195_v28 = vld [vmem:[#allocation3 + $0x3b8] sm:$0xff] }
 0x3ff   :  { %3639 = vmatpush1.bf16.msra.mxu0 %v1024_v40  ;;  %v289_v40 = vld [vmem:[#allocation3 + $0x6a8] sm:$0xff] }
 0x400   :  { %3680 = vmatpush1.bf16.msra.mxu1 %v1536_v41  ;;  %3640 = vmatprep.subr.bf16.mxu0 %v993_v53  ;;  %v545_v41 = vld [vmem:[#allocation3 + $0xea8] sm:$0xff]  ;;  %v1281_v53 = vunpack.c.h.s8.bf16 %v289_v40 }
 0x401   :  { %3681 = vmatprep.subr.bf16.mxu1 %v1505_v35  ;;  %v1793_v35 = vunpack.c.h.s8.bf16 %v545_v41 }
 0x403   :  { %3641 = vmatpush1.bf16.msra.mxu0 %v992_v58  ;;  %v1280_v58 = vunpack.c.h.s8.bf16 %v288_v44 }
 0x404   :  { %3682 = vmatpush1.bf16.msra.mxu1 %v1504_v59  ;;  %3642 = vmatprep.subr.bf16.mxu0 %v961_v61  ;;  %v1792_v59 = vunpack.c.h.s8.bf16 %v544_v4  ;;  %v1249_v61 = vunpack.c.l.s8.bf16 %v289_v40  ;;  %v704_v40 = vld [vmem:[#allocation3 + $0x13a0] sm:$0xff] }
 0x405   :  { %3683 = vmatprep.subr.bf16.mxu1 %v1473_v1  ;;  %v1761_v1 = vunpack.c.l.s8.bf16 %v545_v41  ;;  %v194_v41 = vld [vmem:[#allocation3 + $0x3b0] sm:$0xff] }
 0x407   :  { %3643 = vmatpush1.bf16.msra.mxu0 %v960_v42  ;;  %v1248_v42 = vunpack.c.l.s8.bf16 %v288_v44  ;;  %v673_v44 = vld [vmem:[#allocation3 + $0x12a8] sm:$0xff] }
 0x408   :  { %3684 = vmatpush1.bf16.msra.mxu1 %v1472_v6  ;;  %3644 = vmatprep.subr.bf16.mxu0 %v929_v7  ;;  %v1760_v6 = vunpack.c.l.s8.bf16 %v544_v4  ;;  %v1217_v7 = vunpack.c.h.s8.bf16 %v257_v51  ;;  %v163_v4 = vld [vmem:[#allocation3 + $0x2b8] sm:$0xff] }
 0x409   :  { %3685 = vmatprep.subr.bf16.mxu1 %v1441_v8  ;;  %v1729_v8 = vunpack.c.h.s8.bf16 %v513_v0 }
 0x40b   :  { %3645 = vmatpush1.bf16.msra.mxu0 %v928_v11  ;;  %v1216_v11 = vunpack.c.h.s8.bf16 %v256_v29 }
 0x40c   :  { %3686 = vmatpush1.bf16.msra.mxu1 %v1440_v12  ;;  %3646 = vmatprep.subr.bf16.mxu0 %v897_v13  ;;  %v1728_v12 = vunpack.c.h.s8.bf16 %v512_v56  ;;  %v1185_v13 = vunpack.c.l.s8.bf16 %v257_v51  ;;  %v1058_v51 = vunpack.c.l.s8.bf16 %v194_v41 }
 0x40d   :  { %3687 = vmatprep.subr.bf16.mxu1 %v1409_v14  ;;  %v1697_v14 = vunpack.c.l.s8.bf16 %v513_v0 }
 0x40f   :  { %3647 = vmatpush1.bf16.msra.mxu0 %v896_v17  ;;  %v1184_v17 = vunpack.c.l.s8.bf16 %v256_v29  ;;  %v162_v29 = vld [vmem:[#allocation3 + $0x2b0] sm:$0xff] }
 0x410   :  { %3688 = vmatpush1.bf16.msra.mxu1 %v1408_v18  ;;  %3648 = vmatprep.subr.bf16.mxu0 %v865_v46  ;;  %v1696_v18 = vunpack.c.l.s8.bf16 %v512_v56  ;;  %v1153_v46 = vunpack.c.h.s8.bf16 %v225_v15 }
 0x411   :  { %3689 = vmatprep.subr.bf16.mxu1 %v1377_v19  ;;  %v1665_v19 = vunpack.c.h.s8.bf16 %v481_v16 }
 0x413   :  { %3649 = vmatpush1.bf16.msra.mxu0 %v864_v21  ;;  %v1152_v21 = vunpack.c.h.s8.bf16 %v224_v2 }
 0x414   :  { %3690 = vmatpush1.bf16.msra.mxu1 %v1376_v24  ;;  %3650 = vmatprep.subr.bf16.mxu0 %v1345_v52  ;;  %v1664_v24 = vunpack.c.h.s8.bf16 %v480_v20  ;;  %v1121_v52 = vunpack.c.l.s8.bf16 %v225_v15 }
 0x415   :  { %3691 = vmatprep.subr.bf16.mxu1 %v1857_v25  ;;  %v1633_v25 = vunpack.c.l.s8.bf16 %v481_v16 }
 0x417   :  { %3651 = vmatpush2.bf16.msra.mxu0 %v1344_v30  ;;  %v1120_v30 = vunpack.c.l.s8.bf16 %v224_v2 }
 0x418   :  { %3692 = vmatpush2.bf16.msra.mxu1 %v1856_v49  ;;  %3652 = vmatprep.subr.bf16.mxu0 %v1313_v34  ;;  %v1632_v49 = vunpack.c.l.s8.bf16 %v480_v20  ;;  %v2113_v34 = vunpack.c.h.s8.bf16 %v705_v27  ;;  %v994_v20 = vunpack.c.l.s8.bf16 %v162_v29 }
 0x419   :  { %3693 = vmatprep.subr.bf16.mxu1 %v1825_v39  ;;  %v1091_v39 = vunpack.c.h.s8.bf16 %v195_v28 }
 0x41b   :  { %3653 = vmatpush2.bf16.msra.mxu0 %v1312_v43  ;;  %v2112_v43 = vunpack.c.h.s8.bf16 %v704_v40 }
 0x41c   :  { %3694 = vmatpush2.bf16.msra.mxu1 %v1824_v50  ;;  %3654 = vmatprep.subr.bf16.mxu0 %v1281_v53  ;;  %v1090_v50 = vunpack.c.h.s8.bf16 %v194_v41  ;;  %v2081_v53 = vunpack.c.l.s8.bf16 %v705_v27 }
 0x41d   :  { %3695 = vmatprep.subr.bf16.mxu1 %v1793_v35  ;;  %v1059_v35 = vunpack.c.l.s8.bf16 %v195_v28 }
 0x41f   :  { %3655 = vmatpush2.bf16.msra.mxu0 %v1280_v58 }
 0x420   :  { %3696 = vmatpush2.bf16.msra.mxu1 %v1792_v59  ;;  %3656 = vmatprep.subr.bf16.mxu0 %v1249_v61 }
 0x421   :  { %3697 = vmatprep.subr.bf16.mxu1 %v1761_v1  ;;  %v2080_v1 = vunpack.c.l.s8.bf16 %v704_v40 }
 0x423   :  { %3657 = vmatpush2.bf16.msra.mxu0 %v1248_v42 }
 0x424   :  { %3698 = vmatpush2.bf16.msra.mxu1 %v1760_v6  ;;  %3658 = vmatprep.subr.bf16.mxu0 %v1217_v7  ;;  %v2049_v6 = vunpack.c.h.s8.bf16 %v673_v44  ;;  %v1027_v7 = vunpack.c.h.s8.bf16 %v163_v4 }
 0x425   :  { %3699 = vmatprep.subr.bf16.mxu1 %v1729_v8  ;;  %v672_v8 = vld [vmem:[#allocation3 + $0x12a0] sm:$0xff] }
 0x426   :  { %v2016_v2 = vunpack.c.l.s8.bf16 %v672_v8 }
 0x427   :  { %3659 = vmatpush2.bf16.msra.mxu0 %v1216_v11 }
 0x428   :  { %3700 = vmatpush2.bf16.msra.mxu1 %v1728_v12  ;;  %3660 = vmatprep.subr.bf16.mxu0 %v1185_v13  ;;  %v2048_v13 = vunpack.c.h.s8.bf16 %v672_v8  ;;  %v832_v8 = vld [vmem:[#allocation3 + $0x17a0] sm:$0xff] }
 0x429   :  { %3701 = vmatprep.subr.bf16.mxu1 %v1697_v14  ;;  %v1026_v14 = vunpack.c.h.s8.bf16 %v162_v29  ;;  %v322_v29 = vld [vmem:[#allocation3 + $0x7b0] sm:$0xff] }
 0x42b   :  { %3661 = vmatpush2.bf16.msra.mxu0 %v1184_v17  ;;  %v2017_v17 = vunpack.c.l.s8.bf16 %v673_v44 }
 0x42c   :  { %3702 = vmatpush2.bf16.msra.mxu1 %v1696_v18  ;;  %3662 = vmatprep.subr.bf16.mxu0 %v1153_v46  ;;  %v995_v18 = vunpack.c.l.s8.bf16 %v163_v4  ;;  %v641_v46 = vld [vmem:[#allocation3 + $0x11a8] sm:$0xff] }
 0x42d   :  { %3703 = vmatprep.subr.bf16.mxu1 %v1665_v19  ;;  %v131_v19 = vld [vmem:[#allocation3 + $0x1b8] sm:$0xff] }
 0x42f   :  { %3663 = vmatpush2.bf16.msra.mxu0 %v1152_v21  ;;  %v1985_v21 = vunpack.c.h.s8.bf16 %v641_v46 }
 0x430   :  { %3704 = vmatpush2.bf16.msra.mxu1 %v1664_v24  ;;  %3664 = vmatprep.subr.bf16.mxu0 %v1121_v52  ;;  %v963_v24 = vunpack.c.h.s8.bf16 %v131_v19  ;;  %v640_v52 = vld [vmem:[#allocation3 + $0x11a0] sm:$0xff] }
 0x431   :  { %3705 = vmatprep.subr.bf16.mxu1 %v1633_v25  ;;  %v130_v25 = vld [vmem:[#allocation3 + $0x1b0] sm:$0xff]  ;;  %v1984_v27 = vunpack.c.h.s8.bf16 %v640_v52  ;;  %v1952_v40 = vunpack.c.l.s8.bf16 %v640_v52 }
 0x432   :  { %v962_v28 = vunpack.c.h.s8.bf16 %v130_v25  ;;  %v930_v41 = vunpack.c.l.s8.bf16 %v130_v25 }
 0x433   :  { %3665 = vmatpush2.bf16.msra.mxu0 %v1120_v30  ;;  %v1953_v30 = vunpack.c.l.s8.bf16 %v641_v46 }
 0x434   :  { %3706 = vmatpush2.bf16.msra.mxu1 %v1632_v49  ;;  %3716 = vmatprep.subr.bf16.mxu0 %v2113_v34  ;;  %v931_v49 = vunpack.c.l.s8.bf16 %v131_v19  ;;  %v609_v34 = vld [vmem:[#allocation3 + $0x10a8] sm:$0xff] }
 0x435   :  { %3757 = vmatprep.subr.bf16.mxu1 %v1091_v39  ;;  %v99_v39 = vld [vmem:[#allocation3 + $0xb8] sm:$0xff] }
 0x436   :  { %v3422_v58 = vpop.f32.mrf.mxu0  ;;  %3667 = vmatmul.mubr.bf16.vlgmr.msra.gmra.mxu0 %v5519_v47 }
 0x437   :  { %v3463_v59 = vpop.f32.mrf.mxu1  ;;  %3708 = vmatmul.mubr.bf16.vlgmr.msra.gmra.mxu1 %v5523_v48  ;;  %3717 = vmatpush1.bf16.msra.mxu0 %v2112_v43  ;;  %v1921_v43 = vunpack.c.h.s8.bf16 %v609_v34 }
 0x438   :  { %v5680_v61 = vadd.f32 %v3463_v59, %v3422_v58  ;;  %3758 = vmatpush1.bf16.msra.mxu1 %v1090_v50  ;;  %v3424_v0 = vpop.f32.mrf.mxu0  ;;  %3718 = vmatprep.subr.bf16.mxu0 %v2081_v53  ;;  %v899_v50 = vunpack.c.h.s8.bf16 %v99_v39  ;;  %v608_v53 = vld [vmem:[#allocation3 + $0x10a0] sm:$0xff]  ;;  %v1889_v58 = vunpack.c.l.s8.bf16 %v609_v34  ;;  %v867_v59 = vunpack.c.l.s8.bf16 %v99_v39 }
 0x439   :  { %v3465_v42 = vpop.f32.mrf.mxu1  ;;  %3759 = vmatprep.subr.bf16.mxu1 %v1059_v35  ;;  %3748 = vmatprep.mubr.bf16.mxu0 %v5532_v55  ;;  %v98_v35 = vld [vmem:[#allocation3 + $0xb0] sm:$0xff]  ;;  %v1920_v44 = vunpack.c.h.s8.bf16 %v608_v53 }
 0x43a   :  { %v5682_v56 = vadd.f32 %v3465_v42, %v3424_v0  ;;  %3789 = vmatprep.mubr.bf16.mxu1 %v5509_v37  ;;  %v3426_v11 = vpop.f32.mrf.mxu0  ;;  %v898_v4 = vunpack.c.h.s8.bf16 %v98_v35  ;;  %v1888_v0 = vunpack.c.l.s8.bf16 %v608_v53  ;;  %v866_v42 = vunpack.c.l.s8.bf16 %v98_v35 }
 0x43b   :  { %v3467_v12 = vpop.f32.mrf.mxu1  ;;  %3719 = vmatpush1.bf16.msra.mxu0 %v2080_v1  ;;  %v833_v1 = vld [vmem:[#allocation3 + $0x17a8] sm:$0xff]  ;;  %v2368_v11 = vunpack.c.h.s8.bf16 %v832_v8 }
 0x43c   :  { %3760 = vmatpush1.bf16.msra.mxu1 %v1058_v51  ;;  %v3427_v15 = vpop.f32.mrf.mxu0  ;;  %3720 = vmatprep.subr.bf16.mxu0 %v2049_v6  ;;  %v323_v51 = vld [vmem:[#allocation3 + $0x7b8] sm:$0xff]  ;;  %v2369_v6 = vunpack.c.h.s8.bf16 %v833_v1  ;;  %v1346_v12 = vunpack.c.h.s8.bf16 %v322_v29 }
 0x43d   :  { %v3468_v16 = vpop.f32.mrf.mxu1  ;;  %3761 = vmatprep.subr.bf16.mxu1 %v1027_v7  ;;  %v1347_v7 = vunpack.c.h.s8.bf16 %v323_v51  ;;  %v801_v15 = vld [vmem:[#allocation3 + $0x16a8] sm:$0xff] }
 0x43e   :  { %v291_v16 = vld [vmem:[#allocation3 + $0x6b8] sm:$0xff]  ;;  %v2305_v46 = vunpack.c.h.s8.bf16 %v801_v15  ;;  %v2273_v52 = vunpack.c.l.s8.bf16 %v801_v15 }
 0x43f   :  { %3721 = vmatpush1.bf16.msra.mxu0 %v2048_v13  ;;  %v2337_v13 = vunpack.c.l.s8.bf16 %v833_v1  ;;  %v1283_v19 = vunpack.c.h.s8.bf16 %v291_v16  ;;  %v1251_v25 = vunpack.c.l.s8.bf16 %v291_v16 }
 0x440   :  { %3762 = vmatpush1.bf16.msra.mxu1 %v1026_v14  ;;  %3722 = vmatprep.subr.bf16.mxu0 %v2017_v17  ;;  %v1315_v14 = vunpack.c.l.s8.bf16 %v323_v51  ;;  %v2336_v17 = vunpack.c.l.s8.bf16 %v832_v8 }
 0x441   :  { %3763 = vmatprep.subr.bf16.mxu1 %v995_v18  ;;  %v1314_v18 = vunpack.c.l.s8.bf16 %v322_v29 }
 0x443   :  { %3723 = vmatpush1.bf16.msra.mxu0 %v2016_v2  ;;  %v800_v2 = vld [vmem:[#allocation3 + $0x16a0] sm:$0xff] }
 0x444   :  { %3764 = vmatpush1.bf16.msra.mxu1 %v994_v20  ;;  %3724 = vmatprep.subr.bf16.mxu0 %v1985_v21  ;;  %v290_v20 = vld [vmem:[#allocation3 + $0x6b0] sm:$0xff]  ;;  %v2304_v21 = vunpack.c.h.s8.bf16 %v800_v2 }
 0x445   :  { %3765 = vmatprep.subr.bf16.mxu1 %v963_v24  ;;  %v1282_v24 = vunpack.c.h.s8.bf16 %v290_v20 }
 0x447   :  { %3725 = vmatpush1.bf16.msra.mxu0 %v1984_v27  ;;  %v769_v27 = vld [vmem:[#allocation3 + $0x15a8] sm:$0xff] }
 0x448   :  { %3766 = vmatpush1.bf16.msra.mxu1 %v962_v28  ;;  %3726 = vmatprep.subr.bf16.mxu0 %v1953_v30  ;;  %v259_v28 = vld [vmem:[#allocation3 + $0x5b8] sm:$0xff]  ;;  %v2272_v30 = vunpack.c.l.s8.bf16 %v800_v2  ;;  %v2241_v34 = vunpack.c.h.s8.bf16 %v769_v27  ;;  %v2209_v53 = vunpack.c.l.s8.bf16 %v769_v27 }
 0x449   :  { %3767 = vmatprep.subr.bf16.mxu1 %v931_v49  ;;  %v1250_v49 = vunpack.c.l.s8.bf16 %v290_v20  ;;  %v1219_v39 = vunpack.c.h.s8.bf16 %v259_v28  ;;  %v1187_v35 = vunpack.c.l.s8.bf16 %v259_v28 }
 0x44b   :  { %3727 = vmatpush1.bf16.msra.mxu0 %v1952_v40  ;;  %v768_v40 = vld [vmem:[#allocation3 + $0x15a0] sm:$0xff] }
 0x44c   :  { %3768 = vmatpush1.bf16.msra.mxu1 %v930_v41  ;;  %3728 = vmatprep.subr.bf16.mxu0 %v1921_v43  ;;  %v258_v41 = vld [vmem:[#allocation3 + $0x5b0] sm:$0xff]  ;;  %v2240_v43 = vunpack.c.h.s8.bf16 %v768_v40 }
 0x44d   :  { %3769 = vmatprep.subr.bf16.mxu1 %v899_v50  ;;  %v1218_v50 = vunpack.c.h.s8.bf16 %v258_v41 }
 0x44f   :  { %3729 = vmatpush1.bf16.msra.mxu0 %v1920_v44  ;;  %v737_v44 = vld [vmem:[#allocation3 + $0x14a8] sm:$0xff] }
 0x450   :  { %3770 = vmatpush1.bf16.msra.mxu1 %v898_v4  ;;  %3730 = vmatprep.subr.bf16.mxu0 %v1889_v58  ;;  %v227_v4 = vld [vmem:[#allocation3 + $0x4b8] sm:$0xff]  ;;  %v2208_v58 = vunpack.c.l.s8.bf16 %v768_v40  ;;  %v2177_v1 = vunpack.c.h.s8.bf16 %v737_v44  ;;  %v2145_v8 = vunpack.c.l.s8.bf16 %v737_v44 }
 0x451   :  { %3771 = vmatprep.subr.bf16.mxu1 %v867_v59  ;;  %v1186_v59 = vunpack.c.l.s8.bf16 %v258_v41  ;;  %v1155_v51 = vunpack.c.h.s8.bf16 %v227_v4  ;;  %v1123_v29 = vunpack.c.l.s8.bf16 %v227_v4  ;;  %v418_v41 = vld [vmem:[#allocation3 + $0xab0] sm:$0xff] }
 0x453   :  { %3731 = vmatpush1.bf16.msra.mxu0 %v1888_v0  ;;  %v736_v0 = vld [vmem:[#allocation3 + $0x14a0] sm:$0xff] }
 0x454   :  { %3772 = vmatpush1.bf16.msra.mxu1 %v866_v42  ;;  %3732 = vmatprep.subr.bf16.mxu0 %v2369_v6  ;;  %v226_v42 = vld [vmem:[#allocation3 + $0x4b0] sm:$0xff]  ;;  %v2176_v6 = vunpack.c.h.s8.bf16 %v736_v0 }
 0x455   :  { %3773 = vmatprep.subr.bf16.mxu1 %v1347_v7  ;;  %v1154_v7 = vunpack.c.h.s8.bf16 %v226_v42 }
 0x457   :  { %3733 = vmatpush2.bf16.msra.mxu0 %v2368_v11  ;;  %v451_v11 = vld [vmem:[#allocation3 + $0xbb8] sm:$0xff] }
 0x458   :  { %3774 = vmatpush2.bf16.msra.mxu1 %v1346_v12  ;;  %3734 = vmatprep.subr.bf16.mxu0 %v2337_v13  ;;  %v707_v12 = vld [vmem:[#allocation3 + $0x13b8] sm:$0xff]  ;;  %v2144_v13 = vunpack.c.l.s8.bf16 %v736_v0  ;;  %v1603_v15 = vunpack.c.h.s8.bf16 %v451_v11  ;;  %v1571_v2 = vunpack.c.l.s8.bf16 %v451_v11 }
 0x459   :  { %3775 = vmatprep.subr.bf16.mxu1 %v1315_v14  ;;  %v1122_v14 = vunpack.c.l.s8.bf16 %v226_v42  ;;  %v2115_v16 = vunpack.c.h.s8.bf16 %v707_v12  ;;  %v2083_v20 = vunpack.c.l.s8.bf16 %v707_v12  ;;  %v643_v0 = vld [vmem:[#allocation3 + $0x11b8] sm:$0xff] }
 0x45b   :  { %3735 = vmatpush2.bf16.msra.mxu0 %v2336_v17  ;;  %v450_v17 = vld [vmem:[#allocation3 + $0xbb0] sm:$0xff] }
 0x45c   :  { %3776 = vmatpush2.bf16.msra.mxu1 %v1314_v18  ;;  %3736 = vmatprep.subr.bf16.mxu0 %v2305_v46  ;;  %v706_v18 = vld [vmem:[#allocation3 + $0x13b0] sm:$0xff]  ;;  %v1602_v46 = vunpack.c.h.s8.bf16 %v450_v17  ;;  %v1570_v28 = vunpack.c.l.s8.bf16 %v450_v17 }
 0x45d   :  { %3777 = vmatprep.subr.bf16.mxu1 %v1283_v19  ;;  %v2114_v19 = vunpack.c.h.s8.bf16 %v706_v18 }
 0x45f   :  { %3737 = vmatpush2.bf16.msra.mxu0 %v2304_v21  ;;  %v419_v21 = vld [vmem:[#allocation3 + $0xab8] sm:$0xff] }
 0x460   :  { %3778 = vmatpush2.bf16.msra.mxu1 %v1282_v24  ;;  %3738 = vmatprep.subr.bf16.mxu0 %v2273_v52  ;;  %v675_v24 = vld [vmem:[#allocation3 + $0x12b8] sm:$0xff] }
 0x461   :  { %3779 = vmatprep.subr.bf16.mxu1 %v1251_v25  ;;  %v2051_v40 = vunpack.c.h.s8.bf16 %v675_v24 }
 0x463   :  { %3739 = vmatpush2.bf16.msra.mxu0 %v2272_v30  ;;  %v2082_v30 = vunpack.c.l.s8.bf16 %v706_v18 }
 0x464   :  { %3780 = vmatpush2.bf16.msra.mxu1 %v1250_v49  ;;  %3740 = vmatprep.subr.bf16.mxu0 %v2241_v34 }
 0x465   :  { %3781 = vmatprep.subr.bf16.mxu1 %v1219_v39  ;;  %v1539_v39 = vunpack.c.h.s8.bf16 %v419_v21 }
 0x467   :  { %3741 = vmatpush2.bf16.msra.mxu0 %v2240_v43  ;;  %v674_v43 = vld [vmem:[#allocation3 + $0x12b0] sm:$0xff] }
 0x468   :  { %3782 = vmatpush2.bf16.msra.mxu1 %v1218_v50  ;;  %3742 = vmatprep.subr.bf16.mxu0 %v2209_v53  ;;  %v2050_v44 = vunpack.c.h.s8.bf16 %v674_v43  ;;  %v2018_v42 = vunpack.c.l.s8.bf16 %v674_v43 }
 0x469   :  { %3783 = vmatprep.subr.bf16.mxu1 %v1187_v35  ;;  %v1538_v35 = vunpack.c.h.s8.bf16 %v418_v41 }
 0x46b   :  { %3743 = vmatpush2.bf16.msra.mxu0 %v2208_v58 }
 0x46c   :  { %3784 = vmatpush2.bf16.msra.mxu1 %v1186_v59  ;;  %3744 = vmatprep.subr.bf16.mxu0 %v2177_v1  ;;  %v1507_v59 = vunpack.c.l.s8.bf16 %v419_v21  ;;  %v2019_v1 = vunpack.c.l.s8.bf16 %v675_v24 }
 0x46d   :  { %3785 = vmatprep.subr.bf16.mxu1 %v1155_v51  ;;  %v387_v51 = vld [vmem:[#allocation3 + $0x9b8] sm:$0xff] }
 0x46f   :  { %3745 = vmatpush2.bf16.msra.mxu0 %v2176_v6  ;;  %v1475_v6 = vunpack.c.h.s8.bf16 %v387_v51 }
 0x470   :  { %3786 = vmatpush2.bf16.msra.mxu1 %v1154_v7  ;;  %3746 = vmatprep.subr.bf16.mxu0 %v2145_v8  ;;  %v1987_v7 = vunpack.c.h.s8.bf16 %v643_v0  ;;  %v386_v8 = vld [vmem:[#allocation3 + $0x9b0] sm:$0xff] }
 0x471   :  { %3787 = vmatprep.subr.bf16.mxu1 %v1123_v29  ;;  %v642_v29 = vld [vmem:[#allocation3 + $0x11b0] sm:$0xff]  ;;  %v1474_v11 = vunpack.c.h.s8.bf16 %v386_v8  ;;  %v1442_v17 = vunpack.c.l.s8.bf16 %v386_v8 }
 0x472   :  { %v1986_v12 = vunpack.c.h.s8.bf16 %v642_v29  ;;  %v1954_v18 = vunpack.c.l.s8.bf16 %v642_v29 }
 0x473   :  { %3747 = vmatpush2.bf16.msra.mxu0 %v2144_v13  ;;  %v1443_v13 = vunpack.c.l.s8.bf16 %v387_v51 }
 0x474   :  { %3788 = vmatpush2.bf16.msra.mxu1 %v1122_v14  ;;  %3798 = vmatprep.subr.bf16.mxu0 %v1603_v15  ;;  %v1955_v14 = vunpack.c.l.s8.bf16 %v643_v0  ;;  %v355_v15 = vld [vmem:[#allocation3 + $0x8b8] sm:$0xff] }
 0x475   :  { %3839 = vmatprep.subr.bf16.mxu1 %v2115_v16  ;;  %v611_v16 = vld [vmem:[#allocation3 + $0x10b8] sm:$0xff] }
 0x476   :  { %v3504_v52 = vpop.f32.mrf.mxu0  ;;  %3749 = vmatmul.mubr.bf16.vlgmr.msra.gmra.mxu0 %v5540_v23 }
 0x477   :  { %v5686_v25 = vpop.f32.mrf.mxu1  ;;  %3790 = vmatmul.mubr.bf16.vlgmr.msra.gmra.mxu1 %v5519_v47  ;;  %v5691_v27 = vadd.f32 %v3504_v52, %v5680_v61  ;;  %3799 = vmatpush1.bf16.msra.mxu0 %v1602_v46  ;;  %v1411_v46 = vunpack.c.h.s8.bf16 %v355_v15  ;;  %v1379_v52 = vunpack.c.l.s8.bf16 %v355_v15 }
 0x478   :  { %3840 = vmatpush1.bf16.msra.mxu1 %v2114_v19  ;;  %v3506_v49 = vpop.f32.mrf.mxu0  ;;  %3800 = vmatprep.subr.bf16.mxu0 %v1571_v2  ;;  %v1923_v19 = vunpack.c.h.s8.bf16 %v611_v16  ;;  %v354_v2 = vld [vmem:[#allocation3 + $0x8b0] sm:$0xff] }
 0x479   :  { %v5693_v34 = vpop.f32.mrf.mxu1  ;;  %3841 = vmatprep.subr.bf16.mxu1 %v2083_v20  ;;  %v5696_v50 = vadd.f32 %v3506_v49, %v5682_v56  ;;  %3830 = vmatprep.mubr.bf16.mxu0 %v5513_v38  ;;  %v1506_v56 = vunpack.c.l.s8.bf16 %v418_v41  ;;  %v610_v20 = vld [vmem:[#allocation3 + $0x10b0] sm:$0xff]  ;;  %v1410_v21 = vunpack.c.h.s8.bf16 %v354_v2  ;;  %v835_v49 = vld [vmem:[#allocation3 + $0x17b8] sm:$0xff] }
 0x47a   :  { %3871 = vmatprep.mubr.bf16.mxu1 %v5532_v55  ;;  %v3508_v61 = vpop.f32.mrf.mxu0  ;;  %v1922_v24 = vunpack.c.h.s8.bf16 %v610_v20  ;;  %v2371_v43 = vunpack.c.h.s8.bf16 %v835_v49 }
 0x47b   :  { %v3549_v53 = vpop.f32.mrf.mxu1  ;;  %3801 = vmatpush1.bf16.msra.mxu0 %v1570_v28  ;;  %v1891_v28 = vunpack.c.l.s8.bf16 %v611_v16  ;;  %v578_v61 = vld [vmem:[#allocation3 + $0xfb0] sm:$0xff] }
 0x47c   :  { %3842 = vmatpush1.bf16.msra.mxu1 %v2082_v30  ;;  %v3509_v4 = vpop.f32.mrf.mxu0  ;;  %3802 = vmatprep.subr.bf16.mxu0 %v1539_v39  ;;  %v579_v30 = vld [vmem:[#allocation3 + $0xfb8] sm:$0xff]  ;;  %v1378_v39 = vunpack.c.l.s8.bf16 %v354_v2  ;;  %v834_v53 = vld [vmem:[#allocation3 + $0x17b0] sm:$0xff]  ;;  %v1826_v51 = vunpack.c.l.s8.bf16 %v578_v61 }
 0x47d   :  { %v3550_v58 = vpop.f32.mrf.mxu1  ;;  %3843 = vmatprep.subr.bf16.mxu1 %v2051_v40  ;;  %v1890_v40 = vunpack.c.l.s8.bf16 %v610_v20  ;;  %v1859_v41 = vunpack.c.h.s8.bf16 %v579_v30  ;;  %v1827_v4 = vunpack.c.l.s8.bf16 %v579_v30  ;;  %v2338_v0 = vunpack.c.l.s8.bf16 %v834_v53 }
 0x47e   :  { %v2339_v58 = vunpack.c.l.s8.bf16 %v835_v49 }
 0x47f   :  { %3803 = vmatpush1.bf16.msra.mxu0 %v1538_v35  ;;  %v1858_v35 = vunpack.c.h.s8.bf16 %v578_v61 }
 0x480   :  { %3844 = vmatpush1.bf16.msra.mxu1 %v2050_v44  ;;  %3804 = vmatprep.subr.bf16.mxu0 %v1507_v59  ;;  %v2370_v44 = vunpack.c.h.s8.bf16 %v834_v53  ;;  %v547_v59 = vld [vmem:[#allocation3 + $0xeb8] sm:$0xff] }
 0x481   :  { %3845 = vmatprep.subr.bf16.mxu1 %v2019_v1  ;;  %v803_v1 = vld [vmem:[#allocation3 + $0x16b8] sm:$0xff] }
 0x483   :  { %3805 = vmatpush1.bf16.msra.mxu0 %v1506_v56  ;;  %v1795_v56 = vunpack.c.h.s8.bf16 %v547_v59 }
 0x484   :  { %3846 = vmatpush1.bf16.msra.mxu1 %v2018_v42  ;;  %3806 = vmatprep.subr.bf16.mxu0 %v1475_v6  ;;  %v2307_v42 = vunpack.c.h.s8.bf16 %v803_v1  ;;  %v546_v6 = vld [vmem:[#allocation3 + $0xeb0] sm:$0xff] }
 0x485   :  { %3847 = vmatprep.subr.bf16.mxu1 %v1987_v7  ;;  %v802_v7 = vld [vmem:[#allocation3 + $0x16b0] sm:$0xff]  ;;  %v1794_v8 = vunpack.c.h.s8.bf16 %v546_v6  ;;  %v1762_v15 = vunpack.c.l.s8.bf16 %v546_v6 }
 0x486   :  { %v2306_v29 = vunpack.c.h.s8.bf16 %v802_v7  ;;  %v2274_v16 = vunpack.c.l.s8.bf16 %v802_v7 }
 0x487   :  { %3807 = vmatpush1.bf16.msra.mxu0 %v1474_v11  ;;  %v1763_v11 = vunpack.c.l.s8.bf16 %v547_v59 }
 0x488   :  { %3848 = vmatpush1.bf16.msra.mxu1 %v1986_v12  ;;  %3808 = vmatprep.subr.bf16.mxu0 %v1443_v13  ;;  %v2275_v12 = vunpack.c.l.s8.bf16 %v803_v1  ;;  %v515_v13 = vld [vmem:[#allocation3 + $0xdb8] sm:$0xff] }
 0x489   :  { %3849 = vmatprep.subr.bf16.mxu1 %v1955_v14  ;;  %v771_v14 = vld [vmem:[#allocation3 + $0x15b8] sm:$0xff] }
 0x48b   :  { %3809 = vmatpush1.bf16.msra.mxu0 %v1442_v17  ;;  %v1731_v17 = vunpack.c.h.s8.bf16 %v515_v13 }
 0x48c   :  { %3850 = vmatpush1.bf16.msra.mxu1 %v1954_v18  ;;  %3810 = vmatprep.subr.bf16.mxu0 %v1411_v46  ;;  %v2243_v18 = vunpack.c.h.s8.bf16 %v771_v14  ;;  %v514_v46 = vld [vmem:[#allocation3 + $0xdb0] sm:$0xff] }
 0x48d   :  { %3851 = vmatprep.subr.bf16.mxu1 %v1923_v19  ;;  %v770_v19 = vld [vmem:[#allocation3 + $0x15b0] sm:$0xff]  ;;  %v1730_v2 = vunpack.c.h.s8.bf16 %v514_v46  ;;  %v1698_v30 = vunpack.c.l.s8.bf16 %v514_v46 }
 0x48e   :  { %v2242_v20 = vunpack.c.h.s8.bf16 %v770_v19  ;;  %v2210_v49 = vunpack.c.l.s8.bf16 %v770_v19 }
 0x48f   :  { %3811 = vmatpush1.bf16.msra.mxu0 %v1410_v21  ;;  %v1699_v21 = vunpack.c.l.s8.bf16 %v515_v13 }
 0x490   :  { %3852 = vmatpush1.bf16.msra.mxu1 %v1922_v24  ;;  %3812 = vmatprep.subr.bf16.mxu0 %v1379_v52  ;;  %v2211_v24 = vunpack.c.l.s8.bf16 %v771_v14  ;;  %v483_v52 = vld [vmem:[#allocation3 + $0xcb8] sm:$0xff] }
 0x491   :  { %3853 = vmatprep.subr.bf16.mxu1 %v1891_v28  ;;  %v739_v28 = vld [vmem:[#allocation3 + $0x14b8] sm:$0xff] }
 0x493   :  { %3813 = vmatpush1.bf16.msra.mxu0 %v1378_v39  ;;  %v1667_v39 = vunpack.c.h.s8.bf16 %v483_v52 }
 0x494   :  { %3854 = vmatpush1.bf16.msra.mxu1 %v1890_v40  ;;  %3814 = vmatprep.subr.bf16.mxu0 %v1859_v41  ;;  %v2179_v40 = vunpack.c.h.s8.bf16 %v739_v28  ;;  %v482_v41 = vld [vmem:[#allocation3 + $0xcb0] sm:$0xff] }
 0x495   :  { %3855 = vmatprep.subr.bf16.mxu1 %v2371_v43  ;;  %v738_v43 = vld [vmem:[#allocation3 + $0x14b0] sm:$0xff]  ;;  %v1666_v61 = vunpack.c.h.s8.bf16 %v482_v41  ;;  %v1634_v59 = vunpack.c.l.s8.bf16 %v482_v41 }
 0x496   :  { %v2178_v53 = vunpack.c.h.s8.bf16 %v738_v43  ;;  %v2146_v1 = vunpack.c.l.s8.bf16 %v738_v43 }
 0x497   :  { %3815 = vmatpush2.bf16.msra.mxu0 %v1858_v35  ;;  %v1635_v35 = vunpack.c.l.s8.bf16 %v483_v52 }
 0x498   :  { %3856 = vmatpush2.bf16.msra.mxu1 %v2370_v44  ;;  %3816 = vmatprep.subr.bf16.mxu0 %v1827_v4  ;;  %v2147_v44 = vunpack.c.l.s8.bf16 %v739_v28  ;;  %v197_v4 = vld [vmem:[#allocation3 + $0x3c8] sm:$0xff] }
 0x499   :  { %3857 = vmatprep.subr.bf16.mxu1 %v2339_v58  ;;  %v453_v58 = vld [vmem:[#allocation3 + $0xbc8] sm:$0xff] }
 0x49b   :  { %3817 = vmatpush2.bf16.msra.mxu0 %v1826_v51  ;;  %v1093_v51 = vunpack.c.h.s8.bf16 %v197_v4 }
 0x49c   :  { %3858 = vmatpush2.bf16.msra.mxu1 %v2338_v0  ;;  %3818 = vmatprep.subr.bf16.mxu0 %v1795_v56  ;;  %v1605_v0 = vunpack.c.h.s8.bf16 %v453_v58  ;;  %v196_v56 = vld [vmem:[#allocation3 + $0x3c0] sm:$0xff] }
 0x49d   :  { %3859 = vmatprep.subr.bf16.mxu1 %v2307_v42  ;;  %v452_v42 = vld [vmem:[#allocation3 + $0xbc0] sm:$0xff]  ;;  %v1092_v6 = vunpack.c.h.s8.bf16 %v196_v56 }
 0x49e   :  { %v1604_v7 = vunpack.c.h.s8.bf16 %v452_v42 }
 0x49f   :  { %3819 = vmatpush2.bf16.msra.mxu0 %v1794_v8  ;;  %v1061_v8 = vunpack.c.l.s8.bf16 %v197_v4 }
 0x4a0   :  { %3860 = vmatpush2.bf16.msra.mxu1 %v2306_v29  ;;  %3820 = vmatprep.subr.bf16.mxu0 %v1763_v11  ;;  %v1573_v29 = vunpack.c.l.s8.bf16 %v453_v58  ;;  %v165_v11 = vld [vmem:[#allocation3 + $0x2c8] sm:$0xff] }
 0x4a1   :  { %3861 = vmatprep.subr.bf16.mxu1 %v2275_v12  ;;  %v421_v12 = vld [vmem:[#allocation3 + $0xac8] sm:$0xff]  ;;  %v1029_v19 = vunpack.c.h.s8.bf16 %v165_v11  ;;  %v997_v43 = vunpack.c.l.s8.bf16 %v165_v11 }
 0x4a3   :  { %3821 = vmatpush2.bf16.msra.mxu0 %v1762_v15 }
 0x4a4   :  { %3862 = vmatpush2.bf16.msra.mxu1 %v2274_v16  ;;  %3822 = vmatprep.subr.bf16.mxu0 %v1731_v17  ;;  %v1060_v16 = vunpack.c.l.s8.bf16 %v196_v56  ;;  %v1572_v17 = vunpack.c.l.s8.bf16 %v452_v42 }
 0x4a5   :  { %3863 = vmatprep.subr.bf16.mxu1 %v2243_v18 }
 0x4a7   :  { %3823 = vmatpush2.bf16.msra.mxu0 %v1730_v2  ;;  %v1541_v2 = vunpack.c.h.s8.bf16 %v421_v12 }
 0x4a8   :  { %3864 = vmatpush2.bf16.msra.mxu1 %v2242_v20  ;;  %3824 = vmatprep.subr.bf16.mxu0 %v1699_v21  ;;  %v164_v20 = vld [vmem:[#allocation3 + $0x2c0] sm:$0xff] }
 0x4a9   :  { %3865 = vmatprep.subr.bf16.mxu1 %v2211_v24  ;;  %v420_v21 = vld [vmem:[#allocation3 + $0xac0] sm:$0xff] }
 0x4ab   :  { %3825 = vmatpush2.bf16.msra.mxu0 %v1698_v30 }
 0x4ac   :  { %3866 = vmatpush2.bf16.msra.mxu1 %v2210_v49  ;;  %3826 = vmatprep.subr.bf16.mxu0 %v1667_v39  ;;  %v1028_v49 = vunpack.c.h.s8.bf16 %v164_v20  ;;  %v1540_v39 = vunpack.c.h.s8.bf16 %v420_v21 }
 0x4ad   :  { %3867 = vmatprep.subr.bf16.mxu1 %v2179_v40 }
 0x4af   :  { %3827 = vmatpush2.bf16.msra.mxu0 %v1666_v61  ;;  %v1509_v61 = vunpack.c.l.s8.bf16 %v421_v12 }
 0x4b0   :  { %3868 = vmatpush2.bf16.msra.mxu1 %v2178_v53  ;;  %3828 = vmatprep.subr.bf16.mxu0 %v1635_v35  ;;  %v133_v53 = vld [vmem:[#allocation3 + $0x1c8] sm:$0xff]  ;;  %v996_v35 = vunpack.c.l.s8.bf16 %v164_v20 }
 0x4b1   :  { %3869 = vmatprep.subr.bf16.mxu1 %v2147_v44  ;;  %v1508_v44 = vunpack.c.l.s8.bf16 %v420_v21  ;;  %v965_v4 = vunpack.c.h.s8.bf16 %v133_v53  ;;  %v933_v56 = vunpack.c.l.s8.bf16 %v133_v53 }
 0x4b3   :  { %3829 = vmatpush2.bf16.msra.mxu0 %v1634_v59  ;;  %v132_v59 = vld [vmem:[#allocation3 + $0x1c0] sm:$0xff] }
 0x4b4   :  { %3870 = vmatpush2.bf16.msra.mxu1 %v2146_v1  ;;  %3880 = vmatprep.subr.bf16.mxu0 %v1093_v51  ;;  %v388_v1 = vld [vmem:[#allocation3 + $0x9c0] sm:$0xff]  ;;  %v964_v51 = vunpack.c.h.s8.bf16 %v132_v59 }
 0x4b5   :  { %3921 = vmatprep.subr.bf16.mxu1 %v1605_v0  ;;  %v1476_v0 = vunpack.c.h.s8.bf16 %v388_v1 }
 0x4b6   :  { %v3586_v13 = vpop.f32.mrf.mxu0  ;;  %3831 = vmatmul.mubr.bf16.vlgmr.msra.gmra.mxu0 %v5523_v48 }
 0x4b7   :  { %v3627_v14 = vpop.f32.mrf.mxu1  ;;  %3872 = vmatmul.mubr.bf16.vlgmr.msra.gmra.mxu1 %v5540_v23  ;;  %v3587_v15 = vadd.f32 %v3586_v13, %v5686_v25  ;;  %3881 = vmatpush1.bf16.msra.mxu0 %v1092_v6  ;;  %v101_v6 = vld [vmem:[#allocation3 + $0xc8] sm:$0xff]  ;;  %v100_v13 = vld [vmem:[#allocation3 + $0xc0] sm:$0xff] }
 0x4b8   :  { %3922 = vmatpush1.bf16.msra.mxu1 %v1604_v7  ;;  %v3588_v18 = vpop.f32.mrf.mxu0  ;;  %3882 = vmatprep.subr.bf16.mxu0 %v1061_v8  ;;  %v357_v7 = vld [vmem:[#allocation3 + $0x8c8] sm:$0xff]  ;;  %v932_v8 = vunpack.c.l.s8.bf16 %v132_v59  ;;  %v901_v11 = vunpack.c.h.s8.bf16 %v101_v6 }
 0x4b9   :  { %v3629_v46 = vpop.f32.mrf.mxu1  ;;  %3923 = vmatprep.subr.bf16.mxu1 %v1573_v29  ;;  %v5703_v24 = vadd.f32 %v3627_v14, %v3587_v15  ;;  %v3589_v52 = vadd.f32 %v3588_v18, %v5693_v34  ;;  %3912 = vmatprep.mubr.bf16.mxu0 %v5509_v37  ;;  %v389_v34 = vld [vmem:[#allocation3 + $0x9c8] sm:$0xff]  ;;  %v1444_v29 = vunpack.c.l.s8.bf16 %v388_v1  ;;  %v1413_v12 = vunpack.c.h.s8.bf16 %v357_v7  ;;  %v356_v14 = vld [vmem:[#allocation3 + $0x8c0] sm:$0xff] }
 0x4ba   :  { %3953 = vmatprep.mubr.bf16.mxu1 %v5513_v38  ;;  %v3590_v25 = vpop.f32.mrf.mxu0  ;;  %v1477_v58 = vunpack.c.h.s8.bf16 %v389_v34  ;;  %v1445_v42 = vunpack.c.l.s8.bf16 %v389_v34  ;;  %v900_v15 = vunpack.c.h.s8.bf16 %v100_v13  ;;  %v1381_v18 = vunpack.c.l.s8.bf16 %v357_v7 }
 0x4bb   :  { %v3631_v28 = vpop.f32.mrf.mxu1  ;;  %v5708_v30 = vadd.f32 %v3629_v46, %v3589_v52  ;;  %3883 = vmatpush1.bf16.msra.mxu0 %v1060_v16  ;;  %v1412_v16 = vunpack.c.h.s8.bf16 %v356_v14  ;;  %v325_v46 = vld [vmem:[#allocation3 + $0x7c8] sm:$0xff]  ;;  %v1380_v20 = vunpack.c.l.s8.bf16 %v356_v14  ;;  %v324_v25 = vld [vmem:[#allocation3 + $0x7c0] sm:$0xff] }
 0x4bc   :  { %3924 = vmatpush1.bf16.msra.mxu1 %v1572_v17  ;;  %v3591_v40 = vpop.f32.mrf.mxu0  ;;  %3884 = vmatprep.subr.bf16.mxu0 %v1029_v19  ;;  %v869_v17 = vunpack.c.l.s8.bf16 %v101_v6  ;;  %v581_v19 = vld [vmem:[#allocation3 + $0xfc8] sm:$0xff]  ;;  %v1349_v21 = vunpack.c.h.s8.bf16 %v325_v46  ;;  %v580_v28 = vld [vmem:[#allocation3 + $0xfc0] sm:$0xff]  ;;  %v1316_v53 = vunpack.c.l.s8.bf16 %v324_v25 }
 0x4bd   :  { %v3632_v41 = vpop.f32.mrf.mxu1  ;;  %3925 = vmatprep.subr.bf16.mxu1 %v1541_v2  ;;  %v868_v2 = vunpack.c.l.s8.bf16 %v100_v13  ;;  %v1861_v52 = vunpack.c.h.s8.bf16 %v581_v19  ;;  %v1317_v40 = vunpack.c.l.s8.bf16 %v325_v46  ;;  %v1828_v34 = vunpack.c.l.s8.bf16 %v580_v28 }
 0x4be   :  { %v1829_v41 = vunpack.c.l.s8.bf16 %v581_v19 }
 0x4bf   :  { %3885 = vmatpush1.bf16.msra.mxu0 %v1028_v49  ;;  %v1348_v49 = vunpack.c.h.s8.bf16 %v324_v25 }
 0x4c0   :  { %3926 = vmatpush1.bf16.msra.mxu1 %v1540_v39  ;;  %3886 = vmatprep.subr.bf16.mxu0 %v997_v43  ;;  %v1860_v39 = vunpack.c.h.s8.bf16 %v580_v28  ;;  %v293_v43 = vld [vmem:[#allocation3 + $0x6c8] sm:$0xff] }
 0x4c1   :  { %3927 = vmatprep.subr.bf16.mxu1 %v1509_v61  ;;  %v549_v61 = vld [vmem:[#allocation3 + $0xec8] sm:$0xff] }
 0x4c3   :  { %3887 = vmatpush1.bf16.msra.mxu0 %v996_v35  ;;  %v1285_v35 = vunpack.c.h.s8.bf16 %v293_v43 }
 0x4c4   :  { %3928 = vmatpush1.bf16.msra.mxu1 %v1508_v44  ;;  %3888 = vmatprep.subr.bf16.mxu0 %v965_v4  ;;  %v1797_v44 = vunpack.c.h.s8.bf16 %v549_v61  ;;  %v292_v4 = vld [vmem:[#allocation3 + $0x6c0] sm:$0xff] }
 0x4c5   :  { %3929 = vmatprep.subr.bf16.mxu1 %v1477_v58  ;;  %v548_v58 = vld [vmem:[#allocation3 + $0xec0] sm:$0xff]  ;;  %v1284_v59 = vunpack.c.h.s8.bf16 %v292_v4  ;;  %v1252_v6 = vunpack.c.l.s8.bf16 %v292_v4 }
 0x4c6   :  { %v1796_v1 = vunpack.c.h.s8.bf16 %v548_v58  ;;  %v1764_v7 = vunpack.c.l.s8.bf16 %v548_v58 }
 0x4c7   :  { %3889 = vmatpush1.bf16.msra.mxu0 %v964_v51  ;;  %v1253_v51 = vunpack.c.l.s8.bf16 %v293_v43 }
 0x4c8   :  { %3930 = vmatpush1.bf16.msra.mxu1 %v1476_v0  ;;  %3890 = vmatprep.subr.bf16.mxu0 %v933_v56  ;;  %v1765_v0 = vunpack.c.l.s8.bf16 %v549_v61  ;;  %v261_v56 = vld [vmem:[#allocation3 + $0x5c8] sm:$0xff] }
 0x4c9   :  { %3931 = vmatprep.subr.bf16.mxu1 %v1445_v42  ;;  %v517_v42 = vld [vmem:[#allocation3 + $0xdc8] sm:$0xff] }
 0x4cb   :  { %3891 = vmatpush1.bf16.msra.mxu0 %v932_v8  ;;  %v1221_v8 = vunpack.c.h.s8.bf16 %v261_v56 }
 0x4cc   :  { %3932 = vmatpush1.bf16.msra.mxu1 %v1444_v29  ;;  %3892 = vmatprep.subr.bf16.mxu0 %v901_v11  ;;  %v1733_v29 = vunpack.c.h.s8.bf16 %v517_v42  ;;  %v260_v11 = vld [vmem:[#allocation3 + $0x5c0] sm:$0xff] }
 0x4cd   :  { %3933 = vmatprep.subr.bf16.mxu1 %v1413_v12  ;;  %v516_v12 = vld [vmem:[#allocation3 + $0xdc0] sm:$0xff]  ;;  %v1220_v13 = vunpack.c.h.s8.bf16 %v260_v11  ;;  %v1188_v46 = vunpack.c.l.s8.bf16 %v260_v11 }
 0x4ce   :  { %v1732_v14 = vunpack.c.h.s8.bf16 %v516_v12  ;;  %v1700_v19 = vunpack.c.l.s8.bf16 %v516_v12 }
 0x4cf   :  { %3893 = vmatpush1.bf16.msra.mxu0 %v900_v15  ;;  %v1189_v15 = vunpack.c.l.s8.bf16 %v261_v56 }
 0x4d0   :  { %3934 = vmatpush1.bf16.msra.mxu1 %v1412_v16  ;;  %3894 = vmatprep.subr.bf16.mxu0 %v869_v17  ;;  %v1701_v16 = vunpack.c.l.s8.bf16 %v517_v42  ;;  %v229_v17 = vld [vmem:[#allocation3 + $0x4c8] sm:$0xff] }
 0x4d1   :  { %3935 = vmatprep.subr.bf16.mxu1 %v1381_v18  ;;  %v485_v18 = vld [vmem:[#allocation3 + $0xcc8] sm:$0xff] }
 0x4d3   :  { %3895 = vmatpush1.bf16.msra.mxu0 %v868_v2  ;;  %v1157_v2 = vunpack.c.h.s8.bf16 %v229_v17 }
 0x4d4   :  { %3936 = vmatpush1.bf16.msra.mxu1 %v1380_v20  ;;  %3896 = vmatprep.subr.bf16.mxu0 %v1349_v21  ;;  %v1669_v20 = vunpack.c.h.s8.bf16 %v485_v18  ;;  %v228_v21 = vld [vmem:[#allocation3 + $0x4c0] sm:$0xff] }
 0x4d5   :  { %3937 = vmatprep.subr.bf16.mxu1 %v1861_v52  ;;  %v484_v52 = vld [vmem:[#allocation3 + $0xcc0] sm:$0xff]  ;;  %v1156_v25 = vunpack.c.h.s8.bf16 %v228_v21  ;;  %v1124_v43 = vunpack.c.l.s8.bf16 %v228_v21 }
 0x4d6   :  { %v1668_v28 = vunpack.c.h.s8.bf16 %v484_v52  ;;  %v1636_v61 = vunpack.c.l.s8.bf16 %v484_v52 }
 0x4d7   :  { %3897 = vmatpush2.bf16.msra.mxu0 %v1348_v49  ;;  %v1125_v49 = vunpack.c.l.s8.bf16 %v229_v17 }
 0x4d8   :  { %3938 = vmatpush2.bf16.msra.mxu1 %v1860_v39  ;;  %3898 = vmatprep.subr.bf16.mxu0 %v1317_v40  ;;  %v1637_v39 = vunpack.c.l.s8.bf16 %v485_v18  ;;  %v709_v40 = vld [vmem:[#allocation3 + $0x13c8] sm:$0xff] }
 0x4d9   :  { %3939 = vmatprep.subr.bf16.mxu1 %v1829_v41  ;;  %v199_v41 = vld [vmem:[#allocation3 + $0x3d8] sm:$0xff] }
 0x4db   :  { %3899 = vmatpush2.bf16.msra.mxu0 %v1316_v53  ;;  %v2117_v53 = vunpack.c.h.s8.bf16 %v709_v40 }
 0x4dc   :  { %3940 = vmatpush2.bf16.msra.mxu1 %v1828_v34  ;;  %3900 = vmatprep.subr.bf16.mxu0 %v1285_v35  ;;  %v1095_v34 = vunpack.c.h.s8.bf16 %v199_v41  ;;  %v708_v35 = vld [vmem:[#allocation3 + $0x13c0] sm:$0xff] }
 0x4dd   :  { %3941 = vmatprep.subr.bf16.mxu1 %v1797_v44  ;;  %v198_v44 = vld [vmem:[#allocation3 + $0x3d0] sm:$0xff]  ;;  %v2116_v4 = vunpack.c.h.s8.bf16 %v708_v35 }
 0x4de   :  { %v1094_v58 = vunpack.c.h.s8.bf16 %v198_v44 }
 0x4df   :  { %3901 = vmatpush2.bf16.msra.mxu0 %v1284_v59  ;;  %v2085_v59 = vunpack.c.l.s8.bf16 %v709_v40 }
 0x4e0   :  { %3942 = vmatpush2.bf16.msra.mxu1 %v1796_v1  ;;  %3902 = vmatprep.subr.bf16.mxu0 %v1253_v51  ;;  %v1063_v1 = vunpack.c.l.s8.bf16 %v199_v41  ;;  %v677_v51 = vld [vmem:[#allocation3 + $0x12c8] sm:$0xff] }
 0x4e1   :  { %3943 = vmatprep.subr.bf16.mxu1 %v1765_v0  ;;  %v167_v0 = vld [vmem:[#allocation3 + $0x2d8] sm:$0xff]  ;;  %v2053_v12 = vunpack.c.h.s8.bf16 %v677_v51  ;;  %v2021_v21 = vunpack.c.l.s8.bf16 %v677_v51 }
 0x4e2   :  { %v999_v52 = vunpack.c.l.s8.bf16 %v167_v0 }
 0x4e3   :  { %3903 = vmatpush2.bf16.msra.mxu0 %v1252_v6 }
 0x4e4   :  { %3944 = vmatpush2.bf16.msra.mxu1 %v1764_v7  ;;  %3904 = vmatprep.subr.bf16.mxu0 %v1221_v8  ;;  %v2084_v7 = vunpack.c.l.s8.bf16 %v708_v35  ;;  %v1062_v8 = vunpack.c.l.s8.bf16 %v198_v44 }
 0x4e5   :  { %3945 = vmatprep.subr.bf16.mxu1 %v1733_v29 }
 0x4e7   :  { %3905 = vmatpush2.bf16.msra.mxu0 %v1220_v13  ;;  %v1031_v13 = vunpack.c.h.s8.bf16 %v167_v0 }
 0x4e8   :  { %3946 = vmatpush2.bf16.msra.mxu1 %v1732_v14  ;;  %3906 = vmatprep.subr.bf16.mxu0 %v1189_v15  ;;  %v676_v14 = vld [vmem:[#allocation3 + $0x12c0] sm:$0xff]  ;;  %v166_v15 = vld [vmem:[#allocation3 + $0x2d0] sm:$0xff] }
 0x4e9   :  { %3947 = vmatprep.subr.bf16.mxu1 %v1701_v16 }
 0x4eb   :  { %3907 = vmatpush2.bf16.msra.mxu0 %v1188_v46  ;;  %v2052_v46 = vunpack.c.h.s8.bf16 %v676_v14 }
 0x4ec   :  { %3948 = vmatpush2.bf16.msra.mxu1 %v1700_v19  ;;  %3908 = vmatprep.subr.bf16.mxu0 %v1157_v2  ;;  %v1030_v19 = vunpack.c.h.s8.bf16 %v166_v15 }
 0x4ed   :  { %3949 = vmatprep.subr.bf16.mxu1 %v1669_v20 }
 0x4ef   :  { %3909 = vmatpush2.bf16.msra.mxu0 %v1156_v25  ;;  %v645_v25 = vld [vmem:[#allocation3 + $0x11c8] sm:$0xff] }
 0x4f0   :  { %3950 = vmatpush2.bf16.msra.mxu1 %v1668_v28  ;;  %3910 = vmatprep.subr.bf16.mxu0 %v1125_v49  ;;  %v135_v28 = vld [vmem:[#allocation3 + $0x1d8] sm:$0xff]  ;;  %v2020_v49 = vunpack.c.l.s8.bf16 %v676_v14  ;;  %v1989_v40 = vunpack.c.h.s8.bf16 %v645_v25  ;;  %v1957_v35 = vunpack.c.l.s8.bf16 %v645_v25  ;;  %v805_v25 = vld [vmem:[#allocation3 + $0x16c8] sm:$0xff] }
 0x4f1   :  { %3951 = vmatprep.subr.bf16.mxu1 %v1637_v39  ;;  %v998_v39 = vunpack.c.l.s8.bf16 %v166_v15  ;;  %v967_v41 = vunpack.c.h.s8.bf16 %v135_v28  ;;  %v935_v44 = vunpack.c.l.s8.bf16 %v135_v28  ;;  %v295_v28 = vld [vmem:[#allocation3 + $0x6d8] sm:$0xff] }
 0x4f3   :  { %3911 = vmatpush2.bf16.msra.mxu0 %v1124_v43  ;;  %v644_v43 = vld [vmem:[#allocation3 + $0x11c0] sm:$0xff] }
 0x4f4   :  { %3952 = vmatpush2.bf16.msra.mxu1 %v1636_v61  ;;  %3962 = vmatprep.subr.bf16.mxu0 %v2117_v53  ;;  %v134_v61 = vld [vmem:[#allocation3 + $0x1d0] sm:$0xff]  ;;  %v1988_v53 = vunpack.c.h.s8.bf16 %v644_v43 }
 0x4f5   :  { %4003 = vmatprep.subr.bf16.mxu1 %v1095_v34  ;;  %v966_v34 = vunpack.c.h.s8.bf16 %v134_v61 }
 0x4f6   :  { %v3668_v56 = vpop.f32.mrf.mxu0  ;;  %3913 = vmatmul.mubr.bf16.vlgmr.msra.gmra.mxu0 %v5519_v47 }
 0x4f7   :  { %v3709_v42 = vpop.f32.mrf.mxu1  ;;  %3954 = vmatmul.mubr.bf16.vlgmr.msra.gmra.mxu1 %v5523_v48  ;;  %3963 = vmatpush1.bf16.msra.mxu0 %v2116_v4  ;;  %v613_v4 = vld [vmem:[#allocation3 + $0x10c8] sm:$0xff] }
 0x4f8   :  { %v5712_v6 = vadd.f32 %v3709_v42, %v3668_v56  ;;  %4004 = vmatpush1.bf16.msra.mxu1 %v1094_v58  ;;  %v3670_v29 = vpop.f32.mrf.mxu0  ;;  %3964 = vmatprep.subr.bf16.mxu0 %v2085_v59  ;;  %v103_v58 = vld [vmem:[#allocation3 + $0xd8] sm:$0xff]  ;;  %v1956_v59 = vunpack.c.l.s8.bf16 %v644_v43  ;;  %v1925_v51 = vunpack.c.h.s8.bf16 %v613_v4  ;;  %v612_v56 = vld [vmem:[#allocation3 + $0x10c0] sm:$0xff]  ;;  %v102_v42 = vld [vmem:[#allocation3 + $0xd0] sm:$0xff] }
 0x4f9   :  { %v3711_v11 = vpop.f32.mrf.mxu1  ;;  %4005 = vmatprep.subr.bf16.mxu1 %v1063_v1  ;;  %3994 = vmatprep.mubr.bf16.mxu0 %v5532_v55  ;;  %v934_v1 = vunpack.c.l.s8.bf16 %v134_v61  ;;  %v903_v0 = vunpack.c.h.s8.bf16 %v103_v58  ;;  %v1892_v14 = vunpack.c.l.s8.bf16 %v612_v56  ;;  %v870_v15 = vunpack.c.l.s8.bf16 %v102_v42  ;;  %v804_v43 = vld [vmem:[#allocation3 + $0x16c0] sm:$0xff]  ;;  %v294_v61 = vld [vmem:[#allocation3 + $0x6d0] sm:$0xff] }
 0x4fa   :  { %v5714_v16 = vadd.f32 %v3711_v11, %v3670_v29  ;;  %4035 = vmatprep.mubr.bf16.mxu1 %v5509_v37  ;;  %v3672_v17 = vpop.f32.mrf.mxu0  ;;  %v1893_v29 = vunpack.c.l.s8.bf16 %v613_v4  ;;  %v871_v11 = vunpack.c.l.s8.bf16 %v103_v58  ;;  %v773_v4 = vld [vmem:[#allocation3 + $0x15c8] sm:$0xff]  ;;  %v263_v58 = vld [vmem:[#allocation3 + $0x5d8] sm:$0xff] }
 0x4fb   :  { %v3713_v18 = vpop.f32.mrf.mxu1  ;;  %3965 = vmatpush1.bf16.msra.mxu0 %v2084_v7  ;;  %v1924_v7 = vunpack.c.h.s8.bf16 %v612_v56  ;;  %v772_v56 = vld [vmem:[#allocation3 + $0x15c0] sm:$0xff] }
 0x4fc   :  { %4006 = vmatpush1.bf16.msra.mxu1 %v1062_v8  ;;  %v3673_v2 = vpop.f32.mrf.mxu0  ;;  %3966 = vmatprep.subr.bf16.mxu0 %v2053_v12  ;;  %v902_v8 = vunpack.c.h.s8.bf16 %v102_v42  ;;  %v837_v12 = vld [vmem:[#allocation3 + $0x17c8] sm:$0xff]  ;;  %v262_v42 = vld [vmem:[#allocation3 + $0x5d0] sm:$0xff] }
 0x4fd   :  { %v3714_v20 = vpop.f32.mrf.mxu1  ;;  %4007 = vmatprep.subr.bf16.mxu1 %v1031_v13  ;;  %v327_v13 = vld [vmem:[#allocation3 + $0x7d8] sm:$0xff]  ;;  %v2373_v17 = vunpack.c.h.s8.bf16 %v837_v12 }
 0x4fe   :  { %v1351_v18 = vunpack.c.h.s8.bf16 %v327_v13 }
 0x4ff   :  { %3967 = vmatpush1.bf16.msra.mxu0 %v2052_v46  ;;  %v836_v46 = vld [vmem:[#allocation3 + $0x17c0] sm:$0xff] }
 0x500   :  { %4008 = vmatpush1.bf16.msra.mxu1 %v1030_v19  ;;  %3968 = vmatprep.subr.bf16.mxu0 %v2021_v21  ;;  %v326_v19 = vld [vmem:[#allocation3 + $0x7d0] sm:$0xff]  ;;  %v2372_v2 = vunpack.c.h.s8.bf16 %v836_v46  ;;  %v2341_v21 = vunpack.c.l.s8.bf16 %v837_v12  ;;  %v741_v12 = vld [vmem:[#allocation3 + $0x14c8] sm:$0xff] }
 0x501   :  { %4009 = vmatprep.subr.bf16.mxu1 %v999_v52  ;;  %v1350_v20 = vunpack.c.h.s8.bf16 %v326_v19  ;;  %v1319_v52 = vunpack.c.l.s8.bf16 %v327_v13  ;;  %v231_v13 = vld [vmem:[#allocation3 + $0x4d8] sm:$0xff] }
 0x503   :  { %3969 = vmatpush1.bf16.msra.mxu0 %v2020_v49  ;;  %v2340_v49 = vunpack.c.l.s8.bf16 %v836_v46  ;;  %v740_v46 = vld [vmem:[#allocation3 + $0x14c0] sm:$0xff] }
 0x504   :  { %4010 = vmatpush1.bf16.msra.mxu1 %v998_v39  ;;  %3970 = vmatprep.subr.bf16.mxu0 %v1989_v40  ;;  %v1318_v39 = vunpack.c.l.s8.bf16 %v326_v19  ;;  %v2309_v40 = vunpack.c.h.s8.bf16 %v805_v25  ;;  %v230_v19 = vld [vmem:[#allocation3 + $0x4d0] sm:$0xff] }
 0x505   :  { %4011 = vmatprep.subr.bf16.mxu1 %v967_v41  ;;  %v1287_v41 = vunpack.c.h.s8.bf16 %v295_v28 }
 0x507   :  { %3971 = vmatpush1.bf16.msra.mxu0 %v1988_v53  ;;  %v2308_v53 = vunpack.c.h.s8.bf16 %v804_v43 }
 0x508   :  { %4012 = vmatpush1.bf16.msra.mxu1 %v966_v34  ;;  %3972 = vmatprep.subr.bf16.mxu0 %v1957_v35  ;;  %v1286_v34 = vunpack.c.h.s8.bf16 %v294_v61  ;;  %v2277_v35 = vunpack.c.l.s8.bf16 %v805_v25  ;;  %v455_v25 = vld [vmem:[#allocation3 + $0xbd8] sm:$0xff] }
 0x509   :  { %4013 = vmatprep.subr.bf16.mxu1 %v935_v44  ;;  %v1255_v44 = vunpack.c.l.s8.bf16 %v295_v28  ;;  %v711_v28 = vld [vmem:[#allocation3 + $0x13d8] sm:$0xff] }
 0x50b   :  { %3973 = vmatpush1.bf16.msra.mxu0 %v1956_v59  ;;  %v2276_v59 = vunpack.c.l.s8.bf16 %v804_v43  ;;  %v454_v43 = vld [vmem:[#allocation3 + $0xbd0] sm:$0xff] }
 0x50c   :  { %4014 = vmatpush1.bf16.msra.mxu1 %v934_v1  ;;  %3974 = vmatprep.subr.bf16.mxu0 %v1925_v51  ;;  %v1254_v1 = vunpack.c.l.s8.bf16 %v294_v61  ;;  %v2245_v51 = vunpack.c.h.s8.bf16 %v773_v4  ;;  %v710_v61 = vld [vmem:[#allocation3 + $0x13d0] sm:$0xff] }
 0x50d   :  { %4015 = vmatprep.subr.bf16.mxu1 %v903_v0  ;;  %v1223_v0 = vunpack.c.h.s8.bf16 %v263_v58 }
 0x50f   :  { %3975 = vmatpush1.bf16.msra.mxu0 %v1924_v7  ;;  %v2244_v7 = vunpack.c.h.s8.bf16 %v772_v56 }
 0x510   :  { %4016 = vmatpush1.bf16.msra.mxu1 %v902_v8  ;;  %3976 = vmatprep.subr.bf16.mxu0 %v1893_v29  ;;  %v1222_v8 = vunpack.c.h.s8.bf16 %v262_v42  ;;  %v2213_v29 = vunpack.c.l.s8.bf16 %v773_v4  ;;  %v423_v4 = vld [vmem:[#allocation3 + $0xad8] sm:$0xff] }
 0x511   :  { %4017 = vmatprep.subr.bf16.mxu1 %v871_v11  ;;  %v1191_v11 = vunpack.c.l.s8.bf16 %v263_v58  ;;  %v679_v58 = vld [vmem:[#allocation3 + $0x12d8] sm:$0xff] }
 0x513   :  { %3977 = vmatpush1.bf16.msra.mxu0 %v1892_v14  ;;  %v2212_v14 = vunpack.c.l.s8.bf16 %v772_v56  ;;  %v2086_v56 = vunpack.c.l.s8.bf16 %v710_v61 }
 0x514   :  { %4018 = vmatpush1.bf16.msra.mxu1 %v870_v15  ;;  %3978 = vmatprep.subr.bf16.mxu0 %v2373_v17  ;;  %v1190_v15 = vunpack.c.l.s8.bf16 %v262_v42  ;;  %v2181_v17 = vunpack.c.h.s8.bf16 %v741_v12 }
 0x515   :  { %4019 = vmatprep.subr.bf16.mxu1 %v1351_v18  ;;  %v1159_v18 = vunpack.c.h.s8.bf16 %v231_v13 }
 0x517   :  { %3979 = vmatpush2.bf16.msra.mxu0 %v2372_v2  ;;  %v2180_v2 = vunpack.c.h.s8.bf16 %v740_v46 }
 0x518   :  { %4020 = vmatpush2.bf16.msra.mxu1 %v1350_v20  ;;  %3980 = vmatprep.subr.bf16.mxu0 %v2341_v21  ;;  %v1158_v20 = vunpack.c.h.s8.bf16 %v230_v19  ;;  %v2149_v21 = vunpack.c.l.s8.bf16 %v741_v12  ;;  %v678_v12 = vld [vmem:[#allocation3 + $0x12d0] sm:$0xff] }
 0x519   :  { %4021 = vmatprep.subr.bf16.mxu1 %v1319_v52  ;;  %v1127_v52 = vunpack.c.l.s8.bf16 %v231_v13 }
 0x51b   :  { %3981 = vmatpush2.bf16.msra.mxu0 %v2340_v49  ;;  %v2148_v49 = vunpack.c.l.s8.bf16 %v740_v46 }
 0x51c   :  { %4022 = vmatpush2.bf16.msra.mxu1 %v1318_v39  ;;  %3982 = vmatprep.subr.bf16.mxu0 %v2309_v40  ;;  %v1126_v39 = vunpack.c.l.s8.bf16 %v230_v19  ;;  %v1607_v40 = vunpack.c.h.s8.bf16 %v455_v25  ;;  %v1511_v19 = vunpack.c.l.s8.bf16 %v423_v4 }
 0x51d   :  { %4023 = vmatprep.subr.bf16.mxu1 %v1287_v41  ;;  %v2119_v41 = vunpack.c.h.s8.bf16 %v711_v28 }
 0x51f   :  { %3983 = vmatpush2.bf16.msra.mxu0 %v2308_v53  ;;  %v1606_v53 = vunpack.c.h.s8.bf16 %v454_v43 }
 0x520   :  { %4024 = vmatpush2.bf16.msra.mxu1 %v1286_v34  ;;  %3984 = vmatprep.subr.bf16.mxu0 %v2277_v35  ;;  %v2118_v34 = vunpack.c.h.s8.bf16 %v710_v61  ;;  %v1575_v35 = vunpack.c.l.s8.bf16 %v455_v25 }
 0x521   :  { %4025 = vmatprep.subr.bf16.mxu1 %v1255_v44  ;;  %v2087_v44 = vunpack.c.l.s8.bf16 %v711_v28 }
 0x523   :  { %3985 = vmatpush2.bf16.msra.mxu0 %v2276_v59 }
 0x524   :  { %4026 = vmatpush2.bf16.msra.mxu1 %v1254_v1  ;;  %3986 = vmatprep.subr.bf16.mxu0 %v2245_v51 }
 0x525   :  { %4027 = vmatprep.subr.bf16.mxu1 %v1223_v0  ;;  %v1574_v0 = vunpack.c.l.s8.bf16 %v454_v43 }
 0x527   :  { %3987 = vmatpush2.bf16.msra.mxu0 %v2244_v7 }
 0x528   :  { %4028 = vmatpush2.bf16.msra.mxu1 %v1222_v8  ;;  %3988 = vmatprep.subr.bf16.mxu0 %v2213_v29  ;;  %v1543_v8 = vunpack.c.h.s8.bf16 %v423_v4  ;;  %v2055_v29 = vunpack.c.h.s8.bf16 %v679_v58 }
 0x529   :  { %4029 = vmatprep.subr.bf16.mxu1 %v1191_v11  ;;  %v422_v11 = vld [vmem:[#allocation3 + $0xad0] sm:$0xff] }
 0x52b   :  { %3989 = vmatpush2.bf16.msra.mxu0 %v2212_v14 }
 0x52c   :  { %4030 = vmatpush2.bf16.msra.mxu1 %v1190_v15  ;;  %3990 = vmatprep.subr.bf16.mxu0 %v2181_v17  ;;  %v1542_v15 = vunpack.c.h.s8.bf16 %v422_v11  ;;  %v2054_v17 = vunpack.c.h.s8.bf16 %v678_v12 }
 0x52d   :  { %4031 = vmatprep.subr.bf16.mxu1 %v1159_v18 }
 0x52f   :  { %3991 = vmatpush2.bf16.msra.mxu0 %v2180_v2  ;;  %v2023_v2 = vunpack.c.l.s8.bf16 %v679_v58 }
 0x530   :  { %4032 = vmatpush2.bf16.msra.mxu1 %v1158_v20  ;;  %3992 = vmatprep.subr.bf16.mxu0 %v2149_v21  ;;  %v391_v20 = vld [vmem:[#allocation3 + $0x9d8] sm:$0xff] }
 0x531   :  { %4033 = vmatprep.subr.bf16.mxu1 %v1127_v52  ;;  %v647_v21 = vld [vmem:[#allocation3 + $0x11d8] sm:$0xff]  ;;  %v2022_v52 = vunpack.c.l.s8.bf16 %v678_v12  ;;  %v1479_v25 = vunpack.c.h.s8.bf16 %v391_v20  ;;  %v1447_v43 = vunpack.c.l.s8.bf16 %v391_v20 }
 0x532   :  { %v1991_v28 = vunpack.c.h.s8.bf16 %v647_v21  ;;  %v1959_v61 = vunpack.c.l.s8.bf16 %v647_v21  ;;  %v839_v12 = vld [vmem:[#allocation3 + $0x17d8] sm:$0xff] }
 0x533   :  { %3993 = vmatpush2.bf16.msra.mxu0 %v2148_v49  ;;  %v390_v49 = vld [vmem:[#allocation3 + $0x9d0] sm:$0xff]  ;;  %v2343_v21 = vunpack.c.l.s8.bf16 %v839_v12 }
 0x534   :  { %4034 = vmatpush2.bf16.msra.mxu1 %v1126_v39  ;;  %4044 = vmatprep.subr.bf16.mxu0 %v1607_v40  ;;  %v646_v39 = vld [vmem:[#allocation3 + $0x11d0] sm:$0xff]  ;;  %v1478_v40 = vunpack.c.h.s8.bf16 %v390_v49 }
 0x535   :  { %4085 = vmatprep.subr.bf16.mxu1 %v2119_v41  ;;  %v1990_v41 = vunpack.c.h.s8.bf16 %v646_v39 }
 0x536   :  { %v3750_v59 = vpop.f32.mrf.mxu0  ;;  %3995 = vmatmul.mubr.bf16.vlgmr.msra.gmra.mxu0 %v5540_v23 }
 0x537   :  { %v5718_v1 = vpop.f32.mrf.mxu1  ;;  %4036 = vmatmul.mubr.bf16.vlgmr.msra.gmra.mxu1 %v5519_v47  ;;  %v5723_v51 = vadd.f32 %v3750_v59, %v5712_v6  ;;  %4045 = vmatpush1.bf16.msra.mxu0 %v1606_v53  ;;  %v359_v53 = vld [vmem:[#allocation3 + $0x8d8] sm:$0xff]  ;;  %v358_v59 = vld [vmem:[#allocation3 + $0x8d0] sm:$0xff] }
 0x538   :  { %4086 = vmatpush1.bf16.msra.mxu1 %v2118_v34  ;;  %v3752_v42 = vpop.f32.mrf.mxu0  ;;  %4046 = vmatprep.subr.bf16.mxu0 %v1575_v35  ;;  %v615_v34 = vld [vmem:[#allocation3 + $0x10d8] sm:$0xff]  ;;  %v1446_v35 = vunpack.c.l.s8.bf16 %v390_v49  ;;  %v1415_v4 = vunpack.c.h.s8.bf16 %v359_v53 }
 0x539   :  { %v5725_v7 = vpop.f32.mrf.mxu1  ;;  %4087 = vmatprep.subr.bf16.mxu1 %v2087_v44  ;;  %v5728_v13 = vadd.f32 %v3752_v42, %v5714_v16  ;;  %4076 = vmatprep.mubr.bf16.mxu0 %v5513_v38  ;;  %v1510_v16 = vunpack.c.l.s8.bf16 %v422_v11  ;;  %v1958_v44 = vunpack.c.l.s8.bf16 %v646_v39  ;;  %v1927_v58 = vunpack.c.h.s8.bf16 %v615_v34  ;;  %v583_v11 = vld [vmem:[#allocation3 + $0xfd8] sm:$0xff] }
 0x53a   :  { %4117 = vmatprep.mubr.bf16.mxu1 %v5532_v55  ;;  %v3754_v6 = vpop.f32.mrf.mxu0  ;;  %v1831_v20 = vunpack.c.l.s8.bf16 %v583_v11 }
 0x53b   :  { %v3795_v14 = vpop.f32.mrf.mxu1  ;;  %4047 = vmatpush1.bf16.msra.mxu0 %v1574_v0  ;;  %v614_v0 = vld [vmem:[#allocation3 + $0x10d0] sm:$0xff]  ;;  %v1382_v6 = vunpack.c.l.s8.bf16 %v358_v59 }
 0x53c   :  { %4088 = vmatpush1.bf16.msra.mxu1 %v2086_v56  ;;  %v3755_v18 = vpop.f32.mrf.mxu0  ;;  %4048 = vmatprep.subr.bf16.mxu0 %v1543_v8  ;;  %v1414_v56 = vunpack.c.h.s8.bf16 %v358_v59  ;;  %v1926_v42 = vunpack.c.h.s8.bf16 %v614_v0  ;;  %v1383_v8 = vunpack.c.l.s8.bf16 %v359_v53  ;;  %v1894_v14 = vunpack.c.l.s8.bf16 %v614_v0 }
 0x53d   :  { %v3796_v46 = vpop.f32.mrf.mxu1  ;;  %4089 = vmatprep.subr.bf16.mxu1 %v2055_v29  ;;  %v1895_v29 = vunpack.c.l.s8.bf16 %v615_v34  ;;  %v582_v18 = vld [vmem:[#allocation3 + $0xfd0] sm:$0xff] }
 0x53e   :  { %v838_v46 = vld [vmem:[#allocation3 + $0x17d0] sm:$0xff] }
 0x53f   :  { %4049 = vmatpush1.bf16.msra.mxu0 %v1542_v15  ;;  %v1863_v15 = vunpack.c.h.s8.bf16 %v583_v11 }
 0x540   :  { %4090 = vmatpush1.bf16.msra.mxu1 %v2054_v17  ;;  %4050 = vmatprep.subr.bf16.mxu0 %v1511_v19  ;;  %v2375_v17 = vunpack.c.h.s8.bf16 %v839_v12  ;;  %v1862_v19 = vunpack.c.h.s8.bf16 %v582_v18 }
 0x541   :  { %4091 = vmatprep.subr.bf16.mxu1 %v2023_v2  ;;  %v2374_v2 = vunpack.c.h.s8.bf16 %v838_v46 }
 0x543   :  { %4051 = vmatpush1.bf16.msra.mxu0 %v1510_v16  ;;  %v551_v16 = vld [vmem:[#allocation3 + $0xed8] sm:$0xff] }
 0x544   :  { %4092 = vmatpush1.bf16.msra.mxu1 %v2022_v52  ;;  %4052 = vmatprep.subr.bf16.mxu0 %v1479_v25  ;;  %v807_v52 = vld [vmem:[#allocation3 + $0x16d8] sm:$0xff]  ;;  %v1830_v25 = vunpack.c.l.s8.bf16 %v582_v18  ;;  %v1799_v49 = vunpack.c.h.s8.bf16 %v551_v16  ;;  %v1767_v53 = vunpack.c.l.s8.bf16 %v551_v16 }
 0x545   :  { %4093 = vmatprep.subr.bf16.mxu1 %v1991_v28  ;;  %v2342_v28 = vunpack.c.l.s8.bf16 %v838_v46  ;;  %v2311_v39 = vunpack.c.h.s8.bf16 %v807_v52  ;;  %v2279_v34 = vunpack.c.l.s8.bf16 %v807_v52 }
 0x547   :  { %4053 = vmatpush1.bf16.msra.mxu0 %v1478_v40  ;;  %v550_v40 = vld [vmem:[#allocation3 + $0xed0] sm:$0xff] }
 0x548   :  { %4094 = vmatpush1.bf16.msra.mxu1 %v1990_v41  ;;  %4054 = vmatprep.subr.bf16.mxu0 %v1447_v43  ;;  %v806_v41 = vld [vmem:[#allocation3 + $0x16d0] sm:$0xff]  ;;  %v1798_v43 = vunpack.c.h.s8.bf16 %v550_v40 }
 0x549   :  { %4095 = vmatprep.subr.bf16.mxu1 %v1959_v61  ;;  %v2310_v61 = vunpack.c.h.s8.bf16 %v806_v41 }
 0x54b   :  { %4055 = vmatpush1.bf16.msra.mxu0 %v1446_v35  ;;  %v519_v35 = vld [vmem:[#allocation3 + $0xdd8] sm:$0xff] }
 0x54c   :  { %4096 = vmatpush1.bf16.msra.mxu1 %v1958_v44  ;;  %4056 = vmatprep.subr.bf16.mxu0 %v1415_v4  ;;  %v775_v44 = vld [vmem:[#allocation3 + $0x15d8] sm:$0xff]  ;;  %v1766_v4 = vunpack.c.l.s8.bf16 %v550_v40  ;;  %v1735_v59 = vunpack.c.h.s8.bf16 %v519_v35  ;;  %v1703_v11 = vunpack.c.l.s8.bf16 %v519_v35 }
 0x54d   :  { %4097 = vmatprep.subr.bf16.mxu1 %v1927_v58  ;;  %v2278_v58 = vunpack.c.l.s8.bf16 %v806_v41  ;;  %v2247_v0 = vunpack.c.h.s8.bf16 %v775_v44  ;;  %v2215_v12 = vunpack.c.l.s8.bf16 %v775_v44 }
 0x54f   :  { %4057 = vmatpush1.bf16.msra.mxu0 %v1414_v56  ;;  %v518_v56 = vld [vmem:[#allocation3 + $0xdd0] sm:$0xff] }
 0x550   :  { %4098 = vmatpush1.bf16.msra.mxu1 %v1926_v42  ;;  %4058 = vmatprep.subr.bf16.mxu0 %v1383_v8  ;;  %v774_v42 = vld [vmem:[#allocation3 + $0x15d0] sm:$0xff]  ;;  %v1734_v8 = vunpack.c.h.s8.bf16 %v518_v56 }
 0x551   :  { %4099 = vmatprep.subr.bf16.mxu1 %v1895_v29  ;;  %v2246_v29 = vunpack.c.h.s8.bf16 %v774_v42 }
 0x553   :  { %4059 = vmatpush1.bf16.msra.mxu0 %v1382_v6  ;;  %v487_v6 = vld [vmem:[#allocation3 + $0xcd8] sm:$0xff] }
 0x554   :  { %4100 = vmatpush1.bf16.msra.mxu1 %v1894_v14  ;;  %4060 = vmatprep.subr.bf16.mxu0 %v1863_v15  ;;  %v743_v14 = vld [vmem:[#allocation3 + $0x14d8] sm:$0xff]  ;;  %v1702_v15 = vunpack.c.l.s8.bf16 %v518_v56  ;;  %v1671_v18 = vunpack.c.h.s8.bf16 %v487_v6  ;;  %v1639_v16 = vunpack.c.l.s8.bf16 %v487_v6 }
 0x555   :  { %4101 = vmatprep.subr.bf16.mxu1 %v2375_v17  ;;  %v2214_v17 = vunpack.c.l.s8.bf16 %v774_v42  ;;  %v2183_v46 = vunpack.c.h.s8.bf16 %v743_v14  ;;  %v2151_v52 = vunpack.c.l.s8.bf16 %v743_v14  ;;  %v168_v14 = vld [vmem:[#allocation3 + $0x2e0] sm:$0xff] }
 0x557   :  { %4061 = vmatpush2.bf16.msra.mxu0 %v1862_v19  ;;  %v486_v19 = vld [vmem:[#allocation3 + $0xcd0] sm:$0xff] }
 0x558   :  { %4102 = vmatpush2.bf16.msra.mxu1 %v2374_v2  ;;  %4062 = vmatprep.subr.bf16.mxu0 %v1831_v20  ;;  %v742_v2 = vld [vmem:[#allocation3 + $0x14d0] sm:$0xff]  ;;  %v1670_v20 = vunpack.c.h.s8.bf16 %v486_v19 }
 0x559   :  { %4103 = vmatprep.subr.bf16.mxu1 %v2343_v21  ;;  %v2182_v21 = vunpack.c.h.s8.bf16 %v742_v2 }
 0x55b   :  { %4063 = vmatpush2.bf16.msra.mxu0 %v1830_v25  ;;  %v201_v25 = vld [vmem:[#allocation3 + $0x3e8] sm:$0xff] }
 0x55c   :  { %4104 = vmatpush2.bf16.msra.mxu1 %v2342_v28  ;;  %4064 = vmatprep.subr.bf16.mxu0 %v1799_v49  ;;  %v457_v28 = vld [vmem:[#allocation3 + $0xbe8] sm:$0xff]  ;;  %v1638_v49 = vunpack.c.l.s8.bf16 %v486_v19  ;;  %v1097_v40 = vunpack.c.h.s8.bf16 %v201_v25  ;;  %v1065_v35 = vunpack.c.l.s8.bf16 %v201_v25 }
 0x55d   :  { %4105 = vmatprep.subr.bf16.mxu1 %v2311_v39  ;;  %v2150_v39 = vunpack.c.l.s8.bf16 %v742_v2  ;;  %v1609_v41 = vunpack.c.h.s8.bf16 %v457_v28  ;;  %v1577_v44 = vunpack.c.l.s8.bf16 %v457_v28  ;;  %v1032_v2 = vunpack.c.h.s8.bf16 %v168_v14  ;;  %v137_v28 = vld [vmem:[#allocation3 + $0x1e8] sm:$0xff] }
 0x55f   :  { %4065 = vmatpush2.bf16.msra.mxu0 %v1798_v43  ;;  %v200_v43 = vld [vmem:[#allocation3 + $0x3e0] sm:$0xff] }
 0x560   :  { %4106 = vmatpush2.bf16.msra.mxu1 %v2310_v61  ;;  %4066 = vmatprep.subr.bf16.mxu0 %v1767_v53  ;;  %v456_v61 = vld [vmem:[#allocation3 + $0xbe0] sm:$0xff]  ;;  %v1096_v53 = vunpack.c.h.s8.bf16 %v200_v43  ;;  %v1064_v42 = vunpack.c.l.s8.bf16 %v200_v43 }
 0x561   :  { %4107 = vmatprep.subr.bf16.mxu1 %v2279_v34  ;;  %v1608_v34 = vunpack.c.h.s8.bf16 %v456_v61  ;;  %v136_v43 = vld [vmem:[#allocation3 + $0x1e0] sm:$0xff] }
 0x563   :  { %4067 = vmatpush2.bf16.msra.mxu0 %v1766_v4  ;;  %v169_v4 = vld [vmem:[#allocation3 + $0x2e8] sm:$0xff] }
 0x564   :  { %4108 = vmatpush2.bf16.msra.mxu1 %v2278_v58  ;;  %4068 = vmatprep.subr.bf16.mxu0 %v1735_v59  ;;  %v425_v58 = vld [vmem:[#allocation3 + $0xae8] sm:$0xff] }
 0x565   :  { %4109 = vmatprep.subr.bf16.mxu1 %v2247_v0  ;;  %v1545_v6 = vunpack.c.h.s8.bf16 %v425_v58  ;;  %v1513_v25 = vunpack.c.l.s8.bf16 %v425_v58  ;;  %v361_v58 = vld [vmem:[#allocation3 + $0x8e8] sm:$0xff] }
 0x567   :  { %4069 = vmatpush2.bf16.msra.mxu0 %v1734_v8  ;;  %v1576_v8 = vunpack.c.l.s8.bf16 %v456_v61  ;;  %v392_v61 = vld [vmem:[#allocation3 + $0x9e0] sm:$0xff] }
 0x568   :  { %4110 = vmatpush2.bf16.msra.mxu1 %v2246_v29  ;;  %4070 = vmatprep.subr.bf16.mxu0 %v1703_v11 }
 0x569   :  { %4111 = vmatprep.subr.bf16.mxu1 %v2215_v12  ;;  %v1033_v12 = vunpack.c.h.s8.bf16 %v169_v4 }
 0x56b   :  { %4071 = vmatpush2.bf16.msra.mxu0 %v1702_v15  ;;  %v424_v15 = vld [vmem:[#allocation3 + $0xae0] sm:$0xff] }
 0x56c   :  { %4112 = vmatpush2.bf16.msra.mxu1 %v2214_v17  ;;  %4072 = vmatprep.subr.bf16.mxu0 %v1671_v18 }
 0x56d   :  { %4113 = vmatprep.subr.bf16.mxu1 %v2183_v46 }
 0x56f   :  { %4073 = vmatpush2.bf16.msra.mxu0 %v1670_v20  ;;  %v1544_v20 = vunpack.c.h.s8.bf16 %v424_v15 }
 0x570   :  { %4114 = vmatpush2.bf16.msra.mxu1 %v2182_v21  ;;  %4074 = vmatprep.subr.bf16.mxu0 %v1639_v16 }
 0x571   :  { %4115 = vmatprep.subr.bf16.mxu1 %v2151_v52  ;;  %v1001_v52 = vunpack.c.l.s8.bf16 %v169_v4  ;;  %v105_v4 = vld [vmem:[#allocation3 + $0xe8] sm:$0xff] }
 0x573   :  { %4075 = vmatpush2.bf16.msra.mxu0 %v1638_v49  ;;  %v1000_v49 = vunpack.c.l.s8.bf16 %v168_v14  ;;  %v1385_v14 = vunpack.c.l.s8.bf16 %v361_v58 }
 0x574   :  { %4116 = vmatpush2.bf16.msra.mxu1 %v2150_v39  ;;  %4126 = vmatprep.subr.bf16.mxu0 %v1097_v40  ;;  %v1512_v39 = vunpack.c.l.s8.bf16 %v424_v15  ;;  %v969_v40 = vunpack.c.h.s8.bf16 %v137_v28  ;;  %v329_v15 = vld [vmem:[#allocation3 + $0x7e8] sm:$0xff] }
 0x575   :  { %4167 = vmatprep.subr.bf16.mxu1 %v1609_v41 }
 0x576   :  { %v3832_v59 = vpop.f32.mrf.mxu0  ;;  %4077 = vmatmul.mubr.bf16.vlgmr.msra.gmra.mxu0 %v5523_v48 }
 0x577   :  { %v3873_v0 = vpop.f32.mrf.mxu1  ;;  %4118 = vmatmul.mubr.bf16.vlgmr.msra.gmra.mxu1 %v5540_v23  ;;  %v3833_v56 = vadd.f32 %v3832_v59, %v5718_v1  ;;  %4127 = vmatpush1.bf16.msra.mxu0 %v1096_v53  ;;  %v968_v53 = vunpack.c.h.s8.bf16 %v136_v43  ;;  %v936_v59 = vunpack.c.l.s8.bf16 %v136_v43 }
 0x578   :  { %4168 = vmatpush1.bf16.msra.mxu1 %v1608_v34  ;;  %v3834_v29 = vpop.f32.mrf.mxu0  ;;  %4128 = vmatprep.subr.bf16.mxu0 %v1065_v35  ;;  %v1480_v34 = vunpack.c.h.s8.bf16 %v392_v61  ;;  %v937_v35 = vunpack.c.l.s8.bf16 %v137_v28  ;;  %v1321_v28 = vunpack.c.l.s8.bf16 %v329_v15 }
 0x579   :  { %v3875_v11 = vpop.f32.mrf.mxu1  ;;  %4169 = vmatprep.subr.bf16.mxu1 %v1577_v44  ;;  %v5735_v17 = vadd.f32 %v3873_v0, %v3833_v56  ;;  %v3835_v18 = vadd.f32 %v3834_v29, %v5725_v7  ;;  %4158 = vmatprep.mubr.bf16.mxu0 %v5509_v37  ;;  %v393_v7 = vld [vmem:[#allocation3 + $0x9e8] sm:$0xff]  ;;  %v1448_v0 = vunpack.c.l.s8.bf16 %v392_v61  ;;  %v905_v56 = vunpack.c.h.s8.bf16 %v105_v4  ;;  %v360_v29 = vld [vmem:[#allocation3 + $0x8e0] sm:$0xff] }
 0x57a   :  { %4199 = vmatprep.mubr.bf16.mxu1 %v5513_v38  ;;  %v3836_v1 = vpop.f32.mrf.mxu0  ;;  %v1481_v41 = vunpack.c.h.s8.bf16 %v393_v7  ;;  %v1449_v44 = vunpack.c.l.s8.bf16 %v393_v7 }
 0x57b   :  { %v3877_v46 = vpop.f32.mrf.mxu1  ;;  %v5740_v19 = vadd.f32 %v3875_v11, %v3835_v18  ;;  %4129 = vmatpush1.bf16.msra.mxu0 %v1064_v42  ;;  %v1417_v42 = vunpack.c.h.s8.bf16 %v361_v58  ;;  %v585_v18 = vld [vmem:[#allocation3 + $0xfe8] sm:$0xff] }
 0x57c   :  { %4170 = vmatpush1.bf16.msra.mxu1 %v1576_v8  ;;  %v3837_v21 = vpop.f32.mrf.mxu0  ;;  %4130 = vmatprep.subr.bf16.mxu0 %v1033_v12  ;;  %v104_v8 = vld [vmem:[#allocation3 + $0xe0] sm:$0xff]  ;;  %v1416_v12 = vunpack.c.h.s8.bf16 %v360_v29  ;;  %v1384_v46 = vunpack.c.l.s8.bf16 %v360_v29  ;;  %v1833_v7 = vunpack.c.l.s8.bf16 %v585_v18 }
 0x57d   :  { %v3878_v16 = vpop.f32.mrf.mxu1  ;;  %4171 = vmatprep.subr.bf16.mxu1 %v1545_v6  ;;  %v904_v11 = vunpack.c.h.s8.bf16 %v104_v8  ;;  %v873_v6 = vunpack.c.l.s8.bf16 %v105_v4  ;;  %v872_v1 = vunpack.c.l.s8.bf16 %v104_v8  ;;  %v328_v21 = vld [vmem:[#allocation3 + $0x7e0] sm:$0xff] }
 0x57e   :  { %v584_v16 = vld [vmem:[#allocation3 + $0xfe0] sm:$0xff] }
 0x57f   :  { %4131 = vmatpush1.bf16.msra.mxu0 %v1032_v2  ;;  %v1353_v2 = vunpack.c.h.s8.bf16 %v329_v15 }
 0x580   :  { %4172 = vmatpush1.bf16.msra.mxu1 %v1544_v20  ;;  %4132 = vmatprep.subr.bf16.mxu0 %v1001_v52  ;;  %v1865_v20 = vunpack.c.h.s8.bf16 %v585_v18  ;;  %v1352_v52 = vunpack.c.h.s8.bf16 %v328_v21 }
 0x581   :  { %4173 = vmatprep.subr.bf16.mxu1 %v1513_v25  ;;  %v1864_v25 = vunpack.c.h.s8.bf16 %v584_v16 }
 0x583   :  { %4133 = vmatpush1.bf16.msra.mxu0 %v1000_v49  ;;  %v297_v49 = vld [vmem:[#allocation3 + $0x6e8] sm:$0xff] }
 0x584   :  { %4174 = vmatpush1.bf16.msra.mxu1 %v1512_v39  ;;  %4134 = vmatprep.subr.bf16.mxu0 %v969_v40  ;;  %v553_v39 = vld [vmem:[#allocation3 + $0xee8] sm:$0xff]  ;;  %v1320_v40 = vunpack.c.l.s8.bf16 %v328_v21  ;;  %v1289_v43 = vunpack.c.h.s8.bf16 %v297_v49  ;;  %v1257_v4 = vunpack.c.l.s8.bf16 %v297_v49 }
 0x585   :  { %4175 = vmatprep.subr.bf16.mxu1 %v1481_v41  ;;  %v1832_v41 = vunpack.c.l.s8.bf16 %v584_v16  ;;  %v1801_v61 = vunpack.c.h.s8.bf16 %v553_v39  ;;  %v1769_v58 = vunpack.c.l.s8.bf16 %v553_v39 }
 0x587   :  { %4135 = vmatpush1.bf16.msra.mxu0 %v968_v53  ;;  %v296_v53 = vld [vmem:[#allocation3 + $0x6e0] sm:$0xff] }
 0x588   :  { %4176 = vmatpush1.bf16.msra.mxu1 %v1480_v34  ;;  %4136 = vmatprep.subr.bf16.mxu0 %v937_v35  ;;  %v552_v34 = vld [vmem:[#allocation3 + $0xee0] sm:$0xff]  ;;  %v1288_v35 = vunpack.c.h.s8.bf16 %v296_v53 }
 0x589   :  { %4177 = vmatprep.subr.bf16.mxu1 %v1449_v44  ;;  %v1800_v44 = vunpack.c.h.s8.bf16 %v552_v34 }
 0x58b   :  { %4137 = vmatpush1.bf16.msra.mxu0 %v936_v59  ;;  %v265_v59 = vld [vmem:[#allocation3 + $0x5e8] sm:$0xff] }
 0x58c   :  { %4178 = vmatpush1.bf16.msra.mxu1 %v1448_v0  ;;  %4138 = vmatprep.subr.bf16.mxu0 %v905_v56  ;;  %v521_v0 = vld [vmem:[#allocation3 + $0xde8] sm:$0xff]  ;;  %v1256_v56 = vunpack.c.l.s8.bf16 %v296_v53  ;;  %v1225_v8 = vunpack.c.h.s8.bf16 %v265_v59  ;;  %v1193_v15 = vunpack.c.l.s8.bf16 %v265_v59 }
 0x58d   :  { %4179 = vmatprep.subr.bf16.mxu1 %v1417_v42  ;;  %v1768_v42 = vunpack.c.l.s8.bf16 %v552_v34  ;;  %v1737_v29 = vunpack.c.h.s8.bf16 %v521_v0  ;;  %v1705_v18 = vunpack.c.l.s8.bf16 %v521_v0 }
 0x58f   :  { %4139 = vmatpush1.bf16.msra.mxu0 %v904_v11  ;;  %v264_v11 = vld [vmem:[#allocation3 + $0x5e0] sm:$0xff] }
 0x590   :  { %4180 = vmatpush1.bf16.msra.mxu1 %v1416_v12  ;;  %4140 = vmatprep.subr.bf16.mxu0 %v873_v6  ;;  %v520_v12 = vld [vmem:[#allocation3 + $0xde0] sm:$0xff]  ;;  %v1224_v6 = vunpack.c.h.s8.bf16 %v264_v11 }
 0x591   :  { %4181 = vmatprep.subr.bf16.mxu1 %v1385_v14  ;;  %v1736_v14 = vunpack.c.h.s8.bf16 %v520_v12 }
 0x593   :  { %4141 = vmatpush1.bf16.msra.mxu0 %v872_v1  ;;  %v233_v1 = vld [vmem:[#allocation3 + $0x4e8] sm:$0xff] }
 0x594   :  { %4182 = vmatpush1.bf16.msra.mxu1 %v1384_v46  ;;  %4142 = vmatprep.subr.bf16.mxu0 %v1353_v2  ;;  %v489_v46 = vld [vmem:[#allocation3 + $0xce8] sm:$0xff]  ;;  %v1192_v2 = vunpack.c.l.s8.bf16 %v264_v11  ;;  %v1161_v21 = vunpack.c.h.s8.bf16 %v233_v1  ;;  %v1129_v49 = vunpack.c.l.s8.bf16 %v233_v1 }
 0x595   :  { %4183 = vmatprep.subr.bf16.mxu1 %v1865_v20  ;;  %v1704_v20 = vunpack.c.l.s8.bf16 %v520_v12  ;;  %v1673_v16 = vunpack.c.h.s8.bf16 %v489_v46  ;;  %v1641_v39 = vunpack.c.l.s8.bf16 %v489_v46  ;;  %v680_v46 = vld [vmem:[#allocation3 + $0x12e0] sm:$0xff] }
 0x597   :  { %4143 = vmatpush2.bf16.msra.mxu0 %v1352_v52  ;;  %v232_v52 = vld [vmem:[#allocation3 + $0x4e0] sm:$0xff] }
 0x598   :  { %4184 = vmatpush2.bf16.msra.mxu1 %v1864_v25  ;;  %4144 = vmatprep.subr.bf16.mxu0 %v1321_v28  ;;  %v488_v25 = vld [vmem:[#allocation3 + $0xce0] sm:$0xff]  ;;  %v1160_v28 = vunpack.c.h.s8.bf16 %v232_v52 }
 0x599   :  { %4185 = vmatprep.subr.bf16.mxu1 %v1833_v7  ;;  %v1672_v7 = vunpack.c.h.s8.bf16 %v488_v25 }
 0x59b   :  { %4145 = vmatpush2.bf16.msra.mxu0 %v1320_v40  ;;  %v713_v40 = vld [vmem:[#allocation3 + $0x13e8] sm:$0xff] }
 0x59c   :  { %4186 = vmatpush2.bf16.msra.mxu1 %v1832_v41  ;;  %4146 = vmatprep.subr.bf16.mxu0 %v1289_v43  ;;  %v203_v41 = vld [vmem:[#allocation3 + $0x3f8] sm:$0xff]  ;;  %v1128_v43 = vunpack.c.l.s8.bf16 %v232_v52  ;;  %v2121_v53 = vunpack.c.h.s8.bf16 %v713_v40  ;;  %v2089_v59 = vunpack.c.l.s8.bf16 %v713_v40  ;;  %v2056_v52 = vunpack.c.h.s8.bf16 %v680_v46  ;;  %v649_v40 = vld [vmem:[#allocation3 + $0x11e8] sm:$0xff] }
 0x59d   :  { %4187 = vmatprep.subr.bf16.mxu1 %v1801_v61  ;;  %v1640_v61 = vunpack.c.l.s8.bf16 %v488_v25  ;;  %v1099_v34 = vunpack.c.h.s8.bf16 %v203_v41  ;;  %v1067_v0 = vunpack.c.l.s8.bf16 %v203_v41  ;;  %v139_v41 = vld [vmem:[#allocation3 + $0x1f8] sm:$0xff] }
 0x59f   :  { %4147 = vmatpush2.bf16.msra.mxu0 %v1288_v35  ;;  %v712_v35 = vld [vmem:[#allocation3 + $0x13e0] sm:$0xff] }
 0x5a0   :  { %4188 = vmatpush2.bf16.msra.mxu1 %v1800_v44  ;;  %4148 = vmatprep.subr.bf16.mxu0 %v1257_v4  ;;  %v202_v44 = vld [vmem:[#allocation3 + $0x3f0] sm:$0xff]  ;;  %v2120_v4 = vunpack.c.h.s8.bf16 %v712_v35  ;;  %v2088_v12 = vunpack.c.l.s8.bf16 %v712_v35 }
 0x5a1   :  { %4189 = vmatprep.subr.bf16.mxu1 %v1769_v58  ;;  %v1098_v58 = vunpack.c.h.s8.bf16 %v202_v44  ;;  %v138_v35 = vld [vmem:[#allocation3 + $0x1f0] sm:$0xff] }
 0x5a3   :  { %4149 = vmatpush2.bf16.msra.mxu0 %v1256_v56  ;;  %v681_v56 = vld [vmem:[#allocation3 + $0x12e8] sm:$0xff] }
 0x5a4   :  { %4190 = vmatpush2.bf16.msra.mxu1 %v1768_v42  ;;  %4150 = vmatprep.subr.bf16.mxu0 %v1225_v8  ;;  %v171_v42 = vld [vmem:[#allocation3 + $0x2f8] sm:$0xff] }
 0x5a5   :  { %4191 = vmatprep.subr.bf16.mxu1 %v1737_v29  ;;  %v1035_v1 = vunpack.c.h.s8.bf16 %v171_v42 }
 0x5a7   :  { %4151 = vmatpush2.bf16.msra.mxu0 %v1224_v6  ;;  %v1066_v6 = vunpack.c.l.s8.bf16 %v202_v44 }
 0x5a8   :  { %4192 = vmatpush2.bf16.msra.mxu1 %v1736_v14  ;;  %4152 = vmatprep.subr.bf16.mxu0 %v1193_v15 }
 0x5a9   :  { %4193 = vmatprep.subr.bf16.mxu1 %v1705_v18  ;;  %v2057_v18 = vunpack.c.h.s8.bf16 %v681_v56 }
 0x5ab   :  { %4153 = vmatpush2.bf16.msra.mxu0 %v1192_v2  ;;  %v170_v2 = vld [vmem:[#allocation3 + $0x2f0] sm:$0xff] }
 0x5ac   :  { %4194 = vmatpush2.bf16.msra.mxu1 %v1704_v20  ;;  %4154 = vmatprep.subr.bf16.mxu0 %v1161_v21  ;;  %v1034_v25 = vunpack.c.h.s8.bf16 %v170_v2 }
 0x5ad   :  { %4195 = vmatprep.subr.bf16.mxu1 %v1673_v16 }
 0x5af   :  { %4155 = vmatpush2.bf16.msra.mxu0 %v1160_v28 }
 0x5b0   :  { %4196 = vmatpush2.bf16.msra.mxu1 %v1672_v7  ;;  %4156 = vmatprep.subr.bf16.mxu0 %v1129_v49  ;;  %v2025_v49 = vunpack.c.l.s8.bf16 %v681_v56  ;;  %v107_v56 = vld [vmem:[#allocation3 + $0xf8] sm:$0xff] }
 0x5b1   :  { %4197 = vmatprep.subr.bf16.mxu1 %v1641_v39  ;;  %v1003_v39 = vunpack.c.l.s8.bf16 %v171_v42 }
 0x5b3   :  { %4157 = vmatpush2.bf16.msra.mxu0 %v1128_v43  ;;  %v2024_v43 = vunpack.c.l.s8.bf16 %v680_v46  ;;  %v875_v46 = vunpack.c.l.s8.bf16 %v107_v56 }
 0x5b4   :  { %4198 = vmatpush2.bf16.msra.mxu1 %v1640_v61  ;;  %4208 = vmatprep.subr.bf16.mxu0 %v2121_v53  ;;  %v1002_v61 = vunpack.c.l.s8.bf16 %v170_v2  ;;  %v971_v53 = vunpack.c.h.s8.bf16 %v139_v41  ;;  %v841_v2 = vld [vmem:[#allocation3 + $0x17e8] sm:$0xff] }
 0x5b5   :  { %4249 = vmatprep.subr.bf16.mxu1 %v1099_v34  ;;  %v648_v34 = vld [vmem:[#allocation3 + $0x11e0] sm:$0xff] }
 0x5b6   :  { %v3914_v8 = vpop.f32.mrf.mxu0  ;;  %4159 = vmatmul.mubr.bf16.vlgmr.msra.gmra.mxu0 %v5519_v47  ;;  %v1992_v44 = vunpack.c.h.s8.bf16 %v648_v34  ;;  %v1960_v42 = vunpack.c.l.s8.bf16 %v648_v34 }
 0x5b7   :  { %v3955_v29 = vpop.f32.mrf.mxu1  ;;  %4200 = vmatmul.mubr.bf16.vlgmr.msra.gmra.mxu1 %v5523_v48  ;;  %4209 = vmatpush1.bf16.msra.mxu0 %v2120_v4  ;;  %v970_v4 = vunpack.c.h.s8.bf16 %v138_v35 }
 0x5b8   :  { %v5744_v11 = vadd.f32 %v3955_v29, %v3914_v8  ;;  %4250 = vmatpush1.bf16.msra.mxu1 %v1098_v58  ;;  %v3916_v14 = vpop.f32.mrf.mxu0  ;;  %4210 = vmatprep.subr.bf16.mxu0 %v2089_v59  ;;  %v1961_v58 = vunpack.c.l.s8.bf16 %v649_v40  ;;  %v939_v59 = vunpack.c.l.s8.bf16 %v139_v41  ;;  %v938_v8 = vunpack.c.l.s8.bf16 %v138_v35 }
 0x5b9   :  { %v3957_v15 = vpop.f32.mrf.mxu1  ;;  %4251 = vmatprep.subr.bf16.mxu1 %v1067_v0  ;;  %4240 = vmatprep.mubr.bf16.mxu0 %v5532_v55  ;;  %v617_v0 = vld [vmem:[#allocation3 + $0x10e8] sm:$0xff]  ;;  %v2345_v41 = vunpack.c.l.s8.bf16 %v841_v2 }
 0x5ba   :  { %v5746_v20 = vadd.f32 %v3957_v15, %v3916_v14  ;;  %4281 = vmatprep.mubr.bf16.mxu1 %v5509_v37  ;;  %v3918_v21 = vpop.f32.mrf.mxu0  ;;  %v1993_v37 = vunpack.c.h.s8.bf16 %v649_v40  ;;  %v1929_v29 = vunpack.c.h.s8.bf16 %v617_v0  ;;  %v106_v14 = vld [vmem:[#allocation3 + $0xf0] sm:$0xff] }
 0x5bb   :  { %v3959_v16 = vpop.f32.mrf.mxu1  ;;  %4211 = vmatpush1.bf16.msra.mxu0 %v2088_v12  ;;  %v907_v12 = vunpack.c.h.s8.bf16 %v107_v56  ;;  %v331_v21 = vld [vmem:[#allocation3 + $0x7f8] sm:$0xff] }
 0x5bc   :  { %4252 = vmatpush1.bf16.msra.mxu1 %v1066_v6  ;;  %v3919_v28 = vpop.f32.mrf.mxu0  ;;  %4212 = vmatprep.subr.bf16.mxu0 %v2057_v18  ;;  %v616_v6 = vld [vmem:[#allocation3 + $0x10e0] sm:$0xff]  ;;  %v906_v18 = vunpack.c.h.s8.bf16 %v106_v14 }
 0x5bd   :  { %v3960_v7 = vpop.f32.mrf.mxu1  ;;  %4253 = vmatprep.subr.bf16.mxu1 %v1035_v1  ;;  %v1928_v15 = vunpack.c.h.s8.bf16 %v616_v6  ;;  %v1897_v1 = vunpack.c.l.s8.bf16 %v617_v0  ;;  %v1896_v16 = vunpack.c.l.s8.bf16 %v616_v6  ;;  %v1355_v28 = vunpack.c.h.s8.bf16 %v331_v21 }
 0x5be   :  { %v840_v7 = vld [vmem:[#allocation3 + $0x17e0] sm:$0xff] }
 0x5bf   :  { %4213 = vmatpush1.bf16.msra.mxu0 %v2056_v52  ;;  %v874_v52 = vunpack.c.l.s8.bf16 %v106_v14 }
 0x5c0   :  { %4254 = vmatpush1.bf16.msra.mxu1 %v1034_v25  ;;  %4214 = vmatprep.subr.bf16.mxu0 %v2025_v49  ;;  %v2377_v25 = vunpack.c.h.s8.bf16 %v841_v2  ;;  %v330_v49 = vld [vmem:[#allocation3 + $0x7f0] sm:$0xff] }
 0x5c1   :  { %4255 = vmatprep.subr.bf16.mxu1 %v1003_v39  ;;  %v2376_v39 = vunpack.c.h.s8.bf16 %v840_v7  ;;  %v1354_v40 = vunpack.c.h.s8.bf16 %v330_v49  ;;  %v1322_v34 = vunpack.c.l.s8.bf16 %v330_v49 }
 0x5c3   :  { %4215 = vmatpush1.bf16.msra.mxu0 %v2024_v43  ;;  %v1323_v43 = vunpack.c.l.s8.bf16 %v331_v21 }
 0x5c4   :  { %4256 = vmatpush1.bf16.msra.mxu1 %v1002_v61  ;;  %4216 = vmatprep.subr.bf16.mxu0 %v1993_v37  ;;  %v809_v61 = vld [vmem:[#allocation3 + $0x16e8] sm:$0xff]  ;;  %v299_v37 = vld [vmem:[#allocation3 + $0x6f8] sm:$0xff] }
 0x5c5   :  { %4257 = vmatprep.subr.bf16.mxu1 %v971_v53  ;;  %v2344_v53 = vunpack.c.l.s8.bf16 %v840_v7  ;;  %v2313_v35 = vunpack.c.h.s8.bf16 %v809_v61  ;;  %v2281_v56 = vunpack.c.l.s8.bf16 %v809_v61 }
 0x5c7   :  { %4217 = vmatpush1.bf16.msra.mxu0 %v1992_v44  ;;  %v1291_v44 = vunpack.c.h.s8.bf16 %v299_v37 }
 0x5c8   :  { %4258 = vmatpush1.bf16.msra.mxu1 %v970_v4  ;;  %4218 = vmatprep.subr.bf16.mxu0 %v1961_v58  ;;  %v808_v4 = vld [vmem:[#allocation3 + $0x16e0] sm:$0xff]  ;;  %v298_v58 = vld [vmem:[#allocation3 + $0x6f0] sm:$0xff] }
 0x5c9   :  { %4259 = vmatprep.subr.bf16.mxu1 %v939_v59  ;;  %v2312_v59 = vunpack.c.h.s8.bf16 %v808_v4  ;;  %v1290_v0 = vunpack.c.h.s8.bf16 %v298_v58  ;;  %v1258_v6 = vunpack.c.l.s8.bf16 %v298_v58 }
 0x5cb   :  { %4219 = vmatpush1.bf16.msra.mxu0 %v1960_v42  ;;  %v1259_v42 = vunpack.c.l.s8.bf16 %v299_v37 }
 0x5cc   :  { %4260 = vmatpush1.bf16.msra.mxu1 %v938_v8  ;;  %4220 = vmatprep.subr.bf16.mxu0 %v1929_v29  ;;  %v777_v8 = vld [vmem:[#allocation3 + $0x15e8] sm:$0xff]  ;;  %v267_v29 = vld [vmem:[#allocation3 + $0x5f8] sm:$0xff] }
 0x5cd   :  { %4261 = vmatprep.subr.bf16.mxu1 %v907_v12  ;;  %v2280_v12 = vunpack.c.l.s8.bf16 %v808_v4  ;;  %v2249_v14 = vunpack.c.h.s8.bf16 %v777_v8  ;;  %v2217_v21 = vunpack.c.l.s8.bf16 %v777_v8 }
 0x5cf   :  { %4221 = vmatpush1.bf16.msra.mxu0 %v1928_v15  ;;  %v1227_v15 = vunpack.c.h.s8.bf16 %v267_v29 }
 0x5d0   :  { %4262 = vmatpush1.bf16.msra.mxu1 %v906_v18  ;;  %4222 = vmatprep.subr.bf16.mxu0 %v1897_v1  ;;  %v776_v18 = vld [vmem:[#allocation3 + $0x15e0] sm:$0xff]  ;;  %v266_v1 = vld [vmem:[#allocation3 + $0x5f0] sm:$0xff] }
 0x5d1   :  { %4263 = vmatprep.subr.bf16.mxu1 %v875_v46  ;;  %v2248_v46 = vunpack.c.h.s8.bf16 %v776_v18  ;;  %v1226_v2 = vunpack.c.h.s8.bf16 %v266_v1  ;;  %v1194_v7 = vunpack.c.l.s8.bf16 %v266_v1 }
 0x5d3   :  { %4223 = vmatpush1.bf16.msra.mxu0 %v1896_v16  ;;  %v1195_v16 = vunpack.c.l.s8.bf16 %v267_v29 }
 0x5d4   :  { %4264 = vmatpush1.bf16.msra.mxu1 %v874_v52  ;;  %4224 = vmatprep.subr.bf16.mxu0 %v2377_v25  ;;  %v745_v52 = vld [vmem:[#allocation3 + $0x14e8] sm:$0xff]  ;;  %v235_v25 = vld [vmem:[#allocation3 + $0x4f8] sm:$0xff] }
 0x5d5   :  { %4265 = vmatprep.subr.bf16.mxu1 %v1355_v28  ;;  %v2216_v28 = vunpack.c.l.s8.bf16 %v776_v18  ;;  %v2185_v49 = vunpack.c.h.s8.bf16 %v745_v52  ;;  %v2153_v37 = vunpack.c.l.s8.bf16 %v745_v52 }
 0x5d7   :  { %4225 = vmatpush2.bf16.msra.mxu0 %v2376_v39  ;;  %v1163_v39 = vunpack.c.h.s8.bf16 %v235_v25 }
 0x5d8   :  { %4266 = vmatpush2.bf16.msra.mxu1 %v1354_v40  ;;  %4226 = vmatprep.subr.bf16.mxu0 %v2345_v41  ;;  %v744_v40 = vld [vmem:[#allocation3 + $0x14e0] sm:$0xff]  ;;  %v234_v41 = vld [vmem:[#allocation3 + $0x4f0] sm:$0xff] }
 0x5d9   :  { %4267 = vmatprep.subr.bf16.mxu1 %v1323_v43  ;;  %v2184_v43 = vunpack.c.h.s8.bf16 %v744_v40  ;;  %v1162_v61 = vunpack.c.h.s8.bf16 %v234_v41  ;;  %v1130_v4 = vunpack.c.l.s8.bf16 %v234_v41 }
 0x5db   :  { %4227 = vmatpush2.bf16.msra.mxu0 %v2344_v53  ;;  %v1131_v53 = vunpack.c.l.s8.bf16 %v235_v25 }
 0x5dc   :  { %4268 = vmatpush2.bf16.msra.mxu1 %v1322_v34  ;;  %4228 = vmatprep.subr.bf16.mxu0 %v2313_v35  ;;  %v459_v34 = vld [vmem:[#allocation3 + $0xbf8] sm:$0xff] }
 0x5dd   :  { %4269 = vmatprep.subr.bf16.mxu1 %v1291_v44  ;;  %v715_v35 = vld [vmem:[#allocation3 + $0x13f8] sm:$0xff]  ;;  %v2152_v44 = vunpack.c.l.s8.bf16 %v744_v40  ;;  %v1611_v58 = vunpack.c.h.s8.bf16 %v459_v34  ;;  %v1579_v29 = vunpack.c.l.s8.bf16 %v459_v34 }
 0x5de   :  { %v651_v34 = vld [vmem:[#allocation3 + $0x11f8] sm:$0xff] }
 0x5df   :  { %4229 = vmatpush2.bf16.msra.mxu0 %v2312_v59  ;;  %v2123_v59 = vunpack.c.h.s8.bf16 %v715_v35 }
 0x5e0   :  { %4270 = vmatpush2.bf16.msra.mxu1 %v1290_v0  ;;  %4230 = vmatprep.subr.bf16.mxu0 %v2281_v56  ;;  %v458_v0 = vld [vmem:[#allocation3 + $0xbf0] sm:$0xff] }
 0x5e1   :  { %4271 = vmatprep.subr.bf16.mxu1 %v1259_v42  ;;  %v714_v56 = vld [vmem:[#allocation3 + $0x13f0] sm:$0xff]  ;;  %v1610_v42 = vunpack.c.h.s8.bf16 %v458_v0 }
 0x5e2   :  { %v2122_v8 = vunpack.c.h.s8.bf16 %v714_v56 }
 0x5e3   :  { %4231 = vmatpush2.bf16.msra.mxu0 %v2280_v12  ;;  %v2091_v12 = vunpack.c.l.s8.bf16 %v715_v35  ;;  %v1995_v35 = vunpack.c.h.s8.bf16 %v651_v34 }
 0x5e4   :  { %4272 = vmatpush2.bf16.msra.mxu1 %v1258_v6  ;;  %4232 = vmatprep.subr.bf16.mxu0 %v2249_v14  ;;  %v427_v6 = vld [vmem:[#allocation3 + $0xaf8] sm:$0xff] }
 0x5e5   :  { %4273 = vmatprep.subr.bf16.mxu1 %v1227_v15  ;;  %v683_v14 = vld [vmem:[#allocation3 + $0x12f8] sm:$0xff]  ;;  %v1547_v52 = vunpack.c.h.s8.bf16 %v427_v6 }
 0x5e6   :  { %v2059_v25 = vunpack.c.h.s8.bf16 %v683_v14 }
 0x5e7   :  { %4233 = vmatpush2.bf16.msra.mxu0 %v2248_v46  ;;  %v1578_v46 = vunpack.c.l.s8.bf16 %v458_v0 }
 0x5e8   :  { %4274 = vmatpush2.bf16.msra.mxu1 %v1226_v2  ;;  %4234 = vmatprep.subr.bf16.mxu0 %v2217_v21  ;;  %v2090_v2 = vunpack.c.l.s8.bf16 %v714_v56  ;;  %v1963_v56 = vunpack.c.l.s8.bf16 %v651_v34 }
 0x5e9   :  { %4275 = vmatprep.subr.bf16.mxu1 %v1195_v16 }
 0x5eb   :  { %4235 = vmatpush2.bf16.msra.mxu0 %v2216_v28  ;;  %v426_v28 = vld [vmem:[#allocation3 + $0xaf0] sm:$0xff] }
 0x5ec   :  { %4276 = vmatpush2.bf16.msra.mxu1 %v1194_v7  ;;  %4236 = vmatprep.subr.bf16.mxu0 %v2185_v49  ;;  %v682_v7 = vld [vmem:[#allocation3 + $0x12f0] sm:$0xff] }
 0x5ed   :  { %4277 = vmatprep.subr.bf16.mxu1 %v1163_v39  ;;  %v1546_v39 = vunpack.c.h.s8.bf16 %v426_v28  ;;  %v2058_v40 = vunpack.c.h.s8.bf16 %v682_v7 }
 0x5ef   :  { %4237 = vmatpush2.bf16.msra.mxu0 %v2184_v43 }
 0x5f0   :  { %4278 = vmatpush2.bf16.msra.mxu1 %v1162_v61  ;;  %4238 = vmatprep.subr.bf16.mxu0 %v2153_v37  ;;  %v1515_v61 = vunpack.c.l.s8.bf16 %v427_v6  ;;  %v2027_v37 = vunpack.c.l.s8.bf16 %v683_v14 }
 0x5f1   :  { %4279 = vmatprep.subr.bf16.mxu1 %v1131_v53  ;;  %v395_v53 = vld [vmem:[#allocation3 + $0x9f8] sm:$0xff] }
 0x5f2   :  { %v1451_v0 = vunpack.c.l.s8.bf16 %v395_v53 }
 0x5f3   :  { %4239 = vmatpush2.bf16.msra.mxu0 %v2152_v44  ;;  %v394_v44 = vld [vmem:[#allocation3 + $0x9f0] sm:$0xff] }
 0x5f4   :  { %4280 = vmatpush2.bf16.msra.mxu1 %v1130_v4  ;;  %4290 = vmatprep.subr.bf16.mxu0 %v1611_v58  ;;  %v650_v4 = vld [vmem:[#allocation3 + $0x11f0] sm:$0xff]  ;;  %v1482_v58 = vunpack.c.h.s8.bf16 %v394_v44 }
 0x5f5   :  { %4331 = vmatprep.subr.bf16.mxu1 %v2123_v59  ;;  %v1994_v59 = vunpack.c.h.s8.bf16 %v650_v4 }
 0x5f6   :  { %v3996_v15 = vpop.f32.mrf.mxu0  ;;  %4241 = vmatmul.mubr.bf16.vlgmr.msra.gmra.mxu0 %v5540_v23 }
 0x5f7   :  { %v5750_v18 = vpop.f32.mrf.mxu1  ;;  %4282 = vmatmul.mubr.bf16.vlgmr.msra.gmra.mxu1 %v5519_v47  ;;  %v5755_v1 = vadd.f32 %v3996_v15, %v5744_v11  ;;  %4291 = vmatpush1.bf16.msra.mxu0 %v1610_v42  ;;  %v363_v42 = vld [vmem:[#allocation3 + $0x8f8] sm:$0xff]  ;;  %v362_v15 = vld [vmem:[#allocation3 + $0x8f0] sm:$0xff] }
 0x5f8   :  { %4332 = vmatpush1.bf16.msra.mxu1 %v2122_v8  ;;  %v3998_v21 = vpop.f32.mrf.mxu0  ;;  %4292 = vmatprep.subr.bf16.mxu0 %v1579_v29  ;;  %v619_v8 = vld [vmem:[#allocation3 + $0x10f8] sm:$0xff]  ;;  %v1450_v29 = vunpack.c.l.s8.bf16 %v394_v44  ;;  %v1419_v6 = vunpack.c.h.s8.bf16 %v363_v42 }
 0x5f9   :  { %v5757_v16 = vpop.f32.mrf.mxu1  ;;  %4333 = vmatprep.subr.bf16.mxu1 %v2091_v12  ;;  %v5760_v49 = vadd.f32 %v3998_v21, %v5746_v20  ;;  %4322 = vmatprep.mubr.bf16.mxu0 %v5513_v38  ;;  %v1514_v20 = vunpack.c.l.s8.bf16 %v426_v28  ;;  %v2026_v38 = vunpack.c.l.s8.bf16 %v682_v7  ;;  %v1962_v12 = vunpack.c.l.s8.bf16 %v650_v4  ;;  %v587_v28 = vld [vmem:[#allocation3 + $0xff8] sm:$0xff] }
 0x5fa   :  { %4363 = vmatprep.mubr.bf16.mxu1 %v5532_v55  ;;  %v4000_v47 = vpop.f32.mrf.mxu0  ;;  %v1483_v55 = vunpack.c.h.s8.bf16 %v395_v53  ;;  %v1931_v14 = vunpack.c.h.s8.bf16 %v619_v8  ;;  %v843_v7 = vld [vmem:[#allocation3 + $0x17f8] sm:$0xff]  ;;  %v1835_v53 = vunpack.c.l.s8.bf16 %v587_v28 }
 0x5fb   :  { %v4041_v11 = vpop.f32.mrf.mxu1  ;;  %4293 = vmatpush1.bf16.msra.mxu0 %v1578_v46  ;;  %v618_v46 = vld [vmem:[#allocation3 + $0x10f0] sm:$0xff]  ;;  %v1386_v47 = vunpack.c.l.s8.bf16 %v362_v15  ;;  %v2347_v34 = vunpack.c.l.s8.bf16 %v843_v7 }
 0x5fc   :  { %4334 = vmatpush1.bf16.msra.mxu1 %v2090_v2  ;;  %v4001_v41 = vpop.f32.mrf.mxu0  ;;  %4294 = vmatprep.subr.bf16.mxu0 %v1547_v52  ;;  %v1418_v2 = vunpack.c.h.s8.bf16 %v362_v15  ;;  %v1930_v21 = vunpack.c.h.s8.bf16 %v618_v46  ;;  %v1387_v52 = vunpack.c.l.s8.bf16 %v363_v42  ;;  %v1898_v11 = vunpack.c.l.s8.bf16 %v618_v46 }
 0x5fd   :  { %v4042_v43 = vpop.f32.mrf.mxu1  ;;  %4335 = vmatprep.subr.bf16.mxu1 %v2059_v25  ;;  %v1899_v25 = vunpack.c.l.s8.bf16 %v619_v8  ;;  %v586_v41 = vld [vmem:[#allocation3 + $0xff0] sm:$0xff] }
 0x5fe   :  { %v842_v43 = vld [vmem:[#allocation3 + $0x17f0] sm:$0xff] }
 0x5ff   :  { %4295 = vmatpush1.bf16.msra.mxu0 %v1546_v39  ;;  %v1867_v39 = vunpack.c.h.s8.bf16 %v587_v28 }
 0x600   :  { %4336 = vmatpush1.bf16.msra.mxu1 %v2058_v40  ;;  %4296 = vmatprep.subr.bf16.mxu0 %v1515_v61  ;;  %v2379_v40 = vunpack.c.h.s8.bf16 %v843_v7  ;;  %v1866_v61 = vunpack.c.h.s8.bf16 %v586_v41 }
 0x601   :  { %4337 = vmatprep.subr.bf16.mxu1 %v2027_v37  ;;  %v2378_v37 = vunpack.c.h.s8.bf16 %v842_v43 }
 0x603   :  { %4297 = vmatpush1.bf16.msra.mxu0 %v1514_v20  ;;  %v555_v20 = vld [vmem:[#allocation3 + $0xef8] sm:$0xff] }
 0x604   :  { %4338 = vmatpush1.bf16.msra.mxu1 %v2026_v38  ;;  %4298 = vmatprep.subr.bf16.mxu0 %v1483_v55  ;;  %v811_v38 = vld [vmem:[#allocation3 + $0x16f8] sm:$0xff]  ;;  %v1834_v55 = vunpack.c.l.s8.bf16 %v586_v41  ;;  %v1803_v44 = vunpack.c.h.s8.bf16 %v555_v20  ;;  %v1771_v42 = vunpack.c.l.s8.bf16 %v555_v20 }
 0x605   :  { %4339 = vmatprep.subr.bf16.mxu1 %v1995_v35  ;;  %v2346_v35 = vunpack.c.l.s8.bf16 %v842_v43  ;;  %v2315_v4 = vunpack.c.h.s8.bf16 %v811_v38  ;;  %v2283_v8 = vunpack.c.l.s8.bf16 %v811_v38 }
 0x607   :  { %4299 = vmatpush1.bf16.msra.mxu0 %v1482_v58  ;;  %v554_v58 = vld [vmem:[#allocation3 + $0xef0] sm:$0xff] }
 0x608   :  { %4340 = vmatpush1.bf16.msra.mxu1 %v1994_v59  ;;  %4300 = vmatprep.subr.bf16.mxu0 %v1451_v0  ;;  %v810_v59 = vld [vmem:[#allocation3 + $0x16f0] sm:$0xff]  ;;  %v1802_v0 = vunpack.c.h.s8.bf16 %v554_v58 }
 0x609   :  { %4341 = vmatprep.subr.bf16.mxu1 %v1963_v56  ;;  %v2314_v56 = vunpack.c.h.s8.bf16 %v810_v59 }
 0x60b   :  { %4301 = vmatpush1.bf16.msra.mxu0 %v1450_v29  ;;  %v523_v29 = vld [vmem:[#allocation3 + $0xdf8] sm:$0xff] }
 0x60c   :  { %4342 = vmatpush1.bf16.msra.mxu1 %v1962_v12  ;;  %4302 = vmatprep.subr.bf16.mxu0 %v1419_v6  ;;  %v779_v12 = vld [vmem:[#allocation3 + $0x15f8] sm:$0xff]  ;;  %v1770_v6 = vunpack.c.l.s8.bf16 %v554_v58  ;;  %v1739_v15 = vunpack.c.h.s8.bf16 %v523_v29  ;;  %v1707_v28 = vunpack.c.l.s8.bf16 %v523_v29 }
 0x60d   :  { %4343 = vmatprep.subr.bf16.mxu1 %v1931_v14  ;;  %v2282_v14 = vunpack.c.l.s8.bf16 %v810_v59  ;;  %v2251_v46 = vunpack.c.h.s8.bf16 %v779_v12  ;;  %v2219_v7 = vunpack.c.l.s8.bf16 %v779_v12 }
 0x60f   :  { %4303 = vmatpush1.bf16.msra.mxu0 %v1418_v2  ;;  %v522_v2 = vld [vmem:[#allocation3 + $0xdf0] sm:$0xff] }
 0x610   :  { %4344 = vmatpush1.bf16.msra.mxu1 %v1930_v21  ;;  %4304 = vmatprep.subr.bf16.mxu0 %v1387_v52  ;;  %v778_v21 = vld [vmem:[#allocation3 + $0x15f0] sm:$0xff]  ;;  %v1738_v52 = vunpack.c.h.s8.bf16 %v522_v2 }
 0x611   :  { %4345 = vmatprep.subr.bf16.mxu1 %v1899_v25  ;;  %v2250_v25 = vunpack.c.h.s8.bf16 %v778_v21 }
 0x613   :  { %4305 = vmatpush1.bf16.msra.mxu0 %v1386_v47  ;;  %v491_v47 = vld [vmem:[#allocation3 + $0xcf8] sm:$0xff] }
 0x614   :  { %4346 = vmatpush1.bf16.msra.mxu1 %v1898_v11  ;;  %4306 = vmatprep.subr.bf16.mxu0 %v1867_v39  ;;  %v747_v11 = vld [vmem:[#allocation3 + $0x14f8] sm:$0xff]  ;;  %v1706_v39 = vunpack.c.l.s8.bf16 %v522_v2  ;;  %v1675_v41 = vunpack.c.h.s8.bf16 %v491_v47  ;;  %v1643_v20 = vunpack.c.l.s8.bf16 %v491_v47 }
 0x615   :  { %4347 = vmatprep.subr.bf16.mxu1 %v2379_v40  ;;  %v2218_v40 = vunpack.c.l.s8.bf16 %v778_v21  ;;  %v2187_v43 = vunpack.c.h.s8.bf16 %v747_v11  ;;  %v2155_v38 = vunpack.c.l.s8.bf16 %v747_v11 }
 0x617   :  { %4307 = vmatpush2.bf16.msra.mxu0 %v1866_v61  ;;  %v490_v61 = vld [vmem:[#allocation3 + $0xcf0] sm:$0xff] }
 0x618   :  { %4348 = vmatpush2.bf16.msra.mxu1 %v2378_v37  ;;  %4308 = vmatprep.subr.bf16.mxu0 %v1835_v53  ;;  %v746_v37 = vld [vmem:[#allocation3 + $0x14f0] sm:$0xff]  ;;  %v1674_v53 = vunpack.c.h.s8.bf16 %v490_v61 }
 0x619   :  { %4349 = vmatprep.subr.bf16.mxu1 %v2347_v34  ;;  %v2186_v34 = vunpack.c.h.s8.bf16 %v746_v37 }
 0x61b   :  { %4309 = vmatpush2.bf16.msra.mxu0 %v1834_v55  ;;  %v1642_v55 = vunpack.c.l.s8.bf16 %v490_v61  ;;  %v5784_v61 = vld [vmem:[#allocation7] sm:$0xff] }
 0x61c   :  { %4350 = vmatpush2.bf16.msra.mxu1 %v2346_v35  ;;  %4310 = vmatprep.subr.bf16.mxu0 %v1803_v44  ;;  %v2154_v35 = vunpack.c.l.s8.bf16 %v746_v37 }
 0x61d   :  { %4351 = vmatprep.subr.bf16.mxu1 %v2315_v4 }
 0x61f   :  { %4311 = vmatpush2.bf16.msra.mxu0 %v1802_v0 }
 0x620   :  { %4352 = vmatpush2.bf16.msra.mxu1 %v2314_v56  ;;  %4312 = vmatprep.subr.bf16.mxu0 %v1771_v42 }
 0x621   :  { %4353 = vmatprep.subr.bf16.mxu1 %v2283_v8 }
 0x623   :  { %4313 = vmatpush2.bf16.msra.mxu0 %v1770_v6 }
 0x624   :  { %4354 = vmatpush2.bf16.msra.mxu1 %v2282_v14  ;;  %4314 = vmatprep.subr.bf16.mxu0 %v1739_v15 }
 0x625   :  { %4355 = vmatprep.subr.bf16.mxu1 %v2251_v46 }
 0x627   :  { %4315 = vmatpush2.bf16.msra.mxu0 %v1738_v52 }
 0x628   :  { %4356 = vmatpush2.bf16.msra.mxu1 %v2250_v25  ;;  %4316 = vmatprep.subr.bf16.mxu0 %v1707_v28 }
 0x629   :  { %4357 = vmatprep.subr.bf16.mxu1 %v2219_v7  ;;  %v4380_v7 = vlaneseq }
 0x62b   :  { %4317 = vmatpush2.bf16.msra.mxu0 %v1706_v39 }
 0x62c   :  { %4358 = vmatpush2.bf16.msra.mxu1 %v2218_v40  ;;  %4318 = vmatprep.subr.bf16.mxu0 %v1675_v41  ;;  %v4372_v40 = vld [vmem:[#allocation5] sm:$0xff] }
 0x62d   :  { %4359 = vmatprep.subr.bf16.mxu1 %v2187_v43 }
 0x62f   :  { %4319 = vmatpush2.bf16.msra.mxu0 %v1674_v53 }
 0x630   :  { %4360 = vmatpush2.bf16.msra.mxu1 %v2186_v34  ;;  %4320 = vmatprep.subr.bf16.mxu0 %v1643_v20 }
 0x631   :  { %4361 = vmatprep.subr.bf16.mxu1 %v2155_v38 }
 0x633   :  { %4321 = vmatpush2.bf16.msra.mxu0 %v1642_v55 }
 0x634   :  { %4362 = vmatpush2.bf16.msra.mxu1 %v2154_v35 }
 0x636   :  { %v4078_v44 = vpop.f32.mrf.mxu0  ;;  %4323 = vmatmul.mubr.bf16.vlgmr.msra.gmra.mxu0 %v5523_v48 }
 0x637   :  { %v4119_v4 = vpop.f32.mrf.mxu1  ;;  %4364 = vmatmul.mubr.bf16.vlgmr.msra.gmra.mxu1 %v5540_v23  ;;  %v4079_v58 = vadd.f32 %v4078_v44, %v5750_v18  ;;  %v5797_v44 = vld [vmem:[#allocation8] sm:$0xff] }
 0x638   :  { %v4080_v59 = vpop.f32.mrf.mxu0 }
 0x639   :  { %v4121_v0 = vpop.f32.mrf.mxu1  ;;  %v5767_v56 = vadd.f32 %v4119_v4, %v4079_v58  ;;  %v4081_v42 = vadd.f32 %v4080_v59, %v5757_v16  ;;  %v4381_v16 = vshrl.u32 %v4380_v7, 7 }
 0x63a   :  { %v4082_v8 = vpop.f32.mrf.mxu0 }
 0x63b   :  { %v4123_v29 = vpop.f32.mrf.mxu1  ;;  %v5770_v12 = vadd.f32 %v4121_v0, %v4081_v42  ;;  %v5776_v47 = vsub.s32 1, %v4381_v16  ;;  %v5778_v11 = vsub.s32 0, %v4381_v16  ;;  %v5780_v39 = vsub.s32 2, %v4381_v16 }
 0x63c   :  { %v4083_v6 = vpop.f32.mrf.mxu0  ;;  %v5787_v53 = vsub.s32 3, %v4381_v16  ;;  %v5794_v55 = vsub.s32 4, %v4381_v16  ;;  %v5812_v29 = vsub.s32 5, %v4381_v16 }
 0x63d   :  { %v4124_v14 = vpop.f32.mrf.mxu1  ;;  %v4387_v41 = vrot.slane %v4372_v40, %v5776_v47  ;;  %v4383_v43 = vrot.slane %v4372_v40, %v5778_v11  ;;  %v4391_v37 = vrot.slane %v4372_v40, %v5780_v39  ;;  %v4587_v20 = vrot.slane %v5784_v61, %v5776_v47 }
 0x63e   :  { %v4583_v38 = vrot.slane %v5784_v61, %v5778_v11  ;;  %v4591_v58 = vrot.slane %v5784_v61, %v5780_v39  ;;  %v4395_v59 = vrot.slane %v4372_v40, %v5787_v53  ;;  %v4787_v0 = vrot.slane %v5797_v44, %v5776_v47 }
 0x63f   :  { %v4541_v34 = vmul.f32 %v4387_v41, %v5568_v57  ;;  %v4540_v35 = vmul.f32 %v4383_v43, %v5563_v45  ;;  %v4542_v4 = vmul.f32 %v4391_v37, %v5575_v54  ;;  %v4783_v42 = vrot.slane %v5797_v44, %v5778_v11 }
 0x640   :  { %v4791_v45 = vrot.slane %v5797_v44, %v5780_v39  ;;  %v4399_v8 = vrot.slane %v4372_v40, %v5794_v55  ;;  %v4543_v14 = vmul.f32 %v4395_v59, %v5580_v32  ;;  %v4795_v32 = vrot.slane %v5797_v44, %v5787_v53 }
 0x641   :  { %v5803_v57 = vadd.f32 %v4587_v20, %v4541_v34  ;;  %v5814_v54 = vadd.f32 %v4583_v38, %v4540_v35  ;;  %v5816_v6 = vadd.f32 %v4591_v58, %v4542_v4  ;;  %v5835_v43 = vsub.s32 7, %v4381_v16 }
 0x642   :  { %v4799_v20 = vrot.slane %v5797_v44, %v5794_v55  ;;  %v4603_v35 = vrot.slane %v5784_v61, %v5812_v29 }
 0x676   :  { %v4160_v15 = vpop.f32.mrf.mxu0 }
 0x677   :  { %v4201_v46 = vpop.f32.mrf.mxu1 }
 0x678   :  { %v5772_v2 = vadd.f32 %v4201_v46, %v4160_v15  ;;  %v4162_v48 = vpop.f32.mrf.mxu0  ;;  %v4595_v15 = vrot.slane %v5784_v61, %v5787_v53  ;;  %v5821_v46 = vsub.s32 6, %v4381_v16 }
 0x679   :  { %v4203_v23 = vpop.f32.mrf.mxu1 }
 0x67a   :  { %v5774_v21 = vadd.f32 %v4203_v23, %v4162_v48  ;;  %v4164_v18 = vpop.f32.mrf.mxu0  ;;  %v4941_v48 = vmul.f32 %v4787_v0, %v5803_v57  ;;  %v4544_v23 = vmul.f32 %v4399_v8, %v5595_v36  ;;  %v5830_v7 = vadd.f32 %v4595_v15, %v4543_v14 }
 0x67b   :  { %v4205_v52 = vpop.f32.mrf.mxu1  ;;  %v4599_v18 = vrot.slane %v5784_v61, %v5794_v55  ;;  %v4407_v41 = vrot.slane %v4372_v40, %v5821_v46  ;;  %v5021_v36 = vmax.f32 %v5814_v54, %v5803_v57  ;;  %v4607_v0 = vrot.slane %v5784_v61, %v5821_v46 }
 0x67c   :  { %v4165_v25 = vpop.f32.mrf.mxu0  ;;  %v4403_v52 = vrot.slane %v4372_v40, %v5812_v29  ;;  %v4943_v16 = vmul.f32 %v4795_v32, %v5830_v7  ;;  %v4803_v14 = vrot.slane %v5797_v44, %v5812_v29 }
 0x67d   :  { %v4206_v28 = vpop.f32.mrf.mxu1  ;;  %v4940_v25 = vmul.f32 %v4783_v42, %v5814_v54  ;;  %v5839_v34 = vadd.f32 %v4599_v18, %v4544_v23  ;;  %v5022_v4 = vmax.f32 %v5816_v6, %v5021_v36  ;;  %v4546_v59 = vmul.f32 %v4407_v41, %v5607_v60 }
 0x67e   :  { %v4942_v28 = vmul.f32 %v4791_v45, %v5816_v6  ;;  %v4545_v38 = vmul.f32 %v4403_v52, %v5600_v31  ;;  %v4411_v42 = vrot.slane %v4372_v40, %v5835_v43  ;;  %v5852_v45 = vld [vmem:[#allocation5 + $0x8] sm:$0xff]  ;;  %v4807_v40 = vrot.slane %v5797_v44, %v5821_v46 }
 0x67f   :  { %v4972_v37 = vadd.f32 %v4941_v48, %v4940_v25  ;;  %v4944_v8 = vmul.f32 %v4799_v20, %v5839_v34  ;;  %v5023_v15 = vmax.f32 %v5830_v7, %v5022_v4  ;;  %v4415_v60 = vrot.slane %v5852_v45, %v5778_v11  ;;  %v5869_v25 = vld [vmem:[#allocation7 + $0x8] sm:$0xff] }
 0x680   :  { %v5855_v31 = vadd.f32 %v4603_v35, %v4545_v38  ;;  %v5862_v23 = vadd.f32 %v4607_v0, %v4546_v59  ;;  %v4547_v18 = vmul.f32 %v4411_v42, %v5612_v63  ;;  %v4611_v52 = vrot.slane %v5784_v61, %v5835_v43  ;;  %v5883_v35 = vld [vmem:[#allocation8 + $0x8] sm:$0xff] }
 0x681   :  { %v4973_v58 = vadd.f32 %v4972_v37, %v4942_v28  ;;  %v5024_v28 = vmax.f32 %v5839_v34, %v5023_v15  ;;  %v4548_v36 = vmul.f32 %v4415_v60, %v5627_v3  ;;  %v4615_v37 = vrot.slane %v5869_v25, %v5778_v11 }
 0x682   :  { %v4945_v41 = vmul.f32 %v4803_v14, %v5855_v31  ;;  %v4419_v20 = vrot.slane %v5852_v45, %v5776_v47  ;;  %v4946_v63 = vmul.f32 %v4807_v40, %v5862_v23  ;;  %v5879_v38 = vadd.f32 %v4611_v52, %v4547_v18 }
 0x683   :  { %v4974_v48 = vadd.f32 %v4973_v58, %v4943_v16  ;;  %v4811_v61 = vrot.slane %v5797_v44, %v5835_v43  ;;  %v4423_v4 = vrot.slane %v5852_v45, %v5780_v39  ;;  %v5025_v3 = vmax.f32 %v5855_v31, %v5024_v28 }
 0x684   :  { %v5888_v16 = vadd.f32 %v4615_v37, %v4548_v36  ;;  %v4815_v59 = vrot.slane %v5883_v35, %v5778_v11  ;;  %v4549_v0 = vmul.f32 %v4419_v20, %v5632_v10  ;;  %v4619_v42 = vrot.slane %v5869_v25, %v5776_v47 }
 0x685   :  { %v4975_v32 = vadd.f32 %v4974_v48, %v4944_v8  ;;  %v5026_v44 = vmax.f32 %v5862_v23, %v5025_v3  ;;  %v4947_v14 = vmul.f32 %v4811_v61, %v5879_v38  ;;  %v4550_v15 = vmul.f32 %v4423_v4, %v5639_v22 }
 0x686   :  { %v4623_v48 = vrot.slane %v5869_v25, %v5780_v39  ;;  %v4427_v60 = vrot.slane %v5852_v45, %v5787_v53  ;;  %v4948_v40 = vmul.f32 %v4815_v59, %v5888_v16  ;;  %v5903_v18 = vadd.f32 %v4619_v42, %v4549_v0 }
 0x687   :  { %v4976_v58 = vadd.f32 %v4975_v32, %v4945_v41  ;;  %v4819_v10 = vrot.slane %v5883_v35, %v5776_v47  ;;  %v5027_v32 = vmax.f32 %v5879_v38, %v5026_v44  ;;  %v4431_v41 = vrot.slane %v5852_v45, %v5794_v55 }
 0x688   :  { %v5914_v36 = vadd.f32 %v4623_v48, %v4550_v15  ;;  %v4823_v37 = vrot.slane %v5883_v35, %v5780_v39  ;;  %v4551_v20 = vmul.f32 %v4427_v60, %v5644_v26  ;;  %v4435_v26 = vrot.slane %v5852_v45, %v5812_v29 }
 0x689   :  { %v4977_v8 = vadd.f32 %v4976_v58, %v4946_v63  ;;  %v4627_v63 = vrot.slane %v5869_v25, %v5787_v53  ;;  %v5028_v3 = vmax.f32 %v5888_v16, %v5027_v32  ;;  %v4949_v59 = vmul.f32 %v4819_v10, %v5903_v18 }
 0x68a   :  { %v4552_v44 = vmul.f32 %v4431_v41, %v5659_v62  ;;  %v4827_v48 = vrot.slane %v5883_v35, %v5787_v53  ;;  %v4439_v10 = vrot.slane %v5852_v45, %v5821_v46  ;;  %v4831_v41 = vrot.slane %v5883_v35, %v5794_v55 }
 0x68b   :  { %v4978_v22 = vadd.f32 %v4977_v8, %v4947_v14  ;;  %v4631_v8 = vrot.slane %v5869_v25, %v5794_v55  ;;  %v4950_v14 = vmul.f32 %v4823_v37, %v5914_v36  ;;  %v5933_v15 = vadd.f32 %v4627_v63, %v4551_v20 }
 0x68c   :  { %v5029_v62 = vmax.f32 %v5903_v18, %v5028_v3  ;;  %v4553_v37 = vmul.f32 %v4435_v26, %v5664_v9  ;;  %v4635_v20 = vrot.slane %v5869_v25, %v5812_v29  ;;  %v4639_v3 = vrot.slane %v5869_v25, %v5821_v46 }
 0x68d   :  { %v4979_v58 = vadd.f32 %v4978_v22, %v4948_v40  ;;  %v5940_v22 = vadd.f32 %v4631_v8, %v4552_v44  ;;  %v4835_v8 = vrot.slane %v5883_v35, %v5812_v29 }
 0x68e   :  { %v5030_v63 = vmax.f32 %v5914_v36, %v5029_v62  ;;  %v5957_v44 = vadd.f32 %v4635_v20, %v4553_v37  ;;  %v5971_v62 = vld [vmem:[#allocation7 + $0x10] sm:$0xff] }
 0x68f   :  { %v4980_v32 = vadd.f32 %v4979_v58, %v4949_v59  ;;  %v4443_v58 = vrot.slane %v5852_v45, %v5835_v43  ;;  %v5954_v59 = vld [vmem:[#allocation5 + $0x10] sm:$0xff]  ;;  %v4952_v9 = vmul.f32 %v4831_v41, %v5940_v22  ;;  %v4839_v45 = vrot.slane %v5883_v35, %v5821_v46 }
 0x690   :  { %v5031_v26 = vmax.f32 %v5933_v15, %v5030_v63  ;;  %v4953_v37 = vmul.f32 %v4835_v8, %v5957_v44  ;;  %v4647_v63 = vrot.slane %v5971_v62, %v5778_v11 }
 0x6b6   :  { %v5907_v52 = vpop.f32.mrf.mxu0 }
 0x6b7   :  { %v5909_v28 = vpop.f32.mrf.mxu1 }
 0x6b8   :  { %v5921_v61 = vpop.f32.mrf.mxu0 }
 0x6b9   :  { %v5923_v4 = vpop.f32.mrf.mxu1 }
 0x6ba   :  { %v4246_v0 = vpop.f32.mrf.mxu0 }
 0x6bb   :  { %v4287_v42 = vpop.f32.mrf.mxu1  ;;  %v4981_v0 = vadd.f32 %v4980_v32, %v4950_v14  ;;  %v5032_v32 = vmax.f32 %v5940_v22, %v5031_v26 }
 0x6bc   :  { %v4247_v60 = vpop.f32.mrf.mxu0  ;;  %v4951_v42 = vmul.f32 %v4827_v48, %v5933_v15 }
 0x6bd   :  { %v4288_v40 = vpop.f32.mrf.mxu1  ;;  %v4554_v60 = vmul.f32 %v4439_v10, %v5671_v33  ;;  %v4447_v33 = vrot.slane %v5954_v59, %v5778_v11  ;;  %v4643_v10 = vrot.slane %v5869_v25, %v5835_v43  ;;  %v4843_v25 = vrot.slane %v5883_v35, %v5835_v43 }
 0x6be   :  { %v4982_v14 = vadd.f32 %v4981_v0, %v4951_v42  ;;  %v4555_v40 = vmul.f32 %v4443_v58, %v5676_v5  ;;  %v4451_v0 = vrot.slane %v5954_v59, %v5776_v47 }
 0x6bf   :  { %v5964_v48 = vadd.f32 %v4639_v3, %v4554_v60  ;;  %v4556_v20 = vmul.f32 %v4447_v33, %v5691_v27  ;;  %v5985_v60 = vld [vmem:[#allocation8 + $0x10] sm:$0xff]  ;;  %v4455_v3 = vrot.slane %v5954_v59, %v5780_v39  ;;  %v5033_v27 = vmax.f32 %v5957_v44, %v5032_v32 }
 0x6c0   :  { %v4983_v41 = vadd.f32 %v4982_v14, %v4952_v9  ;;  %v5981_v42 = vadd.f32 %v4643_v10, %v4555_v40  ;;  %v4847_v8 = vrot.slane %v5985_v60, %v5778_v11  ;;  %v4557_v26 = vmul.f32 %v4451_v0, %v5696_v50 }
 0x6c1   :  { %v4954_v5 = vmul.f32 %v4839_v45, %v5964_v48  ;;  %v5990_v9 = vadd.f32 %v4647_v63, %v4556_v20  ;;  %v4651_v14 = vrot.slane %v5971_v62, %v5776_v47  ;;  %v5034_v35 = vmax.f32 %v5964_v48, %v5033_v27 }
 0x6c2   :  { %v4984_v58 = vadd.f32 %v4983_v41, %v4953_v37  ;;  %v4955_v45 = vmul.f32 %v4843_v25, %v5981_v42  ;;  %v4558_v40 = vmul.f32 %v4455_v3, %v5703_v24  ;;  %v4655_v10 = vrot.slane %v5971_v62, %v5780_v39 }
 0x6c3   :  { %v4459_v32 = vrot.slane %v5954_v59, %v5787_v53  ;;  %v4956_v41 = vmul.f32 %v4847_v8, %v5990_v9  ;;  %v6005_v37 = vadd.f32 %v4651_v14, %v4557_v26  ;;  %v4851_v50 = vrot.slane %v5985_v60, %v5776_v47 }
 0x6c4   :  { %v4985_v33 = vadd.f32 %v4984_v58, %v4954_v5  ;;  %v5035_v20 = vmax.f32 %v5981_v42, %v5034_v35  ;;  %v4463_v0 = vrot.slane %v5954_v59, %v5794_v55  ;;  %v6012_v24 = vadd.f32 %v4655_v10, %v4558_v40 }
 0x6c5   :  { %v4855_v5 = vrot.slane %v5985_v60, %v5780_v39  ;;  %v4559_v25 = vmul.f32 %v4459_v32, %v5708_v30  ;;  %v4659_v3 = vrot.slane %v5971_v62, %v5787_v53  ;;  %v4957_v8 = vmul.f32 %v4851_v50, %v6005_v37 }
 0x6c6   :  { %v4986_v63 = vadd.f32 %v4985_v33, %v4955_v45  ;;  %v5036_v27 = vmax.f32 %v5990_v9, %v5035_v20  ;;  %v4560_v26 = vmul.f32 %v4463_v0, %v5723_v51  ;;  %v4663_v14 = vrot.slane %v5971_v62, %v5794_v55 }
 0x6c7   :  { %v4467_v35 = vrot.slane %v5954_v59, %v5812_v29  ;;  %v4958_v33 = vmul.f32 %v4855_v5, %v6012_v24  ;;  %v6027_v45 = vadd.f32 %v4659_v3, %v4559_v25  ;;  %v4859_v30 = vrot.slane %v5985_v60, %v5787_v53 }
 0x6c8   :  { %v4987_v58 = vadd.f32 %v4986_v63, %v4956_v41  ;;  %v4471_v40 = vrot.slane %v5954_v59, %v5821_v46  ;;  %v5037_v10 = vmax.f32 %v6005_v37, %v5036_v27  ;;  %v6034_v51 = vadd.f32 %v4663_v14, %v4560_v26 }
 0x6c9   :  { %v4863_v41 = vrot.slane %v5985_v60, %v5794_v55  ;;  %v4561_v50 = vmul.f32 %v4467_v35, %v5728_v13  ;;  %v4667_v20 = vrot.slane %v5971_v62, %v5812_v29  ;;  %v4959_v5 = vmul.f32 %v4859_v30, %v6027_v45 }
 0x6ca   :  { %v4988_v32 = vadd.f32 %v4987_v58, %v4957_v8  ;;  %v5038_v63 = vmax.f32 %v6012_v24, %v5037_v10  ;;  %v4562_v25 = vmul.f32 %v4471_v40, %v5735_v17  ;;  %v4671_v3 = vrot.slane %v5971_v62, %v5821_v46  ;;  %v6048_v58 = vld [vmem:[#allocation5 + $0x18] sm:$0xff] }
 0x6cb   :  { %v4475_v27 = vrot.slane %v5954_v59, %v5835_v43  ;;  %v4960_v13 = vmul.f32 %v4863_v41, %v6034_v51  ;;  %v6051_v8 = vadd.f32 %v4667_v20, %v4561_v50  ;;  %v4867_v26 = vrot.slane %v5985_v60, %v5812_v29  ;;  %v6065_v10 = vld [vmem:[#allocation7 + $0x18] sm:$0xff] }
 0x6cc   :  { %v4989_v0 = vadd.f32 %v4988_v32, %v4958_v33  ;;  %v5039_v14 = vmax.f32 %v6027_v45, %v5038_v63  ;;  %v4479_v17 = vrot.slane %v6048_v58, %v5778_v11  ;;  %v6058_v33 = vadd.f32 %v4671_v3, %v4562_v25 }
 0x6cd   :  { %v4871_v59 = vrot.slane %v5985_v60, %v5821_v46  ;;  %v4563_v30 = vmul.f32 %v4475_v27, %v5740_v19  ;;  %v4675_v40 = vrot.slane %v5971_v62, %v5835_v43  ;;  %v4961_v50 = vmul.f32 %v4867_v26, %v6051_v8 }
 0x6ce   :  { %v4990_v35 = vadd.f32 %v4989_v0, %v4959_v5  ;;  %v5040_v32 = vmax.f32 %v6034_v51, %v5039_v14  ;;  %v4564_v20 = vmul.f32 %v4479_v17, %v5755_v1  ;;  %v4679_v63 = vrot.slane %v6065_v10, %v5778_v11  ;;  %v6072_v0 = vld [vmem:[#allocation8 + $0x18] sm:$0xff] }
 0x6cf   :  { %v4483_v19 = vrot.slane %v6048_v58, %v5776_v47  ;;  %v4962_v5 = vmul.f32 %v4871_v59, %v6058_v33  ;;  %v6077_v62 = vadd.f32 %v4675_v40, %v4563_v30  ;;  %v4875_v25 = vrot.slane %v5985_v60, %v5835_v43 }
 0x6d0   :  { %v4991_v41 = vadd.f32 %v4990_v35, %v4960_v13  ;;  %v5041_v3 = vmax.f32 %v6051_v8, %v5040_v32  ;;  %v4487_v1 = vrot.slane %v6048_v58, %v5780_v39  ;;  %v4879_v13 = vrot.slane %v6072_v0, %v5778_v11 }
 0x6d1   :  { %v6087_v14 = vadd.f32 %v4679_v63, %v4564_v20  ;;  %v4565_v35 = vmul.f32 %v4483_v19, %v5760_v49  ;;  %v4683_v17 = vrot.slane %v6065_v10, %v5776_v47  ;;  %v4963_v60 = vmul.f32 %v4875_v25, %v6077_v62 }
 0x6d2   :  { %v4992_v27 = vadd.f32 %v4991_v41, %v4961_v50  ;;  %v5042_v26 = vmax.f32 %v6058_v33, %v5041_v3  ;;  %v4566_v30 = vmul.f32 %v4487_v1, %v5767_v56  ;;  %v4687_v40 = vrot.slane %v6065_v10, %v5780_v39 }
 0x6d3   :  { %v4491_v11 = vrot.slane %v6048_v58, %v5787_v53  ;;  %v4964_v41 = vmul.f32 %v4879_v13, %v6087_v14  ;;  %v6100_v50 = vadd.f32 %v4683_v17, %v4565_v35  ;;  %v4883_v49 = vrot.slane %v6072_v0, %v5776_v47 }
 0x6d4   :  { %v4993_v59 = vadd.f32 %v4992_v27, %v4962_v5  ;;  %v5043_v32 = vmax.f32 %v6077_v62, %v5042_v26  ;;  %v4887_v63 = vrot.slane %v6072_v0, %v5780_v39  ;;  %v4243_v56 = vadd.f32 %v5907_v52, %v5772_v2 }
 0x6d5   :  { %v4495_v19 = vrot.slane %v6048_v58, %v5794_v55  ;;  %v6111_v25 = vadd.f32 %v4687_v40, %v4566_v30  ;;  %v4567_v3 = vmul.f32 %v4491_v11, %v5770_v12  ;;  %v4691_v1 = vrot.slane %v6065_v10, %v5787_v53 }
 0x6d6   :  { %v4994_v20 = vadd.f32 %v4993_v59, %v4963_v60  ;;  %v5044_v5 = vmax.f32 %v6087_v14, %v5043_v32  ;;  %v4965_v27 = vmul.f32 %v4883_v49, %v6100_v50  ;;  %v4695_v39 = vrot.slane %v6065_v10, %v5794_v55 }
 0x6d7   :  { %v4568_v13 = vmul.f32 %v4495_v19, %v4243_v56  ;;  %v4245_v2 = vadd.f32 %v5921_v61, %v5774_v21  ;;  %v4499_v52 = vrot.slane %v6048_v58, %v5812_v29  ;;  %v4966_v12 = vmul.f32 %v4887_v63, %v6111_v25 }
 0x6d8   :  { %v4995_v47 = vadd.f32 %v4994_v20, %v4964_v41  ;;  %v5045_v26 = vmax.f32 %v6100_v50, %v5044_v5  ;;  %v6125_v35 = vadd.f32 %v4691_v1, %v4567_v3  ;;  %v4891_v17 = vrot.slane %v6072_v0, %v5787_v53 }
 0x6d9   :  { %v6130_v30 = vadd.f32 %v4695_v39, %v4568_v13  ;;  %v4895_v21 = vrot.slane %v6072_v0, %v5794_v55  ;;  %v4569_v61 = vmul.f32 %v4499_v52, %v4245_v2  ;;  %v4699_v40 = vrot.slane %v6065_v10, %v5812_v29 }
 0x6da   :  { %v4996_v59 = vadd.f32 %v4995_v47, %v4965_v27  ;;  %v5046_v60 = vmax.f32 %v6111_v25, %v5045_v26  ;;  %v4967_v32 = vmul.f32 %v4891_v17, %v6125_v35  ;;  %v4899_v53 = vrot.slane %v6072_v0, %v5812_v29 }
 0x6db   :  { %v4968_v63 = vmul.f32 %v4895_v21, %v6130_v30  ;;  %v6141_v56 = vadd.f32 %v4699_v40, %v4569_v61  ;;  %v4503_v19 = vrot.slane %v6048_v58, %v5821_v46  ;;  %v4703_v5 = vrot.slane %v6065_v10, %v5821_v46 }
 0x6dc   :  { %v4997_v11 = vadd.f32 %v4996_v59, %v4966_v12  ;;  %v5047_v41 = vmax.f32 %v6125_v35, %v5046_v60  ;;  %v4507_v39 = vrot.slane %v6048_v58, %v5835_v43  ;;  %v4903_v26 = vrot.slane %v6072_v0, %v5821_v46 }
 0x6dd   :  { %v4969_v59 = vmul.f32 %v4899_v53, %v6141_v56 }
 0x6de   :  { %v4998_v47 = vadd.f32 %v4997_v11, %v4967_v32  ;;  %v5048_v27 = vmax.f32 %v6130_v30, %v5047_v41 }
 0x6e0   :  { %v4999_v60 = vadd.f32 %v4998_v47, %v4968_v63 }
 0x6e2   :  { %v5000_v41 = vadd.f32 %v4999_v60, %v4969_v59 }
 0x6f6   :  { %v4324_v49 = vpop.f32.mrf.mxu0 }
 0x6f7   :  { %v4365_v20 = vpop.f32.mrf.mxu1  ;;  %v4325_v55 = vadd.f32 %v4324_v49, %v5909_v28  ;;  %v4707_v28 = vrot.slane %v6065_v10, %v5835_v43  ;;  %v4907_v10 = vrot.slane %v6072_v0, %v5835_v43 }
 0x6f8   :  { %v4326_v3 = vpop.f32.mrf.mxu0 }
 0x6f9   :  { %v4367_v1 = vpop.f32.mrf.mxu1  ;;  %v4366_v13 = vadd.f32 %v4365_v20, %v4325_v55  ;;  %v4327_v29 = vadd.f32 %v4326_v3, %v5923_v4  ;;  %v5049_v4 = vmax.f32 %v6141_v56, %v5048_v27  ;;  %v5441_v55 = vmov 0  }
 0x6fa   :  { %v4328_v2 = vpop.f32.mrf.mxu0  ;;  %5273 = vset.pattern.permute.xlu1 %v5441_v55  ;;  %5274 = vset.pattern.permute.xlu0 %v5441_v55 }
 0x6fb   :  { %v4369_v52 = vpop.f32.mrf.mxu1  ;;  %v4570_v12 = vmul.f32 %v4503_v19, %v4366_v13  ;;  %v4368_v17 = vadd.f32 %v4367_v1, %v4327_v29 }
 0x6fc   :  { %v4329_v21 = vpop.f32.mrf.mxu0 }
 0x6fd   :  { %v4370_v61 = vpop.f32.mrf.mxu1  ;;  %v6158_v40 = vadd.f32 %v4703_v5, %v4570_v12  ;;  %v4571_v58 = vmul.f32 %v4507_v39, %v4368_v17 }
 0x6ff   :  { %v5050_v11 = vmax.f32 %v6158_v40, %v5049_v4  ;;  %v6163_v32 = vadd.f32 %v4707_v28, %v4571_v58  ;;  %v4970_v46 = vmul.f32 %v4903_v26, %v6158_v40 }
 0x701   :  { %v5051_v49 = vmax.f32 %v6163_v32, %v5050_v11  ;;  %v4971_v20 = vmul.f32 %v4907_v10, %v6163_v32  ;;  %v5001_v53 = vadd.f32 %v5000_v41, %v4970_v46 }
 0x703   :  { %5052 = vmax.xlane.f32.xlu0 %v5051_v49  ;;  %v5002_v63 = vadd.f32 %v5001_v53, %v4971_v20 }
 0x707   :  { %5003 = vadd.xlane.f32.xlu0 %v5002_v63 }
 0x78c   :  { %v6168_v19 = vpop.xlane.xlu0 %5052 }
 0x78d   :  { %v5054_v43 = vsub.f32 %v5814_v54, %v6168_v19  ;;  %v5055_v0 = vsub.f32 %v5803_v57, %v6168_v19  ;;  %v5056_v5 = vsub.f32 %v5816_v6, %v6168_v19  ;;  %v5057_v3 = vsub.f32 %v5830_v7, %v6168_v19 }
 0x78e   :  { %v5058_v47 = vsub.f32 %v5839_v34, %v6168_v19  ;;  %v5059_v29 = vsub.f32 %v5855_v31, %v6168_v19  ;;  %v5060_v57 = vsub.f32 %v5862_v23, %v6168_v19  ;;  %v5061_v7 = vsub.f32 %v5879_v38, %v6168_v19 }
 0x78f   :  { %v5086_v1 = vmul.f32 1.442695, %v5054_v43  ;;  %v5088_v27 = vmul.f32 1.442695, %v5055_v0  ;;  %v5090_v13 = vmul.f32 1.442695, %v5056_v5  ;;  %v5062_v34 = vsub.f32 %v5888_v16, %v6168_v19 }
 0x790   :  { %v5092_v54 = vmul.f32 1.442695, %v5057_v3  ;;  %v5094_v6 = vmul.f32 1.442695, %v5058_v47  ;;  %v5096_v39 = vmul.f32 1.442695, %v5059_v29  ;;  %v5063_v31 = vsub.f32 %v5903_v18, %v6168_v19 }
 0x791   :  { %5281 = vpow2.f32 %v5086_v1  ;;  %v5098_v28 = vmul.f32 1.442695, %v5060_v57  ;;  %v5100_v2 = vmul.f32 1.442695, %v5061_v7  ;;  %v5064_v23 = vsub.f32 %v5914_v36, %v6168_v19 }
 0x792   :  { %5283 = vpow2.f32 %v5088_v27  ;;  %v5102_v52 = vmul.f32 1.442695, %v5062_v34  ;;  %v5065_v38 = vsub.f32 %v5933_v15, %v6168_v19  ;;  %v5104_v12 = vmul.f32 1.442695, %v5063_v31 }
 0x793   :  { %5285 = vpow2.f32 %v5090_v13  ;;  %v5066_v17 = vsub.f32 %v5940_v22, %v6168_v19  ;;  %v5106_v18 = vmul.f32 1.442695, %v5064_v23  ;;  %v5067_v60 = vsub.f32 %v5957_v44, %v6168_v19 }
 0x794   :  { %5287 = vpow2.f32 %v5092_v54  ;;  %v5108_v21 = vmul.f32 1.442695, %v5065_v38  ;;  %v5068_v4 = vsub.f32 %v5964_v48, %v6168_v19  ;;  %v5069_v11 = vsub.f32 %v5981_v42, %v6168_v19 }
 0x795   :  { %5289 = vpow2.f32 %v5094_v6  ;;  %v5110_v22 = vmul.f32 1.442695, %v5066_v17  ;;  %v5112_v44 = vmul.f32 1.442695, %v5067_v60  ;;  %v5070_v49 = vsub.f32 %v5990_v9, %v6168_v19 }
 0x796   :  { %5291 = vpow2.f32 %v5096_v39  ;;  %v5114_v48 = vmul.f32 1.442695, %v5068_v4  ;;  %v5071_v63 = vsub.f32 %v6005_v37, %v6168_v19  ;;  %v5116_v42 = vmul.f32 1.442695, %v5069_v11 }
 0x797   :  { %5293 = vpow2.f32 %v5098_v28  ;;  %v5072_v0 = vsub.f32 %v6012_v24, %v6168_v19  ;;  %v5118_v9 = vmul.f32 1.442695, %v5070_v49  ;;  %v5073_v1 = vsub.f32 %v6027_v45, %v6168_v19 }
 0x798   :  { %5295 = vpow2.f32 %v5100_v2  ;;  %v5120_v37 = vmul.f32 1.442695, %v5071_v63  ;;  %v5074_v13 = vsub.f32 %v6034_v51, %v6168_v19  ;;  %v5075_v57 = vsub.f32 %v6051_v8, %v6168_v19 }
 0x799   :  { %5297 = vpow2.f32 %v5102_v52  ;;  %v5122_v24 = vmul.f32 1.442695, %v5072_v0  ;;  %v5124_v45 = vmul.f32 1.442695, %v5073_v1  ;;  %v5076_v39 = vsub.f32 %v6058_v33, %v6168_v19 }
 0x79a   :  { %5299 = vpow2.f32 %v5104_v12  ;;  %v5126_v51 = vmul.f32 1.442695, %v5074_v13  ;;  %v5077_v31 = vsub.f32 %v6077_v62, %v6168_v19  ;;  %v5128_v8 = vmul.f32 1.442695, %v5075_v57 }
 0x79b   :  { %5301 = vpow2.f32 %v5106_v18  ;;  %v5078_v52 = vsub.f32 %v6087_v14, %v6168_v19  ;;  %v5130_v33 = vmul.f32 1.442695, %v5076_v39  ;;  %v5079_v17 = vsub.f32 %v6100_v50, %v6168_v19 }
 0x79c   :  { %5303 = vpow2.f32 %v5108_v21  ;;  %v5132_v62 = vmul.f32 1.442695, %v5077_v31  ;;  %v5080_v60 = vsub.f32 %v6111_v25, %v6168_v19  ;;  %v5081_v4 = vsub.f32 %v6125_v35, %v6168_v19 }
 0x79d   :  { %5305 = vpow2.f32 %v5110_v22  ;;  %v5134_v14 = vmul.f32 1.442695, %v5078_v52  ;;  %v5136_v50 = vmul.f32 1.442695, %v5079_v17  ;;  %v5082_v11 = vsub.f32 %v6130_v30, %v6168_v19 }
 0x79e   :  { %v6192_v26 = vpop.eup %5281  ;;  %5307 = vpow2.f32 %v5112_v44  ;;  %v5138_v25 = vmul.f32 1.442695, %v5080_v60  ;;  %v5083_v49 = vsub.f32 %v6141_v56, %v6168_v19  ;;  %v5140_v35 = vmul.f32 1.442695, %v5081_v4 }
 0x79f   :  { %v6196_v16 = vpop.eup %5283  ;;  %5309 = vpow2.f32 %v5114_v48  ;;  %v5084_v63 = vsub.f32 %v6158_v40, %v6168_v19  ;;  %v5142_v30 = vmul.f32 1.442695, %v5082_v11  ;;  %v5085_v0 = vsub.f32 %v6163_v32, %v6168_v19 }
 0x7a0   :  { %v5150_v59 = vadd.f32 %v6196_v16, %v6192_v26  ;;  %v6202_v36 = vpop.eup %5285  ;;  %5311 = vpow2.f32 %v5116_v42  ;;  %v5144_v56 = vmul.f32 1.442695, %v5083_v49 }
 0x7a1   :  { %v6207_v61 = vpop.eup %5287  ;;  %5313 = vpow2.f32 %v5118_v9  ;;  %v5146_v1 = vmul.f32 1.442695, %v5084_v63 }
 0x7a2   :  { %v5151_v15 = vadd.f32 %v6202_v36, %v5150_v59  ;;  %v6212_v10 = vpop.eup %5289  ;;  %5315 = vpow2.f32 %v5120_v37 }
 0x7a3   :  { %v6217_v41 = vpop.eup %5291  ;;  %5317 = vpow2.f32 %v5122_v24 }
 0x7a4   :  { %v5152_v58 = vadd.f32 %v6207_v61, %v5151_v15  ;;  %v6222_v53 = vpop.eup %5293  ;;  %5319 = vpow2.f32 %v5124_v45 }
 0x7a5   :  { %v6227_v43 = vpop.eup %5295  ;;  %5321 = vpow2.f32 %v5126_v51 }
 0x7a6   :  { %v5153_v46 = vadd.f32 %v6212_v10, %v5152_v58  ;;  %v6232_v3 = vpop.eup %5297  ;;  %5323 = vpow2.f32 %v5128_v8  ;;  %v5265_v8 = vld [vmem:[#allocation2] ss:$0 sm:$0xff] }
 0x7a7   :  { %v6237_v27 = vpop.eup %5299  ;;  %5325 = vpow2.f32 %v5130_v33 }
 0x7a8   :  { %v5154_v20 = vadd.f32 %v6217_v41, %v5153_v46  ;;  %v6242_v54 = vpop.eup %5301  ;;  %5327 = vpow2.f32 %v5132_v62 }
 0x7a9   :  { %v6247_v7 = vpop.eup %5303  ;;  %5329 = vpow2.f32 %v5134_v14 }
 0x7aa   :  { %v5155_v55 = vadd.f32 %v6222_v53, %v5154_v20  ;;  %v6252_v28 = vpop.eup %5305  ;;  %5331 = vpow2.f32 %v5136_v50 }
 0x7ab   :  { %v6257_v23 = vpop.eup %5307  ;;  %5333 = vpow2.f32 %v5138_v25 }
 0x7ac   :  { %v5156_v5 = vadd.f32 %v6227_v43, %v5155_v55  ;;  %v6262_v12 = vpop.eup %5309  ;;  %5335 = vpow2.f32 %v5140_v35 }
 0x7ad   :  { %v6267_v59 = vpop.eup %5311  ;;  %5337 = vpow2.f32 %v5142_v30 }
 0x7ae   :  { %v5157_v47 = vadd.f32 %v6232_v3, %v5156_v5  ;;  %v6272_v15 = vpop.eup %5313  ;;  %5339 = vpow2.f32 %v5144_v56 }
 0x7af   :  { %v6277_v58 = vpop.eup %5315  ;;  %5341 = vpow2.f32 %v5146_v1 }
 0x7b0   :  { %v5158_v29 = vadd.f32 %v6237_v27, %v5157_v47  ;;  %v6282_v46 = vpop.eup %5317  ;;  %v5148_v47 = vmul.f32 1.442695, %v5085_v0 }
 0x7b1   :  { %v6287_v20 = vpop.eup %5319 }
 0x7b2   :  { %v5159_v6 = vadd.f32 %v6242_v54, %v5158_v29  ;;  %v6292_v55 = vpop.eup %5321  ;;  %5343 = vpow2.f32 %v5148_v47 }
 0x7b3   :  { %v6297_v5 = vpop.eup %5323 }
 0x7b4   :  { %v5160_v34 = vadd.f32 %v6247_v7, %v5159_v6  ;;  %v6300_v40 = vpop.eup %5325 }
 0x7b5   :  { %v6303_v24 = vpop.eup %5327 }
 0x7b6   :  { %v5161_v2 = vadd.f32 %v6252_v28, %v5160_v34  ;;  %v6306_v19 = vpop.eup %5329 }
 0x7b7   :  { %v6309_v57 = vpop.eup %5331 }
 0x7b8   :  { %v5162_v38 = vadd.f32 %v6257_v23, %v5161_v2  ;;  %v6312_v6 = vpop.eup %5333  ;;  %v5004_v2 = vpop.xlane.xlu0 %5003 }
 0x7b9   :  { %v6315_v51 = vpop.eup %5335  ;;  %v5012_v62 = vadd.f32 %v5265_v8, %v5004_v2 }
 0x7ba   :  { %v5163_v18 = vadd.f32 %v6262_v12, %v5162_v38  ;;  %v6318_v31 = vpop.eup %5337 }
 0x7bb   :  { %v6321_v33 = vpop.eup %5339 }
 0x7bc   :  { %v5164_v21 = vadd.f32 %v6267_v59, %v5163_v18  ;;  %v6324_v17 = vpop.eup %5341 }
 0x7be   :  { %v5165_v22 = vadd.f32 %v6272_v15, %v5164_v21  ;;  %v5013_v21 = vmul.f32 0.5, %v5012_v62 }
 0x7bf   :  { %v6327_v60 = vpop.eup %5343 }
 0x7c0   :  { %v5166_v44 = vadd.f32 %v6277_v58, %v5165_v22  ;;  %5345 = vtanh.f32 %v5013_v21 }
 0x7c2   :  { %v5167_v48 = vadd.f32 %v6282_v46, %v5166_v44 }
 0x7c4   :  { %v5168_v42 = vadd.f32 %v6287_v20, %v5167_v48 }
 0x7c6   :  { %v5169_v9 = vadd.f32 %v6292_v55, %v5168_v42 }
 0x7c8   :  { %v5170_v37 = vadd.f32 %v6297_v5, %v5169_v9 }
 0x7ca   :  { %v5171_v13 = vadd.f32 %v6300_v40, %v5170_v37 }
 0x7cc   :  { %v5172_v32 = vadd.f32 %v6303_v24, %v5171_v13 }
 0x7cd   :  { %v5346_v4 = vpop.eup %5345 }
 0x7ce   :  { %v5173_v29 = vadd.f32 %v6306_v19, %v5172_v32 }
 0x7d0   :  { %v5174_v45 = vadd.f32 %v6309_v57, %v5173_v29 }
 0x7d2   :  { %v5175_v39 = vadd.f32 %v6312_v6, %v5174_v45 }
 0x7d4   :  { %v5176_v34 = vadd.f32 %v6315_v51, %v5175_v39 }
 0x7d6   :  { %v5177_v52 = vadd.f32 %v6318_v31, %v5176_v34 }
 0x7d8   :  { %v5178_v38 = vadd.f32 %v6321_v33, %v5177_v52 }
 0x7da   :  { %v5179_v18 = vadd.f32 %v6324_v17, %v5178_v38 }
 0x7dc   :  { %v5180_v14 = vadd.f32 %v6327_v60, %v5179_v18 }
 0x7de   :  { %5181 = vadd.xlane.f32.xlu1 %v5180_v14 }
 0x7ef   :  { %5017 = vperm.xlu1 %5273, %v5346_v4  }
 0x867   :  { %v5182_v50 = vpop.xlane.xlu1 %5181 }
 0x868   :  { %5347 = vrcp.f32 %v5182_v50 }
 0x86b   :  { %v5018_v22 = vpop.permute.xlu1 %5017 }
 0x86c   :  { %5020 = vst [vmem:[%s6468_s7] sm:$0xff] %v5018_v22 }
 0x875   :  { %v5348_v11 = vpop.eup %5347 }
 0x876   :  { %v5184_v25 = vmul.f32 %v5348_v11, %v6192_v26  ;;  %v5185_v44 = vmul.f32 %v5348_v11, %v6196_v16  ;;  %v5186_v49 = vmul.f32 %v5348_v11, %v6202_v36  ;;  %v5187_v35 = vmul.f32 %v5348_v11, %v6207_v61 }
 0x877   :  { %v5188_v48 = vmul.f32 %v5348_v11, %v6212_v10  ;;  %v5189_v63 = vmul.f32 %v5348_v11, %v6217_v41  ;;  %v5190_v30 = vmul.f32 %v5348_v11, %v6222_v53  ;;  %v5191_v42 = vmul.f32 %v5348_v11, %v6227_v43 }
 0x878   :  { %v5192_v0 = vmul.f32 %v5348_v11, %v6232_v3  ;;  %v5193_v56 = vmul.f32 %v5348_v11, %v6237_v27  ;;  %v5194_v26 = vmul.f32 %v5348_v11, %v6242_v54  ;;  %v5195_v16 = vmul.f32 %v5348_v11, %v6247_v7  ;;  %5216 = vst [vmem:[%s6467_s6] sm:$0xff] %v5184_v25 }
 0x879   :  { %5217 = vst [vmem:[%s6467_s6 + $0x8] sm:$0xff] %v5185_v44  ;;  %5218 = vst [vmem:[%s6467_s6 + $0x10] sm:$0xff] %v5186_v49  ;;  %v5196_v36 = vmul.f32 %v5348_v11, %v6252_v28  ;;  %v5197_v61 = vmul.f32 %v5348_v11, %v6257_v23  ;;  %v5198_v10 = vmul.f32 %v5348_v11, %v6262_v12 }
 0x87a   :  { %5219 = vst [vmem:[%s6467_s6 + $0x18] sm:$0xff] %v5187_v35  ;;  %v5199_v41 = vmul.f32 %v5348_v11, %v6267_v59  ;;  %5220 = vst [vmem:[%s6467_s6 + $0x20] sm:$0xff] %v5188_v48  ;;  %v5200_v53 = vmul.f32 %v5348_v11, %v6272_v15  ;;  %v5201_v43 = vmul.f32 %v5348_v11, %v6277_v58 }
 0x87b   :  { %5221 = vst [vmem:[%s6467_s6 + $0x28] sm:$0xff] %v5189_v63  ;;  %5222 = vst [vmem:[%s6467_s6 + $0x30] sm:$0xff] %v5190_v30  ;;  %v5202_v3 = vmul.f32 %v5348_v11, %v6282_v46  ;;  %v5203_v27 = vmul.f32 %v5348_v11, %v6287_v20  ;;  %v5204_v54 = vmul.f32 %v5348_v11, %v6292_v55 }
 0x87c   :  { %5223 = vst [vmem:[%s6467_s6 + $0x38] sm:$0xff] %v5191_v42  ;;  %5224 = vst [vmem:[%s6467_s6 + $0x40] sm:$0xff] %v5192_v0  ;;  %v5205_v7 = vmul.f32 %v5348_v11, %v6297_v5  ;;  %v5206_v28 = vmul.f32 %v5348_v11, %v6300_v40  ;;  %v5207_v23 = vmul.f32 %v5348_v11, %v6303_v24 }
 0x87d   :  { %5225 = vst [vmem:[%s6467_s6 + $0x48] sm:$0xff] %v5193_v56  ;;  %5226 = vst [vmem:[%s6467_s6 + $0x50] sm:$0xff] %v5194_v26  ;;  %v5208_v12 = vmul.f32 %v5348_v11, %v6306_v19  ;;  %v5209_v59 = vmul.f32 %v5348_v11, %v6309_v57  ;;  %v5210_v15 = vmul.f32 %v5348_v11, %v6312_v6 }
 0x87e   :  { %5227 = vst [vmem:[%s6467_s6 + $0x58] sm:$0xff] %v5195_v16  ;;  %5228 = vst [vmem:[%s6467_s6 + $0x60] sm:$0xff] %v5196_v36  ;;  %v5211_v58 = vmul.f32 %v5348_v11, %v6315_v51  ;;  %v5212_v46 = vmul.f32 %v5348_v11, %v6318_v31  ;;  %v5213_v20 = vmul.f32 %v5348_v11, %v6321_v33 }
 0x87f   :  { %5229 = vst [vmem:[%s6467_s6 + $0x68] sm:$0xff] %v5197_v61  ;;  %5230 = vst [vmem:[%s6467_s6 + $0x70] sm:$0xff] %v5198_v10  ;;  %v5214_v55 = vmul.f32 %v5348_v11, %v6324_v17  ;;  %v5215_v9 = vmul.f32 %v5348_v11, %v6327_v60 }
 0x880   :  { %5231 = vst [vmem:[%s6467_s6 + $0x78] sm:$0xff] %v5199_v41  ;;  %5232 = vst [vmem:[%s6467_s6 + $0x80] sm:$0xff] %v5200_v53 }
 0x881   :  { %5233 = vst [vmem:[%s6467_s6 + $0x88] sm:$0xff] %v5201_v43  ;;  %5234 = vst [vmem:[%s6467_s6 + $0x90] sm:$0xff] %v5202_v3 }
 0x882   :  { %5235 = vst [vmem:[%s6467_s6 + $0x98] sm:$0xff] %v5203_v27  ;;  %5236 = vst [vmem:[%s6467_s6 + $0xa0] sm:$0xff] %v5204_v54 }
 0x883   :  { %5237 = vst [vmem:[%s6467_s6 + $0xa8] sm:$0xff] %v5205_v7  ;;  %5238 = vst [vmem:[%s6467_s6 + $0xb0] sm:$0xff] %v5206_v28 }
 0x884   :  { %5239 = vst [vmem:[%s6467_s6 + $0xb8] sm:$0xff] %v5207_v23  ;;  %5240 = vst [vmem:[%s6467_s6 + $0xc0] sm:$0xff] %v5208_v12 }
 0x885   :  { %5241 = vst [vmem:[%s6467_s6 + $0xc8] sm:$0xff] %v5209_v59  ;;  %5242 = vst [vmem:[%s6467_s6 + $0xd0] sm:$0xff] %v5210_v15 }
 0x886   :  { %5243 = vst [vmem:[%s6467_s6 + $0xd8] sm:$0xff] %v5211_v58  ;;  %5244 = vst [vmem:[%s6467_s6 + $0xe0] sm:$0xff] %v5212_v46 }
 0x887   :  { %5245 = vst [vmem:[%s6467_s6 + $0xe8] sm:$0xff] %v5213_v20  ;;  %5246 = vst [vmem:[%s6467_s6 + $0xf0] sm:$0xff] %v5214_v55 }
 0x888   :  { %5247 = vst [vmem:[%s6467_s6 + $0xf8] sm:$0xff] %v5215_v9 }
 0x889   :  { %5256 = vsyncpa [#allocation4], 1 }
 0x88a   :  { %5257 = vsyncpa [#allocation6], 1 }
 0x88b   :  { %5258 = vsyncpa [#allocation9], 1 }

</bundles_post_ra>
